<compile_context>
chip_gen: v7x
topology: tpu7x:2x2x1
jax: 0.10.0
libtpu: 0.0.40
codegen_flags: <defaults>
</compile_context>

<pallas_src>
import functools

import numpy as np
import jax
import jax.numpy as jnp
from jax.experimental import pallas as pl
from jax.experimental.pallas import tpu as pltpu

LATENT_DIM = 20
CALC_SHAPE = 256


# ----------------------------------------------------------------------------
# Pallas kernels
# ----------------------------------------------------------------------------
def _mm_bias_act_kernel(a_ref, w_ref, b_ref, o_ref, *, act):
    """out = act(a @ w + b); bf16 operands, f32 accumulate + f32 epilogue."""
    acc = jnp.dot(a_ref[...], w_ref[...], preferred_element_type=jnp.float32)
    acc = acc + b_ref[...]
    if act == "relu":
        acc = jnp.maximum(acc, 0.0)
    elif act == "sigmoid":
        acc = jax.nn.sigmoid(acc)
    o_ref[...] = acc.astype(o_ref.dtype)


def matmul_bias_act(a, w, b, act, out_dtype):
    """act(a @ w + b) with exact (un-padded) shapes.

    a: (M, K) bf16, w: (K, N) bf16, b: (1, N) f32  ->  (M, N) out_dtype.
    Small layers run as one full block (grid=1).  The two M=2048 layers are
    split into two 'parallel' blocks for v7x megacore (one extra ~0.35us grid
    step on single-TC v5e/v6e -- negligible).
    """
    M, K = a.shape
    _, N = w.shape
    grid_m = 2 if (M >= 2048 and M % 16 == 0) else 1
    tm = M // grid_m
    return pl.pallas_call(
        functools.partial(_mm_bias_act_kernel, act=act),
        out_shape=jax.ShapeDtypeStruct((M, N), out_dtype),
        grid=(grid_m,),
        in_specs=[
            pl.BlockSpec((tm, K), lambda i: (i, 0)),
            pl.BlockSpec((K, N), lambda i: (0, 0)),
            pl.BlockSpec((1, N), lambda i: (0, 0)),
        ],
        out_specs=pl.BlockSpec((tm, N), lambda i: (i, 0)),
        compiler_params=pltpu.CompilerParams(
            dimension_semantics=("parallel",)),
    )(a, w, b)


def _tail_kernel(flat_ref, eps_ref, w5_ref, b5_ref, w11_ref, b11_ref,
                 w12_ref, b12_ref, w2_ref, b2_ref, wd1_ref, bd1_ref,
                 mu_ref, ls_ref, d1_ref):
    """Fused tiny-M tail: conv5(+relu) -> fc11/fc12 -> reparameterize ->
    fc2(+relu) -> deconv1(1x1-input ConvTranspose == matmul)(+relu)."""
    f32 = jnp.float32
    # conv5: 4x4 valid conv on the 4x4 input == (B, 1024) @ (1024, 256).
    flat = jnp.dot(flat_ref[...], w5_ref[...], preferred_element_type=f32)
    flat = jnp.maximum(flat + b5_ref[...], 0.0)
    flat_b = flat.astype(jnp.bfloat16)
    mu = jnp.dot(flat_b, w11_ref[...], preferred_element_type=f32) + b11_ref[...]
    ls = jnp.dot(flat_b, w12_ref[...], preferred_element_type=f32) + b12_ref[...]
    mu_ref[...] = mu
    ls_ref[...] = ls
    # reparameterize: z = mu + eps * exp(0.5 * log_sigma)   (exp on the EUP)
    z = mu + eps_ref[...] * jnp.exp(0.5 * ls)
    h = jnp.dot(z.astype(jnp.bfloat16), w2_ref[...], preferred_element_type=f32)
    h = jnp.maximum(h + b2_ref[...], 0.0)                       # fc2 + relu
    d1 = jnp.dot(h.astype(jnp.bfloat16), wd1_ref[...],
                 preferred_element_type=f32)
    d1 = jnp.maximum(d1 + bd1_ref[...], 0.0)                    # deconv1 + relu
    d1_ref[...] = d1.astype(d1_ref.dtype)


def fused_tail(flat_in, eps, packed):
    B = flat_in.shape[0]
    w5, b5 = packed["conv5"]
    w11, b11 = packed["fc11"]
    w12, b12 = packed["fc12"]
    w2, b2 = packed["fc2"]
    wd1, bd1 = packed["deconv1"]
    args = (flat_in, eps, w5, b5, w11, b11, w12, b12, w2, b2, wd1, bd1)

    def _full(arr):
        return pl.BlockSpec(arr.shape, lambda i: (0,) * arr.ndim)

    mu, log_sigma, d1 = pl.pallas_call(
        _tail_kernel,
        out_shape=(jax.ShapeDtypeStruct((B, LATENT_DIM), jnp.float32),
                   jax.ShapeDtypeStruct((B, LATENT_DIM), jnp.float32),
                   jax.ShapeDtypeStruct((B, 16 * 64), jnp.bfloat16)),
        grid=(1,),
        in_specs=[_full(a) for a in args],
        out_specs=(pl.BlockSpec((B, LATENT_DIM), lambda i: (0, 0)),
                   pl.BlockSpec((B, LATENT_DIM), lambda i: (0, 0)),
                   pl.BlockSpec((B, 16 * 64), lambda i: (0, 0))),
        compiler_params=pltpu.CompilerParams(
            dimension_semantics=("arbitrary",)),
    )(*args)
    return mu, log_sigma, d1


# ----------------------------------------------------------------------------
# NHWC conv / deconv layers (im2col + pixel-shuffle are 1x-sized bf16 XLA glue)
# ----------------------------------------------------------------------------
def _im2col_nhwc(x, kh, kw, stride, pad):
    """x: (B, H, W, C) bf16 -> col (B*Ho*Wo, kh*kw*C), K-order (ki, kj, c)."""
    B, H, W, C = x.shape
    xp = jnp.pad(x, ((0, 0), (pad, pad), (pad, pad), (0, 0)))
    Ho = (H + 2 * pad - kh) // stride + 1
    Wo = (W + 2 * pad - kw) // stride + 1
    cols = [xp[:, i:i + stride * Ho:stride, j:j + stride * Wo:stride, :]
            for i in range(kh) for j in range(kw)]
    col = jnp.concatenate(cols, axis=-1)
    return col.reshape(B * Ho * Wo, kh * kw * C), Ho, Wo


def conv2d_nhwc(x, w, b, kh, kw, stride, pad, act="relu",
                out_dtype=jnp.bfloat16):
    B = x.shape[0]
    cout = w.shape[1]
    col, Ho, Wo = _im2col_nhwc(x, kh, kw, stride, pad)
    out = matmul_bias_act(col, w, b, act, out_dtype)
    return out.reshape(B, Ho, Wo, cout)


def deconv_s2_nhwc(x, w, b, cout, act, out_dtype=jnp.bfloat16):
    """ConvTranspose2d(Cin, cout, 4, stride=2, padding=1) as a sub-pixel conv:
    3x3/stride-1 conv producing 4*cout channels, then pixel shuffle."""
    B, H, W, _ = x.shape
    col, _, _ = _im2col_nhwc(x, 3, 3, 1, 1)
    out = matmul_bias_act(col, w, b, act, out_dtype)       # (B*H*W, 4*cout)
    out = out.reshape(B, H, W, 2, 2, cout).transpose(0, 1, 3, 2, 4, 5)
    return out.reshape(B, 2 * H, 2 * W, cout)


# ----------------------------------------------------------------------------
# One-time weight packing (bf16, exact sizes) -- done outside jit
# ----------------------------------------------------------------------------
def _bf16(x):
    return x.astype(jnp.bfloat16)


def pack_conv(w, b):
    """nn.Conv2d weight (Cout, Cin, kh, kw) -> (kh*kw*Cin, Cout) bf16."""
    cout, cin, kh, kw = w.shape
    w_mat = jnp.transpose(w, (2, 3, 1, 0)).reshape(kh * kw * cin, cout)
    return _bf16(w_mat), b.reshape(1, cout).astype(jnp.float32)


def pack_linear(w, b):
    """nn.Linear weight (Nout, Nin) -> (Nin, Nout) bf16."""
    return _bf16(w.T), b.reshape(1, -1).astype(jnp.float32)


def pack_deconv1(w, b):
    """nn.ConvTranspose2d(256, 64, 4) on a 1x1 input -> (Cin, 16*Cout) bf16."""
    cin, cout, kh, kw = w.shape
    w_mat = jnp.transpose(w, (0, 2, 3, 1)).reshape(cin, kh * kw * cout)
    b_mat = jnp.tile(b, kh * kw)                 # bias broadcast over (ki, kj)
    return _bf16(w_mat), b_mat.reshape(1, -1).astype(jnp.float32)


def pack_deconv_s2(w, b):
    """nn.ConvTranspose2d(k=4, s=2, p=1) -> sub-pixel 3x3/stride-1 weight.

    y[b, 2*oh+ry, 2*ow+rx, co] =
        sum_{dr,dc,ci} x[b, oh+dr-1, ow+dc-1, ci] * Wsub[dr, dc, ci, ry, rx, co]
    with Wsub[ry+d, rx+e, ci, ry, rx, co] = W[ci, co, 3-ry-2d, 3-rx-2e]
    for d, e in {0,1} and zero elsewhere.  (Validated vs lax.conv below.)
    """
    cin, cout, _, _ = w.shape
    wt = jnp.zeros((3, 3, cin, 2, 2, cout), jnp.float32)
    for ry in range(2):
        for rx in range(2):
            for d in range(2):
                for e in range(2):
                    wt = wt.at[ry + d, rx + e, :, ry, rx, :].set(
                        w[:, :, 3 - ry - 2 * d, 3 - rx - 2 * e])
    w_mat = wt.reshape(9 * cin, 4 * cout)
    b_mat = jnp.tile(b, 4)                       # bias broadcast over (ry, rx)
    return _bf16(w_mat), b_mat.reshape(1, -1).astype(jnp.float32)


def pack_params(p):
    return {
        "conv1": pack_conv(p["conv1_w"], p["conv1_b"]),
        "conv2": pack_conv(p["conv2_w"], p["conv2_b"]),
        "conv3": pack_conv(p["conv3_w"], p["conv3_b"]),
        "conv4": pack_conv(p["conv4_w"], p["conv4_b"]),
        "conv5": pack_conv(p["conv5_w"], p["conv5_b"]),
        "fc11": pack_linear(p["fc11_w"], p["fc11_b"]),
        "fc12": pack_linear(p["fc12_w"], p["fc12_b"]),
        "fc2": pack_linear(p["fc2_w"], p["fc2_b"]),
        "deconv1": pack_deconv1(p["deconv1_w"], p["deconv1_b"]),
        "deconv2": pack_deconv_s2(p["deconv2_w"], p["deconv2_b"]),
        "deconv3": pack_deconv_s2(p["deconv3_w"], p["deconv3_b"]),
        "deconv4": pack_deconv_s2(p["deconv4_w"], p["deconv4_b"]),
        "deconv5": pack_deconv_s2(p["deconv5_w"], p["deconv5_b"]),
    }


# ----------------------------------------------------------------------------
# Forward pass (Pallas path)
# ----------------------------------------------------------------------------
def betavae_forward(packed, x, eps):
    B = x.shape[0]

    # ---- encode: NHWC + bf16 once at the boundary, stays that way ----
    h = jnp.transpose(x, (0, 2, 3, 1)).astype(jnp.bfloat16)
    h = conv2d_nhwc(h, *packed["conv1"], kh=4, kw=4, stride=2, pad=1)
    h = conv2d_nhwc(h, *packed["conv2"], kh=4, kw=4, stride=2, pad=1)
    h = conv2d_nhwc(h, *packed["conv3"], kh=4, kw=4, stride=2, pad=1)
    h = conv2d_nhwc(h, *packed["conv4"], kh=4, kw=4, stride=2, pad=1)
    flat_in = h.reshape(B, 4 * 4 * 64)            # free row-major flatten

    # ---- fused tail: conv5 -> fc11/fc12 -> reparameterize -> fc2 -> deconv1
    mu, log_sigma, d1 = fused_tail(flat_in, eps, packed)

    # ---- decode ----
    d = d1.reshape(B, 4, 4, 64)                   # relu(deconv1(...)), NHWC
    # PyTorch applies F.relu twice after deconv2 (idempotent).
    d = deconv_s2_nhwc(d, *packed["deconv2"], cout=64, act="relu")
    d = deconv_s2_nhwc(d, *packed["deconv3"], cout=32, act="relu")
    d = deconv_s2_nhwc(d, *packed["deconv4"], cout=32, act="relu")
    d = deconv_s2_nhwc(d, *packed["deconv5"], cout=3, act="sigmoid",
                       out_dtype=jnp.float32)
    decoded = jnp.transpose(d, (0, 3, 1, 2))      # back to NCHW
    return decoded, mu, log_sigma


# ----------------------------------------------------------------------------
# Pure-JAX reference (same bf16-operand / f32-accumulate precision policy)
# ----------------------------------------------------------------------------
def _relu(x):
    return jnp.maximum(x, 0.0)


def _ref_conv(x, w, b, stride, pad):
    y = jax.lax.conv_general_dilated(
        x.astype(jnp.bfloat16), w.astype(jnp.bfloat16),
        window_strides=(stride, stride), padding=[(pad, pad), (pad, pad)],
        dimension_numbers=("NCHW", "OIHW", "NCHW"),
        preferred_element_type=jnp.float32)
    return y + b.reshape(1, -1, 1, 1)


def _ref_deconv(x, w, b, stride, pad):
    k = w.shape[2]
    w_conv = jnp.flip(w, (2, 3)).transpose(1, 0, 2, 3)     # (Cout, Cin, k, k)
    y = jax.lax.conv_general_dilated(
        x.astype(jnp.bfloat16), w_conv.astype(jnp.bfloat16),
        window_strides=(1, 1), padding=[(k - 1 - pad, k - 1 - pad)] * 2,
        lhs_dilation=(stride, stride),
        dimension_numbers=("NCHW", "OIHW", "NCHW"),
        preferred_element_type=jnp.float32)
    return y + b.reshape(1, -1, 1, 1)


def _ref_linear(x, w, b):
    return jnp.dot(x.astype(jnp.bfloat16), w.T.astype(jnp.bfloat16),
                   preferred_element_type=jnp.float32) + b


def reference_forward(p, x, eps):
    B = x.shape[0]
    h = _relu(_ref_conv(x, p["conv1_w"], p["conv1_b"], 2, 1))
    h = _relu(_ref_conv(h, p["conv2_w"], p["conv2_b"], 2, 1))
    h = _relu(_ref_conv(h, p["conv3_w"], p["conv3_b"], 2, 1))
    h = _relu(_ref_conv(h, p["conv4_w"], p["conv4_b"], 2, 1))
    h = _relu(_ref_conv(h, p["conv5_w"], p["conv5_b"], 1, 0))
    flat = h.reshape(B, CALC_SHAPE)
    mu = _ref_linear(flat, p["fc11_w"], p["fc11_b"])
    log_sigma = _ref_linear(flat, p["fc12_w"], p["fc12_b"])
    z = mu + eps * jnp.exp(0.5 * log_sigma)
    d = _relu(_ref_linear(z, p["fc2_w"], p["fc2_b"])).reshape(B, 256, 1, 1)
    d = _relu(_ref_deconv(d, p["deconv1_w"], p["deconv1_b"], 1, 0))
    d = _relu(_ref_deconv(d, p["deconv2_w"], p["deconv2_b"], 2, 1))
    d = _relu(_ref_deconv(d, p["deconv3_w"], p["deconv3_b"], 2, 1))
    d = _relu(_ref_deconv(d, p["deconv4_w"], p["deconv4_b"], 2, 1))
    d = jax.nn.sigmoid(_ref_deconv(d, p["deconv5_w"], p["deconv5_b"], 2, 1))
    return d, mu, log_sigma


# ----------------------------------------------------------------------------
# Parameter init (PyTorch layouts; scales chosen to keep activations O(1))
# ----------------------------------------------------------------------------
def init_params(key):
    params = {}

    def nxt():
        nonlocal key
        key, sub = jax.random.split(key)
        return sub

    def w_init(shape, fan_in, gain):
        return (gain / fan_in) ** 0.5 * jax.random.normal(nxt(), shape,
                                                          jnp.float32)

    def b_init(n):
        return 0.1 * jax.random.normal(nxt(), (n,), jnp.float32)

    def conv_p(name, cout, cin, k, gain=2.0):
        params[name + "_w"] = w_init((cout, cin, k, k), cin * k * k, gain)
        params[name + "_b"] = b_init(cout)

    def deconv_p(name, cin, cout, k, fan_in, gain=2.0):
        params[name + "_w"] = w_init((cin, cout, k, k), fan_in, gain)
        params[name + "_b"] = b_init(cout)

    def linear_p(name, nin, nout, gain=1.0):
        params[name + "_w"] = w_init((nout, nin), nin, gain)
        params[name + "_b"] = b_init(nout)

    conv_p("conv1", 32, 3, 4)
    conv_p("conv2", 32, 32, 4)
    conv_p("conv3", 64, 32, 4)
    conv_p("conv4", 64, 64, 4)
    conv_p("conv5", 256, 64, 4)
    linear_p("fc11", CALC_SHAPE, LATENT_DIM)
    linear_p("fc12", CALC_SHAPE, LATENT_DIM)
    linear_p("fc2", LATENT_DIM, 256, gain=2.0)
    deconv_p("deconv1", 256, 64, 4, fan_in=256)
    deconv_p("deconv2", 64, 64, 4, fan_in=64 * 4)
    deconv_p("deconv3", 64, 32, 4, fan_in=64 * 4)
    deconv_p("deconv4", 32, 32, 4, fan_in=32 * 4)
    deconv_p("deconv5", 32, 3, 4, fan_in=32 * 4, gain=1.0)
    return params


if __name__ == "__main__":
    key = jax.random.PRNGKey(0)
    pkey, xkey, ekey = jax.random.split(key, 3)

    # Input must be 64x64 so the encoder bottleneck is 256*1*1, as in BetaL1.py
    B = 2
    x = jax.random.normal(xkey, (B, 3, 64, 64), jnp.float32)
    # eps is passed explicitly (torch.randn_like in reparameterize).
    eps = jax.random.normal(ekey, (B, LATENT_DIM), jnp.float32)

    params = init_params(pkey)
    packed = pack_params(params)                 # one-time bf16 weight packing

    fwd = jax.jit(betavae_forward)
    decoded, mu, log_sigma = fwd(packed, x, eps)
    jax.block_until_ready((decoded, mu, log_sigma))

    assert decoded.shape == (B, 3, 64, 64)
    assert mu.shape == (B, LATENT_DIM)
    assert log_sigma.shape == (B, LATENT_DIM)
    assert bool(jnp.all(jnp.isfinite(decoded)))
    assert bool(jnp.all((decoded >= 0.0) & (decoded <= 1.0)))

    # Numerical check vs a pure-JAX lax.conv reference using the identical
    # bf16-operand / f32-accumulate policy: validates the sub-pixel
    # ConvTranspose2d decomposition and all weight packings.
    ref_dec, ref_mu, ref_ls = jax.jit(reference_forward)(params, x, eps)
    np.testing.assert_allclose(np.asarray(mu), np.asarray(ref_mu),
                               rtol=5e-3, atol=5e-3)
    np.testing.assert_allclose(np.asarray(log_sigma), np.asarray(ref_ls),
                               rtol=5e-3, atol=5e-3)
    np.testing.assert_allclose(np.asarray(decoded), np.asarray(ref_dec),
                               rtol=5e-3, atol=5e-3)

    print("KERNEL_OK")
</pallas_src>

<mosaic_0001>
module attributes {stable_mosaic.version = 11 : i64} {
  func.func @_mm_bias_act_kernel(%arg0: i32, %arg1: memref<1024x48xbf16, #tpu.memory_space<vmem>>, %arg2: memref<48x32xbf16, #tpu.memory_space<vmem>>, %arg3: memref<1x32xf32, #tpu.memory_space<vmem>>, %arg4: memref<1024x32xbf16, #tpu.memory_space<vmem>>) attributes {dimension_semantics = [#tpu.dimension_semantics<parallel>], iteration_bounds = array<i64: 2>, scalar_prefetch = 0 : i64, scratch_operands = 0 : i64, tpu.core_type = #tpu.core_type<tc>, window_params = [{transform_indices = @transform_0, window_bounds = array<i64: 1024, 48>}, {pipeline_mode = #tpu.pipeline_mode<synchronous>, transform_indices = @transform_1, window_bounds = array<i64: 48, 32>}, {pipeline_mode = #tpu.pipeline_mode<synchronous>, transform_indices = @transform_2, window_bounds = array<i64: 1, 32>}, {transform_indices = @transform_3, window_bounds = array<i64: 1024, 32>}]} {
    %c0 = arith.constant 0 : index
    %c0_0 = arith.constant 0 : index
    %0 = vector.load %arg1[%c0, %c0_0] : memref<1024x48xbf16, #tpu.memory_space<vmem>>, vector<1024x48xbf16>
    %c0_1 = arith.constant 0 : index
    %c0_2 = arith.constant 0 : index
    %1 = vector.load %arg2[%c0_1, %c0_2] : memref<48x32xbf16, #tpu.memory_space<vmem>>, vector<48x32xbf16>
    %cst = arith.constant dense<0.000000e+00> : vector<1024x32xf32>
    %2 = tpu.matmul %0, %1, %cst {dimension_numbers = #tpu.dot_dimension_numbers<[1], [0], [0], [1], [0, 0, 1, 1], [], []>} : vector<1024x48xbf16>, vector<48x32xbf16>, vector<1024x32xf32> -> vector<1024x32xf32>
    %c0_3 = arith.constant 0 : index
    %c0_4 = arith.constant 0 : index
    %3 = vector.load %arg3[%c0_3, %c0_4] : memref<1x32xf32, #tpu.memory_space<vmem>>, vector<1x32xf32>
    %4 = vector.broadcast %3 : vector<1x32xf32> to vector<1024x32xf32>
    %5 = arith.addf %2, %4 : vector<1024x32xf32>
    %cst_5 = arith.constant 0.000000e+00 : f32
    %6 = vector.broadcast %cst_5 : f32 to vector<1024x32xf32>
    %7 = arith.maximumf %5, %6 : vector<1024x32xf32>
    %8 = arith.truncf %7 : vector<1024x32xf32> to vector<1024x32xbf16>
    %c0_6 = arith.constant 0 : index
    %c0_7 = arith.constant 0 : index
    %9 = vector.load %arg4[%c0_6, %c0_7] : memref<1024x32xbf16, #tpu.memory_space<vmem>>, vector<1024x32xbf16>
    tpu.vector_store %arg4[%c0_6, %c0_7], %8 {strides = array<i32>} : memref<1024x32xbf16, #tpu.memory_space<vmem>>, vector<1024x32xbf16>,
    return
  }
  func.func @transform_0(%arg0: i32) -> (i32, i32) {
    %c0_i32 = arith.constant 0 : i32
    %c0_i32_0 = arith.constant 0 : i32
    return %arg0, %c0_i32 : i32, i32
  }
  func.func @transform_1(%arg0: i32) -> (i32, i32) {
    %c0_i32 = arith.constant 0 : i32
    %c0_i32_0 = arith.constant 0 : i32
    %c0_i32_1 = arith.constant 0 : i32
    return %c0_i32, %c0_i32_0 : i32, i32
  }
  func.func @transform_2(%arg0: i32) -> (i32, i32) {
    %c0_i32 = arith.constant 0 : i32
    %c0_i32_0 = arith.constant 0 : i32
    %c0_i32_1 = arith.constant 0 : i32
    return %c0_i32, %c0_i32_0 : i32, i32
  }
  func.func @transform_3(%arg0: i32) -> (i32, i32) {
    %c0_i32 = arith.constant 0 : i32
    %c0_i32_0 = arith.constant 0 : i32
    return %arg0, %c0_i32 : i32, i32
  }
}

module attributes {stable_mosaic.version = 11 : i64} {
  func.func @_mm_bias_act_kernel(%arg0: i32, %arg1: memref<512x512xbf16, #tpu.memory_space<vmem>>, %arg2: memref<512x32xbf16, #tpu.memory_space<vmem>>, %arg3: memref<1x32xf32, #tpu.memory_space<vmem>>, %arg4: memref<512x32xbf16, #tpu.memory_space<vmem>>) attributes {dimension_semantics = [#tpu.dimension_semantics<parallel>], iteration_bounds = array<i64: 1>, scalar_prefetch = 0 : i64, scratch_operands = 0 : i64, tpu.core_type = #tpu.core_type<tc>, window_params = [{transform_indices = @transform_0, window_bounds = array<i64: 512, 512>}, {pipeline_mode = #tpu.pipeline_mode<synchronous>, transform_indices = @transform_1, window_bounds = array<i64: 512, 32>}, {pipeline_mode = #tpu.pipeline_mode<synchronous>, transform_indices = @transform_2, window_bounds = array<i64: 1, 32>}, {transform_indices = @transform_3, window_bounds = array<i64: 512, 32>}]} {
    %c0 = arith.constant 0 : index
    %c0_0 = arith.constant 0 : index
    %0 = vector.load %arg1[%c0, %c0_0] : memref<512x512xbf16, #tpu.memory_space<vmem>>, vector<512x512xbf16>
    %c0_1 = arith.constant 0 : index
    %c0_2 = arith.constant 0 : index
    %1 = vector.load %arg2[%c0_1, %c0_2] : memref<512x32xbf16, #tpu.memory_space<vmem>>, vector<512x32xbf16>
    %cst = arith.constant dense<0.000000e+00> : vector<512x32xf32>
    %2 = tpu.matmul %0, %1, %cst {dimension_numbers = #tpu.dot_dimension_numbers<[1], [0], [0], [1], [0, 0, 1, 1], [], []>} : vector<512x512xbf16>, vector<512x32xbf16>, vector<512x32xf32> -> vector<512x32xf32>
    %c0_3 = arith.constant 0 : index
    %c0_4 = arith.constant 0 : index
    %3 = vector.load %arg3[%c0_3, %c0_4] : memref<1x32xf32, #tpu.memory_space<vmem>>, vector<1x32xf32>
    %4 = vector.broadcast %3 : vector<1x32xf32> to vector<512x32xf32>
    %5 = arith.addf %2, %4 : vector<512x32xf32>
    %cst_5 = arith.constant 0.000000e+00 : f32
    %6 = vector.broadcast %cst_5 : f32 to vector<512x32xf32>
    %7 = arith.maximumf %5, %6 : vector<512x32xf32>
    %8 = arith.truncf %7 : vector<512x32xf32> to vector<512x32xbf16>
    %c0_6 = arith.constant 0 : index
    %c0_7 = arith.constant 0 : index
    %9 = vector.load %arg4[%c0_6, %c0_7] : memref<512x32xbf16, #tpu.memory_space<vmem>>, vector<512x32xbf16>
    tpu.vector_store %arg4[%c0_6, %c0_7], %8 {strides = array<i32>} : memref<512x32xbf16, #tpu.memory_space<vmem>>, vector<512x32xbf16>,
    return
  }
  func.func @transform_0(%arg0: i32) -> (i32, i32) {
    %c0_i32 = arith.constant 0 : i32
    %c0_i32_0 = arith.constant 0 : i32
    return %arg0, %c0_i32 : i32, i32
  }
  func.func @transform_1(%arg0: i32) -> (i32, i32) {
    %c0_i32 = arith.constant 0 : i32
    %c0_i32_0 = arith.constant 0 : i32
    %c0_i32_1 = arith.constant 0 : i32
    return %c0_i32, %c0_i32_0 : i32, i32
  }
  func.func @transform_2(%arg0: i32) -> (i32, i32) {
    %c0_i32 = arith.constant 0 : i32
    %c0_i32_0 = arith.constant 0 : i32
    %c0_i32_1 = arith.constant 0 : i32
    return %c0_i32, %c0_i32_0 : i32, i32
  }
  func.func @transform_3(%arg0: i32) -> (i32, i32) {
    %c0_i32 = arith.constant 0 : i32
    %c0_i32_0 = arith.constant 0 : i32
    return %arg0, %c0_i32 : i32, i32
  }
}

module attributes {stable_mosaic.version = 11 : i64} {
  func.func @_mm_bias_act_kernel(%arg0: i32, %arg1: memref<128x512xbf16, #tpu.memory_space<vmem>>, %arg2: memref<512x64xbf16, #tpu.memory_space<vmem>>, %arg3: memref<1x64xf32, #tpu.memory_space<vmem>>, %arg4: memref<128x64xbf16, #tpu.memory_space<vmem>>) attributes {dimension_semantics = [#tpu.dimension_semantics<parallel>], iteration_bounds = array<i64: 1>, scalar_prefetch = 0 : i64, scratch_operands = 0 : i64, tpu.core_type = #tpu.core_type<tc>, window_params = [{transform_indices = @transform_0, window_bounds = array<i64: 128, 512>}, {pipeline_mode = #tpu.pipeline_mode<synchronous>, transform_indices = @transform_1, window_bounds = array<i64: 512, 64>}, {pipeline_mode = #tpu.pipeline_mode<synchronous>, transform_indices = @transform_2, window_bounds = array<i64: 1, 64>}, {transform_indices = @transform_3, window_bounds = array<i64: 128, 64>}]} {
    %c0 = arith.constant 0 : index
    %c0_0 = arith.constant 0 : index
    %0 = vector.load %arg1[%c0, %c0_0] : memref<128x512xbf16, #tpu.memory_space<vmem>>, vector<128x512xbf16>
    %c0_1 = arith.constant 0 : index
    %c0_2 = arith.constant 0 : index
    %1 = vector.load %arg2[%c0_1, %c0_2] : memref<512x64xbf16, #tpu.memory_space<vmem>>, vector<512x64xbf16>
    %cst = arith.constant dense<0.000000e+00> : vector<128x64xf32>
    %2 = tpu.matmul %0, %1, %cst {dimension_numbers = #tpu.dot_dimension_numbers<[1], [0], [0], [1], [0, 0, 1, 1], [], []>} : vector<128x512xbf16>, vector<512x64xbf16>, vector<128x64xf32> -> vector<128x64xf32>
    %c0_3 = arith.constant 0 : index
    %c0_4 = arith.constant 0 : index
    %3 = vector.load %arg3[%c0_3, %c0_4] : memref<1x64xf32, #tpu.memory_space<vmem>>, vector<1x64xf32>
    %4 = vector.broadcast %3 : vector<1x64xf32> to vector<128x64xf32>
    %5 = arith.addf %2, %4 : vector<128x64xf32>
    %cst_5 = arith.constant 0.000000e+00 : f32
    %6 = vector.broadcast %cst_5 : f32 to vector<128x64xf32>
    %7 = arith.maximumf %5, %6 : vector<128x64xf32>
    %8 = arith.truncf %7 : vector<128x64xf32> to vector<128x64xbf16>
    %c0_6 = arith.constant 0 : index
    %c0_7 = arith.constant 0 : index
    %9 = vector.load %arg4[%c0_6, %c0_7] : memref<128x64xbf16, #tpu.memory_space<vmem>>, vector<128x64xbf16>
    tpu.vector_store %arg4[%c0_6, %c0_7], %8 {strides = array<i32>} : memref<128x64xbf16, #tpu.memory_space<vmem>>, vector<128x64xbf16>,
    return
  }
  func.func @transform_0(%arg0: i32) -> (i32, i32) {
    %c0_i32 = arith.constant 0 : i32
    %c0_i32_0 = arith.constant 0 : i32
    return %arg0, %c0_i32 : i32, i32
  }
  func.func @transform_1(%arg0: i32) -> (i32, i32) {
    %c0_i32 = arith.constant 0 : i32
    %c0_i32_0 = arith.constant 0 : i32
    %c0_i32_1 = arith.constant 0 : i32
    return %c0_i32, %c0_i32_0 : i32, i32
  }
  func.func @transform_2(%arg0: i32) -> (i32, i32) {
    %c0_i32 = arith.constant 0 : i32
    %c0_i32_0 = arith.constant 0 : i32
    %c0_i32_1 = arith.constant 0 : i32
    return %c0_i32, %c0_i32_0 : i32, i32
  }
  func.func @transform_3(%arg0: i32) -> (i32, i32) {
    %c0_i32 = arith.constant 0 : i32
    %c0_i32_0 = arith.constant 0 : i32
    return %arg0, %c0_i32 : i32, i32
  }
}

module attributes {stable_mosaic.version = 11 : i64} {
  func.func @_mm_bias_act_kernel(%arg0: i32, %arg1: memref<32x1024xbf16, #tpu.memory_space<vmem>>, %arg2: memref<1024x64xbf16, #tpu.memory_space<vmem>>, %arg3: memref<1x64xf32, #tpu.memory_space<vmem>>, %arg4: memref<32x64xbf16, #tpu.memory_space<vmem>>) attributes {dimension_semantics = [#tpu.dimension_semantics<parallel>], iteration_bounds = array<i64: 1>, scalar_prefetch = 0 : i64, scratch_operands = 0 : i64, tpu.core_type = #tpu.core_type<tc>, window_params = [{transform_indices = @transform_0, window_bounds = array<i64: 32, 1024>}, {pipeline_mode = #tpu.pipeline_mode<synchronous>, transform_indices = @transform_1, window_bounds = array<i64: 1024, 64>}, {pipeline_mode = #tpu.pipeline_mode<synchronous>, transform_indices = @transform_2, window_bounds = array<i64: 1, 64>}, {transform_indices = @transform_3, window_bounds = array<i64: 32, 64>}]} {
    %c0 = arith.constant 0 : index
    %c0_0 = arith.constant 0 : index
    %0 = vector.load %arg1[%c0, %c0_0] : memref<32x1024xbf16, #tpu.memory_space<vmem>>, vector<32x1024xbf16>
    %c0_1 = arith.constant 0 : index
    %c0_2 = arith.constant 0 : index
    %1 = vector.load %arg2[%c0_1, %c0_2] : memref<1024x64xbf16, #tpu.memory_space<vmem>>, vector<1024x64xbf16>
    %cst = arith.constant dense<0.000000e+00> : vector<32x64xf32>
    %2 = tpu.matmul %0, %1, %cst {dimension_numbers = #tpu.dot_dimension_numbers<[1], [0], [0], [1], [0, 0, 1, 1], [], []>} : vector<32x1024xbf16>, vector<1024x64xbf16>, vector<32x64xf32> -> vector<32x64xf32>
    %c0_3 = arith.constant 0 : index
    %c0_4 = arith.constant 0 : index
    %3 = vector.load %arg3[%c0_3, %c0_4] : memref<1x64xf32, #tpu.memory_space<vmem>>, vector<1x64xf32>
    %4 = vector.broadcast %3 : vector<1x64xf32> to vector<32x64xf32>
    %5 = arith.addf %2, %4 : vector<32x64xf32>
    %cst_5 = arith.constant 0.000000e+00 : f32
    %6 = vector.broadcast %cst_5 : f32 to vector<32x64xf32>
    %7 = arith.maximumf %5, %6 : vector<32x64xf32>
    %8 = arith.truncf %7 : vector<32x64xf32> to vector<32x64xbf16>
    %c0_6 = arith.constant 0 : index
    %c0_7 = arith.constant 0 : index
    %9 = vector.load %arg4[%c0_6, %c0_7] : memref<32x64xbf16, #tpu.memory_space<vmem>>, vector<32x64xbf16>
    tpu.vector_store %arg4[%c0_6, %c0_7], %8 {strides = array<i32>} : memref<32x64xbf16, #tpu.memory_space<vmem>>, vector<32x64xbf16>,
    return
  }
  func.func @transform_0(%arg0: i32) -> (i32, i32) {
    %c0_i32 = arith.constant 0 : i32
    %c0_i32_0 = arith.constant 0 : i32
    return %arg0, %c0_i32 : i32, i32
  }
  func.func @transform_1(%arg0: i32) -> (i32, i32) {
    %c0_i32 = arith.constant 0 : i32
    %c0_i32_0 = arith.constant 0 : i32
    %c0_i32_1 = arith.constant 0 : i32
    return %c0_i32, %c0_i32_0 : i32, i32
  }
  func.func @transform_2(%arg0: i32) -> (i32, i32) {
    %c0_i32 = arith.constant 0 : i32
    %c0_i32_0 = arith.constant 0 : i32
    %c0_i32_1 = arith.constant 0 : i32
    return %c0_i32, %c0_i32_0 : i32, i32
  }
  func.func @transform_3(%arg0: i32) -> (i32, i32) {
    %c0_i32 = arith.constant 0 : i32
    %c0_i32_0 = arith.constant 0 : i32
    return %arg0, %c0_i32 : i32, i32
  }
}

module attributes {stable_mosaic.version = 11 : i64} {
  func.func @_tail_kernel(%arg0: i32, %arg1: memref<2x1024xbf16, #tpu.memory_space<vmem>>, %arg2: memref<2x20xf32, #tpu.memory_space<vmem>>, %arg3: memref<1024x256xbf16, #tpu.memory_space<vmem>>, %arg4: memref<1x256xf32, #tpu.memory_space<vmem>>, %arg5: memref<256x20xbf16, #tpu.memory_space<vmem>>, %arg6: memref<1x20xf32, #tpu.memory_space<vmem>>, %arg7: memref<256x20xbf16, #tpu.memory_space<vmem>>, %arg8: memref<1x20xf32, #tpu.memory_space<vmem>>, %arg9: memref<20x256xbf16, #tpu.memory_space<vmem>>, %arg10: memref<1x256xf32, #tpu.memory_space<vmem>>, %arg11: memref<256x1024xbf16, #tpu.memory_space<vmem>>, %arg12: memref<1x1024xf32, #tpu.memory_space<vmem>>, %arg13: memref<2x20xf32, #tpu.memory_space<vmem>>, %arg14: memref<2x20xf32, #tpu.memory_space<vmem>>, %arg15: memref<2x1024xbf16, #tpu.memory_space<vmem>>) attributes {dimension_semantics = [#tpu.dimension_semantics<arbitrary>], iteration_bounds = array<i64: 1>, scalar_prefetch = 0 : i64, scratch_operands = 0 : i64, tpu.core_type = #tpu.core_type<tc>, window_params = [{pipeline_mode = #tpu.pipeline_mode<synchronous>, transform_indices = @transform_0, window_bounds = array<i64: 2, 1024>}, {pipeline_mode = #tpu.pipeline_mode<synchronous>, transform_indices = @transform_1, window_bounds = array<i64: 2, 20>}, {pipeline_mode = #tpu.pipeline_mode<synchronous>, transform_indices = @transform_2, window_bounds = array<i64: 1024, 256>}, {pipeline_mode = #tpu.pipeline_mode<synchronous>, transform_indices = @transform_3, window_bounds = array<i64: 1, 256>}, {pipeline_mode = #tpu.pipeline_mode<synchronous>, transform_indices = @transform_4, window_bounds = array<i64: 256, 20>}, {pipeline_mode = #tpu.pipeline_mode<synchronous>, transform_indices = @transform_5, window_bounds = array<i64: 1, 20>}, {pipeline_mode = #tpu.pipeline_mode<synchronous>, transform_indices = @transform_6, window_bounds = array<i64: 256, 20>}, {pipeline_mode = #tpu.pipeline_mode<synchronous>, transform_indices = @transform_7, window_bounds = array<i64: 1, 20>}, {pipeline_mode = #tpu.pipeline_mode<synchronous>, transform_indices = @transform_8, window_bounds = array<i64: 20, 256>}, {pipeline_mode = #tpu.pipeline_mode<synchronous>, transform_indices = @transform_9, window_bounds = array<i64: 1, 256>}, {pipeline_mode = #tpu.pipeline_mode<synchronous>, transform_indices = @transform_10, window_bounds = array<i64: 256, 1024>}, {pipeline_mode = #tpu.pipeline_mode<synchronous>, transform_indices = @transform_11, window_bounds = array<i64: 1, 1024>}, {pipeline_mode = #tpu.pipeline_mode<synchronous>, transform_indices = @transform_12, window_bounds = array<i64: 2, 20>}, {pipeline_mode = #tpu.pipeline_mode<synchronous>, transform_indices = @transform_13, window_bounds = array<i64: 2, 20>}, {pipeline_mode = #tpu.pipeline_mode<synchronous>, transform_indices = @transform_14, window_bounds = array<i64: 2, 1024>}]} {
    %c0 = arith.constant 0 : index
    %c0_0 = arith.constant 0 : index
    %0 = vector.load %arg1[%c0, %c0_0] : memref<2x1024xbf16, #tpu.memory_space<vmem>>, vector<2x1024xbf16>
    %c0_1 = arith.constant 0 : index
    %c0_2 = arith.constant 0 : index
    %1 = vector.load %arg3[%c0_1, %c0_2] : memref<1024x256xbf16, #tpu.memory_space<vmem>>, vector<1024x256xbf16>
    %cst = arith.constant dense<0.000000e+00> : vector<2x256xf32>
    %2 = tpu.matmul %0, %1, %cst {dimension_numbers = #tpu.dot_dimension_numbers<[1], [0], [0], [1], [0, 0, 1, 1], [], []>} : vector<2x1024xbf16>, vector<1024x256xbf16>, vector<2x256xf32> -> vector<2x256xf32>
    %c0_3 = arith.constant 0 : index
    %c0_4 = arith.constant 0 : index
    %3 = vector.load %arg4[%c0_3, %c0_4] : memref<1x256xf32, #tpu.memory_space<vmem>>, vector<1x256xf32>
    %4 = vector.broadcast %3 : vector<1x256xf32> to vector<2x256xf32>
    %5 = arith.addf %2, %4 : vector<2x256xf32>
    %cst_5 = arith.constant 0.000000e+00 : f32
    %6 = vector.broadcast %cst_5 : f32 to vector<2x256xf32>
    %7 = arith.maximumf %5, %6 : vector<2x256xf32>
    %8 = arith.truncf %7 : vector<2x256xf32> to vector<2x256xbf16>
    %c0_6 = arith.constant 0 : index
    %c0_7 = arith.constant 0 : index
    %9 = vector.load %arg5[%c0_6, %c0_7] : memref<256x20xbf16, #tpu.memory_space<vmem>>, vector<256x20xbf16>
    %cst_8 = arith.constant dense<0.000000e+00> : vector<2x20xf32>
    %10 = tpu.matmul %8, %9, %cst_8 {dimension_numbers = #tpu.dot_dimension_numbers<[1], [0], [0], [1], [0, 0, 1, 1], [], []>} : vector<2x256xbf16>, vector<256x20xbf16>, vector<2x20xf32> -> vector<2x20xf32>
    %c0_9 = arith.constant 0 : index
    %c0_10 = arith.constant 0 : index
    %11 = vector.load %arg6[%c0_9, %c0_10] : memref<1x20xf32, #tpu.memory_space<vmem>>, vector<1x20xf32>
    %12 = vector.broadcast %11 : vector<1x20xf32> to vector<2x20xf32>
    %13 = arith.addf %10, %12 : vector<2x20xf32>
    %c0_11 = arith.constant 0 : index
    %c0_12 = arith.constant 0 : index
    %14 = vector.load %arg7[%c0_11, %c0_12] : memref<256x20xbf16, #tpu.memory_space<vmem>>, vector<256x20xbf16>
    %cst_13 = arith.constant dense<0.000000e+00> : vector<2x20xf32>
    %15 = tpu.matmul %8, %14, %cst_13 {dimension_numbers = #tpu.dot_dimension_numbers<[1], [0], [0], [1], [0, 0, 1, 1], [], []>} : vector<2x256xbf16>, vector<256x20xbf16>, vector<2x20xf32> -> vector<2x20xf32>
    %c0_14 = arith.constant 0 : index
    %c0_15 = arith.constant 0 : index
    %16 = vector.load %arg8[%c0_14, %c0_15] : memref<1x20xf32, #tpu.memory_space<vmem>>, vector<1x20xf32>
    %17 = vector.broadcast %16 : vector<1x20xf32> to vector<2x20xf32>
    %18 = arith.addf %15, %17 : vector<2x20xf32>
    %c0_16 = arith.constant 0 : index
    %c0_17 = arith.constant 0 : index
    %19 = vector.load %arg13[%c0_16, %c0_17] : memref<2x20xf32, #tpu.memory_space<vmem>>, vector<2x20xf32>
    tpu.vector_store %arg13[%c0_16, %c0_17], %13 {strides = array<i32>} : memref<2x20xf32, #tpu.memory_space<vmem>>, vector<2x20xf32>,
    %c0_18 = arith.constant 0 : index
    %c0_19 = arith.constant 0 : index
    %20 = vector.load %arg14[%c0_18, %c0_19] : memref<2x20xf32, #tpu.memory_space<vmem>>, vector<2x20xf32>
    tpu.vector_store %arg14[%c0_18, %c0_19], %18 {strides = array<i32>} : memref<2x20xf32, #tpu.memory_space<vmem>>, vector<2x20xf32>,
    %c0_20 = arith.constant 0 : index
    %c0_21 = arith.constant 0 : index
    %21 = vector.load %arg2[%c0_20, %c0_21] : memref<2x20xf32, #tpu.memory_space<vmem>>, vector<2x20xf32>
    %cst_22 = arith.constant 5.000000e-01 : f32
    %22 = vector.broadcast %cst_22 : f32 to vector<2x20xf32>
    %23 = arith.mulf %22, %18 : vector<2x20xf32>
    %24 = math.exp %23 : vector<2x20xf32>
    %25 = arith.mulf %21, %24 : vector<2x20xf32>
    %26 = arith.addf %13, %25 : vector<2x20xf32>
    %27 = arith.truncf %26 : vector<2x20xf32> to vector<2x20xbf16>
    %c0_23 = arith.constant 0 : index
    %c0_24 = arith.constant 0 : index
    %28 = vector.load %arg9[%c0_23, %c0_24] : memref<20x256xbf16, #tpu.memory_space<vmem>>, vector<20x256xbf16>
    %cst_25 = arith.constant dense<0.000000e+00> : vector<2x256xf32>
    %29 = tpu.matmul %27, %28, %cst_25 {dimension_numbers = #tpu.dot_dimension_numbers<[1], [0], [0], [1], [0, 0, 1, 1], [], []>} : vector<2x20xbf16>, vector<20x256xbf16>, vector<2x256xf32> -> vector<2x256xf32>
    %c0_26 = arith.constant 0 : index
    %c0_27 = arith.constant 0 : index
    %30 = vector.load %arg10[%c0_26, %c0_27] : memref<1x256xf32, #tpu.memory_space<vmem>>, vector<1x256xf32>
    %31 = vector.broadcast %30 : vector<1x256xf32> to vector<2x256xf32>
    %32 = arith.addf %29, %31 : vector<2x256xf32>
    %cst_28 = arith.constant 0.000000e+00 : f32
    %33 = vector.broadcast %cst_28 : f32 to vector<2x256xf32>
    %34 = arith.maximumf %32, %33 : vector<2x256xf32>
    %35 = arith.truncf %34 : vector<2x256xf32> to vector<2x256xbf16>
    %c0_29 = arith.constant 0 : index
    %c0_30 = arith.constant 0 : index
    %36 = vector.load %arg11[%c0_29, %c0_30] : memref<256x1024xbf16, #tpu.memory_space<vmem>>, vector<256x1024xbf16>
    %cst_31 = arith.constant dense<0.000000e+00> : vector<2x1024xf32>
    %37 = tpu.matmul %35, %36, %cst_31 {dimension_numbers = #tpu.dot_dimension_numbers<[1], [0], [0], [1], [0, 0, 1, 1], [], []>} : vector<2x256xbf16>, vector<256x1024xbf16>, vector<2x1024xf32> -> vector<2x1024xf32>
    %c0_32 = arith.constant 0 : index
    %c0_33 = arith.constant 0 : index
    %38 = vector.load %arg12[%c0_32, %c0_33] : memref<1x1024xf32, #tpu.memory_space<vmem>>, vector<1x1024xf32>
    %39 = vector.broadcast %38 : vector<1x1024xf32> to vector<2x1024xf32>
    %40 = arith.addf %37, %39 : vector<2x1024xf32>
    %cst_34 = arith.constant 0.000000e+00 : f32
    %41 = vector.broadcast %cst_34 : f32 to vector<2x1024xf32>
    %42 = arith.maximumf %40, %41 : vector<2x1024xf32>
    %43 = arith.truncf %42 : vector<2x1024xf32> to vector<2x1024xbf16>
    %c0_35 = arith.constant 0 : index
    %c0_36 = arith.constant 0 : index
    %44 = vector.load %arg15[%c0_35, %c0_36] : memref<2x1024xbf16, #tpu.memory_space<vmem>>, vector<2x1024xbf16>
    tpu.vector_store %arg15[%c0_35, %c0_36], %43 {strides = array<i32>} : memref<2x1024xbf16, #tpu.memory_space<vmem>>, vector<2x1024xbf16>,
    return
  }
  func.func @transform_0(%arg0: i32) -> (i32, i32) {
    %c0_i32 = arith.constant 0 : i32
    %c0_i32_0 = arith.constant 0 : i32
    %c0_i32_1 = arith.constant 0 : i32
    return %c0_i32, %c0_i32_0 : i32, i32
  }
  func.func @transform_1(%arg0: i32) -> (i32, i32) {
    %c0_i32 = arith.constant 0 : i32
    %c0_i32_0 = arith.constant 0 : i32
    %c0_i32_1 = arith.constant 0 : i32
    return %c0_i32, %c0_i32_0 : i32, i32
  }
  func.func @transform_2(%arg0: i32) -> (i32, i32) {
    %c0_i32 = arith.constant 0 : i32
    %c0_i32_0 = arith.constant 0 : i32
    %c0_i32_1 = arith.constant 0 : i32
    return %c0_i32, %c0_i32_0 : i32, i32
  }
  func.func @transform_3(%arg0: i32) -> (i32, i32) {
    %c0_i32 = arith.constant 0 : i32
    %c0_i32_0 = arith.constant 0 : i32
    %c0_i32_1 = arith.constant 0 : i32
    return %c0_i32, %c0_i32_0 : i32, i32
  }
  func.func @transform_4(%arg0: i32) -> (i32, i32) {
    %c0_i32 = arith.constant 0 : i32
    %c0_i32_0 = arith.constant 0 : i32
    %c0_i32_1 = arith.constant 0 : i32
    return %c0_i32, %c0_i32_0 : i32, i32
  }
  func.func @transform_5(%arg0: i32) -> (i32, i32) {
    %c0_i32 = arith.constant 0 : i32
    %c0_i32_0 = arith.constant 0 : i32
    %c0_i32_1 = arith.constant 0 : i32
    return %c0_i32, %c0_i32_0 : i32, i32
  }
  func.func @transform_6(%arg0: i32) -> (i32, i32) {
    %c0_i32 = arith.constant 0 : i32
    %c0_i32_0 = arith.constant 0 : i32
    %c0_i32_1 = arith.constant 0 : i32
    return %c0_i32, %c0_i32_0 : i32, i32
  }
  func.func @transform_7(%arg0: i32) -> (i32, i32) {
    %c0_i32 = arith.constant 0 : i32
    %c0_i32_0 = arith.constant 0 : i32
    %c0_i32_1 = arith.constant 0 : i32
    return %c0_i32, %c0_i32_0 : i32, i32
  }
  func.func @transform_8(%arg0: i32) -> (i32, i32) {
    %c0_i32 = arith.constant 0 : i32
    %c0_i32_0 = arith.constant 0 : i32
    %c0_i32_1 = arith.constant 0 : i32
    return %c0_i32, %c0_i32_0 : i32, i32
  }
  func.func @transform_9(%arg0: i32) -> (i32, i32) {
    %c0_i32 = arith.constant 0 : i32
    %c0_i32_0 = arith.constant 0 : i32
    %c0_i32_1 = arith.constant 0 : i32
    return %c0_i32, %c0_i32_0 : i32, i32
  }
  func.func @transform_10(%arg0: i32) -> (i32, i32) {
    %c0_i32 = arith.constant 0 : i32
    %c0_i32_0 = arith.constant 0 : i32
    %c0_i32_1 = arith.constant 0 : i32
    return %c0_i32, %c0_i32_0 : i32, i32
  }
  func.func @transform_11(%arg0: i32) -> (i32, i32) {
    %c0_i32 = arith.constant 0 : i32
    %c0_i32_0 = arith.constant 0 : i32
    %c0_i32_1 = arith.constant 0 : i32
    return %c0_i32, %c0_i32_0 : i32, i32
  }
  func.func @transform_12(%arg0: i32) -> (i32, i32) {
    %c0_i32 = arith.constant 0 : i32
    %c0_i32_0 = arith.constant 0 : i32
    %c0_i32_1 = arith.constant 0 : i32
    return %c0_i32, %c0_i32_0 : i32, i32
  }
  func.func @transform_13(%arg0: i32) -> (i32, i32) {
    %c0_i32 = arith.constant 0 : i32
    %c0_i32_0 = arith.constant 0 : i32
    %c0_i32_1 = arith.constant 0 : i32
    return %c0_i32, %c0_i32_0 : i32, i32
  }
  func.func @transform_14(%arg0: i32) -> (i32, i32) {
    %c0_i32 = arith.constant 0 : i32
    %c0_i32_0 = arith.constant 0 : i32
    %c0_i32_1 = arith.constant 0 : i32
    return %c0_i32, %c0_i32_0 : i32, i32
  }
}

module attributes {stable_mosaic.version = 11 : i64} {
  func.func @_mm_bias_act_kernel(%arg0: i32, %arg1: memref<32x576xbf16, #tpu.memory_space<vmem>>, %arg2: memref<576x256xbf16, #tpu.memory_space<vmem>>, %arg3: memref<1x256xf32, #tpu.memory_space<vmem>>, %arg4: memref<32x256xbf16, #tpu.memory_space<vmem>>) attributes {dimension_semantics = [#tpu.dimension_semantics<parallel>], iteration_bounds = array<i64: 1>, scalar_prefetch = 0 : i64, scratch_operands = 0 : i64, tpu.core_type = #tpu.core_type<tc>, window_params = [{transform_indices = @transform_0, window_bounds = array<i64: 32, 576>}, {pipeline_mode = #tpu.pipeline_mode<synchronous>, transform_indices = @transform_1, window_bounds = array<i64: 576, 256>}, {pipeline_mode = #tpu.pipeline_mode<synchronous>, transform_indices = @transform_2, window_bounds = array<i64: 1, 256>}, {transform_indices = @transform_3, window_bounds = array<i64: 32, 256>}]} {
    %c0 = arith.constant 0 : index
    %c0_0 = arith.constant 0 : index
    %0 = vector.load %arg1[%c0, %c0_0] : memref<32x576xbf16, #tpu.memory_space<vmem>>, vector<32x576xbf16>
    %c0_1 = arith.constant 0 : index
    %c0_2 = arith.constant 0 : index
    %1 = vector.load %arg2[%c0_1, %c0_2] : memref<576x256xbf16, #tpu.memory_space<vmem>>, vector<576x256xbf16>
    %cst = arith.constant dense<0.000000e+00> : vector<32x256xf32>
    %2 = tpu.matmul %0, %1, %cst {dimension_numbers = #tpu.dot_dimension_numbers<[1], [0], [0], [1], [0, 0, 1, 1], [], []>} : vector<32x576xbf16>, vector<576x256xbf16>, vector<32x256xf32> -> vector<32x256xf32>
    %c0_3 = arith.constant 0 : index
    %c0_4 = arith.constant 0 : index
    %3 = vector.load %arg3[%c0_3, %c0_4] : memref<1x256xf32, #tpu.memory_space<vmem>>, vector<1x256xf32>
    %4 = vector.broadcast %3 : vector<1x256xf32> to vector<32x256xf32>
    %5 = arith.addf %2, %4 : vector<32x256xf32>
    %cst_5 = arith.constant 0.000000e+00 : f32
    %6 = vector.broadcast %cst_5 : f32 to vector<32x256xf32>
    %7 = arith.maximumf %5, %6 : vector<32x256xf32>
    %8 = arith.truncf %7 : vector<32x256xf32> to vector<32x256xbf16>
    %c0_6 = arith.constant 0 : index
    %c0_7 = arith.constant 0 : index
    %9 = vector.load %arg4[%c0_6, %c0_7] : memref<32x256xbf16, #tpu.memory_space<vmem>>, vector<32x256xbf16>
    tpu.vector_store %arg4[%c0_6, %c0_7], %8 {strides = array<i32>} : memref<32x256xbf16, #tpu.memory_space<vmem>>, vector<32x256xbf16>,
    return
  }
  func.func @transform_0(%arg0: i32) -> (i32, i32) {
    %c0_i32 = arith.constant 0 : i32
    %c0_i32_0 = arith.constant 0 : i32
    return %arg0, %c0_i32 : i32, i32
  }
  func.func @transform_1(%arg0: i32) -> (i32, i32) {
    %c0_i32 = arith.constant 0 : i32
    %c0_i32_0 = arith.constant 0 : i32
    %c0_i32_1 = arith.constant 0 : i32
    return %c0_i32, %c0_i32_0 : i32, i32
  }
  func.func @transform_2(%arg0: i32) -> (i32, i32) {
    %c0_i32 = arith.constant 0 : i32
    %c0_i32_0 = arith.constant 0 : i32
    %c0_i32_1 = arith.constant 0 : i32
    return %c0_i32, %c0_i32_0 : i32, i32
  }
  func.func @transform_3(%arg0: i32) -> (i32, i32) {
    %c0_i32 = arith.constant 0 : i32
    %c0_i32_0 = arith.constant 0 : i32
    return %arg0, %c0_i32 : i32, i32
  }
}

module attributes {stable_mosaic.version = 11 : i64} {
  func.func @_mm_bias_act_kernel(%arg0: i32, %arg1: memref<128x576xbf16, #tpu.memory_space<vmem>>, %arg2: memref<576x128xbf16, #tpu.memory_space<vmem>>, %arg3: memref<1x128xf32, #tpu.memory_space<vmem>>, %arg4: memref<128x128xbf16, #tpu.memory_space<vmem>>) attributes {dimension_semantics = [#tpu.dimension_semantics<parallel>], iteration_bounds = array<i64: 1>, scalar_prefetch = 0 : i64, scratch_operands = 0 : i64, tpu.core_type = #tpu.core_type<tc>, window_params = [{transform_indices = @transform_0, window_bounds = array<i64: 128, 576>}, {pipeline_mode = #tpu.pipeline_mode<synchronous>, transform_indices = @transform_1, window_bounds = array<i64: 576, 128>}, {pipeline_mode = #tpu.pipeline_mode<synchronous>, transform_indices = @transform_2, window_bounds = array<i64: 1, 128>}, {transform_indices = @transform_3, window_bounds = array<i64: 128, 128>}]} {
    %c0 = arith.constant 0 : index
    %c0_0 = arith.constant 0 : index
    %0 = vector.load %arg1[%c0, %c0_0] : memref<128x576xbf16, #tpu.memory_space<vmem>>, vector<128x576xbf16>
    %c0_1 = arith.constant 0 : index
    %c0_2 = arith.constant 0 : index
    %1 = vector.load %arg2[%c0_1, %c0_2] : memref<576x128xbf16, #tpu.memory_space<vmem>>, vector<576x128xbf16>
    %cst = arith.constant dense<0.000000e+00> : vector<128x128xf32>
    %2 = tpu.matmul %0, %1, %cst {dimension_numbers = #tpu.dot_dimension_numbers<[1], [0], [0], [1], [0, 0, 1, 1], [], []>} : vector<128x576xbf16>, vector<576x128xbf16>, vector<128x128xf32> -> vector<128x128xf32>
    %c0_3 = arith.constant 0 : index
    %c0_4 = arith.constant 0 : index
    %3 = vector.load %arg3[%c0_3, %c0_4] : memref<1x128xf32, #tpu.memory_space<vmem>>, vector<1x128xf32>
    %4 = vector.broadcast %3 : vector<1x128xf32> to vector<128x128xf32>
    %5 = arith.addf %2, %4 : vector<128x128xf32>
    %cst_5 = arith.constant 0.000000e+00 : f32
    %6 = vector.broadcast %cst_5 : f32 to vector<128x128xf32>
    %7 = arith.maximumf %5, %6 : vector<128x128xf32>
    %8 = arith.truncf %7 : vector<128x128xf32> to vector<128x128xbf16>
    %c0_6 = arith.constant 0 : index
    %c0_7 = arith.constant 0 : index
    %9 = vector.load %arg4[%c0_6, %c0_7] : memref<128x128xbf16, #tpu.memory_space<vmem>>, vector<128x128xbf16>
    tpu.vector_store %arg4[%c0_6, %c0_7], %8 {strides = array<i32>} : memref<128x128xbf16, #tpu.memory_space<vmem>>, vector<128x128xbf16>,
    return
  }
  func.func @transform_0(%arg0: i32) -> (i32, i32) {
    %c0_i32 = arith.constant 0 : i32
    %c0_i32_0 = arith.constant 0 : i32
    return %arg0, %c0_i32 : i32, i32
  }
  func.func @transform_1(%arg0: i32) -> (i32, i32) {
    %c0_i32 = arith.constant 0 : i32
    %c0_i32_0 = arith.constant 0 : i32
    %c0_i32_1 = arith.constant 0 : i32
    return %c0_i32, %c0_i32_0 : i32, i32
  }
  func.func @transform_2(%arg0: i32) -> (i32, i32) {
    %c0_i32 = arith.constant 0 : i32
    %c0_i32_0 = arith.constant 0 : i32
    %c0_i32_1 = arith.constant 0 : i32
    return %c0_i32, %c0_i32_0 : i32, i32
  }
  func.func @transform_3(%arg0: i32) -> (i32, i32) {
    %c0_i32 = arith.constant 0 : i32
    %c0_i32_0 = arith.constant 0 : i32
    return %arg0, %c0_i32 : i32, i32
  }
}

module attributes {stable_mosaic.version = 11 : i64} {
  func.func @_mm_bias_act_kernel(%arg0: i32, %arg1: memref<512x288xbf16, #tpu.memory_space<vmem>>, %arg2: memref<288x128xbf16, #tpu.memory_space<vmem>>, %arg3: memref<1x128xf32, #tpu.memory_space<vmem>>, %arg4: memref<512x128xbf16, #tpu.memory_space<vmem>>) attributes {dimension_semantics = [#tpu.dimension_semantics<parallel>], iteration_bounds = array<i64: 1>, scalar_prefetch = 0 : i64, scratch_operands = 0 : i64, tpu.core_type = #tpu.core_type<tc>, window_params = [{transform_indices = @transform_0, window_bounds = array<i64: 512, 288>}, {pipeline_mode = #tpu.pipeline_mode<synchronous>, transform_indices = @transform_1, window_bounds = array<i64: 288, 128>}, {pipeline_mode = #tpu.pipeline_mode<synchronous>, transform_indices = @transform_2, window_bounds = array<i64: 1, 128>}, {transform_indices = @transform_3, window_bounds = array<i64: 512, 128>}]} {
    %c0 = arith.constant 0 : index
    %c0_0 = arith.constant 0 : index
    %0 = vector.load %arg1[%c0, %c0_0] : memref<512x288xbf16, #tpu.memory_space<vmem>>, vector<512x288xbf16>
    %c0_1 = arith.constant 0 : index
    %c0_2 = arith.constant 0 : index
    %1 = vector.load %arg2[%c0_1, %c0_2] : memref<288x128xbf16, #tpu.memory_space<vmem>>, vector<288x128xbf16>
    %cst = arith.constant dense<0.000000e+00> : vector<512x128xf32>
    %2 = tpu.matmul %0, %1, %cst {dimension_numbers = #tpu.dot_dimension_numbers<[1], [0], [0], [1], [0, 0, 1, 1], [], []>} : vector<512x288xbf16>, vector<288x128xbf16>, vector<512x128xf32> -> vector<512x128xf32>
    %c0_3 = arith.constant 0 : index
    %c0_4 = arith.constant 0 : index
    %3 = vector.load %arg3[%c0_3, %c0_4] : memref<1x128xf32, #tpu.memory_space<vmem>>, vector<1x128xf32>
    %4 = vector.broadcast %3 : vector<1x128xf32> to vector<512x128xf32>
    %5 = arith.addf %2, %4 : vector<512x128xf32>
    %cst_5 = arith.constant 0.000000e+00 : f32
    %6 = vector.broadcast %cst_5 : f32 to vector<512x128xf32>
    %7 = arith.maximumf %5, %6 : vector<512x128xf32>
    %8 = arith.truncf %7 : vector<512x128xf32> to vector<512x128xbf16>
    %c0_6 = arith.constant 0 : index
    %c0_7 = arith.constant 0 : index
    %9 = vector.load %arg4[%c0_6, %c0_7] : memref<512x128xbf16, #tpu.memory_space<vmem>>, vector<512x128xbf16>
    tpu.vector_store %arg4[%c0_6, %c0_7], %8 {strides = array<i32>} : memref<512x128xbf16, #tpu.memory_space<vmem>>, vector<512x128xbf16>,
    return
  }
  func.func @transform_0(%arg0: i32) -> (i32, i32) {
    %c0_i32 = arith.constant 0 : i32
    %c0_i32_0 = arith.constant 0 : i32
    return %arg0, %c0_i32 : i32, i32
  }
  func.func @transform_1(%arg0: i32) -> (i32, i32) {
    %c0_i32 = arith.constant 0 : i32
    %c0_i32_0 = arith.constant 0 : i32
    %c0_i32_1 = arith.constant 0 : i32
    return %c0_i32, %c0_i32_0 : i32, i32
  }
  func.func @transform_2(%arg0: i32) -> (i32, i32) {
    %c0_i32 = arith.constant 0 : i32
    %c0_i32_0 = arith.constant 0 : i32
    %c0_i32_1 = arith.constant 0 : i32
    return %c0_i32, %c0_i32_0 : i32, i32
  }
  func.func @transform_3(%arg0: i32) -> (i32, i32) {
    %c0_i32 = arith.constant 0 : i32
    %c0_i32_0 = arith.constant 0 : i32
    return %arg0, %c0_i32 : i32, i32
  }
}

module attributes {stable_mosaic.version = 11 : i64} {
  func.func @_mm_bias_act_kernel(%arg0: i32, %arg1: memref<1024x288xbf16, #tpu.memory_space<vmem>>, %arg2: memref<288x12xbf16, #tpu.memory_space<vmem>>, %arg3: memref<1x12xf32, #tpu.memory_space<vmem>>, %arg4: memref<1024x12xf32, #tpu.memory_space<vmem>>) attributes {dimension_semantics = [#tpu.dimension_semantics<parallel>], iteration_bounds = array<i64: 2>, scalar_prefetch = 0 : i64, scratch_operands = 0 : i64, tpu.core_type = #tpu.core_type<tc>, window_params = [{transform_indices = @transform_0, window_bounds = array<i64: 1024, 288>}, {pipeline_mode = #tpu.pipeline_mode<synchronous>, transform_indices = @transform_1, window_bounds = array<i64: 288, 12>}, {pipeline_mode = #tpu.pipeline_mode<synchronous>, transform_indices = @transform_2, window_bounds = array<i64: 1, 12>}, {transform_indices = @transform_3, window_bounds = array<i64: 1024, 12>}]} {
    %c0 = arith.constant 0 : index
    %c0_0 = arith.constant 0 : index
    %0 = vector.load %arg1[%c0, %c0_0] : memref<1024x288xbf16, #tpu.memory_space<vmem>>, vector<1024x288xbf16>
    %c0_1 = arith.constant 0 : index
    %c0_2 = arith.constant 0 : index
    %1 = vector.load %arg2[%c0_1, %c0_2] : memref<288x12xbf16, #tpu.memory_space<vmem>>, vector<288x12xbf16>
    %cst = arith.constant dense<0.000000e+00> : vector<1024x12xf32>
    %2 = tpu.matmul %0, %1, %cst {dimension_numbers = #tpu.dot_dimension_numbers<[1], [0], [0], [1], [0, 0, 1, 1], [], []>} : vector<1024x288xbf16>, vector<288x12xbf16>, vector<1024x12xf32> -> vector<1024x12xf32>
    %c0_3 = arith.constant 0 : index
    %c0_4 = arith.constant 0 : index
    %3 = vector.load %arg3[%c0_3, %c0_4] : memref<1x12xf32, #tpu.memory_space<vmem>>, vector<1x12xf32>
    %4 = vector.broadcast %3 : vector<1x12xf32> to vector<1024x12xf32>
    %5 = arith.addf %2, %4 : vector<1024x12xf32>
    %6 = arith.negf %5 : vector<1024x12xf32>
    %7 = math.exp %6 : vector<1024x12xf32>
    %cst_5 = arith.constant 1.000000e+00 : f32
    %8 = vector.broadcast %cst_5 : f32 to vector<1024x12xf32>
    %9 = arith.addf %8, %7 : vector<1024x12xf32>
    %10 = arith.divf %8, %9 : vector<1024x12xf32>
    %c0_6 = arith.constant 0 : index
    %c0_7 = arith.constant 0 : index
    %11 = vector.load %arg4[%c0_6, %c0_7] : memref<1024x12xf32, #tpu.memory_space<vmem>>, vector<1024x12xf32>
    tpu.vector_store %arg4[%c0_6, %c0_7], %10 {strides = array<i32>} : memref<1024x12xf32, #tpu.memory_space<vmem>>, vector<1024x12xf32>,
    return
  }
  func.func @transform_0(%arg0: i32) -> (i32, i32) {
    %c0_i32 = arith.constant 0 : i32
    %c0_i32_0 = arith.constant 0 : i32
    return %arg0, %c0_i32 : i32, i32
  }
  func.func @transform_1(%arg0: i32) -> (i32, i32) {
    %c0_i32 = arith.constant 0 : i32
    %c0_i32_0 = arith.constant 0 : i32
    %c0_i32_1 = arith.constant 0 : i32
    return %c0_i32, %c0_i32_0 : i32, i32
  }
  func.func @transform_2(%arg0: i32) -> (i32, i32) {
    %c0_i32 = arith.constant 0 : i32
    %c0_i32_0 = arith.constant 0 : i32
    %c0_i32_1 = arith.constant 0 : i32
    return %c0_i32, %c0_i32_0 : i32, i32
  }
  func.func @transform_3(%arg0: i32) -> (i32, i32) {
    %c0_i32 = arith.constant 0 : i32
    %c0_i32_0 = arith.constant 0 : i32
    return %arg0, %c0_i32 : i32, i32
  }
}

</mosaic_0001>

<bundles_post_ra>
// kernel: betavae_forward.9
= control target key start
LH: loop header
LB: loop body
LE: loop exit
PB: predicated region body
PF: predicated region fallthrough
CT: control target
= control target key end

     0   :  { %8 = vsyncpa [#allocation3], 0  ;;  %s2998_s12 = smov 0   ;;  %s3593_s0 = inlined_call_operand.vmem [shape: bf16[2048,48], index: 0, kind: input, shape index: {}]   ;;  %s3594_s1 = inlined_call_operand.vmem [shape: bf16[48,32], index: 1, kind: input, shape index: {}]   ;;  %s3595_s2 = inlined_call_operand.hbm [shape: f32[1,32], index: 2, kind: input, shape index: {}]   ;;  %s3596_s3 = inlined_call_operand.vmem [shape: bf16[2048,32], index: 3, kind: output, shape index: {}]  }
   0x1 LB: > { %s2242_s13 = sadd.s32 4294967295, %s2975_s12   ;;  %p2244_p0 = scmp.ge.s32.totalorder %s2975_s12, 1  ;;  %s2975_s12 = sphi %s2998_s12, %s14_s12  }
   0x2   : > { %p113_p1 = scmp.lt.s32.totalorder %s2975_s12, 3  ;;  %p3012_p3 = scmp.eq.s32.totalorder %s2242_s13, 0 }
   0x3   : > { %s2977_s16 = smov [#allocation2]   ;;  %s2937_s21 = scalar_lea.hbm %s3595_s2, 16 }
   0x4   : > { %p3006_p2 = pnand %p2244_p0, %p113_p1  ;;  %s129_s17 = sshll.u32 %s2977_s16, 4  ;;  %s130_s17 = int_to_ptr.vmem [resolvable:$true] %s129_s17 }
   0x5   : > { %s3601_s15 = scalar_select %p3012_p3, 1, 0 }
   0x6   : > { %s3600_s14 = scalar_select %p3006_p2, 1, 0 }
   0x7   : > { %p2854_p4 = pneg %p3006_p2  ;;  %p2938_p6 = scmp.ne.s32.totalorder %s3595_s2, %s2937_s21 }
   0x8   : > { %p2944_p10 = scmp.lt.u32.totalorder %s2937_s21, %s3595_s2 }
   0x9   : > { %p3020_p5 = pnand %p3012_p3, %p2854_p4 }
   0xb   : > { %p2939_p7 = pneg %p3020_p5 }
   0xd   : > { %p2940_p8 = pnand %p2939_p7, %p2938_p6 }
   0xf   : > { %p2941_p9 = pneg %p2940_p8 }
  0x11   : > { %p2946_p11 = pnand %p2944_p10, %p2941_p9 }
  0x13   : > { %2949 = shalt.err (!%p2946_p11)
}
  0x14   : > { %s2950_s26 = scalar_lea.vmem %s130_s17, 16  ;;  %s2957_s27 = scalar_lea.vmem %s130_s17, 32 }
  0x15   : > { %p2951_p12 = scmp.ne.s32.totalorder %s130_s17, %s2950_s26  ;;  %p2958_p1 = scmp.lt.s32.totalorder %s130_s17, %s130_s17 }
  0x16   : > { %p2959_p4 = scmp.lt.s32.totalorder %s2957_s27, %s2950_s26 }
  0x17   : > { %p2953_p13 = pnand %p2951_p12, %p2939_p7 }
  0x18   : > { %p2960_p3 = por %p2959_p4, %p2958_p1 }
  0x19   : > { %p2954_p0 = pneg %p2953_p13 }
  0x1b   : > { %p2961_p2 = pnand %p2960_p3, %p2954_p0 }
  0x1d   : > { %2964 = shalt.err (!%p2961_p2)
}
  0x1e   : > { %2857 = dma.hbm_to_vmem [thread:$0]  (!%p3020_p5), %s3595_s2, 16, %s130_s17, [#allocation3]  }
  0x1f   : > { %p3603_p6 = scmp.ne.s32.totalorder %s3600_s14, 0 }
  0x20   : > { %p3604_p8 = scmp.ne.s32.totalorder (!%p3603_p6), %s3601_s15, 0 }
  0x21   : > { %151 = sbr.rel (%p3603_p6) target bundleno = 396 (0x18c), region = 32 }
  0x28   : > { %2970 = dma.done.wait (%p3604_p8), [#allocation3], 16  }
  0x29   : > { %2972 = vsyncadd (%p3604_p8), [#allocation3], 4294967280  ;;  %s2249_s30 = sshll.u32 %s2242_s13, 7  ;;  %v2869_v0 = vld [vmem:[%s3594_s1] sm:$0xff]   ;;  %v2870_v1 = vld [vmem:[%s3594_s1 + $0x8] sm:$0xff]   ;;  %vm667_vm0 = vcmask 392192  }
  0x2a   : > { %p176_p3 = scmp.lt.s32.totalorder %s2249_s30, 255  ;;  %2710 = vmatprep.subr.bf16.mxu0 %v2869_v0  ;;  %2844 = vmatprep.subr.bf16.mxu1 %v2869_v0  ;;  %v2871_v2 = vld [vmem:[%s3594_s1 + $0x10] sm:$0xff]   ;;  %vm2045_vm1 = vcmask 257024  }
  0x2b   : > { %2711 = vmatpush3.bf16.msra.mxu0 %v2869_v0  ;;  %2847 = vmatpush3.bf16.msra.mxu1 %v2869_v0 }
  0x2c   : > { %s3606_s30 = smov (!%p176_p3, %s2249_s30), 255  ;;  %2712 = vmatprep.subr.bf16.mxu0 %v2870_v1  ;;  %2845 = vmatprep.subr.bf16.mxu1 %v2870_v1 }
  0x2d   : > { %s2250_s4 = sshll.u32 %s3606_s30, 2 }
  0x2e   : > { %s3059_s9 = scalar_lea.vmem %s3593_s0, %s2250_s4  ;;  %s3208_s17 = scalar_lea.vmem %s3596_s3, %s2250_s4 }
  0x2f   : > { %v2872_v3 = vld [vmem:[%s3059_s9] sm:$0xff]   ;;  %2713 = vmatpush3.bf16.msra.mxu0 %v2870_v1  ;;  %2848 = vmatpush3.bf16.msra.mxu1 %v2870_v1  ;;  %v2874_v5 = vld [vmem:[%s3059_s9 + $0x8] sm:$0xff]   ;;  %v2876_v7 = vld [vmem:[%s3059_s9 + $0x10] sm:$0xff]  }
  0x30   : > { %v2873_v4 = vld [vmem:[%s3059_s9 + $0x100] sm:$0xff]   ;;  %2716 = vmatprep.mubr.msk.bf16.mxu0 %vm667_vm0, %v2872_v3  ;;  %2714 = vmatprep.subr.bf16.mxu0 %v2871_v2  ;;  %v2875_v6 = vld [vmem:[%s3059_s9 + $0x108] sm:$0xff]   ;;  %v2877_v8 = vld [vmem:[%s3059_s9 + $0x110] sm:$0xff]  }
  0x31   : > { %2780 = vmatprep.mubr.msk.bf16.mxu1 %vm667_vm0, %v2873_v4  ;;  %2846 = vmatprep.subr.bf16.mxu1 %v2871_v2  ;;  %v2878_v9 = vld [vmem:[%s3059_s9 + $0x18] sm:$0xff]   ;;  %v2880_v11 = vld [vmem:[%s3059_s9 + $0x20] sm:$0xff]   ;;  %v2882_v13 = vld [vmem:[%s3059_s9 + $0x28] sm:$0xff]  }
  0x32   : > { %v2879_v10 = vld [vmem:[%s3059_s9 + $0x118] sm:$0xff]   ;;  %v2881_v12 = vld [vmem:[%s3059_s9 + $0x120] sm:$0xff]   ;;  %v2883_v14 = vld [vmem:[%s3059_s9 + $0x128] sm:$0xff]  }
  0x33   : > { %2715 = vmatpush3.bf16.msra.mxu0 %v2871_v2  ;;  %2849 = vmatpush3.bf16.msra.mxu1 %v2871_v2  ;;  %v2884_v15 = vld [vmem:[%s3059_s9 + $0x30] sm:$0xff]   ;;  %v2886_v17 = vld [vmem:[%s3059_s9 + $0x38] sm:$0xff]   ;;  %v2888_v19 = vld [vmem:[%s3059_s9 + $0x40] sm:$0xff]  }
  0x34   : > { %v2885_v16 = vld [vmem:[%s3059_s9 + $0x130] sm:$0xff]   ;;  %v2887_v18 = vld [vmem:[%s3059_s9 + $0x138] sm:$0xff]   ;;  %v2889_v20 = vld [vmem:[%s3059_s9 + $0x140] sm:$0xff]  }
  0x35   : > { %v2890_v21 = vld [vmem:[%s3059_s9 + $0x48] sm:$0xff]   ;;  %v2892_v23 = vld [vmem:[%s3059_s9 + $0x50] sm:$0xff]   ;;  %v2894_v25 = vld [vmem:[%s3059_s9 + $0x58] sm:$0xff]  }
  0x36   : > { %2717 = vmatmul.mubr.msk.bf16.vlgmr.msra.gmra.mrb[0].mxu0 %vm667_vm0, %v2874_v5  ;;  %2781 = vmatmul.mubr.msk.bf16.vlgmr.msra.gmra.mrb[0].mxu1 %vm667_vm0, %v2875_v6  ;;  %v2891_v22 = vld [vmem:[%s3059_s9 + $0x148] sm:$0xff]   ;;  %v2893_v24 = vld [vmem:[%s3059_s9 + $0x150] sm:$0xff]   ;;  %v2895_v26 = vld [vmem:[%s3059_s9 + $0x158] sm:$0xff]  }
  0x37   : > { %2720 = vmatprep.mubr.msk.bf16.mxu0 %vm667_vm0, %v2876_v7  ;;  %2784 = vmatprep.mubr.msk.bf16.mxu1 %vm667_vm0, %v2877_v8  ;;  %v2896_v27 = vld [vmem:[%s3059_s9 + $0x60] sm:$0xff]   ;;  %v2898_v29 = vld [vmem:[%s3059_s9 + $0x68] sm:$0xff]   ;;  %v2900_v31 = vld [vmem:[%s3059_s9 + $0x70] sm:$0xff]  }
  0x38   : > { %v2897_v28 = vld [vmem:[%s3059_s9 + $0x160] sm:$0xff]   ;;  %v2899_v30 = vld [vmem:[%s3059_s9 + $0x168] sm:$0xff]   ;;  %v2901_v32 = vld [vmem:[%s3059_s9 + $0x170] sm:$0xff]  }
  0x39   : > { %v2902_v33 = vld [vmem:[%s3059_s9 + $0x78] sm:$0xff]   ;;  %v2904_v35 = vld [vmem:[%s3059_s9 + $0x80] sm:$0xff]   ;;  %v2906_v37 = vld [vmem:[%s3059_s9 + $0x88] sm:$0xff]  }
  0x3a   : > { %v2903_v34 = vld [vmem:[%s3059_s9 + $0x178] sm:$0xff]   ;;  %v2905_v36 = vld [vmem:[%s3059_s9 + $0x180] sm:$0xff]   ;;  %v2907_v38 = vld [vmem:[%s3059_s9 + $0x188] sm:$0xff]  }
  0x3b   : > { %v2908_v39 = vld [vmem:[%s3059_s9 + $0x90] sm:$0xff]   ;;  %v2910_v41 = vld [vmem:[%s3059_s9 + $0x98] sm:$0xff]   ;;  %v2912_v43 = vld [vmem:[%s3059_s9 + $0xa0] sm:$0xff]  }
  0x3c   : > { %v2909_v40 = vld [vmem:[%s3059_s9 + $0x190] sm:$0xff]   ;;  %v2911_v42 = vld [vmem:[%s3059_s9 + $0x198] sm:$0xff]   ;;  %v2913_v44 = vld [vmem:[%s3059_s9 + $0x1a0] sm:$0xff]  }
  0x3d   : > { %v2914_v45 = vld [vmem:[%s3059_s9 + $0xa8] sm:$0xff]   ;;  %v2916_v47 = vld [vmem:[%s3059_s9 + $0xb0] sm:$0xff]   ;;  %v2918_v49 = vld [vmem:[%s3059_s9 + $0xb8] sm:$0xff]  }
  0x3e   : > { %2721 = vmatmul.mubr.msk.bf16.gmra.mrb[4].mxu0 %vm667_vm0, %v2878_v9  ;;  %2785 = vmatmul.mubr.msk.bf16.gmra.mrb[4].mxu1 %vm667_vm0, %v2879_v10  ;;  %v2915_v46 = vld [vmem:[%s3059_s9 + $0x1a8] sm:$0xff]   ;;  %v2917_v48 = vld [vmem:[%s3059_s9 + $0x1b0] sm:$0xff]   ;;  %v2919_v50 = vld [vmem:[%s3059_s9 + $0x1b8] sm:$0xff]  }
  0x3f   : > { %2724 = vmatprep.mubr.msk.bf16.mxu0 %vm667_vm0, %v2880_v11  ;;  %2788 = vmatprep.mubr.msk.bf16.mxu1 %vm667_vm0, %v2881_v12  ;;  %v2920_v51 = vld [vmem:[%s3059_s9 + $0xc0] sm:$0xff]   ;;  %v2922_v53 = vld [vmem:[%s3059_s9 + $0xc8] sm:$0xff]   ;;  %v2924_v55 = vld [vmem:[%s3059_s9 + $0xd0] sm:$0xff]  }
  0x40   : > { %v2921_v52 = vld [vmem:[%s3059_s9 + $0x1c0] sm:$0xff]   ;;  %v2923_v54 = vld [vmem:[%s3059_s9 + $0x1c8] sm:$0xff]   ;;  %v2925_v56 = vld [vmem:[%s3059_s9 + $0x1d0] sm:$0xff]  }
  0x41   : > { %v2926_v57 = vld [vmem:[%s3059_s9 + $0xd8] sm:$0xff]   ;;  %v2928_v59 = vld [vmem:[%s3059_s9 + $0xe0] sm:$0xff]   ;;  %v2930_v61 = vld [vmem:[%s3059_s9 + $0xe8] sm:$0xff]  }
  0x42   : > { %v2927_v58 = vld [vmem:[%s3059_s9 + $0x1d8] sm:$0xff]   ;;  %v2929_v60 = vld [vmem:[%s3059_s9 + $0x1e0] sm:$0xff]   ;;  %v2931_v62 = vld [vmem:[%s3059_s9 + $0x1e8] sm:$0xff]  }
  0x43   : > { %v2932_v63 = vld [vmem:[%s3059_s9 + $0xf0] sm:$0xff]   ;;  %v2934_v1 = vld [vmem:[%s3059_s9 + $0xf8] sm:$0xff]  }
  0x44   : > { %v2933_v0 = vld [vmem:[%s3059_s9 + $0x1f0] sm:$0xff]   ;;  %v2935_v2 = vld [vmem:[%s3059_s9 + $0x1f8] sm:$0xff]  }
  0x45   : > { %v3195_v3 = vld [vmem:[#allocation2] ss:$0 sm:$0xff] }
  0x46   : > { %2725 = vmatmul.mubr.msk.bf16.gmra.mrb[8].mxu0 %vm667_vm0, %v2882_v13  ;;  %2789 = vmatmul.mubr.msk.bf16.gmra.mrb[8].mxu1 %vm667_vm0, %v2883_v14 }
  0x47   : > { %2728 = vmatprep.mubr.msk.bf16.mxu0 %vm667_vm0, %v2884_v15  ;;  %2792 = vmatprep.mubr.msk.bf16.mxu1 %vm667_vm0, %v2885_v16 }
  0x4e   : > { %2729 = vmatmul.mubr.msk.bf16.gmra.mrb[12].mxu0 %vm667_vm0, %v2886_v17  ;;  %2793 = vmatmul.mubr.msk.bf16.gmra.mrb[12].mxu1 %vm667_vm0, %v2887_v18 }
  0x4f   : > { %2732 = vmatprep.mubr.msk.bf16.mxu0 %vm667_vm0, %v2888_v19  ;;  %2796 = vmatprep.mubr.msk.bf16.mxu1 %vm667_vm0, %v2889_v20 }
  0x56   : > { %2733 = vmatmul.mubr.msk.bf16.gmra.mrb[16].mxu0 %vm667_vm0, %v2890_v21  ;;  %2797 = vmatmul.mubr.msk.bf16.gmra.mrb[16].mxu1 %vm667_vm0, %v2891_v22 }
  0x57   : > { %2736 = vmatprep.mubr.msk.bf16.mxu0 %vm667_vm0, %v2892_v23  ;;  %2800 = vmatprep.mubr.msk.bf16.mxu1 %vm667_vm0, %v2893_v24 }
  0x5e   : > { %2737 = vmatmul.mubr.msk.bf16.gmra.mrb[20].mxu0 %vm667_vm0, %v2894_v25  ;;  %2801 = vmatmul.mubr.msk.bf16.gmra.mrb[20].mxu1 %vm667_vm0, %v2895_v26 }
  0x5f   : > { %2740 = vmatprep.mubr.msk.bf16.mxu0 %vm667_vm0, %v2896_v27  ;;  %2804 = vmatprep.mubr.msk.bf16.mxu1 %vm667_vm0, %v2897_v28 }
  0x66   : > { %2741 = vmatmul.mubr.msk.bf16.gmra.mrb[24].mxu0 %vm667_vm0, %v2898_v29  ;;  %2805 = vmatmul.mubr.msk.bf16.gmra.mrb[24].mxu1 %vm667_vm0, %v2899_v30 }
  0x67   : > { %2744 = vmatprep.mubr.msk.bf16.mxu0 %vm667_vm0, %v2900_v31  ;;  %2808 = vmatprep.mubr.msk.bf16.mxu1 %vm667_vm0, %v2901_v32 }
  0x6e   : > { %2745 = vmatmul.mubr.msk.bf16.gmra.mrb[28].mxu0 %vm667_vm0, %v2902_v33  ;;  %2809 = vmatmul.mubr.msk.bf16.gmra.mrb[28].mxu1 %vm667_vm0, %v2903_v34 }
  0x6f   : > { %2748 = vmatprep.mubr.msk.bf16.mxu0 %vm667_vm0, %v2904_v35  ;;  %2812 = vmatprep.mubr.msk.bf16.mxu1 %vm667_vm0, %v2905_v36 }
  0x76   : > { %2749 = vmatmul.mubr.msk.bf16.gmra.mrb[32].mxu0 %vm667_vm0, %v2906_v37  ;;  %2813 = vmatmul.mubr.msk.bf16.gmra.mrb[32].mxu1 %vm667_vm0, %v2907_v38 }
  0x77   : > { %2752 = vmatprep.mubr.msk.bf16.mxu0 %vm667_vm0, %v2908_v39  ;;  %2816 = vmatprep.mubr.msk.bf16.mxu1 %vm667_vm0, %v2909_v40 }
  0x7e   : > { %2753 = vmatmul.mubr.msk.bf16.gmra.mrb[36].mxu0 %vm667_vm0, %v2910_v41  ;;  %2817 = vmatmul.mubr.msk.bf16.gmra.mrb[36].mxu1 %vm667_vm0, %v2911_v42 }
  0x7f   : > { %2756 = vmatprep.mubr.msk.bf16.mxu0 %vm667_vm0, %v2912_v43  ;;  %2820 = vmatprep.mubr.msk.bf16.mxu1 %vm667_vm0, %v2913_v44 }
  0x86   : > { %2757 = vmatmul.mubr.msk.bf16.gmra.mrb[40].mxu0 %vm667_vm0, %v2914_v45  ;;  %2821 = vmatmul.mubr.msk.bf16.gmra.mrb[40].mxu1 %vm667_vm0, %v2915_v46 }
  0x87   : > { %2760 = vmatprep.mubr.msk.bf16.mxu0 %vm667_vm0, %v2916_v47  ;;  %2824 = vmatprep.mubr.msk.bf16.mxu1 %vm667_vm0, %v2917_v48 }
  0x8e   : > { %2761 = vmatmul.mubr.msk.bf16.gmra.mrb[44].mxu0 %vm667_vm0, %v2918_v49  ;;  %2825 = vmatmul.mubr.msk.bf16.gmra.mrb[44].mxu1 %vm667_vm0, %v2919_v50 }
  0x8f   : > { %2764 = vmatprep.mubr.msk.bf16.mxu0 %vm667_vm0, %v2920_v51  ;;  %2828 = vmatprep.mubr.msk.bf16.mxu1 %vm667_vm0, %v2921_v52 }
  0x96   : > { %2765 = vmatmul.mubr.msk.bf16.gmra.mrb[48].mxu0 %vm667_vm0, %v2922_v53  ;;  %2829 = vmatmul.mubr.msk.bf16.gmra.mrb[48].mxu1 %vm667_vm0, %v2923_v54 }
  0x97   : > { %2768 = vmatprep.mubr.msk.bf16.mxu0 %vm667_vm0, %v2924_v55  ;;  %2832 = vmatprep.mubr.msk.bf16.mxu1 %vm667_vm0, %v2925_v56 }
  0x9e   : > { %2769 = vmatmul.mubr.msk.bf16.gmra.mrb[52].mxu0 %vm667_vm0, %v2926_v57  ;;  %2833 = vmatmul.mubr.msk.bf16.gmra.mrb[52].mxu1 %vm667_vm0, %v2927_v58 }
  0x9f   : > { %2772 = vmatprep.mubr.msk.bf16.mxu0 %vm667_vm0, %v2928_v59  ;;  %2836 = vmatprep.mubr.msk.bf16.mxu1 %vm667_vm0, %v2929_v60 }
  0xa6   : > { %2773 = vmatmul.mubr.msk.bf16.gmra.mrb[56].mxu0 %vm667_vm0, %v2930_v61  ;;  %2837 = vmatmul.mubr.msk.bf16.gmra.mrb[56].mxu1 %vm667_vm0, %v2931_v62 }
  0xa7   : > { %2776 = vmatprep.mubr.msk.bf16.mxu0 %vm667_vm0, %v2932_v63  ;;  %2840 = vmatprep.mubr.msk.bf16.mxu1 %vm667_vm0, %v2933_v0 }
  0xae   : > { %2777 = vmatmul.mubr.msk.bf16.gmra.mrb[60].mxu0 %vm667_vm0, %v2934_v1  ;;  %2841 = vmatmul.mubr.msk.bf16.gmra.mrb[60].mxu1 %vm667_vm0, %v2935_v2 }
 0x109   : > { %v2718_v4 = vpop.f32.mrb[0].mxu0  ;;  %v2782_v5 = vpop.f32.mrb[0].mxu1 }
 0x10a   : > { %v903_v6 = vadd.f32 %v2718_v4, %v3195_v3  ;;  %v1159_v7 = vadd.f32 %v2782_v5, %v3195_v3  ;;  %v894_v8 = vpop.f32.mrb[1].mxu0  ;;  %v1150_v9 = vpop.f32.mrb[1].mxu1 }
 0x10b   : > { %v895_v10 = vadd.f32 %v3195_v3, %v894_v8  ;;  %v1151_v11 = vadd.f32 %v3195_v3, %v1150_v9  ;;  %v2719_v12 = vpop.f32.mrb[2].mxu0  ;;  %v2783_v13 = vpop.f32.mrb[2].mxu1 }
 0x10c   : > { %v1407_v14 = vmax.f32 %v903_v6, 0.0  ;;  %v1471_v15 = vmax.f32 %v1159_v7, 0.0  ;;  %v906_v16 = vadd.f32 %v2719_v12, %v3195_v3  ;;  %v1162_v17 = vadd.f32 %v2783_v13, %v3195_v3  ;;  %v897_v18 = vpop.f32.mrb[3].mxu0  ;;  %v1153_v19 = vpop.f32.mrb[3].mxu1 }
 0x10d   : > { %v1405_v20 = vmax.f32 %v895_v10, 0.0  ;;  %v1469_v21 = vmax.f32 %v1151_v11, 0.0  ;;  %v898_v22 = vadd.f32 %v3195_v3, %v897_v18  ;;  %v1154_v23 = vadd.f32 %v3195_v3, %v1153_v19 }
 0x10e   : > { %v2517_v24 = vpack.c.bf16 %v1407_v14, %v1407_v14  ;;  %v2581_v25 = vpack.c.bf16 %v1471_v15, %v1471_v15  ;;  %v1408_v26 = vmax.f32 %v906_v16, 0.0  ;;  %v1472_v27 = vmax.f32 %v1162_v17, 0.0 }
 0x10f   : > { %v2515_v28 = vpack.c.bf16 %v1405_v20, %v1405_v20  ;;  %v2579_v29 = vpack.c.bf16 %v1469_v21, %v1469_v21  ;;  %v1406_v30 = vmax.f32 %v898_v22, 0.0  ;;  %v1470_v31 = vmax.f32 %v1154_v23, 0.0 }
 0x110   : > { %2048 = vst.msk [vmem:[%s3208_s17 + $0x8] sm:$0xf] %vm2045_vm1, %v2517_v24  ;;  %2112 = vst.msk [vmem:[%s3208_s17 + $0x108] sm:$0xf] %vm2045_vm1, %v2581_v25  ;;  %v2518_v32 = vpack.c.bf16 %v1408_v26, %v1408_v26  ;;  %v2582_v33 = vpack.c.bf16 %v1472_v27, %v1472_v27 }
 0x111   : > { %2046 = vst.msk [vmem:[%s3208_s17] sm:$0xf] %vm2045_vm1, %v2515_v28  ;;  %2110 = vst.msk [vmem:[%s3208_s17 + $0x100] sm:$0xf] %vm2045_vm1, %v2579_v29  ;;  %v2516_v34 = vpack.c.bf16 %v1406_v30, %v1406_v30  ;;  %v2580_v35 = vpack.c.bf16 %v1470_v31, %v1470_v31  ;;  %v2722_v36 = vpop.f32.mrb[4].mxu0  ;;  %v2786_v37 = vpop.f32.mrb[4].mxu1 }
 0x112   : > { %2049 = vst.msk [vmem:[%s3208_s17 + $0xc] sm:$0xf] %vm2045_vm1, %v2518_v32  ;;  %2113 = vst.msk [vmem:[%s3208_s17 + $0x10c] sm:$0xf] %vm2045_vm1, %v2582_v33  ;;  %v919_v38 = vadd.f32 %v2722_v36, %v3195_v3  ;;  %v1175_v39 = vadd.f32 %v2786_v37, %v3195_v3  ;;  %v910_v40 = vpop.f32.mrb[5].mxu0  ;;  %v1166_v41 = vpop.f32.mrb[5].mxu1 }
 0x113   : > { %2047 = vst.msk [vmem:[%s3208_s17 + $0x4] sm:$0xf] %vm2045_vm1, %v2516_v34  ;;  %2111 = vst.msk [vmem:[%s3208_s17 + $0x104] sm:$0xf] %vm2045_vm1, %v2580_v35  ;;  %v911_v42 = vadd.f32 %v3195_v3, %v910_v40  ;;  %v1167_v43 = vadd.f32 %v3195_v3, %v1166_v41  ;;  %v2723_v44 = vpop.f32.mrb[6].mxu0  ;;  %v2787_v45 = vpop.f32.mrb[6].mxu1 }
 0x114   : > { %v1411_v46 = vmax.f32 %v919_v38, 0.0  ;;  %v1475_v47 = vmax.f32 %v1175_v39, 0.0  ;;  %v922_v48 = vadd.f32 %v2723_v44, %v3195_v3  ;;  %v1178_v49 = vadd.f32 %v2787_v45, %v3195_v3  ;;  %v913_v50 = vpop.f32.mrb[7].mxu0  ;;  %v1169_v51 = vpop.f32.mrb[7].mxu1 }
 0x115   : > { %v1409_v52 = vmax.f32 %v911_v42, 0.0  ;;  %v1473_v53 = vmax.f32 %v1167_v43, 0.0  ;;  %v914_v54 = vadd.f32 %v3195_v3, %v913_v50  ;;  %v1170_v55 = vadd.f32 %v3195_v3, %v1169_v51 }
 0x116   : > { %v2521_v56 = vpack.c.bf16 %v1411_v46, %v1411_v46  ;;  %v2585_v57 = vpack.c.bf16 %v1475_v47, %v1475_v47  ;;  %v1412_v58 = vmax.f32 %v922_v48, 0.0  ;;  %v1476_v59 = vmax.f32 %v1178_v49, 0.0 }
 0x117   : > { %v2519_v60 = vpack.c.bf16 %v1409_v52, %v1409_v52  ;;  %v2583_v61 = vpack.c.bf16 %v1473_v53, %v1473_v53  ;;  %v1410_v62 = vmax.f32 %v914_v54, 0.0  ;;  %v1474_v63 = vmax.f32 %v1170_v55, 0.0 }
 0x118   : > { %2052 = vst.msk [vmem:[%s3208_s17 + $0x18] sm:$0xf] %vm2045_vm1, %v2521_v56  ;;  %2116 = vst.msk [vmem:[%s3208_s17 + $0x118] sm:$0xf] %vm2045_vm1, %v2585_v57  ;;  %v2522_v0 = vpack.c.bf16 %v1412_v58, %v1412_v58  ;;  %v2586_v1 = vpack.c.bf16 %v1476_v59, %v1476_v59 }
 0x119   : > { %2050 = vst.msk [vmem:[%s3208_s17 + $0x10] sm:$0xf] %vm2045_vm1, %v2519_v60  ;;  %2114 = vst.msk [vmem:[%s3208_s17 + $0x110] sm:$0xf] %vm2045_vm1, %v2583_v61  ;;  %v2520_v2 = vpack.c.bf16 %v1410_v62, %v1410_v62  ;;  %v2584_v4 = vpack.c.bf16 %v1474_v63, %v1474_v63  ;;  %v2726_v5 = vpop.f32.mrb[8].mxu0  ;;  %v2790_v6 = vpop.f32.mrb[8].mxu1 }
 0x11a   : > { %2053 = vst.msk [vmem:[%s3208_s17 + $0x1c] sm:$0xf] %vm2045_vm1, %v2522_v0  ;;  %2117 = vst.msk [vmem:[%s3208_s17 + $0x11c] sm:$0xf] %vm2045_vm1, %v2586_v1  ;;  %v935_v7 = vadd.f32 %v2726_v5, %v3195_v3  ;;  %v1191_v8 = vadd.f32 %v2790_v6, %v3195_v3  ;;  %v926_v9 = vpop.f32.mrb[9].mxu0  ;;  %v1182_v10 = vpop.f32.mrb[9].mxu1 }
 0x11b   : > { %2051 = vst.msk [vmem:[%s3208_s17 + $0x14] sm:$0xf] %vm2045_vm1, %v2520_v2  ;;  %2115 = vst.msk [vmem:[%s3208_s17 + $0x114] sm:$0xf] %vm2045_vm1, %v2584_v4  ;;  %v927_v11 = vadd.f32 %v3195_v3, %v926_v9  ;;  %v1183_v12 = vadd.f32 %v3195_v3, %v1182_v10  ;;  %v2727_v13 = vpop.f32.mrb[10].mxu0  ;;  %v2791_v14 = vpop.f32.mrb[10].mxu1 }
 0x11c   : > { %v1415_v15 = vmax.f32 %v935_v7, 0.0  ;;  %v1479_v16 = vmax.f32 %v1191_v8, 0.0  ;;  %v938_v17 = vadd.f32 %v2727_v13, %v3195_v3  ;;  %v1194_v18 = vadd.f32 %v2791_v14, %v3195_v3  ;;  %v929_v19 = vpop.f32.mrb[11].mxu0  ;;  %v1185_v20 = vpop.f32.mrb[11].mxu1 }
 0x11d   : > { %v1413_v21 = vmax.f32 %v927_v11, 0.0  ;;  %v1477_v22 = vmax.f32 %v1183_v12, 0.0  ;;  %v930_v23 = vadd.f32 %v3195_v3, %v929_v19  ;;  %v1186_v24 = vadd.f32 %v3195_v3, %v1185_v20 }
 0x11e   : > { %v2525_v25 = vpack.c.bf16 %v1415_v15, %v1415_v15  ;;  %v2589_v26 = vpack.c.bf16 %v1479_v16, %v1479_v16  ;;  %v1416_v27 = vmax.f32 %v938_v17, 0.0  ;;  %v1480_v28 = vmax.f32 %v1194_v18, 0.0 }
 0x11f   : > { %v2523_v29 = vpack.c.bf16 %v1413_v21, %v1413_v21  ;;  %v2587_v30 = vpack.c.bf16 %v1477_v22, %v1477_v22  ;;  %v1414_v31 = vmax.f32 %v930_v23, 0.0  ;;  %v1478_v32 = vmax.f32 %v1186_v24, 0.0 }
 0x120   : > { %2056 = vst.msk [vmem:[%s3208_s17 + $0x28] sm:$0xf] %vm2045_vm1, %v2525_v25  ;;  %2120 = vst.msk [vmem:[%s3208_s17 + $0x128] sm:$0xf] %vm2045_vm1, %v2589_v26  ;;  %v2526_v33 = vpack.c.bf16 %v1416_v27, %v1416_v27  ;;  %v2590_v34 = vpack.c.bf16 %v1480_v28, %v1480_v28 }
 0x121   : > { %2054 = vst.msk [vmem:[%s3208_s17 + $0x20] sm:$0xf] %vm2045_vm1, %v2523_v29  ;;  %2118 = vst.msk [vmem:[%s3208_s17 + $0x120] sm:$0xf] %vm2045_vm1, %v2587_v30  ;;  %v2524_v35 = vpack.c.bf16 %v1414_v31, %v1414_v31  ;;  %v2588_v36 = vpack.c.bf16 %v1478_v32, %v1478_v32  ;;  %v2730_v37 = vpop.f32.mrb[12].mxu0  ;;  %v2794_v38 = vpop.f32.mrb[12].mxu1 }
 0x122   : > { %2057 = vst.msk [vmem:[%s3208_s17 + $0x2c] sm:$0xf] %vm2045_vm1, %v2526_v33  ;;  %2121 = vst.msk [vmem:[%s3208_s17 + $0x12c] sm:$0xf] %vm2045_vm1, %v2590_v34  ;;  %v951_v39 = vadd.f32 %v2730_v37, %v3195_v3  ;;  %v1207_v40 = vadd.f32 %v2794_v38, %v3195_v3  ;;  %v942_v41 = vpop.f32.mrb[13].mxu0  ;;  %v1198_v42 = vpop.f32.mrb[13].mxu1 }
 0x123   : > { %2055 = vst.msk [vmem:[%s3208_s17 + $0x24] sm:$0xf] %vm2045_vm1, %v2524_v35  ;;  %2119 = vst.msk [vmem:[%s3208_s17 + $0x124] sm:$0xf] %vm2045_vm1, %v2588_v36  ;;  %v943_v43 = vadd.f32 %v3195_v3, %v942_v41  ;;  %v1199_v44 = vadd.f32 %v3195_v3, %v1198_v42  ;;  %v2731_v45 = vpop.f32.mrb[14].mxu0  ;;  %v2795_v46 = vpop.f32.mrb[14].mxu1 }
 0x124   : > { %v1419_v47 = vmax.f32 %v951_v39, 0.0  ;;  %v1483_v48 = vmax.f32 %v1207_v40, 0.0  ;;  %v954_v49 = vadd.f32 %v2731_v45, %v3195_v3  ;;  %v1210_v50 = vadd.f32 %v2795_v46, %v3195_v3  ;;  %v945_v51 = vpop.f32.mrb[15].mxu0  ;;  %v1201_v52 = vpop.f32.mrb[15].mxu1 }
 0x125   : > { %v1417_v53 = vmax.f32 %v943_v43, 0.0  ;;  %v1481_v54 = vmax.f32 %v1199_v44, 0.0  ;;  %v946_v55 = vadd.f32 %v3195_v3, %v945_v51  ;;  %v1202_v56 = vadd.f32 %v3195_v3, %v1201_v52 }
 0x126   : > { %v2529_v57 = vpack.c.bf16 %v1419_v47, %v1419_v47  ;;  %v2593_v58 = vpack.c.bf16 %v1483_v48, %v1483_v48  ;;  %v1420_v59 = vmax.f32 %v954_v49, 0.0  ;;  %v1484_v60 = vmax.f32 %v1210_v50, 0.0 }
 0x127   : > { %v2527_v61 = vpack.c.bf16 %v1417_v53, %v1417_v53  ;;  %v2591_v62 = vpack.c.bf16 %v1481_v54, %v1481_v54  ;;  %v1418_v63 = vmax.f32 %v946_v55, 0.0  ;;  %v1482_v0 = vmax.f32 %v1202_v56, 0.0 }
 0x128   : > { %2060 = vst.msk [vmem:[%s3208_s17 + $0x38] sm:$0xf] %vm2045_vm1, %v2529_v57  ;;  %2124 = vst.msk [vmem:[%s3208_s17 + $0x138] sm:$0xf] %vm2045_vm1, %v2593_v58  ;;  %v2530_v1 = vpack.c.bf16 %v1420_v59, %v1420_v59  ;;  %v2594_v2 = vpack.c.bf16 %v1484_v60, %v1484_v60 }
 0x129   : > { %2058 = vst.msk [vmem:[%s3208_s17 + $0x30] sm:$0xf] %vm2045_vm1, %v2527_v61  ;;  %2122 = vst.msk [vmem:[%s3208_s17 + $0x130] sm:$0xf] %vm2045_vm1, %v2591_v62  ;;  %v2528_v4 = vpack.c.bf16 %v1418_v63, %v1418_v63  ;;  %v2592_v5 = vpack.c.bf16 %v1482_v0, %v1482_v0  ;;  %v2734_v6 = vpop.f32.mrb[16].mxu0  ;;  %v2798_v7 = vpop.f32.mrb[16].mxu1 }
 0x12a   : > { %2061 = vst.msk [vmem:[%s3208_s17 + $0x3c] sm:$0xf] %vm2045_vm1, %v2530_v1  ;;  %2125 = vst.msk [vmem:[%s3208_s17 + $0x13c] sm:$0xf] %vm2045_vm1, %v2594_v2  ;;  %v967_v8 = vadd.f32 %v2734_v6, %v3195_v3  ;;  %v1223_v9 = vadd.f32 %v2798_v7, %v3195_v3  ;;  %v958_v10 = vpop.f32.mrb[17].mxu0  ;;  %v1214_v11 = vpop.f32.mrb[17].mxu1 }
 0x12b   : > { %2059 = vst.msk [vmem:[%s3208_s17 + $0x34] sm:$0xf] %vm2045_vm1, %v2528_v4  ;;  %2123 = vst.msk [vmem:[%s3208_s17 + $0x134] sm:$0xf] %vm2045_vm1, %v2592_v5  ;;  %v959_v12 = vadd.f32 %v3195_v3, %v958_v10  ;;  %v1215_v13 = vadd.f32 %v3195_v3, %v1214_v11  ;;  %v2735_v14 = vpop.f32.mrb[18].mxu0  ;;  %v2799_v15 = vpop.f32.mrb[18].mxu1 }
 0x12c   : > { %v1423_v16 = vmax.f32 %v967_v8, 0.0  ;;  %v1487_v17 = vmax.f32 %v1223_v9, 0.0  ;;  %v970_v18 = vadd.f32 %v2735_v14, %v3195_v3  ;;  %v1226_v19 = vadd.f32 %v2799_v15, %v3195_v3  ;;  %v961_v20 = vpop.f32.mrb[19].mxu0  ;;  %v1217_v21 = vpop.f32.mrb[19].mxu1 }
 0x12d   : > { %v1421_v22 = vmax.f32 %v959_v12, 0.0  ;;  %v1485_v23 = vmax.f32 %v1215_v13, 0.0  ;;  %v962_v24 = vadd.f32 %v3195_v3, %v961_v20  ;;  %v1218_v25 = vadd.f32 %v3195_v3, %v1217_v21 }
 0x12e   : > { %v2533_v26 = vpack.c.bf16 %v1423_v16, %v1423_v16  ;;  %v2597_v27 = vpack.c.bf16 %v1487_v17, %v1487_v17  ;;  %v1424_v28 = vmax.f32 %v970_v18, 0.0  ;;  %v1488_v29 = vmax.f32 %v1226_v19, 0.0 }
 0x12f   : > { %v2531_v30 = vpack.c.bf16 %v1421_v22, %v1421_v22  ;;  %v2595_v31 = vpack.c.bf16 %v1485_v23, %v1485_v23  ;;  %v1422_v32 = vmax.f32 %v962_v24, 0.0  ;;  %v1486_v33 = vmax.f32 %v1218_v25, 0.0 }
 0x130   : > { %2064 = vst.msk [vmem:[%s3208_s17 + $0x48] sm:$0xf] %vm2045_vm1, %v2533_v26  ;;  %2128 = vst.msk [vmem:[%s3208_s17 + $0x148] sm:$0xf] %vm2045_vm1, %v2597_v27  ;;  %v2534_v34 = vpack.c.bf16 %v1424_v28, %v1424_v28  ;;  %v2598_v35 = vpack.c.bf16 %v1488_v29, %v1488_v29 }
 0x131   : > { %2062 = vst.msk [vmem:[%s3208_s17 + $0x40] sm:$0xf] %vm2045_vm1, %v2531_v30  ;;  %2126 = vst.msk [vmem:[%s3208_s17 + $0x140] sm:$0xf] %vm2045_vm1, %v2595_v31  ;;  %v2532_v36 = vpack.c.bf16 %v1422_v32, %v1422_v32  ;;  %v2596_v37 = vpack.c.bf16 %v1486_v33, %v1486_v33  ;;  %v2738_v38 = vpop.f32.mrb[20].mxu0  ;;  %v2802_v39 = vpop.f32.mrb[20].mxu1 }
 0x132   : > { %2065 = vst.msk [vmem:[%s3208_s17 + $0x4c] sm:$0xf] %vm2045_vm1, %v2534_v34  ;;  %2129 = vst.msk [vmem:[%s3208_s17 + $0x14c] sm:$0xf] %vm2045_vm1, %v2598_v35  ;;  %v983_v40 = vadd.f32 %v2738_v38, %v3195_v3  ;;  %v1239_v41 = vadd.f32 %v2802_v39, %v3195_v3  ;;  %v974_v42 = vpop.f32.mrb[21].mxu0  ;;  %v1230_v43 = vpop.f32.mrb[21].mxu1 }
 0x133   : > { %2063 = vst.msk [vmem:[%s3208_s17 + $0x44] sm:$0xf] %vm2045_vm1, %v2532_v36  ;;  %2127 = vst.msk [vmem:[%s3208_s17 + $0x144] sm:$0xf] %vm2045_vm1, %v2596_v37  ;;  %v975_v44 = vadd.f32 %v3195_v3, %v974_v42  ;;  %v1231_v45 = vadd.f32 %v3195_v3, %v1230_v43  ;;  %v2739_v46 = vpop.f32.mrb[22].mxu0  ;;  %v2803_v47 = vpop.f32.mrb[22].mxu1 }
 0x134   : > { %v1427_v48 = vmax.f32 %v983_v40, 0.0  ;;  %v1491_v49 = vmax.f32 %v1239_v41, 0.0  ;;  %v986_v50 = vadd.f32 %v2739_v46, %v3195_v3  ;;  %v1242_v51 = vadd.f32 %v2803_v47, %v3195_v3  ;;  %v977_v52 = vpop.f32.mrb[23].mxu0  ;;  %v1233_v53 = vpop.f32.mrb[23].mxu1 }
 0x135   : > { %v1425_v54 = vmax.f32 %v975_v44, 0.0  ;;  %v1489_v55 = vmax.f32 %v1231_v45, 0.0  ;;  %v978_v56 = vadd.f32 %v3195_v3, %v977_v52  ;;  %v1234_v57 = vadd.f32 %v3195_v3, %v1233_v53 }
 0x136   : > { %v2537_v58 = vpack.c.bf16 %v1427_v48, %v1427_v48  ;;  %v2601_v59 = vpack.c.bf16 %v1491_v49, %v1491_v49  ;;  %v1428_v60 = vmax.f32 %v986_v50, 0.0  ;;  %v1492_v61 = vmax.f32 %v1242_v51, 0.0 }
 0x137   : > { %v2535_v62 = vpack.c.bf16 %v1425_v54, %v1425_v54  ;;  %v2599_v63 = vpack.c.bf16 %v1489_v55, %v1489_v55  ;;  %v1426_v0 = vmax.f32 %v978_v56, 0.0  ;;  %v1490_v1 = vmax.f32 %v1234_v57, 0.0 }
 0x138   : > { %2068 = vst.msk [vmem:[%s3208_s17 + $0x58] sm:$0xf] %vm2045_vm1, %v2537_v58  ;;  %2132 = vst.msk [vmem:[%s3208_s17 + $0x158] sm:$0xf] %vm2045_vm1, %v2601_v59  ;;  %v2538_v2 = vpack.c.bf16 %v1428_v60, %v1428_v60  ;;  %v2602_v4 = vpack.c.bf16 %v1492_v61, %v1492_v61 }
 0x139   : > { %2066 = vst.msk [vmem:[%s3208_s17 + $0x50] sm:$0xf] %vm2045_vm1, %v2535_v62  ;;  %2130 = vst.msk [vmem:[%s3208_s17 + $0x150] sm:$0xf] %vm2045_vm1, %v2599_v63  ;;  %v2536_v5 = vpack.c.bf16 %v1426_v0, %v1426_v0  ;;  %v2600_v6 = vpack.c.bf16 %v1490_v1, %v1490_v1  ;;  %v2742_v7 = vpop.f32.mrb[24].mxu0  ;;  %v2806_v8 = vpop.f32.mrb[24].mxu1 }
 0x13a   : > { %2069 = vst.msk [vmem:[%s3208_s17 + $0x5c] sm:$0xf] %vm2045_vm1, %v2538_v2  ;;  %2133 = vst.msk [vmem:[%s3208_s17 + $0x15c] sm:$0xf] %vm2045_vm1, %v2602_v4  ;;  %v999_v9 = vadd.f32 %v2742_v7, %v3195_v3  ;;  %v1255_v10 = vadd.f32 %v2806_v8, %v3195_v3  ;;  %v990_v11 = vpop.f32.mrb[25].mxu0  ;;  %v1246_v12 = vpop.f32.mrb[25].mxu1 }
 0x13b   : > { %2067 = vst.msk [vmem:[%s3208_s17 + $0x54] sm:$0xf] %vm2045_vm1, %v2536_v5  ;;  %2131 = vst.msk [vmem:[%s3208_s17 + $0x154] sm:$0xf] %vm2045_vm1, %v2600_v6  ;;  %v991_v13 = vadd.f32 %v3195_v3, %v990_v11  ;;  %v1247_v14 = vadd.f32 %v3195_v3, %v1246_v12  ;;  %v2743_v15 = vpop.f32.mrb[26].mxu0  ;;  %v2807_v16 = vpop.f32.mrb[26].mxu1 }
 0x13c   : > { %v1431_v17 = vmax.f32 %v999_v9, 0.0  ;;  %v1495_v18 = vmax.f32 %v1255_v10, 0.0  ;;  %v1002_v19 = vadd.f32 %v2743_v15, %v3195_v3  ;;  %v1258_v20 = vadd.f32 %v2807_v16, %v3195_v3  ;;  %v993_v21 = vpop.f32.mrb[27].mxu0  ;;  %v1249_v22 = vpop.f32.mrb[27].mxu1 }
 0x13d   : > { %v1429_v23 = vmax.f32 %v991_v13, 0.0  ;;  %v1493_v24 = vmax.f32 %v1247_v14, 0.0  ;;  %v994_v25 = vadd.f32 %v3195_v3, %v993_v21  ;;  %v1250_v26 = vadd.f32 %v3195_v3, %v1249_v22 }
 0x13e   : > { %v2541_v27 = vpack.c.bf16 %v1431_v17, %v1431_v17  ;;  %v2605_v28 = vpack.c.bf16 %v1495_v18, %v1495_v18  ;;  %v1432_v29 = vmax.f32 %v1002_v19, 0.0  ;;  %v1496_v30 = vmax.f32 %v1258_v20, 0.0 }
 0x13f   : > { %v2539_v31 = vpack.c.bf16 %v1429_v23, %v1429_v23  ;;  %v2603_v32 = vpack.c.bf16 %v1493_v24, %v1493_v24  ;;  %v1430_v33 = vmax.f32 %v994_v25, 0.0  ;;  %v1494_v34 = vmax.f32 %v1250_v26, 0.0 }
 0x140   : > { %2072 = vst.msk [vmem:[%s3208_s17 + $0x68] sm:$0xf] %vm2045_vm1, %v2541_v27  ;;  %2136 = vst.msk [vmem:[%s3208_s17 + $0x168] sm:$0xf] %vm2045_vm1, %v2605_v28  ;;  %v2542_v35 = vpack.c.bf16 %v1432_v29, %v1432_v29  ;;  %v2606_v36 = vpack.c.bf16 %v1496_v30, %v1496_v30 }
 0x141   : > { %2070 = vst.msk [vmem:[%s3208_s17 + $0x60] sm:$0xf] %vm2045_vm1, %v2539_v31  ;;  %2134 = vst.msk [vmem:[%s3208_s17 + $0x160] sm:$0xf] %vm2045_vm1, %v2603_v32  ;;  %v2540_v37 = vpack.c.bf16 %v1430_v33, %v1430_v33  ;;  %v2604_v38 = vpack.c.bf16 %v1494_v34, %v1494_v34  ;;  %v2746_v39 = vpop.f32.mrb[28].mxu0  ;;  %v2810_v40 = vpop.f32.mrb[28].mxu1 }
 0x142   : > { %2073 = vst.msk [vmem:[%s3208_s17 + $0x6c] sm:$0xf] %vm2045_vm1, %v2542_v35  ;;  %2137 = vst.msk [vmem:[%s3208_s17 + $0x16c] sm:$0xf] %vm2045_vm1, %v2606_v36  ;;  %v1015_v41 = vadd.f32 %v2746_v39, %v3195_v3  ;;  %v1271_v42 = vadd.f32 %v2810_v40, %v3195_v3  ;;  %v1006_v43 = vpop.f32.mrb[29].mxu0  ;;  %v1262_v44 = vpop.f32.mrb[29].mxu1 }
 0x143   : > { %2071 = vst.msk [vmem:[%s3208_s17 + $0x64] sm:$0xf] %vm2045_vm1, %v2540_v37  ;;  %2135 = vst.msk [vmem:[%s3208_s17 + $0x164] sm:$0xf] %vm2045_vm1, %v2604_v38  ;;  %v1007_v45 = vadd.f32 %v3195_v3, %v1006_v43  ;;  %v1263_v46 = vadd.f32 %v3195_v3, %v1262_v44  ;;  %v2747_v47 = vpop.f32.mrb[30].mxu0  ;;  %v2811_v48 = vpop.f32.mrb[30].mxu1 }
 0x144   : > { %v1435_v49 = vmax.f32 %v1015_v41, 0.0  ;;  %v1499_v50 = vmax.f32 %v1271_v42, 0.0  ;;  %v1018_v51 = vadd.f32 %v2747_v47, %v3195_v3  ;;  %v1274_v52 = vadd.f32 %v2811_v48, %v3195_v3  ;;  %v1009_v53 = vpop.f32.mrb[31].mxu0  ;;  %v1265_v54 = vpop.f32.mrb[31].mxu1 }
 0x145   : > { %v1433_v55 = vmax.f32 %v1007_v45, 0.0  ;;  %v1497_v56 = vmax.f32 %v1263_v46, 0.0  ;;  %v1010_v57 = vadd.f32 %v3195_v3, %v1009_v53  ;;  %v1266_v58 = vadd.f32 %v3195_v3, %v1265_v54 }
 0x146   : > { %v2545_v59 = vpack.c.bf16 %v1435_v49, %v1435_v49  ;;  %v2609_v60 = vpack.c.bf16 %v1499_v50, %v1499_v50  ;;  %v1436_v61 = vmax.f32 %v1018_v51, 0.0  ;;  %v1500_v62 = vmax.f32 %v1274_v52, 0.0 }
 0x147   : > { %v2543_v63 = vpack.c.bf16 %v1433_v55, %v1433_v55  ;;  %v2607_v0 = vpack.c.bf16 %v1497_v56, %v1497_v56  ;;  %v1434_v1 = vmax.f32 %v1010_v57, 0.0  ;;  %v1498_v2 = vmax.f32 %v1266_v58, 0.0 }
 0x148   : > { %2076 = vst.msk [vmem:[%s3208_s17 + $0x78] sm:$0xf] %vm2045_vm1, %v2545_v59  ;;  %2140 = vst.msk [vmem:[%s3208_s17 + $0x178] sm:$0xf] %vm2045_vm1, %v2609_v60  ;;  %v2546_v4 = vpack.c.bf16 %v1436_v61, %v1436_v61  ;;  %v2610_v5 = vpack.c.bf16 %v1500_v62, %v1500_v62 }
 0x149   : > { %2074 = vst.msk [vmem:[%s3208_s17 + $0x70] sm:$0xf] %vm2045_vm1, %v2543_v63  ;;  %2138 = vst.msk [vmem:[%s3208_s17 + $0x170] sm:$0xf] %vm2045_vm1, %v2607_v0  ;;  %v2544_v6 = vpack.c.bf16 %v1434_v1, %v1434_v1  ;;  %v2608_v7 = vpack.c.bf16 %v1498_v2, %v1498_v2  ;;  %v2750_v8 = vpop.f32.mrb[32].mxu0  ;;  %v2814_v9 = vpop.f32.mrb[32].mxu1 }
 0x14a   : > { %2077 = vst.msk [vmem:[%s3208_s17 + $0x7c] sm:$0xf] %vm2045_vm1, %v2546_v4  ;;  %2141 = vst.msk [vmem:[%s3208_s17 + $0x17c] sm:$0xf] %vm2045_vm1, %v2610_v5  ;;  %v1031_v10 = vadd.f32 %v2750_v8, %v3195_v3  ;;  %v1287_v11 = vadd.f32 %v2814_v9, %v3195_v3  ;;  %v1022_v12 = vpop.f32.mrb[33].mxu0  ;;  %v1278_v13 = vpop.f32.mrb[33].mxu1 }
 0x14b   : > { %2075 = vst.msk [vmem:[%s3208_s17 + $0x74] sm:$0xf] %vm2045_vm1, %v2544_v6  ;;  %2139 = vst.msk [vmem:[%s3208_s17 + $0x174] sm:$0xf] %vm2045_vm1, %v2608_v7  ;;  %v1023_v14 = vadd.f32 %v3195_v3, %v1022_v12  ;;  %v1279_v15 = vadd.f32 %v3195_v3, %v1278_v13  ;;  %v2751_v16 = vpop.f32.mrb[34].mxu0  ;;  %v2815_v17 = vpop.f32.mrb[34].mxu1 }
 0x14c   : > { %v1439_v18 = vmax.f32 %v1031_v10, 0.0  ;;  %v1503_v19 = vmax.f32 %v1287_v11, 0.0  ;;  %v1034_v20 = vadd.f32 %v2751_v16, %v3195_v3  ;;  %v1290_v21 = vadd.f32 %v2815_v17, %v3195_v3  ;;  %v1025_v22 = vpop.f32.mrb[35].mxu0  ;;  %v1281_v23 = vpop.f32.mrb[35].mxu1 }
 0x14d   : > { %v1437_v24 = vmax.f32 %v1023_v14, 0.0  ;;  %v1501_v25 = vmax.f32 %v1279_v15, 0.0  ;;  %v1026_v26 = vadd.f32 %v3195_v3, %v1025_v22  ;;  %v1282_v27 = vadd.f32 %v3195_v3, %v1281_v23 }
 0x14e   : > { %v2549_v28 = vpack.c.bf16 %v1439_v18, %v1439_v18  ;;  %v2613_v29 = vpack.c.bf16 %v1503_v19, %v1503_v19  ;;  %v1440_v30 = vmax.f32 %v1034_v20, 0.0  ;;  %v1504_v31 = vmax.f32 %v1290_v21, 0.0 }
 0x14f   : > { %v2547_v32 = vpack.c.bf16 %v1437_v24, %v1437_v24  ;;  %v2611_v33 = vpack.c.bf16 %v1501_v25, %v1501_v25  ;;  %v1438_v34 = vmax.f32 %v1026_v26, 0.0  ;;  %v1502_v35 = vmax.f32 %v1282_v27, 0.0 }
 0x150   : > { %2080 = vst.msk [vmem:[%s3208_s17 + $0x88] sm:$0xf] %vm2045_vm1, %v2549_v28  ;;  %2144 = vst.msk [vmem:[%s3208_s17 + $0x188] sm:$0xf] %vm2045_vm1, %v2613_v29  ;;  %v2550_v36 = vpack.c.bf16 %v1440_v30, %v1440_v30  ;;  %v2614_v37 = vpack.c.bf16 %v1504_v31, %v1504_v31 }
 0x151   : > { %2078 = vst.msk [vmem:[%s3208_s17 + $0x80] sm:$0xf] %vm2045_vm1, %v2547_v32  ;;  %2142 = vst.msk [vmem:[%s3208_s17 + $0x180] sm:$0xf] %vm2045_vm1, %v2611_v33  ;;  %v2548_v38 = vpack.c.bf16 %v1438_v34, %v1438_v34  ;;  %v2612_v39 = vpack.c.bf16 %v1502_v35, %v1502_v35  ;;  %v2754_v40 = vpop.f32.mrb[36].mxu0  ;;  %v2818_v41 = vpop.f32.mrb[36].mxu1 }
 0x152   : > { %2081 = vst.msk [vmem:[%s3208_s17 + $0x8c] sm:$0xf] %vm2045_vm1, %v2550_v36  ;;  %2145 = vst.msk [vmem:[%s3208_s17 + $0x18c] sm:$0xf] %vm2045_vm1, %v2614_v37  ;;  %v1047_v42 = vadd.f32 %v2754_v40, %v3195_v3  ;;  %v1303_v43 = vadd.f32 %v2818_v41, %v3195_v3  ;;  %v1038_v44 = vpop.f32.mrb[37].mxu0  ;;  %v1294_v45 = vpop.f32.mrb[37].mxu1 }
 0x153   : > { %2079 = vst.msk [vmem:[%s3208_s17 + $0x84] sm:$0xf] %vm2045_vm1, %v2548_v38  ;;  %2143 = vst.msk [vmem:[%s3208_s17 + $0x184] sm:$0xf] %vm2045_vm1, %v2612_v39  ;;  %v1039_v46 = vadd.f32 %v3195_v3, %v1038_v44  ;;  %v1295_v47 = vadd.f32 %v3195_v3, %v1294_v45  ;;  %v2755_v48 = vpop.f32.mrb[38].mxu0  ;;  %v2819_v49 = vpop.f32.mrb[38].mxu1 }
 0x154   : > { %v1443_v50 = vmax.f32 %v1047_v42, 0.0  ;;  %v1507_v51 = vmax.f32 %v1303_v43, 0.0  ;;  %v1050_v52 = vadd.f32 %v2755_v48, %v3195_v3  ;;  %v1306_v53 = vadd.f32 %v2819_v49, %v3195_v3  ;;  %v1041_v54 = vpop.f32.mrb[39].mxu0  ;;  %v1297_v55 = vpop.f32.mrb[39].mxu1 }
 0x155   : > { %v1441_v56 = vmax.f32 %v1039_v46, 0.0  ;;  %v1505_v57 = vmax.f32 %v1295_v47, 0.0  ;;  %v1042_v58 = vadd.f32 %v3195_v3, %v1041_v54  ;;  %v1298_v59 = vadd.f32 %v3195_v3, %v1297_v55 }
 0x156   : > { %v2553_v60 = vpack.c.bf16 %v1443_v50, %v1443_v50  ;;  %v2617_v61 = vpack.c.bf16 %v1507_v51, %v1507_v51  ;;  %v1444_v62 = vmax.f32 %v1050_v52, 0.0  ;;  %v1508_v63 = vmax.f32 %v1306_v53, 0.0 }
 0x157   : > { %v2551_v0 = vpack.c.bf16 %v1441_v56, %v1441_v56  ;;  %v2615_v1 = vpack.c.bf16 %v1505_v57, %v1505_v57  ;;  %v1442_v2 = vmax.f32 %v1042_v58, 0.0  ;;  %v1506_v4 = vmax.f32 %v1298_v59, 0.0 }
 0x158   : > { %2084 = vst.msk [vmem:[%s3208_s17 + $0x98] sm:$0xf] %vm2045_vm1, %v2553_v60  ;;  %2148 = vst.msk [vmem:[%s3208_s17 + $0x198] sm:$0xf] %vm2045_vm1, %v2617_v61  ;;  %v2554_v5 = vpack.c.bf16 %v1444_v62, %v1444_v62  ;;  %v2618_v6 = vpack.c.bf16 %v1508_v63, %v1508_v63 }
 0x159   : > { %2082 = vst.msk [vmem:[%s3208_s17 + $0x90] sm:$0xf] %vm2045_vm1, %v2551_v0  ;;  %2146 = vst.msk [vmem:[%s3208_s17 + $0x190] sm:$0xf] %vm2045_vm1, %v2615_v1  ;;  %v2552_v7 = vpack.c.bf16 %v1442_v2, %v1442_v2  ;;  %v2616_v8 = vpack.c.bf16 %v1506_v4, %v1506_v4  ;;  %v2758_v9 = vpop.f32.mrb[40].mxu0  ;;  %v2822_v10 = vpop.f32.mrb[40].mxu1 }
 0x15a   : > { %2085 = vst.msk [vmem:[%s3208_s17 + $0x9c] sm:$0xf] %vm2045_vm1, %v2554_v5  ;;  %2149 = vst.msk [vmem:[%s3208_s17 + $0x19c] sm:$0xf] %vm2045_vm1, %v2618_v6  ;;  %v1063_v11 = vadd.f32 %v2758_v9, %v3195_v3  ;;  %v1319_v12 = vadd.f32 %v2822_v10, %v3195_v3  ;;  %v1054_v13 = vpop.f32.mrb[41].mxu0  ;;  %v1310_v14 = vpop.f32.mrb[41].mxu1 }
 0x15b   : > { %2083 = vst.msk [vmem:[%s3208_s17 + $0x94] sm:$0xf] %vm2045_vm1, %v2552_v7  ;;  %2147 = vst.msk [vmem:[%s3208_s17 + $0x194] sm:$0xf] %vm2045_vm1, %v2616_v8  ;;  %v1055_v15 = vadd.f32 %v3195_v3, %v1054_v13  ;;  %v1311_v16 = vadd.f32 %v3195_v3, %v1310_v14  ;;  %v2759_v17 = vpop.f32.mrb[42].mxu0  ;;  %v2823_v18 = vpop.f32.mrb[42].mxu1 }
 0x15c   : > { %v1447_v19 = vmax.f32 %v1063_v11, 0.0  ;;  %v1511_v20 = vmax.f32 %v1319_v12, 0.0  ;;  %v1066_v21 = vadd.f32 %v2759_v17, %v3195_v3  ;;  %v1322_v22 = vadd.f32 %v2823_v18, %v3195_v3  ;;  %v1057_v23 = vpop.f32.mrb[43].mxu0  ;;  %v1313_v24 = vpop.f32.mrb[43].mxu1 }
 0x15d   : > { %v1445_v25 = vmax.f32 %v1055_v15, 0.0  ;;  %v1509_v26 = vmax.f32 %v1311_v16, 0.0  ;;  %v1058_v27 = vadd.f32 %v3195_v3, %v1057_v23  ;;  %v1314_v28 = vadd.f32 %v3195_v3, %v1313_v24 }
 0x15e   : > { %v2557_v29 = vpack.c.bf16 %v1447_v19, %v1447_v19  ;;  %v2621_v30 = vpack.c.bf16 %v1511_v20, %v1511_v20  ;;  %v1448_v31 = vmax.f32 %v1066_v21, 0.0  ;;  %v1512_v32 = vmax.f32 %v1322_v22, 0.0 }
 0x15f   : > { %v2555_v33 = vpack.c.bf16 %v1445_v25, %v1445_v25  ;;  %v2619_v34 = vpack.c.bf16 %v1509_v26, %v1509_v26  ;;  %v1446_v35 = vmax.f32 %v1058_v27, 0.0  ;;  %v1510_v36 = vmax.f32 %v1314_v28, 0.0 }
 0x160   : > { %2088 = vst.msk [vmem:[%s3208_s17 + $0xa8] sm:$0xf] %vm2045_vm1, %v2557_v29  ;;  %2152 = vst.msk [vmem:[%s3208_s17 + $0x1a8] sm:$0xf] %vm2045_vm1, %v2621_v30  ;;  %v2558_v37 = vpack.c.bf16 %v1448_v31, %v1448_v31  ;;  %v2622_v38 = vpack.c.bf16 %v1512_v32, %v1512_v32 }
 0x161   : > { %2086 = vst.msk [vmem:[%s3208_s17 + $0xa0] sm:$0xf] %vm2045_vm1, %v2555_v33  ;;  %2150 = vst.msk [vmem:[%s3208_s17 + $0x1a0] sm:$0xf] %vm2045_vm1, %v2619_v34  ;;  %v2556_v39 = vpack.c.bf16 %v1446_v35, %v1446_v35  ;;  %v2620_v40 = vpack.c.bf16 %v1510_v36, %v1510_v36  ;;  %v2762_v41 = vpop.f32.mrb[44].mxu0  ;;  %v2826_v42 = vpop.f32.mrb[44].mxu1 }
 0x162   : > { %2089 = vst.msk [vmem:[%s3208_s17 + $0xac] sm:$0xf] %vm2045_vm1, %v2558_v37  ;;  %2153 = vst.msk [vmem:[%s3208_s17 + $0x1ac] sm:$0xf] %vm2045_vm1, %v2622_v38  ;;  %v1079_v43 = vadd.f32 %v2762_v41, %v3195_v3  ;;  %v1335_v44 = vadd.f32 %v2826_v42, %v3195_v3  ;;  %v1070_v45 = vpop.f32.mrb[45].mxu0  ;;  %v1326_v46 = vpop.f32.mrb[45].mxu1 }
 0x163   : > { %2087 = vst.msk [vmem:[%s3208_s17 + $0xa4] sm:$0xf] %vm2045_vm1, %v2556_v39  ;;  %2151 = vst.msk [vmem:[%s3208_s17 + $0x1a4] sm:$0xf] %vm2045_vm1, %v2620_v40  ;;  %v1071_v47 = vadd.f32 %v3195_v3, %v1070_v45  ;;  %v1327_v48 = vadd.f32 %v3195_v3, %v1326_v46  ;;  %v2763_v49 = vpop.f32.mrb[46].mxu0  ;;  %v2827_v50 = vpop.f32.mrb[46].mxu1 }
 0x164   : > { %v1451_v51 = vmax.f32 %v1079_v43, 0.0  ;;  %v1515_v52 = vmax.f32 %v1335_v44, 0.0  ;;  %v1082_v53 = vadd.f32 %v2763_v49, %v3195_v3  ;;  %v1338_v54 = vadd.f32 %v2827_v50, %v3195_v3  ;;  %v1073_v55 = vpop.f32.mrb[47].mxu0  ;;  %v1329_v56 = vpop.f32.mrb[47].mxu1  ;;  %v3512_v43 = vld [vmem:[#allocation2] ss:$0 sm:$0xff] }
 0x165   : > { %v1449_v57 = vmax.f32 %v1071_v47, 0.0  ;;  %v1513_v58 = vmax.f32 %v1327_v48, 0.0  ;;  %v1074_v59 = vadd.f32 %v3195_v3, %v1073_v55  ;;  %v1330_v60 = vadd.f32 %v3195_v3, %v1329_v56 }
 0x166   : > { %v2561_v61 = vpack.c.bf16 %v1451_v51, %v1451_v51  ;;  %v2625_v62 = vpack.c.bf16 %v1515_v52, %v1515_v52  ;;  %v1452_v63 = vmax.f32 %v1082_v53, 0.0  ;;  %v1516_v0 = vmax.f32 %v1338_v54, 0.0 }
 0x167   : > { %v2559_v1 = vpack.c.bf16 %v1449_v57, %v1449_v57  ;;  %v2623_v2 = vpack.c.bf16 %v1513_v58, %v1513_v58  ;;  %v1450_v4 = vmax.f32 %v1074_v59, 0.0  ;;  %v1514_v5 = vmax.f32 %v1330_v60, 0.0 }
 0x168   : > { %2092 = vst.msk [vmem:[%s3208_s17 + $0xb8] sm:$0xf] %vm2045_vm1, %v2561_v61  ;;  %2156 = vst.msk [vmem:[%s3208_s17 + $0x1b8] sm:$0xf] %vm2045_vm1, %v2625_v62  ;;  %v2562_v6 = vpack.c.bf16 %v1452_v63, %v1452_v63  ;;  %v2626_v7 = vpack.c.bf16 %v1516_v0, %v1516_v0 }
 0x169   : > { %2090 = vst.msk [vmem:[%s3208_s17 + $0xb0] sm:$0xf] %vm2045_vm1, %v2559_v1  ;;  %2154 = vst.msk [vmem:[%s3208_s17 + $0x1b0] sm:$0xf] %vm2045_vm1, %v2623_v2  ;;  %v2560_v8 = vpack.c.bf16 %v1450_v4, %v1450_v4  ;;  %v2624_v9 = vpack.c.bf16 %v1514_v5, %v1514_v5  ;;  %v2766_v10 = vpop.f32.mrb[48].mxu0  ;;  %v2830_v11 = vpop.f32.mrb[48].mxu1 }
 0x16a   : > { %2093 = vst.msk [vmem:[%s3208_s17 + $0xbc] sm:$0xf] %vm2045_vm1, %v2562_v6  ;;  %2157 = vst.msk [vmem:[%s3208_s17 + $0x1bc] sm:$0xf] %vm2045_vm1, %v2626_v7  ;;  %v1095_v12 = vadd.f32 %v2766_v10, %v3195_v3  ;;  %v1351_v13 = vadd.f32 %v2830_v11, %v3195_v3  ;;  %v1086_v14 = vpop.f32.mrb[49].mxu0  ;;  %v1342_v15 = vpop.f32.mrb[49].mxu1 }
 0x16b   : > { %2091 = vst.msk [vmem:[%s3208_s17 + $0xb4] sm:$0xf] %vm2045_vm1, %v2560_v8  ;;  %2155 = vst.msk [vmem:[%s3208_s17 + $0x1b4] sm:$0xf] %vm2045_vm1, %v2624_v9  ;;  %v1087_v16 = vadd.f32 %v3195_v3, %v1086_v14  ;;  %v1343_v17 = vadd.f32 %v3195_v3, %v1342_v15  ;;  %v2767_v18 = vpop.f32.mrb[50].mxu0  ;;  %v2831_v19 = vpop.f32.mrb[50].mxu1 }
 0x16c   : > { %v1455_v20 = vmax.f32 %v1095_v12, 0.0  ;;  %v1519_v21 = vmax.f32 %v1351_v13, 0.0  ;;  %v1098_v22 = vadd.f32 %v2767_v18, %v3195_v3  ;;  %v1354_v23 = vadd.f32 %v2831_v19, %v3195_v3  ;;  %v1089_v24 = vpop.f32.mrb[51].mxu0  ;;  %v1345_v25 = vpop.f32.mrb[51].mxu1 }
 0x16d   : > { %v1453_v26 = vmax.f32 %v1087_v16, 0.0  ;;  %v1517_v27 = vmax.f32 %v1343_v17, 0.0  ;;  %v1090_v28 = vadd.f32 %v3195_v3, %v1089_v24  ;;  %v1346_v29 = vadd.f32 %v3195_v3, %v1345_v25 }
 0x16e   : > { %v2565_v30 = vpack.c.bf16 %v1455_v20, %v1455_v20  ;;  %v2629_v31 = vpack.c.bf16 %v1519_v21, %v1519_v21  ;;  %v1456_v32 = vmax.f32 %v1098_v22, 0.0  ;;  %v1520_v33 = vmax.f32 %v1354_v23, 0.0 }
 0x16f   : > { %v2563_v34 = vpack.c.bf16 %v1453_v26, %v1453_v26  ;;  %v2627_v35 = vpack.c.bf16 %v1517_v27, %v1517_v27  ;;  %v1454_v36 = vmax.f32 %v1090_v28, 0.0  ;;  %v1518_v37 = vmax.f32 %v1346_v29, 0.0 }
 0x170   : > { %2096 = vst.msk [vmem:[%s3208_s17 + $0xc8] sm:$0xf] %vm2045_vm1, %v2565_v30  ;;  %2160 = vst.msk [vmem:[%s3208_s17 + $0x1c8] sm:$0xf] %vm2045_vm1, %v2629_v31  ;;  %v2566_v38 = vpack.c.bf16 %v1456_v32, %v1456_v32  ;;  %v2630_v39 = vpack.c.bf16 %v1520_v33, %v1520_v33 }
 0x171   : > { %2094 = vst.msk [vmem:[%s3208_s17 + $0xc0] sm:$0xf] %vm2045_vm1, %v2563_v34  ;;  %2158 = vst.msk [vmem:[%s3208_s17 + $0x1c0] sm:$0xf] %vm2045_vm1, %v2627_v35  ;;  %v2564_v3 = vpack.c.bf16 %v1454_v36, %v1454_v36  ;;  %v2628_v40 = vpack.c.bf16 %v1518_v37, %v1518_v37  ;;  %v2770_v41 = vpop.f32.mrb[52].mxu0  ;;  %v2834_v42 = vpop.f32.mrb[52].mxu1 }
 0x172   : > { %2097 = vst.msk [vmem:[%s3208_s17 + $0xcc] sm:$0xf] %vm2045_vm1, %v2566_v38  ;;  %2161 = vst.msk [vmem:[%s3208_s17 + $0x1cc] sm:$0xf] %vm2045_vm1, %v2630_v39  ;;  %v1111_v44 = vadd.f32 %v3512_v43, %v2770_v41  ;;  %v1367_v45 = vadd.f32 %v3512_v43, %v2834_v42  ;;  %v1102_v46 = vpop.f32.mrb[53].mxu0  ;;  %v1358_v47 = vpop.f32.mrb[53].mxu1 }
 0x173   : > { %2095 = vst.msk [vmem:[%s3208_s17 + $0xc4] sm:$0xf] %vm2045_vm1, %v2564_v3  ;;  %2159 = vst.msk [vmem:[%s3208_s17 + $0x1c4] sm:$0xf] %vm2045_vm1, %v2628_v40  ;;  %v1103_v48 = vadd.f32 %v3512_v43, %v1102_v46  ;;  %v1359_v49 = vadd.f32 %v3512_v43, %v1358_v47  ;;  %v2771_v50 = vpop.f32.mrb[54].mxu0  ;;  %v2835_v51 = vpop.f32.mrb[54].mxu1 }
 0x174   : > { %v1459_v52 = vmax.f32 %v1111_v44, 0.0  ;;  %v1523_v53 = vmax.f32 %v1367_v45, 0.0  ;;  %v1114_v54 = vadd.f32 %v3512_v43, %v2771_v50  ;;  %v1370_v55 = vadd.f32 %v3512_v43, %v2835_v51  ;;  %v1105_v56 = vpop.f32.mrb[55].mxu0  ;;  %v1361_v57 = vpop.f32.mrb[55].mxu1 }
 0x175   : > { %v1457_v58 = vmax.f32 %v1103_v48, 0.0  ;;  %v1521_v59 = vmax.f32 %v1359_v49, 0.0  ;;  %v1106_v60 = vadd.f32 %v3512_v43, %v1105_v56  ;;  %v1362_v61 = vadd.f32 %v3512_v43, %v1361_v57 }
 0x176   : > { %v2569_v62 = vpack.c.bf16 %v1459_v52, %v1459_v52  ;;  %v2633_v63 = vpack.c.bf16 %v1523_v53, %v1523_v53  ;;  %v1460_v0 = vmax.f32 %v1114_v54, 0.0  ;;  %v1524_v1 = vmax.f32 %v1370_v55, 0.0 }
 0x177   : > { %v2567_v2 = vpack.c.bf16 %v1457_v58, %v1457_v58  ;;  %v2631_v4 = vpack.c.bf16 %v1521_v59, %v1521_v59  ;;  %v1458_v5 = vmax.f32 %v1106_v60, 0.0  ;;  %v1522_v6 = vmax.f32 %v1362_v61, 0.0 }
 0x178   : > { %2100 = vst.msk [vmem:[%s3208_s17 + $0xd8] sm:$0xf] %vm2045_vm1, %v2569_v62  ;;  %2164 = vst.msk [vmem:[%s3208_s17 + $0x1d8] sm:$0xf] %vm2045_vm1, %v2633_v63  ;;  %v2570_v7 = vpack.c.bf16 %v1460_v0, %v1460_v0  ;;  %v2634_v8 = vpack.c.bf16 %v1524_v1, %v1524_v1 }
 0x179   : > { %2098 = vst.msk [vmem:[%s3208_s17 + $0xd0] sm:$0xf] %vm2045_vm1, %v2567_v2  ;;  %2162 = vst.msk [vmem:[%s3208_s17 + $0x1d0] sm:$0xf] %vm2045_vm1, %v2631_v4  ;;  %v2568_v9 = vpack.c.bf16 %v1458_v5, %v1458_v5  ;;  %v2632_v10 = vpack.c.bf16 %v1522_v6, %v1522_v6  ;;  %v2774_v11 = vpop.f32.mrb[56].mxu0  ;;  %v2838_v12 = vpop.f32.mrb[56].mxu1 }
 0x17a   : > { %2101 = vst.msk [vmem:[%s3208_s17 + $0xdc] sm:$0xf] %vm2045_vm1, %v2570_v7  ;;  %2165 = vst.msk [vmem:[%s3208_s17 + $0x1dc] sm:$0xf] %vm2045_vm1, %v2634_v8  ;;  %v1127_v13 = vadd.f32 %v3512_v43, %v2774_v11  ;;  %v1383_v14 = vadd.f32 %v3512_v43, %v2838_v12  ;;  %v1118_v15 = vpop.f32.mrb[57].mxu0  ;;  %v1374_v16 = vpop.f32.mrb[57].mxu1 }
 0x17b   : > { %2099 = vst.msk [vmem:[%s3208_s17 + $0xd4] sm:$0xf] %vm2045_vm1, %v2568_v9  ;;  %2163 = vst.msk [vmem:[%s3208_s17 + $0x1d4] sm:$0xf] %vm2045_vm1, %v2632_v10  ;;  %v1119_v17 = vadd.f32 %v3512_v43, %v1118_v15  ;;  %v1375_v18 = vadd.f32 %v3512_v43, %v1374_v16  ;;  %v2775_v19 = vpop.f32.mrb[58].mxu0  ;;  %v2839_v20 = vpop.f32.mrb[58].mxu1 }
 0x17c   : > { %v1463_v21 = vmax.f32 %v1127_v13, 0.0  ;;  %v1527_v22 = vmax.f32 %v1383_v14, 0.0  ;;  %v1130_v23 = vadd.f32 %v3512_v43, %v2775_v19  ;;  %v1386_v24 = vadd.f32 %v3512_v43, %v2839_v20  ;;  %v1121_v25 = vpop.f32.mrb[59].mxu0  ;;  %v1377_v26 = vpop.f32.mrb[59].mxu1 }
 0x17d   : > { %v1461_v27 = vmax.f32 %v1119_v17, 0.0  ;;  %v1525_v28 = vmax.f32 %v1375_v18, 0.0  ;;  %v1122_v29 = vadd.f32 %v3512_v43, %v1121_v25  ;;  %v1378_v30 = vadd.f32 %v3512_v43, %v1377_v26 }
 0x17e   : > { %v2573_v31 = vpack.c.bf16 %v1463_v21, %v1463_v21  ;;  %v2637_v32 = vpack.c.bf16 %v1527_v22, %v1527_v22  ;;  %v1464_v33 = vmax.f32 %v1130_v23, 0.0  ;;  %v1528_v34 = vmax.f32 %v1386_v24, 0.0 }
 0x17f   : > { %v2571_v35 = vpack.c.bf16 %v1461_v27, %v1461_v27  ;;  %v2635_v36 = vpack.c.bf16 %v1525_v28, %v1525_v28  ;;  %v1462_v37 = vmax.f32 %v1122_v29, 0.0  ;;  %v1526_v38 = vmax.f32 %v1378_v30, 0.0 }
 0x180   : > { %2104 = vst.msk [vmem:[%s3208_s17 + $0xe8] sm:$0xf] %vm2045_vm1, %v2573_v31  ;;  %2168 = vst.msk [vmem:[%s3208_s17 + $0x1e8] sm:$0xf] %vm2045_vm1, %v2637_v32  ;;  %v2574_v39 = vpack.c.bf16 %v1464_v33, %v1464_v33  ;;  %v2638_v3 = vpack.c.bf16 %v1528_v34, %v1528_v34 }
 0x181   : > { %2102 = vst.msk [vmem:[%s3208_s17 + $0xe0] sm:$0xf] %vm2045_vm1, %v2571_v35  ;;  %2166 = vst.msk [vmem:[%s3208_s17 + $0x1e0] sm:$0xf] %vm2045_vm1, %v2635_v36  ;;  %v2572_v40 = vpack.c.bf16 %v1462_v37, %v1462_v37  ;;  %v2636_v41 = vpack.c.bf16 %v1526_v38, %v1526_v38  ;;  %v2778_v42 = vpop.f32.mrb[60].mxu0  ;;  %v2842_v44 = vpop.f32.mrb[60].mxu1 }
 0x182   : > { %2105 = vst.msk [vmem:[%s3208_s17 + $0xec] sm:$0xf] %vm2045_vm1, %v2574_v39  ;;  %2169 = vst.msk [vmem:[%s3208_s17 + $0x1ec] sm:$0xf] %vm2045_vm1, %v2638_v3  ;;  %v1143_v45 = vadd.f32 %v3512_v43, %v2778_v42  ;;  %v1399_v46 = vadd.f32 %v3512_v43, %v2842_v44  ;;  %v1134_v47 = vpop.f32.mrb[61].mxu0  ;;  %v1390_v48 = vpop.f32.mrb[61].mxu1 }
 0x183   : > { %2103 = vst.msk [vmem:[%s3208_s17 + $0xe4] sm:$0xf] %vm2045_vm1, %v2572_v40  ;;  %2167 = vst.msk [vmem:[%s3208_s17 + $0x1e4] sm:$0xf] %vm2045_vm1, %v2636_v41  ;;  %v1135_v49 = vadd.f32 %v3512_v43, %v1134_v47  ;;  %v1391_v50 = vadd.f32 %v3512_v43, %v1390_v48  ;;  %v2779_v51 = vpop.f32.mrb[62].mxu0  ;;  %v2843_v52 = vpop.f32.mrb[62].mxu1 }
 0x184   : > { %v1467_v53 = vmax.f32 %v1143_v45, 0.0  ;;  %v1531_v54 = vmax.f32 %v1399_v46, 0.0  ;;  %v1146_v55 = vadd.f32 %v3512_v43, %v2779_v51  ;;  %v1402_v56 = vadd.f32 %v3512_v43, %v2843_v52  ;;  %v1137_v57 = vpop.f32.mrb[63].mxu0  ;;  %v1393_v58 = vpop.f32.mrb[63].mxu1 }
 0x185   : > { %v1465_v59 = vmax.f32 %v1135_v49, 0.0  ;;  %v1529_v60 = vmax.f32 %v1391_v50, 0.0  ;;  %v1138_v61 = vadd.f32 %v3512_v43, %v1137_v57  ;;  %v1394_v62 = vadd.f32 %v3512_v43, %v1393_v58 }
 0x186   : > { %v2577_v63 = vpack.c.bf16 %v1467_v53, %v1467_v53  ;;  %v2641_v0 = vpack.c.bf16 %v1531_v54, %v1531_v54  ;;  %v1468_v1 = vmax.f32 %v1146_v55, 0.0  ;;  %v1532_v2 = vmax.f32 %v1402_v56, 0.0 }
 0x187   : > { %v2575_v4 = vpack.c.bf16 %v1465_v59, %v1465_v59  ;;  %v2639_v5 = vpack.c.bf16 %v1529_v60, %v1529_v60  ;;  %v1466_v6 = vmax.f32 %v1138_v61, 0.0  ;;  %v1530_v7 = vmax.f32 %v1394_v62, 0.0 }
 0x188   : > { %2108 = vst.msk [vmem:[%s3208_s17 + $0xf8] sm:$0xf] %vm2045_vm1, %v2577_v63  ;;  %2172 = vst.msk [vmem:[%s3208_s17 + $0x1f8] sm:$0xf] %vm2045_vm1, %v2641_v0  ;;  %v2578_v8 = vpack.c.bf16 %v1468_v1, %v1468_v1  ;;  %v2642_v9 = vpack.c.bf16 %v1532_v2, %v1532_v2 }
 0x189   : > { %2106 = vst.msk [vmem:[%s3208_s17 + $0xf0] sm:$0xf] %vm2045_vm1, %v2575_v4  ;;  %2170 = vst.msk [vmem:[%s3208_s17 + $0x1f0] sm:$0xf] %vm2045_vm1, %v2639_v5  ;;  %v2576_v43 = vpack.c.bf16 %v1466_v6, %v1466_v6  ;;  %v2640_v10 = vpack.c.bf16 %v1530_v7, %v1530_v7 }
 0x18a   : > { %2109 = vst.msk [vmem:[%s3208_s17 + $0xfc] sm:$0xf] %vm2045_vm1, %v2578_v8  ;;  %2173 = vst.msk [vmem:[%s3208_s17 + $0x1fc] sm:$0xf] %vm2045_vm1, %v2642_v9 }
 0x18b   : > { %2107 = vst.msk [vmem:[%s3208_s17 + $0xf4] sm:$0xf] %vm2045_vm1, %v2576_v43  ;;  %2171 = vst.msk [vmem:[%s3208_s17 + $0x1f4] sm:$0xf] %vm2045_vm1, %v2640_v10 }
 0x18c PF: > { %s14_s12 = sadd.s32 1, %s2975_s12  }
 0x18d   : > { %p11_p2 = scmp.ge.s32.totalorder %s14_s12, 4  }
 0x18f   :  { %13 = sbr.rel (!%p11_p2) target bundleno = 1 (0x1), region = 67 }
 0x196   :  { %2196 = vsyncpa [#allocation3], 1 }
 0x197   :  { %2198 = vsyncpa [#allocation3 + $0x1], 1 }

// kernel: betavae_forward.10
= control target key start
LH: loop header
LB: loop body
LE: loop exit
PB: predicated region body
PF: predicated region fallthrough
CT: control target
= control target key end

     0   :  { %v2656_v0 = vmov 0   ;;  %vm1944_vm0 = vcmask 257024   ;;  %s3519_s1 = inlined_call_operand.vmem [shape: bf16[512,32], index: 1, kind: input, shape index: {}]   ;;  %s3520_s0 = inlined_call_operand.vmem [shape: bf16[512,512], index: 0, kind: input, shape index: {}]   ;;  %s3521_s2 = inlined_call_operand.vmem [shape: f32[1,32], index: 2, kind: input, shape index: {}]   ;;  %s3522_s3 = inlined_call_operand.vmem [shape: bf16[512,32], index: 3, kind: output, shape index: {}]  }
   0x1   :  { %1046 = vmatprep.subr.bf16.mxu1 %v2656_v0  ;;  %1335 = vmatprep.subr.bf16.mxu0 %v2656_v0  ;;  %v2431_v1 = vld [vmem:[%s3519_s1] sm:$0xff]   ;;  %v2433_v3 = vld [vmem:[%s3519_s1 + $0x8] sm:$0xff]   ;;  %v2435_v5 = vld [vmem:[%s3519_s1 + $0x10] sm:$0xff]  }
   0x2   :  { %v2432_v2 = vld [vmem:[%s3519_s1 + $0x80] sm:$0xff]   ;;  %1047 = vmatpush1.bf16.msra.mxu1 %v2431_v1  ;;  %v2434_v4 = vld [vmem:[%s3519_s1 + $0x88] sm:$0xff]   ;;  %v2436_v6 = vld [vmem:[%s3519_s1 + $0x90] sm:$0xff]  }
   0x3   :  { %1336 = vmatpush1.bf16.msra.mxu0 %v2432_v2  ;;  %1048 = vmatprep.subr.bf16.mxu1 %v2656_v0  ;;  %v2437_v7 = vld [vmem:[%s3519_s1 + $0x18] sm:$0xff]   ;;  %v2439_v9 = vld [vmem:[%s3519_s1 + $0x20] sm:$0xff]   ;;  %v2441_v11 = vld [vmem:[%s3519_s1 + $0x28] sm:$0xff]  }
   0x4   :  { %1337 = vmatprep.subr.bf16.mxu0 %v2656_v0  ;;  %v2438_v8 = vld [vmem:[%s3519_s1 + $0x98] sm:$0xff]   ;;  %v2440_v10 = vld [vmem:[%s3519_s1 + $0xa0] sm:$0xff]   ;;  %v2442_v12 = vld [vmem:[%s3519_s1 + $0xa8] sm:$0xff]  }
   0x5   :  { %v2443_v13 = vld [vmem:[%s3519_s1 + $0x30] sm:$0xff]   ;;  %v2445_v15 = vld [vmem:[%s3519_s1 + $0x38] sm:$0xff]   ;;  %v2447_v17 = vld [vmem:[%s3519_s1 + $0x40] sm:$0xff]  }
   0x6   :  { %1049 = vmatpush1.bf16.msra.mxu1 %v2433_v3  ;;  %v2444_v14 = vld [vmem:[%s3519_s1 + $0xb0] sm:$0xff]   ;;  %v2446_v16 = vld [vmem:[%s3519_s1 + $0xb8] sm:$0xff]   ;;  %v2448_v18 = vld [vmem:[%s3519_s1 + $0xc0] sm:$0xff]  }
   0x7   :  { %1338 = vmatpush1.bf16.msra.mxu0 %v2434_v4  ;;  %1050 = vmatprep.subr.bf16.mxu1 %v2656_v0  ;;  %v2465_v19 = vld [vmem:[%s3520_s0 + $0x4] ss:$16 sps:$4 sm:$0xff]   ;;  %v2449_v20 = vld [vmem:[%s3519_s1 + $0x48] sm:$0xff]   ;;  %v2453_v25 = vld [vmem:[%s3519_s1 + $0x58] sm:$0xff]  }
   0x8   :  { %1339 = vmatprep.subr.bf16.mxu0 %v2656_v0  ;;  %v2468_v21 = vld [vmem:[%s3520_s0 + $0xc] ss:$16 sps:$4 sm:$0xff]   ;;  %1078 = vmatprep.mubr.bf16.mxu1 %v2465_v19  ;;  %v2451_v23 = vld [vmem:[%s3519_s1 + $0x50] sm:$0xff]   ;;  %v2455_v27 = vld [vmem:[%s3519_s1 + $0x60] sm:$0xff]  }
   0x9   :  { %v2450_v22 = vld [vmem:[%s3519_s1 + $0xc8] sm:$0xff]   ;;  %1367 = vmatprep.mubr.bf16.mxu0 %v2468_v21  ;;  %v2452_v24 = vld [vmem:[%s3519_s1 + $0xd0] sm:$0xff]   ;;  %v2454_v26 = vld [vmem:[%s3519_s1 + $0xd8] sm:$0xff]  }
   0xa   :  { %1051 = vmatpush1.bf16.msra.mxu1 %v2435_v5  ;;  %v2456_v28 = vld [vmem:[%s3519_s1 + $0xe0] sm:$0xff]   ;;  %v2457_v29 = vld [vmem:[%s3519_s1 + $0x68] sm:$0xff]   ;;  %v2459_v31 = vld [vmem:[%s3519_s1 + $0x70] sm:$0xff]  }
   0xb   :  { %1340 = vmatpush1.bf16.msra.mxu0 %v2436_v6  ;;  %1052 = vmatprep.subr.bf16.mxu1 %v2656_v0  ;;  %v2458_v30 = vld [vmem:[%s3519_s1 + $0xe8] sm:$0xff]   ;;  %v2460_v32 = vld [vmem:[%s3519_s1 + $0xf0] sm:$0xff]   ;;  %v2461_v33 = vld [vmem:[%s3519_s1 + $0x78] sm:$0xff]  }
   0xc   :  { %1341 = vmatprep.subr.bf16.mxu0 %v2656_v0  ;;  %v2462_v34 = vld [vmem:[%s3519_s1 + $0xf8] sm:$0xff]   ;;  %v2463_v35 = vld [vmem:[%s3520_s0] ss:$16 sps:$4 sm:$0xff]   ;;  %v2469_v37 = vld [vmem:[%s3520_s0 + $0x24] ss:$16 sps:$4 sm:$0xff]  }
   0xd   :  { %v2466_v36 = vld [vmem:[%s3520_s0 + $0x8] ss:$16 sps:$4 sm:$0xff]   ;;  %v2471_v38 = vld [vmem:[%s3520_s0 + $0x2c] ss:$16 sps:$4 sm:$0xff]   ;;  %v2473_v39 = vld [vmem:[%s3520_s0 + $0x20] ss:$16 sps:$4 sm:$0xff]  }
   0xe   :  { %1053 = vmatpush1.bf16.msra.mxu1 %v2437_v7  ;;  %v2474_v40 = vld [vmem:[%s3520_s0 + $0x28] ss:$16 sps:$4 sm:$0xff]   ;;  %v2475_v41 = vld [vmem:[%s3520_s0 + $0x44] ss:$16 sps:$4 sm:$0xff]   ;;  %v2477_v42 = vld [vmem:[%s3520_s0 + $0x4c] ss:$16 sps:$4 sm:$0xff]  }
   0xf   :  { %1342 = vmatpush1.bf16.msra.mxu0 %v2438_v8  ;;  %1054 = vmatprep.subr.bf16.mxu1 %v2656_v0  ;;  %v2479_v43 = vld [vmem:[%s3520_s0 + $0x40] ss:$16 sps:$4 sm:$0xff]   ;;  %v2480_v44 = vld [vmem:[%s3520_s0 + $0x48] ss:$16 sps:$4 sm:$0xff]   ;;  %v2481_v45 = vld [vmem:[%s3520_s0 + $0x64] ss:$16 sps:$4 sm:$0xff]  }
  0x10   :  { %1343 = vmatprep.subr.bf16.mxu0 %v2656_v0  ;;  %v2483_v46 = vld [vmem:[%s3520_s0 + $0x6c] ss:$16 sps:$4 sm:$0xff]   ;;  %v2485_v47 = vld [vmem:[%s3520_s0 + $0x60] ss:$16 sps:$4 sm:$0xff]   ;;  %v2486_v48 = vld [vmem:[%s3520_s0 + $0x68] ss:$16 sps:$4 sm:$0xff]  }
  0x11   :  { %v2487_v49 = vld [vmem:[%s3520_s0 + $0x84] ss:$16 sps:$4 sm:$0xff]   ;;  %v2489_v50 = vld [vmem:[%s3520_s0 + $0x8c] ss:$16 sps:$4 sm:$0xff]   ;;  %v2491_v51 = vld [vmem:[%s3520_s0 + $0x80] ss:$16 sps:$4 sm:$0xff]  }
  0x12   :  { %1055 = vmatpush1.bf16.msra.mxu1 %v2439_v9  ;;  %v2492_v52 = vld [vmem:[%s3520_s0 + $0x88] ss:$16 sps:$4 sm:$0xff]   ;;  %v2493_v53 = vld [vmem:[%s3520_s0 + $0xa4] ss:$16 sps:$4 sm:$0xff]   ;;  %v2495_v54 = vld [vmem:[%s3520_s0 + $0xac] ss:$16 sps:$4 sm:$0xff]  }
  0x13   :  { %1344 = vmatpush1.bf16.msra.mxu0 %v2440_v10  ;;  %1056 = vmatprep.subr.bf16.mxu1 %v2656_v0  ;;  %v2497_v55 = vld [vmem:[%s3520_s0 + $0xa0] ss:$16 sps:$4 sm:$0xff]   ;;  %v2498_v56 = vld [vmem:[%s3520_s0 + $0xa8] ss:$16 sps:$4 sm:$0xff]   ;;  %v2499_v57 = vld [vmem:[%s3520_s0 + $0xc4] ss:$16 sps:$4 sm:$0xff]  }
  0x14   :  { %1345 = vmatprep.subr.bf16.mxu0 %v2656_v0  ;;  %v2501_v58 = vld [vmem:[%s3520_s0 + $0xcc] ss:$16 sps:$4 sm:$0xff]   ;;  %v2503_v59 = vld [vmem:[%s3520_s0 + $0xc0] ss:$16 sps:$4 sm:$0xff]   ;;  %v2504_v60 = vld [vmem:[%s3520_s0 + $0xc8] ss:$16 sps:$4 sm:$0xff]  }
  0x15   :  { %v2505_v61 = vld [vmem:[%s3520_s0 + $0xe4] ss:$16 sps:$4 sm:$0xff]   ;;  %v2507_v62 = vld [vmem:[%s3520_s0 + $0xec] ss:$16 sps:$4 sm:$0xff]   ;;  %v2509_v63 = vld [vmem:[%s3520_s0 + $0xe0] ss:$16 sps:$4 sm:$0xff]  }
  0x16   :  { %1057 = vmatpush1.bf16.msra.mxu1 %v2441_v11  ;;  %v2511_v1 = vld [vmem:[%s3520_s0 + $0x104] ss:$16 sps:$4 sm:$0xff]   ;;  %v2513_v2 = vld [vmem:[%s3520_s0 + $0x10c] ss:$16 sps:$4 sm:$0xff]   ;;  %v2515_v3 = vld [vmem:[%s3520_s0 + $0x100] ss:$16 sps:$4 sm:$0xff]  }
  0x17   :  { %1346 = vmatpush1.bf16.msra.mxu0 %v2442_v12  ;;  %1058 = vmatprep.subr.bf16.mxu1 %v2656_v0  ;;  %v2516_v4 = vld [vmem:[%s3520_s0 + $0x108] ss:$16 sps:$4 sm:$0xff]   ;;  %v2517_v5 = vld [vmem:[%s3520_s0 + $0x124] ss:$16 sps:$4 sm:$0xff]   ;;  %v2519_v6 = vld [vmem:[%s3520_s0 + $0x12c] ss:$16 sps:$4 sm:$0xff]  }
  0x18   :  { %1347 = vmatprep.subr.bf16.mxu0 %v2656_v0  ;;  %v2521_v7 = vld [vmem:[%s3520_s0 + $0x120] ss:$16 sps:$4 sm:$0xff]   ;;  %v2522_v8 = vld [vmem:[%s3520_s0 + $0x128] ss:$16 sps:$4 sm:$0xff]   ;;  %v2523_v9 = vld [vmem:[%s3520_s0 + $0x144] ss:$16 sps:$4 sm:$0xff]  }
  0x19   :  { %v2525_v10 = vld [vmem:[%s3520_s0 + $0x14c] ss:$16 sps:$4 sm:$0xff]   ;;  %v2527_v11 = vld [vmem:[%s3520_s0 + $0x140] ss:$16 sps:$4 sm:$0xff]   ;;  %v2528_v12 = vld [vmem:[%s3520_s0 + $0x148] ss:$16 sps:$4 sm:$0xff]  }
  0x1a   :  { %1059 = vmatpush1.bf16.msra.mxu1 %v2443_v13  ;;  %v2529_v13 = vld [vmem:[%s3520_s0 + $0x164] ss:$16 sps:$4 sm:$0xff]   ;;  %v2539_v19 = vld [vmem:[%s3520_s0 + $0x180] ss:$16 sps:$4 sm:$0xff]  }
  0x1b   :  { %1348 = vmatpush1.bf16.msra.mxu0 %v2444_v14  ;;  %1060 = vmatprep.subr.bf16.mxu1 %v2656_v0  ;;  %v2531_v14 = vld [vmem:[%s3520_s0 + $0x16c] ss:$16 sps:$4 sm:$0xff]   ;;  %v2541_v21 = vld [vmem:[%s3520_s0 + $0x1a4] ss:$16 sps:$4 sm:$0xff]  }
  0x1c   :  { %1349 = vmatprep.subr.bf16.mxu0 %v2656_v0 }
  0x1e   :  { %1061 = vmatpush1.bf16.msra.mxu1 %v2445_v15  ;;  %v2533_v15 = vld [vmem:[%s3520_s0 + $0x160] ss:$16 sps:$4 sm:$0xff]  }
  0x1f   :  { %1350 = vmatpush1.bf16.msra.mxu0 %v2446_v16  ;;  %1062 = vmatprep.subr.bf16.mxu1 %v2656_v0  ;;  %v2534_v16 = vld [vmem:[%s3520_s0 + $0x168] ss:$16 sps:$4 sm:$0xff]  }
  0x20   :  { %1351 = vmatprep.subr.bf16.mxu0 %v2656_v0 }
  0x22   :  { %1063 = vmatpush1.bf16.msra.mxu1 %v2447_v17  ;;  %v2535_v17 = vld [vmem:[%s3520_s0 + $0x184] ss:$16 sps:$4 sm:$0xff]  }
  0x23   :  { %1352 = vmatpush1.bf16.msra.mxu0 %v2448_v18  ;;  %1064 = vmatprep.subr.bf16.mxu1 %v2656_v0  ;;  %v2537_v18 = vld [vmem:[%s3520_s0 + $0x18c] ss:$16 sps:$4 sm:$0xff]  }
  0x24   :  { %1353 = vmatprep.subr.bf16.mxu0 %v2656_v0 }
  0x26   :  { %1065 = vmatpush1.bf16.msra.mxu1 %v2449_v20  ;;  %v2540_v20 = vld [vmem:[%s3520_s0 + $0x188] ss:$16 sps:$4 sm:$0xff]  }
  0x27   :  { %1354 = vmatpush1.bf16.msra.mxu0 %v2450_v22  ;;  %1066 = vmatprep.subr.bf16.mxu1 %v2656_v0  ;;  %v2543_v22 = vld [vmem:[%s3520_s0 + $0x1ac] ss:$16 sps:$4 sm:$0xff]  }
  0x28   :  { %1355 = vmatprep.subr.bf16.mxu0 %v2656_v0 }
  0x2a   :  { %1067 = vmatpush1.bf16.msra.mxu1 %v2451_v23  ;;  %v2545_v23 = vld [vmem:[%s3520_s0 + $0x1a0] ss:$16 sps:$4 sm:$0xff]  }
  0x2b   :  { %1356 = vmatpush1.bf16.msra.mxu0 %v2452_v24  ;;  %1068 = vmatprep.subr.bf16.mxu1 %v2656_v0  ;;  %v2546_v24 = vld [vmem:[%s3520_s0 + $0x1a8] ss:$16 sps:$4 sm:$0xff]  }
  0x2c   :  { %1357 = vmatprep.subr.bf16.mxu0 %v2656_v0 }
  0x2e   :  { %1069 = vmatpush1.bf16.msra.mxu1 %v2453_v25  ;;  %v2547_v25 = vld [vmem:[%s3520_s0 + $0x1c4] ss:$16 sps:$4 sm:$0xff]  }
  0x2f   :  { %1358 = vmatpush1.bf16.msra.mxu0 %v2454_v26  ;;  %1070 = vmatprep.subr.bf16.mxu1 %v2656_v0  ;;  %v2549_v26 = vld [vmem:[%s3520_s0 + $0x1cc] ss:$16 sps:$4 sm:$0xff]  }
  0x30   :  { %1359 = vmatprep.subr.bf16.mxu0 %v2656_v0 }
  0x32   :  { %1071 = vmatpush1.bf16.msra.mxu1 %v2455_v27  ;;  %v2551_v27 = vld [vmem:[%s3520_s0 + $0x1c0] ss:$16 sps:$4 sm:$0xff]  }
  0x33   :  { %1360 = vmatpush1.bf16.msra.mxu0 %v2456_v28  ;;  %1072 = vmatprep.subr.bf16.mxu1 %v2656_v0  ;;  %v2552_v28 = vld [vmem:[%s3520_s0 + $0x1c8] ss:$16 sps:$4 sm:$0xff]  }
  0x34   :  { %1361 = vmatprep.subr.bf16.mxu0 %v2656_v0 }
  0x36   :  { %1073 = vmatpush1.bf16.msra.mxu1 %v2457_v29  ;;  %v2553_v29 = vld [vmem:[%s3520_s0 + $0x1e4] ss:$16 sps:$4 sm:$0xff]  }
  0x37   :  { %1362 = vmatpush1.bf16.msra.mxu0 %v2458_v30  ;;  %1074 = vmatprep.subr.bf16.mxu1 %v2656_v0  ;;  %v2555_v30 = vld [vmem:[%s3520_s0 + $0x1ec] ss:$16 sps:$4 sm:$0xff]  }
  0x38   :  { %1363 = vmatprep.subr.bf16.mxu0 %v2656_v0 }
  0x3a   :  { %1075 = vmatpush1.bf16.msra.mxu1 %v2459_v31  ;;  %v2557_v31 = vld [vmem:[%s3520_s0 + $0x1e0] ss:$16 sps:$4 sm:$0xff]  }
  0x3b   :  { %1364 = vmatpush1.bf16.msra.mxu0 %v2460_v32  ;;  %1076 = vmatprep.subr.bf16.mxu1 %v2656_v0  ;;  %v2558_v32 = vld [vmem:[%s3520_s0 + $0x1e8] ss:$16 sps:$4 sm:$0xff]  }
  0x3c   :  { %1365 = vmatprep.subr.bf16.mxu0 %v2656_v0  ;;  %v2510_v0 = vld [vmem:[%s3520_s0 + $0xe8] ss:$16 sps:$4 sm:$0xff]  }
  0x3e   :  { %1077 = vmatpush1.bf16.msra.mxu1 %v2461_v33  ;;  %v2559_v33 = vld [vmem:[%s3520_s0 + $0x204] ss:$16 sps:$4 sm:$0xff]  }
  0x3f   :  { %1366 = vmatpush1.bf16.msra.mxu0 %v2462_v34  ;;  %v2561_v34 = vld [vmem:[%s3520_s0 + $0x20c] ss:$16 sps:$4 sm:$0xff]  }
  0x41   :  { %1079 = vmatmul.mubr.bf16.vlgmr.msra.gmra.mrb[0].mxu1 %v2463_v35  ;;  %v2563_v35 = vld [vmem:[%s3520_s0 + $0x200] ss:$16 sps:$4 sm:$0xff]  }
  0x42   :  { %1368 = vmatmul.mubr.bf16.vlgmr.msra.gmra.mrb[0].mxu0 %v2466_v36  ;;  %1086 = vmatprep.mubr.bf16.mxu1 %v2469_v37  ;;  %v2564_v36 = vld [vmem:[%s3520_s0 + $0x208] ss:$16 sps:$4 sm:$0xff]   ;;  %v2565_v37 = vld [vmem:[%s3520_s0 + $0x224] ss:$16 sps:$4 sm:$0xff]  }
  0x43   :  { %1375 = vmatprep.mubr.bf16.mxu0 %v2471_v38  ;;  %v2567_v38 = vld [vmem:[%s3520_s0 + $0x22c] ss:$16 sps:$4 sm:$0xff]  }
  0x49   :  { %1087 = vmatmul.mubr.bf16.gmra.mrb[4].mxu1 %v2473_v39  ;;  %v2569_v39 = vld [vmem:[%s3520_s0 + $0x220] ss:$16 sps:$4 sm:$0xff]  }
  0x4a   :  { %1376 = vmatmul.mubr.bf16.gmra.mrb[4].mxu0 %v2474_v40  ;;  %1094 = vmatprep.mubr.bf16.mxu1 %v2475_v41  ;;  %v2570_v40 = vld [vmem:[%s3520_s0 + $0x228] ss:$16 sps:$4 sm:$0xff]   ;;  %v2571_v41 = vld [vmem:[%s3520_s0 + $0x244] ss:$16 sps:$4 sm:$0xff]  }
  0x4b   :  { %1383 = vmatprep.mubr.bf16.mxu0 %v2477_v42  ;;  %v2573_v42 = vld [vmem:[%s3520_s0 + $0x24c] ss:$16 sps:$4 sm:$0xff]  }
  0x51   :  { %1095 = vmatmul.mubr.bf16.gmra.mrb[8].mxu1 %v2479_v43  ;;  %v2575_v43 = vld [vmem:[%s3520_s0 + $0x240] ss:$16 sps:$4 sm:$0xff]  }
  0x52   :  { %1384 = vmatmul.mubr.bf16.gmra.mrb[8].mxu0 %v2480_v44  ;;  %1102 = vmatprep.mubr.bf16.mxu1 %v2481_v45  ;;  %v2576_v44 = vld [vmem:[%s3520_s0 + $0x248] ss:$16 sps:$4 sm:$0xff]   ;;  %v2577_v45 = vld [vmem:[%s3520_s0 + $0x264] ss:$16 sps:$4 sm:$0xff]  }
  0x53   :  { %1391 = vmatprep.mubr.bf16.mxu0 %v2483_v46  ;;  %v2579_v46 = vld [vmem:[%s3520_s0 + $0x26c] ss:$16 sps:$4 sm:$0xff]  }
  0x59   :  { %1103 = vmatmul.mubr.bf16.gmra.mrb[12].mxu1 %v2485_v47  ;;  %v2581_v47 = vld [vmem:[%s3520_s0 + $0x260] ss:$16 sps:$4 sm:$0xff]  }
  0x5a   :  { %1392 = vmatmul.mubr.bf16.gmra.mrb[12].mxu0 %v2486_v48  ;;  %1110 = vmatprep.mubr.bf16.mxu1 %v2487_v49  ;;  %v2582_v48 = vld [vmem:[%s3520_s0 + $0x268] ss:$16 sps:$4 sm:$0xff]   ;;  %v2583_v49 = vld [vmem:[%s3520_s0 + $0x284] ss:$16 sps:$4 sm:$0xff]  }
  0x5b   :  { %1399 = vmatprep.mubr.bf16.mxu0 %v2489_v50  ;;  %v2585_v50 = vld [vmem:[%s3520_s0 + $0x28c] ss:$16 sps:$4 sm:$0xff]  }
  0x61   :  { %1111 = vmatmul.mubr.bf16.gmra.mrb[16].mxu1 %v2491_v51  ;;  %v2587_v51 = vld [vmem:[%s3520_s0 + $0x280] ss:$16 sps:$4 sm:$0xff]  }
  0x62   :  { %1400 = vmatmul.mubr.bf16.gmra.mrb[16].mxu0 %v2492_v52  ;;  %1118 = vmatprep.mubr.bf16.mxu1 %v2493_v53  ;;  %v2588_v52 = vld [vmem:[%s3520_s0 + $0x288] ss:$16 sps:$4 sm:$0xff]   ;;  %v2589_v53 = vld [vmem:[%s3520_s0 + $0x2a4] ss:$16 sps:$4 sm:$0xff]  }
  0x63   :  { %1407 = vmatprep.mubr.bf16.mxu0 %v2495_v54  ;;  %v2591_v54 = vld [vmem:[%s3520_s0 + $0x2ac] ss:$16 sps:$4 sm:$0xff]  }
  0x69   :  { %1119 = vmatmul.mubr.bf16.gmra.mrb[20].mxu1 %v2497_v55  ;;  %v2593_v55 = vld [vmem:[%s3520_s0 + $0x2a0] ss:$16 sps:$4 sm:$0xff]  }
  0x6a   :  { %1408 = vmatmul.mubr.bf16.gmra.mrb[20].mxu0 %v2498_v56  ;;  %1126 = vmatprep.mubr.bf16.mxu1 %v2499_v57  ;;  %v2594_v56 = vld [vmem:[%s3520_s0 + $0x2a8] ss:$16 sps:$4 sm:$0xff]   ;;  %v2595_v57 = vld [vmem:[%s3520_s0 + $0x2c4] ss:$16 sps:$4 sm:$0xff]  }
  0x6b   :  { %1415 = vmatprep.mubr.bf16.mxu0 %v2501_v58  ;;  %v2597_v58 = vld [vmem:[%s3520_s0 + $0x2cc] ss:$16 sps:$4 sm:$0xff]  }
  0x71   :  { %1127 = vmatmul.mubr.bf16.gmra.mrb[24].mxu1 %v2503_v59  ;;  %v2599_v59 = vld [vmem:[%s3520_s0 + $0x2c0] ss:$16 sps:$4 sm:$0xff]  }
  0x72   :  { %1416 = vmatmul.mubr.bf16.gmra.mrb[24].mxu0 %v2504_v60  ;;  %1134 = vmatprep.mubr.bf16.mxu1 %v2505_v61  ;;  %v2600_v60 = vld [vmem:[%s3520_s0 + $0x2c8] ss:$16 sps:$4 sm:$0xff]   ;;  %v2601_v61 = vld [vmem:[%s3520_s0 + $0x2e4] ss:$16 sps:$4 sm:$0xff]  }
  0x73   :  { %1423 = vmatprep.mubr.bf16.mxu0 %v2507_v62  ;;  %v2603_v62 = vld [vmem:[%s3520_s0 + $0x2ec] ss:$16 sps:$4 sm:$0xff]  }
  0x79   :  { %1135 = vmatmul.mubr.bf16.gmra.mrb[28].mxu1 %v2509_v63  ;;  %v2605_v63 = vld [vmem:[%s3520_s0 + $0x2e0] ss:$16 sps:$4 sm:$0xff]  }
  0x7a   :  { %1424 = vmatmul.mubr.bf16.gmra.mrb[28].mxu0 %v2510_v0  ;;  %1142 = vmatprep.mubr.bf16.mxu1 %v2511_v1  ;;  %v2606_v0 = vld [vmem:[%s3520_s0 + $0x2e8] ss:$16 sps:$4 sm:$0xff]   ;;  %v2607_v1 = vld [vmem:[%s3520_s0 + $0x304] ss:$16 sps:$4 sm:$0xff]  }
  0x7b   :  { %1431 = vmatprep.mubr.bf16.mxu0 %v2513_v2  ;;  %v2609_v2 = vld [vmem:[%s3520_s0 + $0x30c] ss:$16 sps:$4 sm:$0xff]  }
  0x81   :  { %1143 = vmatmul.mubr.bf16.gmra.mrb[32].mxu1 %v2515_v3  ;;  %v2611_v3 = vld [vmem:[%s3520_s0 + $0x300] ss:$16 sps:$4 sm:$0xff]  }
  0x82   :  { %1432 = vmatmul.mubr.bf16.gmra.mrb[32].mxu0 %v2516_v4  ;;  %1150 = vmatprep.mubr.bf16.mxu1 %v2517_v5  ;;  %v2612_v4 = vld [vmem:[%s3520_s0 + $0x308] ss:$16 sps:$4 sm:$0xff]   ;;  %v2613_v5 = vld [vmem:[%s3520_s0 + $0x324] ss:$16 sps:$4 sm:$0xff]  }
  0x83   :  { %1439 = vmatprep.mubr.bf16.mxu0 %v2519_v6  ;;  %v2615_v6 = vld [vmem:[%s3520_s0 + $0x32c] ss:$16 sps:$4 sm:$0xff]  }
  0x89   :  { %1151 = vmatmul.mubr.bf16.gmra.mrb[36].mxu1 %v2521_v7  ;;  %v2617_v7 = vld [vmem:[%s3520_s0 + $0x320] ss:$16 sps:$4 sm:$0xff]  }
  0x8a   :  { %1440 = vmatmul.mubr.bf16.gmra.mrb[36].mxu0 %v2522_v8  ;;  %1158 = vmatprep.mubr.bf16.mxu1 %v2523_v9  ;;  %v2618_v8 = vld [vmem:[%s3520_s0 + $0x328] ss:$16 sps:$4 sm:$0xff]   ;;  %v2619_v9 = vld [vmem:[%s3520_s0 + $0x344] ss:$16 sps:$4 sm:$0xff]  }
  0x8b   :  { %1447 = vmatprep.mubr.bf16.mxu0 %v2525_v10  ;;  %v2621_v10 = vld [vmem:[%s3520_s0 + $0x34c] ss:$16 sps:$4 sm:$0xff]  }
  0x91   :  { %1159 = vmatmul.mubr.bf16.gmra.mrb[40].mxu1 %v2527_v11  ;;  %v2623_v11 = vld [vmem:[%s3520_s0 + $0x340] ss:$16 sps:$4 sm:$0xff]  }
  0x92   :  { %1448 = vmatmul.mubr.bf16.gmra.mrb[40].mxu0 %v2528_v12  ;;  %1166 = vmatprep.mubr.bf16.mxu1 %v2529_v13  ;;  %v2624_v12 = vld [vmem:[%s3520_s0 + $0x348] ss:$16 sps:$4 sm:$0xff]   ;;  %v2625_v13 = vld [vmem:[%s3520_s0 + $0x364] ss:$16 sps:$4 sm:$0xff]  }
  0x93   :  { %1455 = vmatprep.mubr.bf16.mxu0 %v2531_v14  ;;  %v2627_v14 = vld [vmem:[%s3520_s0 + $0x36c] ss:$16 sps:$4 sm:$0xff]  }
  0x99   :  { %1167 = vmatmul.mubr.bf16.gmra.mrb[44].mxu1 %v2533_v15  ;;  %v3138_v15 = vld [vmem:[%s3521_s2] ss:$0 sm:$0xff] }
  0x9a   :  { %1456 = vmatmul.mubr.bf16.gmra.mrb[44].mxu0 %v2534_v16  ;;  %1174 = vmatprep.mubr.bf16.mxu1 %v2535_v17 }
  0x9b   :  { %1463 = vmatprep.mubr.bf16.mxu0 %v2537_v18 }
  0xa1   :  { %1175 = vmatmul.mubr.bf16.gmra.mrb[48].mxu1 %v2539_v19 }
  0xa2   :  { %1464 = vmatmul.mubr.bf16.gmra.mrb[48].mxu0 %v2540_v20  ;;  %1182 = vmatprep.mubr.bf16.mxu1 %v2541_v21  ;;  %v2629_v20 = vld [vmem:[%s3520_s0 + $0x360] ss:$16 sps:$4 sm:$0xff]  }
  0xa3   :  { %1471 = vmatprep.mubr.bf16.mxu0 %v2543_v22 }
  0xa9   :  { %1183 = vmatmul.mubr.bf16.gmra.mrb[52].mxu1 %v2545_v23  ;;  %v2630_v23 = vld [vmem:[%s3520_s0 + $0x368] ss:$16 sps:$4 sm:$0xff]  }
  0xaa   :  { %1472 = vmatmul.mubr.bf16.gmra.mrb[52].mxu0 %v2546_v24  ;;  %1190 = vmatprep.mubr.bf16.mxu1 %v2547_v25  ;;  %v2631_v24 = vld [vmem:[%s3520_s0 + $0x384] ss:$16 sps:$4 sm:$0xff]  }
  0xab   :  { %1479 = vmatprep.mubr.bf16.mxu0 %v2549_v26 }
  0xb1   :  { %1191 = vmatmul.mubr.bf16.gmra.mrb[56].mxu1 %v2551_v27 }
  0xb2   :  { %1480 = vmatmul.mubr.bf16.gmra.mrb[56].mxu0 %v2552_v28  ;;  %1198 = vmatprep.mubr.bf16.mxu1 %v2553_v29  ;;  %v2633_v29 = vld [vmem:[%s3520_s0 + $0x38c] ss:$16 sps:$4 sm:$0xff]  }
  0xb3   :  { %1487 = vmatprep.mubr.bf16.mxu0 %v2555_v30 }
  0xb9   :  { %1199 = vmatmul.mubr.bf16.gmra.mrb[60].mxu1 %v2557_v31 }
  0xba   :  { %1488 = vmatmul.mubr.bf16.gmra.mrb[60].mxu0 %v2558_v32  ;;  %1206 = vmatprep.mubr.bf16.mxu1 %v2559_v33 }
  0xbb   :  { %1495 = vmatprep.mubr.bf16.mxu0 %v2561_v34 }
  0xc1   :  { %1207 = vmatmul.mubr.bf16.gmra.mrb[64].mxu1 %v2563_v35 }
  0xc2   :  { %1496 = vmatmul.mubr.bf16.gmra.mrb[64].mxu0 %v2564_v36  ;;  %1214 = vmatprep.mubr.bf16.mxu1 %v2565_v37 }
  0xc3   :  { %1503 = vmatprep.mubr.bf16.mxu0 %v2567_v38 }
  0xc9   :  { %1215 = vmatmul.mubr.bf16.gmra.mrb[68].mxu1 %v2569_v39 }
  0xca   :  { %1504 = vmatmul.mubr.bf16.gmra.mrb[68].mxu0 %v2570_v40  ;;  %1222 = vmatprep.mubr.bf16.mxu1 %v2571_v41  ;;  %v2635_v40 = vld [vmem:[%s3520_s0 + $0x380] ss:$16 sps:$4 sm:$0xff]  }
  0xcb   :  { %1511 = vmatprep.mubr.bf16.mxu0 %v2573_v42 }
  0xd1   :  { %1223 = vmatmul.mubr.bf16.gmra.mrb[72].mxu1 %v2575_v43  ;;  %v2636_v43 = vld [vmem:[%s3520_s0 + $0x388] ss:$16 sps:$4 sm:$0xff]  }
  0xd2   :  { %1512 = vmatmul.mubr.bf16.gmra.mrb[72].mxu0 %v2576_v44  ;;  %1230 = vmatprep.mubr.bf16.mxu1 %v2577_v45  ;;  %v2637_v44 = vld [vmem:[%s3520_s0 + $0x3a4] ss:$16 sps:$4 sm:$0xff]  }
  0xd3   :  { %1519 = vmatprep.mubr.bf16.mxu0 %v2579_v46 }
  0xd9   :  { %1231 = vmatmul.mubr.bf16.gmra.mrb[76].mxu1 %v2581_v47 }
  0xda   :  { %1520 = vmatmul.mubr.bf16.gmra.mrb[76].mxu0 %v2582_v48  ;;  %1238 = vmatprep.mubr.bf16.mxu1 %v2583_v49  ;;  %v2639_v49 = vld [vmem:[%s3520_s0 + $0x3ac] ss:$16 sps:$4 sm:$0xff]  }
  0xdb   :  { %1527 = vmatprep.mubr.bf16.mxu0 %v2585_v50 }
  0xe1   :  { %1239 = vmatmul.mubr.bf16.gmra.mrb[80].mxu1 %v2587_v51 }
  0xe2   :  { %1528 = vmatmul.mubr.bf16.gmra.mrb[80].mxu0 %v2588_v52  ;;  %1246 = vmatprep.mubr.bf16.mxu1 %v2589_v53 }
  0xe3   :  { %1535 = vmatprep.mubr.bf16.mxu0 %v2591_v54 }
  0xe9   :  { %1247 = vmatmul.mubr.bf16.gmra.mrb[84].mxu1 %v2593_v55 }
  0xea   :  { %1536 = vmatmul.mubr.bf16.gmra.mrb[84].mxu0 %v2594_v56  ;;  %1254 = vmatprep.mubr.bf16.mxu1 %v2595_v57 }
  0xeb   :  { %1543 = vmatprep.mubr.bf16.mxu0 %v2597_v58 }
  0xf1   :  { %1255 = vmatmul.mubr.bf16.gmra.mrb[88].mxu1 %v2599_v59 }
  0xf2   :  { %1544 = vmatmul.mubr.bf16.gmra.mrb[88].mxu0 %v2600_v60  ;;  %1262 = vmatprep.mubr.bf16.mxu1 %v2601_v61  ;;  %v2641_v60 = vld [vmem:[%s3520_s0 + $0x3a0] ss:$16 sps:$4 sm:$0xff]  }
  0xf3   :  { %1551 = vmatprep.mubr.bf16.mxu0 %v2603_v62 }
  0xf9   :  { %1263 = vmatmul.mubr.bf16.gmra.mrb[92].mxu1 %v2605_v63  ;;  %v2642_v63 = vld [vmem:[%s3520_s0 + $0x3a8] ss:$16 sps:$4 sm:$0xff]  }
  0xfa   :  { %1552 = vmatmul.mubr.bf16.gmra.mrb[92].mxu0 %v2606_v0  ;;  %1270 = vmatprep.mubr.bf16.mxu1 %v2607_v1  ;;  %v2643_v0 = vld [vmem:[%s3520_s0 + $0x3c4] ss:$16 sps:$4 sm:$0xff]  }
  0xfb   :  { %1559 = vmatprep.mubr.bf16.mxu0 %v2609_v2 }
 0x101   :  { %1271 = vmatmul.mubr.bf16.gmra.mrb[96].mxu1 %v2611_v3 }
 0x102   :  { %1560 = vmatmul.mubr.bf16.gmra.mrb[96].mxu0 %v2612_v4  ;;  %1278 = vmatprep.mubr.bf16.mxu1 %v2613_v5  ;;  %v2645_v5 = vld [vmem:[%s3520_s0 + $0x3cc] ss:$16 sps:$4 sm:$0xff]  }
 0x103   :  { %1567 = vmatprep.mubr.bf16.mxu0 %v2615_v6 }
 0x109   :  { %1279 = vmatmul.mubr.bf16.gmra.mrb[100].mxu1 %v2617_v7 }
 0x10a   :  { %1568 = vmatmul.mubr.bf16.gmra.mrb[100].mxu0 %v2618_v8  ;;  %1286 = vmatprep.mubr.bf16.mxu1 %v2619_v9 }
 0x10b   :  { %1575 = vmatprep.mubr.bf16.mxu0 %v2621_v10 }
 0x111   :  { %1287 = vmatmul.mubr.bf16.gmra.mrb[104].mxu1 %v2623_v11 }
 0x112   :  { %1576 = vmatmul.mubr.bf16.gmra.mrb[104].mxu0 %v2624_v12  ;;  %1294 = vmatprep.mubr.bf16.mxu1 %v2625_v13 }
 0x113   :  { %1583 = vmatprep.mubr.bf16.mxu0 %v2627_v14 }
 0x114   :  { %v1080_v16 = vpop.f32.mrb[0].mxu1 }
 0x115   :  { %v1081_v17 = vadd.f32 %v3138_v15, %v1080_v16  ;;  %v1369_v18 = vpop.f32.mrb[0].mxu0  ;;  %v1082_v19 = vpop.f32.mrb[1].mxu1 }
 0x116   :  { %v1371_v21 = vpop.f32.mrb[1].mxu0  ;;  %v1083_v22 = vpop.f32.mrb[2].mxu1 }
 0x117   :  { %v1370_v25 = vadd.f32 %v1369_v18, %v1081_v17  ;;  %v1084_v26 = vadd.f32 %v3138_v15, %v1083_v22  ;;  %v1372_v27 = vpop.f32.mrb[2].mxu0  ;;  %v1085_v28 = vpop.f32.mrb[3].mxu1  ;;  %v2647_v17 = vld [vmem:[%s3520_s0 + $0x3c0] ss:$16 sps:$4 sm:$0xff]   ;;  %v2649_v21 = vld [vmem:[%s3520_s0 + $0x3e4] ss:$16 sps:$4 sm:$0xff]  }
 0x118   :  { %v1374_v30 = vpop.f32.mrb[3].mxu0 }
 0x119   :  { %v1624_v31 = vmax.f32 %v1370_v25, 0.0  ;;  %v1373_v32 = vadd.f32 %v1372_v27, %v1084_v26  ;;  %1295 = vmatmul.mubr.bf16.gmra.mrb[108].mxu1 %v2629_v20  ;;  %v2648_v20 = vld [vmem:[%s3520_s0 + $0x3c8] ss:$16 sps:$4 sm:$0xff]   ;;  %v2651_v26 = vld [vmem:[%s3520_s0 + $0x3ec] ss:$16 sps:$4 sm:$0xff]  }
 0x11a   :  { %1584 = vmatmul.mubr.bf16.gmra.mrb[108].mxu0 %v2630_v23  ;;  %1302 = vmatprep.mubr.bf16.mxu1 %v2631_v24 }
 0x11b   :  { %v2238_v33 = vpack.c.bf16 %v1624_v31, %v1624_v31  ;;  %v1625_v34 = vmax.f32 %v1373_v32, 0.0  ;;  %1591 = vmatprep.mubr.bf16.mxu0 %v2633_v29 }
 0x11c   :  { %v1088_v35 = vpop.f32.mrb[4].mxu1 }
 0x11d   :  { %1945 = vst.msk [vmem:[%s3522_s3] sm:$0xf] %vm1944_vm0, %v2238_v33  ;;  %v2239_v36 = vpack.c.bf16 %v1625_v34, %v1625_v34  ;;  %v1089_v37 = vadd.f32 %v3138_v15, %v1088_v35  ;;  %v1377_v38 = vpop.f32.mrb[4].mxu0  ;;  %v1090_v39 = vpop.f32.mrb[5].mxu1 }
 0x11e   :  { %v1379_v41 = vpop.f32.mrb[5].mxu0  ;;  %v1091_v42 = vpop.f32.mrb[6].mxu1 }
 0x11f   :  { %1946 = vst.msk [vmem:[%s3522_s3 + $0x4] sm:$0xf] %vm1944_vm0, %v2239_v36  ;;  %v1378_v45 = vadd.f32 %v1377_v38, %v1089_v37  ;;  %v1092_v46 = vadd.f32 %v3138_v15, %v1091_v42  ;;  %v1380_v47 = vpop.f32.mrb[6].mxu0  ;;  %v1093_v48 = vpop.f32.mrb[7].mxu1  ;;  %v2653_v37 = vld [vmem:[%s3520_s0 + $0x3e0] ss:$16 sps:$4 sm:$0xff]  }
 0x120   :  { %v1382_v50 = vpop.f32.mrb[7].mxu0 }
 0x121   :  { %v1626_v51 = vmax.f32 %v1378_v45, 0.0  ;;  %v1381_v52 = vadd.f32 %v1380_v47, %v1092_v46  ;;  %1303 = vmatmul.mubr.bf16.gmra.mrb[112].mxu1 %v2635_v40  ;;  %v2654_v40 = vld [vmem:[%s3520_s0 + $0x3e8] ss:$16 sps:$4 sm:$0xff]  }
 0x122   :  { %1592 = vmatmul.mubr.bf16.gmra.mrb[112].mxu0 %v2636_v43  ;;  %1310 = vmatprep.mubr.bf16.mxu1 %v2637_v44 }
 0x123   :  { %v2240_v53 = vpack.c.bf16 %v1626_v51, %v1626_v51  ;;  %v1627_v54 = vmax.f32 %v1381_v52, 0.0  ;;  %1599 = vmatprep.mubr.bf16.mxu0 %v2639_v49 }
 0x124   :  { %v1096_v55 = vpop.f32.mrb[8].mxu1 }
 0x125   :  { %1947 = vst.msk [vmem:[%s3522_s3 + $0x8] sm:$0xf] %vm1944_vm0, %v2240_v53  ;;  %v2241_v56 = vpack.c.bf16 %v1627_v54, %v1627_v54  ;;  %v1097_v57 = vadd.f32 %v3138_v15, %v1096_v55  ;;  %v1385_v58 = vpop.f32.mrb[8].mxu0  ;;  %v1098_v59 = vpop.f32.mrb[9].mxu1 }
 0x126   :  { %v1387_v61 = vpop.f32.mrb[9].mxu0  ;;  %v1099_v62 = vpop.f32.mrb[10].mxu1 }
 0x127   :  { %1948 = vst.msk [vmem:[%s3522_s3 + $0xc] sm:$0xf] %vm1944_vm0, %v2241_v56  ;;  %v1386_v1 = vadd.f32 %v1385_v58, %v1097_v57  ;;  %v1100_v2 = vadd.f32 %v3138_v15, %v1099_v62  ;;  %v1388_v3 = vpop.f32.mrb[10].mxu0  ;;  %v1101_v4 = vpop.f32.mrb[11].mxu1 }
 0x128   :  { %v1390_v6 = vpop.f32.mrb[11].mxu0 }
 0x129   :  { %v1628_v7 = vmax.f32 %v1386_v1, 0.0  ;;  %v1389_v8 = vadd.f32 %v1388_v3, %v1100_v2  ;;  %1311 = vmatmul.mubr.bf16.gmra.mrb[116].mxu1 %v2641_v60 }
 0x12a   :  { %1600 = vmatmul.mubr.bf16.gmra.mrb[116].mxu0 %v2642_v63  ;;  %1318 = vmatprep.mubr.bf16.mxu1 %v2643_v0 }
 0x12b   :  { %v2242_v9 = vpack.c.bf16 %v1628_v7, %v1628_v7  ;;  %v1629_v10 = vmax.f32 %v1389_v8, 0.0  ;;  %1607 = vmatprep.mubr.bf16.mxu0 %v2645_v5 }
 0x12c   :  { %v1104_v11 = vpop.f32.mrb[12].mxu1 }
 0x12d   :  { %1949 = vst.msk [vmem:[%s3522_s3 + $0x10] sm:$0xf] %vm1944_vm0, %v2242_v9  ;;  %v2243_v12 = vpack.c.bf16 %v1629_v10, %v1629_v10  ;;  %v1105_v13 = vadd.f32 %v3138_v15, %v1104_v11  ;;  %v1393_v14 = vpop.f32.mrb[12].mxu0  ;;  %v1106_v16 = vpop.f32.mrb[13].mxu1 }
 0x12e   :  { %v1395_v18 = vpop.f32.mrb[13].mxu0  ;;  %v1107_v19 = vpop.f32.mrb[14].mxu1 }
 0x12f   :  { %1950 = vst.msk [vmem:[%s3522_s3 + $0x14] sm:$0xf] %vm1944_vm0, %v2243_v12  ;;  %v1394_v22 = vadd.f32 %v1393_v14, %v1105_v13  ;;  %v1108_v23 = vadd.f32 %v3138_v15, %v1107_v19  ;;  %v1396_v24 = vpop.f32.mrb[14].mxu0  ;;  %v1109_v25 = vpop.f32.mrb[15].mxu1 }
 0x130   :  { %v1398_v27 = vpop.f32.mrb[15].mxu0 }
 0x131   :  { %v1630_v28 = vmax.f32 %v1394_v22, 0.0  ;;  %v1397_v29 = vadd.f32 %v1396_v24, %v1108_v23  ;;  %1319 = vmatmul.mubr.bf16.gmra.mrb[120].mxu1 %v2647_v17 }
 0x132   :  { %1608 = vmatmul.mubr.bf16.gmra.mrb[120].mxu0 %v2648_v20  ;;  %1326 = vmatprep.mubr.bf16.mxu1 %v2649_v21 }
 0x133   :  { %v2244_v30 = vpack.c.bf16 %v1630_v28, %v1630_v28  ;;  %v1631_v31 = vmax.f32 %v1397_v29, 0.0  ;;  %1615 = vmatprep.mubr.bf16.mxu0 %v2651_v26 }
 0x134   :  { %v1112_v32 = vpop.f32.mrb[16].mxu1 }
 0x135   :  { %1951 = vst.msk [vmem:[%s3522_s3 + $0x18] sm:$0xf] %vm1944_vm0, %v2244_v30  ;;  %v2245_v33 = vpack.c.bf16 %v1631_v31, %v1631_v31  ;;  %v1113_v34 = vadd.f32 %v3138_v15, %v1112_v32  ;;  %v1401_v35 = vpop.f32.mrb[16].mxu0  ;;  %v1114_v36 = vpop.f32.mrb[17].mxu1 }
 0x136   :  { %v1403_v38 = vpop.f32.mrb[17].mxu0  ;;  %v1115_v39 = vpop.f32.mrb[18].mxu1 }
 0x137   :  { %1952 = vst.msk [vmem:[%s3522_s3 + $0x1c] sm:$0xf] %vm1944_vm0, %v2245_v33  ;;  %v1402_v41 = vadd.f32 %v1401_v35, %v1113_v34  ;;  %v1116_v42 = vadd.f32 %v3138_v15, %v1115_v39  ;;  %v1404_v43 = vpop.f32.mrb[18].mxu0  ;;  %v1117_v44 = vpop.f32.mrb[19].mxu1 }
 0x138   :  { %v1406_v45 = vpop.f32.mrb[19].mxu0 }
 0x139   :  { %v1632_v46 = vmax.f32 %v1402_v41, 0.0  ;;  %v1405_v47 = vadd.f32 %v1404_v43, %v1116_v42  ;;  %1327 = vmatmul.mubr.bf16.gmra.mrb[124].mxu1 %v2653_v37 }
 0x13a   :  { %1616 = vmatmul.mubr.bf16.gmra.mrb[124].mxu0 %v2654_v40 }
 0x13b   :  { %v2246_v48 = vpack.c.bf16 %v1632_v46, %v1632_v46  ;;  %v1633_v49 = vmax.f32 %v1405_v47, 0.0 }
 0x13c   :  { %v1120_v50 = vpop.f32.mrb[20].mxu1 }
 0x13d   :  { %1953 = vst.msk [vmem:[%s3522_s3 + $0x20] sm:$0xf] %vm1944_vm0, %v2246_v48  ;;  %v2247_v51 = vpack.c.bf16 %v1633_v49, %v1633_v49  ;;  %v1121_v52 = vadd.f32 %v3138_v15, %v1120_v50  ;;  %v1409_v53 = vpop.f32.mrb[20].mxu0  ;;  %v1122_v54 = vpop.f32.mrb[21].mxu1 }
 0x13e   :  { %v1411_v55 = vpop.f32.mrb[21].mxu0  ;;  %v1123_v56 = vpop.f32.mrb[22].mxu1 }
 0x13f   :  { %1954 = vst.msk [vmem:[%s3522_s3 + $0x24] sm:$0xf] %vm1944_vm0, %v2247_v51  ;;  %v1410_v57 = vadd.f32 %v1409_v53, %v1121_v52  ;;  %v1124_v58 = vadd.f32 %v3138_v15, %v1123_v56  ;;  %v1412_v59 = vpop.f32.mrb[22].mxu0  ;;  %v1125_v60 = vpop.f32.mrb[23].mxu1 }
 0x140   :  { %v1414_v61 = vpop.f32.mrb[23].mxu0 }
 0x141   :  { %v1634_v62 = vmax.f32 %v1410_v57, 0.0  ;;  %v1413_v63 = vadd.f32 %v1412_v59, %v1124_v58 }
 0x143   :  { %v2248_v0 = vpack.c.bf16 %v1634_v62, %v1634_v62  ;;  %v1635_v1 = vmax.f32 %v1413_v63, 0.0 }
 0x144   :  { %v1128_v2 = vpop.f32.mrb[24].mxu1 }
 0x145   :  { %1955 = vst.msk [vmem:[%s3522_s3 + $0x28] sm:$0xf] %vm1944_vm0, %v2248_v0  ;;  %v2249_v3 = vpack.c.bf16 %v1635_v1, %v1635_v1  ;;  %v1129_v4 = vadd.f32 %v3138_v15, %v1128_v2  ;;  %v1417_v5 = vpop.f32.mrb[24].mxu0  ;;  %v1130_v6 = vpop.f32.mrb[25].mxu1 }
 0x146   :  { %v1419_v7 = vpop.f32.mrb[25].mxu0  ;;  %v1131_v8 = vpop.f32.mrb[26].mxu1 }
 0x147   :  { %1956 = vst.msk [vmem:[%s3522_s3 + $0x2c] sm:$0xf] %vm1944_vm0, %v2249_v3  ;;  %v1418_v9 = vadd.f32 %v1417_v5, %v1129_v4  ;;  %v1132_v10 = vadd.f32 %v3138_v15, %v1131_v8  ;;  %v1420_v11 = vpop.f32.mrb[26].mxu0  ;;  %v1133_v12 = vpop.f32.mrb[27].mxu1 }
 0x148   :  { %v1422_v13 = vpop.f32.mrb[27].mxu0 }
 0x149   :  { %v1636_v14 = vmax.f32 %v1418_v9, 0.0  ;;  %v1421_v16 = vadd.f32 %v1420_v11, %v1132_v10 }
 0x14b   :  { %v2250_v17 = vpack.c.bf16 %v1636_v14, %v1636_v14  ;;  %v1637_v18 = vmax.f32 %v1421_v16, 0.0 }
 0x14c   :  { %v1136_v19 = vpop.f32.mrb[28].mxu1 }
 0x14d   :  { %1957 = vst.msk [vmem:[%s3522_s3 + $0x30] sm:$0xf] %vm1944_vm0, %v2250_v17  ;;  %v2251_v20 = vpack.c.bf16 %v1637_v18, %v1637_v18  ;;  %v1137_v21 = vadd.f32 %v3138_v15, %v1136_v19  ;;  %v1425_v22 = vpop.f32.mrb[28].mxu0  ;;  %v1138_v23 = vpop.f32.mrb[29].mxu1 }
 0x14e   :  { %v1427_v24 = vpop.f32.mrb[29].mxu0  ;;  %v1139_v25 = vpop.f32.mrb[30].mxu1 }
 0x14f   :  { %1958 = vst.msk [vmem:[%s3522_s3 + $0x34] sm:$0xf] %vm1944_vm0, %v2251_v20  ;;  %v1426_v26 = vadd.f32 %v1425_v22, %v1137_v21  ;;  %v1140_v27 = vadd.f32 %v3138_v15, %v1139_v25  ;;  %v1428_v28 = vpop.f32.mrb[30].mxu0  ;;  %v1141_v29 = vpop.f32.mrb[31].mxu1 }
 0x150   :  { %v1430_v30 = vpop.f32.mrb[31].mxu0 }
 0x151   :  { %v1638_v31 = vmax.f32 %v1426_v26, 0.0  ;;  %v1429_v32 = vadd.f32 %v1428_v28, %v1140_v27 }
 0x153   :  { %v2252_v33 = vpack.c.bf16 %v1638_v31, %v1638_v31  ;;  %v1639_v34 = vmax.f32 %v1429_v32, 0.0 }
 0x154   :  { %v1144_v35 = vpop.f32.mrb[32].mxu1 }
 0x155   :  { %1959 = vst.msk [vmem:[%s3522_s3 + $0x38] sm:$0xf] %vm1944_vm0, %v2252_v33  ;;  %v2253_v36 = vpack.c.bf16 %v1639_v34, %v1639_v34  ;;  %v1145_v37 = vadd.f32 %v3138_v15, %v1144_v35  ;;  %v1433_v38 = vpop.f32.mrb[32].mxu0  ;;  %v1146_v39 = vpop.f32.mrb[33].mxu1 }
 0x156   :  { %v1435_v40 = vpop.f32.mrb[33].mxu0  ;;  %v1147_v41 = vpop.f32.mrb[34].mxu1 }
 0x157   :  { %1960 = vst.msk [vmem:[%s3522_s3 + $0x3c] sm:$0xf] %vm1944_vm0, %v2253_v36  ;;  %v1434_v42 = vadd.f32 %v1433_v38, %v1145_v37  ;;  %v1148_v43 = vadd.f32 %v3138_v15, %v1147_v41  ;;  %v1436_v44 = vpop.f32.mrb[34].mxu0  ;;  %v1149_v45 = vpop.f32.mrb[35].mxu1 }
 0x158   :  { %v1438_v46 = vpop.f32.mrb[35].mxu0 }
 0x159   :  { %v1640_v47 = vmax.f32 %v1434_v42, 0.0  ;;  %v1437_v48 = vadd.f32 %v1436_v44, %v1148_v43 }
 0x15b   :  { %v2254_v49 = vpack.c.bf16 %v1640_v47, %v1640_v47  ;;  %v1641_v50 = vmax.f32 %v1437_v48, 0.0 }
 0x15c   :  { %v1152_v51 = vpop.f32.mrb[36].mxu1 }
 0x15d   :  { %1961 = vst.msk [vmem:[%s3522_s3 + $0x40] sm:$0xf] %vm1944_vm0, %v2254_v49  ;;  %v2255_v52 = vpack.c.bf16 %v1641_v50, %v1641_v50  ;;  %v1153_v53 = vadd.f32 %v3138_v15, %v1152_v51  ;;  %v1441_v54 = vpop.f32.mrb[36].mxu0  ;;  %v1154_v55 = vpop.f32.mrb[37].mxu1 }
 0x15e   :  { %v1443_v56 = vpop.f32.mrb[37].mxu0  ;;  %v1155_v57 = vpop.f32.mrb[38].mxu1 }
 0x15f   :  { %1962 = vst.msk [vmem:[%s3522_s3 + $0x44] sm:$0xf] %vm1944_vm0, %v2255_v52  ;;  %v1442_v58 = vadd.f32 %v1441_v54, %v1153_v53  ;;  %v1156_v59 = vadd.f32 %v3138_v15, %v1155_v57  ;;  %v1444_v60 = vpop.f32.mrb[38].mxu0  ;;  %v1157_v61 = vpop.f32.mrb[39].mxu1 }
 0x160   :  { %v1446_v62 = vpop.f32.mrb[39].mxu0 }
 0x161   :  { %v1642_v63 = vmax.f32 %v1442_v58, 0.0  ;;  %v1445_v0 = vadd.f32 %v1444_v60, %v1156_v59 }
 0x163   :  { %v2256_v1 = vpack.c.bf16 %v1642_v63, %v1642_v63  ;;  %v1643_v2 = vmax.f32 %v1445_v0, 0.0 }
 0x164   :  { %v1160_v3 = vpop.f32.mrb[40].mxu1 }
 0x165   :  { %1963 = vst.msk [vmem:[%s3522_s3 + $0x48] sm:$0xf] %vm1944_vm0, %v2256_v1  ;;  %v2257_v4 = vpack.c.bf16 %v1643_v2, %v1643_v2  ;;  %v1161_v5 = vadd.f32 %v3138_v15, %v1160_v3  ;;  %v1449_v6 = vpop.f32.mrb[40].mxu0  ;;  %v1162_v7 = vpop.f32.mrb[41].mxu1 }
 0x166   :  { %v1451_v8 = vpop.f32.mrb[41].mxu0  ;;  %v1163_v9 = vpop.f32.mrb[42].mxu1 }
 0x167   :  { %1964 = vst.msk [vmem:[%s3522_s3 + $0x4c] sm:$0xf] %vm1944_vm0, %v2257_v4  ;;  %v1450_v10 = vadd.f32 %v1449_v6, %v1161_v5  ;;  %v1164_v11 = vadd.f32 %v3138_v15, %v1163_v9  ;;  %v1452_v12 = vpop.f32.mrb[42].mxu0  ;;  %v1165_v13 = vpop.f32.mrb[43].mxu1 }
 0x168   :  { %v1454_v14 = vpop.f32.mrb[43].mxu0 }
 0x169   :  { %v1644_v16 = vmax.f32 %v1450_v10, 0.0  ;;  %v1453_v17 = vadd.f32 %v1452_v12, %v1164_v11 }
 0x16b   :  { %v2258_v18 = vpack.c.bf16 %v1644_v16, %v1644_v16  ;;  %v1645_v19 = vmax.f32 %v1453_v17, 0.0 }
 0x16c   :  { %v1168_v20 = vpop.f32.mrb[44].mxu1 }
 0x16d   :  { %1965 = vst.msk [vmem:[%s3522_s3 + $0x50] sm:$0xf] %vm1944_vm0, %v2258_v18  ;;  %v2259_v21 = vpack.c.bf16 %v1645_v19, %v1645_v19  ;;  %v1169_v22 = vadd.f32 %v3138_v15, %v1168_v20  ;;  %v1457_v23 = vpop.f32.mrb[44].mxu0  ;;  %v1170_v24 = vpop.f32.mrb[45].mxu1 }
 0x16e   :  { %v1459_v25 = vpop.f32.mrb[45].mxu0  ;;  %v1171_v26 = vpop.f32.mrb[46].mxu1 }
 0x16f   :  { %1966 = vst.msk [vmem:[%s3522_s3 + $0x54] sm:$0xf] %vm1944_vm0, %v2259_v21  ;;  %v1458_v27 = vadd.f32 %v1457_v23, %v1169_v22  ;;  %v1172_v28 = vadd.f32 %v3138_v15, %v1171_v26  ;;  %v1460_v29 = vpop.f32.mrb[46].mxu0  ;;  %v1173_v30 = vpop.f32.mrb[47].mxu1 }
 0x170   :  { %v1462_v31 = vpop.f32.mrb[47].mxu0 }
 0x171   :  { %v1646_v32 = vmax.f32 %v1458_v27, 0.0  ;;  %v1461_v33 = vadd.f32 %v1460_v29, %v1172_v28 }
 0x173   :  { %v2260_v34 = vpack.c.bf16 %v1646_v32, %v1646_v32  ;;  %v1647_v35 = vmax.f32 %v1461_v33, 0.0 }
 0x174   :  { %v1176_v36 = vpop.f32.mrb[48].mxu1 }
 0x175   :  { %1967 = vst.msk [vmem:[%s3522_s3 + $0x58] sm:$0xf] %vm1944_vm0, %v2260_v34  ;;  %v2261_v37 = vpack.c.bf16 %v1647_v35, %v1647_v35  ;;  %v1177_v38 = vadd.f32 %v3138_v15, %v1176_v36  ;;  %v1465_v39 = vpop.f32.mrb[48].mxu0  ;;  %v1178_v40 = vpop.f32.mrb[49].mxu1 }
 0x176   :  { %v1467_v41 = vpop.f32.mrb[49].mxu0  ;;  %v1179_v42 = vpop.f32.mrb[50].mxu1 }
 0x177   :  { %1968 = vst.msk [vmem:[%s3522_s3 + $0x5c] sm:$0xf] %vm1944_vm0, %v2261_v37  ;;  %v1466_v43 = vadd.f32 %v1465_v39, %v1177_v38  ;;  %v1180_v44 = vadd.f32 %v3138_v15, %v1179_v42  ;;  %v1468_v45 = vpop.f32.mrb[50].mxu0  ;;  %v1181_v46 = vpop.f32.mrb[51].mxu1 }
 0x178   :  { %v1470_v47 = vpop.f32.mrb[51].mxu0 }
 0x179   :  { %v1648_v48 = vmax.f32 %v1466_v43, 0.0  ;;  %v1469_v49 = vadd.f32 %v1468_v45, %v1180_v44 }
 0x17b   :  { %v2262_v50 = vpack.c.bf16 %v1648_v48, %v1648_v48  ;;  %v1649_v51 = vmax.f32 %v1469_v49, 0.0 }
 0x17c   :  { %v1184_v52 = vpop.f32.mrb[52].mxu1 }
 0x17d   :  { %1969 = vst.msk [vmem:[%s3522_s3 + $0x60] sm:$0xf] %vm1944_vm0, %v2262_v50  ;;  %v2263_v53 = vpack.c.bf16 %v1649_v51, %v1649_v51  ;;  %v1185_v54 = vadd.f32 %v3138_v15, %v1184_v52  ;;  %v1473_v55 = vpop.f32.mrb[52].mxu0  ;;  %v1186_v56 = vpop.f32.mrb[53].mxu1 }
 0x17e   :  { %v1475_v57 = vpop.f32.mrb[53].mxu0  ;;  %v1187_v58 = vpop.f32.mrb[54].mxu1 }
 0x17f   :  { %1970 = vst.msk [vmem:[%s3522_s3 + $0x64] sm:$0xf] %vm1944_vm0, %v2263_v53  ;;  %v1474_v59 = vadd.f32 %v1473_v55, %v1185_v54  ;;  %v1188_v60 = vadd.f32 %v3138_v15, %v1187_v58  ;;  %v1476_v61 = vpop.f32.mrb[54].mxu0  ;;  %v1189_v62 = vpop.f32.mrb[55].mxu1 }
 0x180   :  { %v1478_v63 = vpop.f32.mrb[55].mxu0 }
 0x181   :  { %v1650_v0 = vmax.f32 %v1474_v59, 0.0  ;;  %v1477_v1 = vadd.f32 %v1476_v61, %v1188_v60 }
 0x183   :  { %v2264_v2 = vpack.c.bf16 %v1650_v0, %v1650_v0  ;;  %v1651_v3 = vmax.f32 %v1477_v1, 0.0 }
 0x184   :  { %v1192_v4 = vpop.f32.mrb[56].mxu1 }
 0x185   :  { %1971 = vst.msk [vmem:[%s3522_s3 + $0x68] sm:$0xf] %vm1944_vm0, %v2264_v2  ;;  %v2265_v5 = vpack.c.bf16 %v1651_v3, %v1651_v3  ;;  %v1193_v6 = vadd.f32 %v3138_v15, %v1192_v4  ;;  %v1481_v7 = vpop.f32.mrb[56].mxu0  ;;  %v1194_v8 = vpop.f32.mrb[57].mxu1 }
 0x186   :  { %v1483_v9 = vpop.f32.mrb[57].mxu0  ;;  %v1195_v10 = vpop.f32.mrb[58].mxu1 }
 0x187   :  { %1972 = vst.msk [vmem:[%s3522_s3 + $0x6c] sm:$0xf] %vm1944_vm0, %v2265_v5  ;;  %v1482_v11 = vadd.f32 %v1481_v7, %v1193_v6  ;;  %v1196_v12 = vadd.f32 %v3138_v15, %v1195_v10  ;;  %v1484_v13 = vpop.f32.mrb[58].mxu0  ;;  %v1197_v14 = vpop.f32.mrb[59].mxu1 }
 0x188   :  { %v1486_v16 = vpop.f32.mrb[59].mxu0 }
 0x189   :  { %v1652_v17 = vmax.f32 %v1482_v11, 0.0  ;;  %v1485_v18 = vadd.f32 %v1484_v13, %v1196_v12 }
 0x18b   :  { %v2266_v19 = vpack.c.bf16 %v1652_v17, %v1652_v17  ;;  %v1653_v20 = vmax.f32 %v1485_v18, 0.0 }
 0x18c   :  { %v1200_v21 = vpop.f32.mrb[60].mxu1 }
 0x18d   :  { %1973 = vst.msk [vmem:[%s3522_s3 + $0x70] sm:$0xf] %vm1944_vm0, %v2266_v19  ;;  %v2267_v22 = vpack.c.bf16 %v1653_v20, %v1653_v20  ;;  %v1201_v23 = vadd.f32 %v3138_v15, %v1200_v21  ;;  %v1489_v24 = vpop.f32.mrb[60].mxu0  ;;  %v1202_v25 = vpop.f32.mrb[61].mxu1 }
 0x18e   :  { %v1491_v26 = vpop.f32.mrb[61].mxu0  ;;  %v1203_v27 = vpop.f32.mrb[62].mxu1 }
 0x18f   :  { %1974 = vst.msk [vmem:[%s3522_s3 + $0x74] sm:$0xf] %vm1944_vm0, %v2267_v22  ;;  %v1490_v28 = vadd.f32 %v1489_v24, %v1201_v23  ;;  %v1204_v29 = vadd.f32 %v3138_v15, %v1203_v27  ;;  %v1492_v30 = vpop.f32.mrb[62].mxu0  ;;  %v1205_v31 = vpop.f32.mrb[63].mxu1 }
 0x190   :  { %v1494_v32 = vpop.f32.mrb[63].mxu0 }
 0x191   :  { %v1654_v33 = vmax.f32 %v1490_v28, 0.0  ;;  %v1493_v34 = vadd.f32 %v1492_v30, %v1204_v29 }
 0x193   :  { %v2268_v35 = vpack.c.bf16 %v1654_v33, %v1654_v33  ;;  %v1655_v36 = vmax.f32 %v1493_v34, 0.0 }
 0x194   :  { %v1208_v37 = vpop.f32.mrb[64].mxu1 }
 0x195   :  { %1975 = vst.msk [vmem:[%s3522_s3 + $0x78] sm:$0xf] %vm1944_vm0, %v2268_v35  ;;  %v2269_v38 = vpack.c.bf16 %v1655_v36, %v1655_v36  ;;  %v1209_v39 = vadd.f32 %v3138_v15, %v1208_v37  ;;  %v1497_v40 = vpop.f32.mrb[64].mxu0  ;;  %v1210_v41 = vpop.f32.mrb[65].mxu1 }
 0x196   :  { %v1499_v42 = vpop.f32.mrb[65].mxu0  ;;  %v1211_v43 = vpop.f32.mrb[66].mxu1 }
 0x197   :  { %1976 = vst.msk [vmem:[%s3522_s3 + $0x7c] sm:$0xf] %vm1944_vm0, %v2269_v38  ;;  %v1498_v44 = vadd.f32 %v1497_v40, %v1209_v39  ;;  %v1212_v45 = vadd.f32 %v3138_v15, %v1211_v43  ;;  %v1500_v46 = vpop.f32.mrb[66].mxu0  ;;  %v1213_v47 = vpop.f32.mrb[67].mxu1 }
 0x198   :  { %v1502_v48 = vpop.f32.mrb[67].mxu0 }
 0x199   :  { %v1656_v49 = vmax.f32 %v1498_v44, 0.0  ;;  %v1501_v50 = vadd.f32 %v1500_v46, %v1212_v45 }
 0x19b   :  { %v2270_v51 = vpack.c.bf16 %v1656_v49, %v1656_v49  ;;  %v1657_v52 = vmax.f32 %v1501_v50, 0.0 }
 0x19c   :  { %v1216_v53 = vpop.f32.mrb[68].mxu1 }
 0x19d   :  { %1977 = vst.msk [vmem:[%s3522_s3 + $0x80] sm:$0xf] %vm1944_vm0, %v2270_v51  ;;  %v2271_v54 = vpack.c.bf16 %v1657_v52, %v1657_v52  ;;  %v1217_v55 = vadd.f32 %v3138_v15, %v1216_v53  ;;  %v1505_v56 = vpop.f32.mrb[68].mxu0  ;;  %v1218_v57 = vpop.f32.mrb[69].mxu1 }
 0x19e   :  { %v1507_v58 = vpop.f32.mrb[69].mxu0  ;;  %v1219_v59 = vpop.f32.mrb[70].mxu1 }
 0x19f   :  { %1978 = vst.msk [vmem:[%s3522_s3 + $0x84] sm:$0xf] %vm1944_vm0, %v2271_v54  ;;  %v1506_v60 = vadd.f32 %v1505_v56, %v1217_v55  ;;  %v1220_v61 = vadd.f32 %v3138_v15, %v1219_v59  ;;  %v1508_v62 = vpop.f32.mrb[70].mxu0  ;;  %v1221_v63 = vpop.f32.mrb[71].mxu1 }
 0x1a0   :  { %v1510_v0 = vpop.f32.mrb[71].mxu0 }
 0x1a1   :  { %v1658_v1 = vmax.f32 %v1506_v60, 0.0  ;;  %v1509_v2 = vadd.f32 %v1508_v62, %v1220_v61 }
 0x1a3   :  { %v2272_v3 = vpack.c.bf16 %v1658_v1, %v1658_v1  ;;  %v1659_v4 = vmax.f32 %v1509_v2, 0.0 }
 0x1a4   :  { %v1224_v5 = vpop.f32.mrb[72].mxu1 }
 0x1a5   :  { %1979 = vst.msk [vmem:[%s3522_s3 + $0x88] sm:$0xf] %vm1944_vm0, %v2272_v3  ;;  %v2273_v6 = vpack.c.bf16 %v1659_v4, %v1659_v4  ;;  %v1225_v7 = vadd.f32 %v3138_v15, %v1224_v5  ;;  %v1513_v8 = vpop.f32.mrb[72].mxu0  ;;  %v1226_v9 = vpop.f32.mrb[73].mxu1 }
 0x1a6   :  { %v1515_v10 = vpop.f32.mrb[73].mxu0  ;;  %v1227_v11 = vpop.f32.mrb[74].mxu1 }
 0x1a7   :  { %1980 = vst.msk [vmem:[%s3522_s3 + $0x8c] sm:$0xf] %vm1944_vm0, %v2273_v6  ;;  %v1514_v12 = vadd.f32 %v1513_v8, %v1225_v7  ;;  %v1228_v13 = vadd.f32 %v3138_v15, %v1227_v11  ;;  %v1516_v14 = vpop.f32.mrb[74].mxu0  ;;  %v1229_v16 = vpop.f32.mrb[75].mxu1 }
 0x1a8   :  { %v1518_v17 = vpop.f32.mrb[75].mxu0 }
 0x1a9   :  { %v1660_v18 = vmax.f32 %v1514_v12, 0.0  ;;  %v1517_v19 = vadd.f32 %v1516_v14, %v1228_v13 }
 0x1ab   :  { %v2274_v20 = vpack.c.bf16 %v1660_v18, %v1660_v18  ;;  %v1661_v21 = vmax.f32 %v1517_v19, 0.0 }
 0x1ac   :  { %v1232_v22 = vpop.f32.mrb[76].mxu1 }
 0x1ad   :  { %1981 = vst.msk [vmem:[%s3522_s3 + $0x90] sm:$0xf] %vm1944_vm0, %v2274_v20  ;;  %v2275_v23 = vpack.c.bf16 %v1661_v21, %v1661_v21  ;;  %v1233_v24 = vadd.f32 %v3138_v15, %v1232_v22  ;;  %v1521_v25 = vpop.f32.mrb[76].mxu0  ;;  %v1234_v26 = vpop.f32.mrb[77].mxu1 }
 0x1ae   :  { %v1523_v27 = vpop.f32.mrb[77].mxu0  ;;  %v1235_v28 = vpop.f32.mrb[78].mxu1 }
 0x1af   :  { %1982 = vst.msk [vmem:[%s3522_s3 + $0x94] sm:$0xf] %vm1944_vm0, %v2275_v23  ;;  %v1522_v29 = vadd.f32 %v1521_v25, %v1233_v24  ;;  %v1236_v30 = vadd.f32 %v3138_v15, %v1235_v28  ;;  %v1524_v31 = vpop.f32.mrb[78].mxu0  ;;  %v1237_v32 = vpop.f32.mrb[79].mxu1 }
 0x1b0   :  { %v1526_v33 = vpop.f32.mrb[79].mxu0 }
 0x1b1   :  { %v1662_v34 = vmax.f32 %v1522_v29, 0.0  ;;  %v1525_v35 = vadd.f32 %v1524_v31, %v1236_v30 }
 0x1b3   :  { %v2276_v36 = vpack.c.bf16 %v1662_v34, %v1662_v34  ;;  %v1663_v37 = vmax.f32 %v1525_v35, 0.0 }
 0x1b4   :  { %v1240_v38 = vpop.f32.mrb[80].mxu1 }
 0x1b5   :  { %1983 = vst.msk [vmem:[%s3522_s3 + $0x98] sm:$0xf] %vm1944_vm0, %v2276_v36  ;;  %v2277_v39 = vpack.c.bf16 %v1663_v37, %v1663_v37  ;;  %v1241_v40 = vadd.f32 %v3138_v15, %v1240_v38  ;;  %v1529_v41 = vpop.f32.mrb[80].mxu0  ;;  %v1242_v42 = vpop.f32.mrb[81].mxu1 }
 0x1b6   :  { %v1531_v43 = vpop.f32.mrb[81].mxu0  ;;  %v1243_v44 = vpop.f32.mrb[82].mxu1 }
 0x1b7   :  { %1984 = vst.msk [vmem:[%s3522_s3 + $0x9c] sm:$0xf] %vm1944_vm0, %v2277_v39  ;;  %v1530_v45 = vadd.f32 %v1529_v41, %v1241_v40  ;;  %v1244_v46 = vadd.f32 %v3138_v15, %v1243_v44  ;;  %v1532_v47 = vpop.f32.mrb[82].mxu0  ;;  %v1245_v48 = vpop.f32.mrb[83].mxu1 }
 0x1b8   :  { %v1534_v49 = vpop.f32.mrb[83].mxu0 }
 0x1b9   :  { %v1664_v50 = vmax.f32 %v1530_v45, 0.0  ;;  %v1533_v51 = vadd.f32 %v1532_v47, %v1244_v46 }
 0x1bb   :  { %v2278_v52 = vpack.c.bf16 %v1664_v50, %v1664_v50  ;;  %v1665_v53 = vmax.f32 %v1533_v51, 0.0 }
 0x1bc   :  { %v1248_v54 = vpop.f32.mrb[84].mxu1 }
 0x1bd   :  { %1985 = vst.msk [vmem:[%s3522_s3 + $0xa0] sm:$0xf] %vm1944_vm0, %v2278_v52  ;;  %v2279_v55 = vpack.c.bf16 %v1665_v53, %v1665_v53  ;;  %v1249_v56 = vadd.f32 %v3138_v15, %v1248_v54  ;;  %v1537_v57 = vpop.f32.mrb[84].mxu0  ;;  %v1250_v58 = vpop.f32.mrb[85].mxu1 }
 0x1be   :  { %v1539_v59 = vpop.f32.mrb[85].mxu0  ;;  %v1251_v60 = vpop.f32.mrb[86].mxu1 }
 0x1bf   :  { %1986 = vst.msk [vmem:[%s3522_s3 + $0xa4] sm:$0xf] %vm1944_vm0, %v2279_v55  ;;  %v1538_v61 = vadd.f32 %v1537_v57, %v1249_v56  ;;  %v1252_v62 = vadd.f32 %v3138_v15, %v1251_v60  ;;  %v1540_v63 = vpop.f32.mrb[86].mxu0  ;;  %v1253_v0 = vpop.f32.mrb[87].mxu1 }
 0x1c0   :  { %v1542_v1 = vpop.f32.mrb[87].mxu0 }
 0x1c1   :  { %v1666_v2 = vmax.f32 %v1538_v61, 0.0  ;;  %v1541_v3 = vadd.f32 %v1540_v63, %v1252_v62 }
 0x1c3   :  { %v2280_v4 = vpack.c.bf16 %v1666_v2, %v1666_v2  ;;  %v1667_v5 = vmax.f32 %v1541_v3, 0.0 }
 0x1c4   :  { %v1256_v6 = vpop.f32.mrb[88].mxu1 }
 0x1c5   :  { %1987 = vst.msk [vmem:[%s3522_s3 + $0xa8] sm:$0xf] %vm1944_vm0, %v2280_v4  ;;  %v2281_v7 = vpack.c.bf16 %v1667_v5, %v1667_v5  ;;  %v1257_v8 = vadd.f32 %v3138_v15, %v1256_v6  ;;  %v1545_v9 = vpop.f32.mrb[88].mxu0  ;;  %v1258_v10 = vpop.f32.mrb[89].mxu1 }
 0x1c6   :  { %v1547_v11 = vpop.f32.mrb[89].mxu0  ;;  %v1259_v12 = vpop.f32.mrb[90].mxu1 }
 0x1c7   :  { %1988 = vst.msk [vmem:[%s3522_s3 + $0xac] sm:$0xf] %vm1944_vm0, %v2281_v7  ;;  %v1546_v13 = vadd.f32 %v1545_v9, %v1257_v8  ;;  %v1260_v14 = vadd.f32 %v3138_v15, %v1259_v12  ;;  %v1548_v16 = vpop.f32.mrb[90].mxu0  ;;  %v1261_v17 = vpop.f32.mrb[91].mxu1 }
 0x1c8   :  { %v1550_v18 = vpop.f32.mrb[91].mxu0 }
 0x1c9   :  { %v1668_v19 = vmax.f32 %v1546_v13, 0.0  ;;  %v1549_v20 = vadd.f32 %v1548_v16, %v1260_v14  ;;  %v3458_v16 = vld [vmem:[%s3521_s2] ss:$0 sm:$0xff] }
 0x1cb   :  { %v2282_v21 = vpack.c.bf16 %v1668_v19, %v1668_v19  ;;  %v1669_v22 = vmax.f32 %v1549_v20, 0.0 }
 0x1cc   :  { %v1264_v23 = vpop.f32.mrb[92].mxu1 }
 0x1cd   :  { %1989 = vst.msk [vmem:[%s3522_s3 + $0xb0] sm:$0xf] %vm1944_vm0, %v2282_v21  ;;  %v2283_v24 = vpack.c.bf16 %v1669_v22, %v1669_v22  ;;  %v1265_v25 = vadd.f32 %v3138_v15, %v1264_v23  ;;  %v1553_v26 = vpop.f32.mrb[92].mxu0  ;;  %v1266_v27 = vpop.f32.mrb[93].mxu1 }
 0x1ce   :  { %v1555_v28 = vpop.f32.mrb[93].mxu0  ;;  %v1267_v29 = vpop.f32.mrb[94].mxu1 }
 0x1cf   :  { %1990 = vst.msk [vmem:[%s3522_s3 + $0xb4] sm:$0xf] %vm1944_vm0, %v2283_v24  ;;  %v1554_v30 = vadd.f32 %v1553_v26, %v1265_v25  ;;  %v1268_v31 = vadd.f32 %v3138_v15, %v1267_v29  ;;  %v1556_v32 = vpop.f32.mrb[94].mxu0  ;;  %v1269_v33 = vpop.f32.mrb[95].mxu1 }
 0x1d0   :  { %v1558_v34 = vpop.f32.mrb[95].mxu0 }
 0x1d1   :  { %v1670_v35 = vmax.f32 %v1554_v30, 0.0  ;;  %v1557_v36 = vadd.f32 %v1556_v32, %v1268_v31 }
 0x1d3   :  { %v2284_v37 = vpack.c.bf16 %v1670_v35, %v1670_v35  ;;  %v1671_v38 = vmax.f32 %v1557_v36, 0.0 }
 0x1d4   :  { %v1272_v39 = vpop.f32.mrb[96].mxu1 }
 0x1d5   :  { %1991 = vst.msk [vmem:[%s3522_s3 + $0xb8] sm:$0xf] %vm1944_vm0, %v2284_v37  ;;  %v2285_v40 = vpack.c.bf16 %v1671_v38, %v1671_v38  ;;  %v1273_v41 = vadd.f32 %v3138_v15, %v1272_v39  ;;  %v1561_v42 = vpop.f32.mrb[96].mxu0  ;;  %v1274_v43 = vpop.f32.mrb[97].mxu1 }
 0x1d6   :  { %v1563_v44 = vpop.f32.mrb[97].mxu0  ;;  %v1275_v45 = vpop.f32.mrb[98].mxu1 }
 0x1d7   :  { %1992 = vst.msk [vmem:[%s3522_s3 + $0xbc] sm:$0xf] %vm1944_vm0, %v2285_v40  ;;  %v1562_v46 = vadd.f32 %v1561_v42, %v1273_v41  ;;  %v1276_v47 = vadd.f32 %v3138_v15, %v1275_v45  ;;  %v1564_v48 = vpop.f32.mrb[98].mxu0  ;;  %v1277_v49 = vpop.f32.mrb[99].mxu1 }
 0x1d8   :  { %v1566_v50 = vpop.f32.mrb[99].mxu0 }
 0x1d9   :  { %v1672_v51 = vmax.f32 %v1562_v46, 0.0  ;;  %v1565_v52 = vadd.f32 %v1564_v48, %v1276_v47 }
 0x1db   :  { %v2286_v53 = vpack.c.bf16 %v1672_v51, %v1672_v51  ;;  %v1673_v54 = vmax.f32 %v1565_v52, 0.0 }
 0x1dc   :  { %v1280_v55 = vpop.f32.mrb[100].mxu1 }
 0x1dd   :  { %1993 = vst.msk [vmem:[%s3522_s3 + $0xc0] sm:$0xf] %vm1944_vm0, %v2286_v53  ;;  %v2287_v56 = vpack.c.bf16 %v1673_v54, %v1673_v54  ;;  %v1281_v57 = vadd.f32 %v3138_v15, %v1280_v55  ;;  %v1569_v58 = vpop.f32.mrb[100].mxu0  ;;  %v1282_v59 = vpop.f32.mrb[101].mxu1 }
 0x1de   :  { %v1571_v60 = vpop.f32.mrb[101].mxu0  ;;  %v1283_v61 = vpop.f32.mrb[102].mxu1 }
 0x1df   :  { %1994 = vst.msk [vmem:[%s3522_s3 + $0xc4] sm:$0xf] %vm1944_vm0, %v2287_v56  ;;  %v1570_v62 = vadd.f32 %v1569_v58, %v1281_v57  ;;  %v1284_v63 = vadd.f32 %v3138_v15, %v1283_v61  ;;  %v1572_v0 = vpop.f32.mrb[102].mxu0  ;;  %v1285_v1 = vpop.f32.mrb[103].mxu1 }
 0x1e0   :  { %v1574_v2 = vpop.f32.mrb[103].mxu0 }
 0x1e1   :  { %v1674_v3 = vmax.f32 %v1570_v62, 0.0  ;;  %v1573_v4 = vadd.f32 %v1572_v0, %v1284_v63 }
 0x1e3   :  { %v2288_v5 = vpack.c.bf16 %v1674_v3, %v1674_v3  ;;  %v1675_v6 = vmax.f32 %v1573_v4, 0.0 }
 0x1e4   :  { %v1288_v7 = vpop.f32.mrb[104].mxu1 }
 0x1e5   :  { %1995 = vst.msk [vmem:[%s3522_s3 + $0xc8] sm:$0xf] %vm1944_vm0, %v2288_v5  ;;  %v2289_v8 = vpack.c.bf16 %v1675_v6, %v1675_v6  ;;  %v1289_v9 = vadd.f32 %v3138_v15, %v1288_v7  ;;  %v1577_v10 = vpop.f32.mrb[104].mxu0  ;;  %v1290_v11 = vpop.f32.mrb[105].mxu1 }
 0x1e6   :  { %v1579_v12 = vpop.f32.mrb[105].mxu0  ;;  %v1291_v13 = vpop.f32.mrb[106].mxu1 }
 0x1e7   :  { %1996 = vst.msk [vmem:[%s3522_s3 + $0xcc] sm:$0xf] %vm1944_vm0, %v2289_v8  ;;  %v1578_v14 = vadd.f32 %v1577_v10, %v1289_v9  ;;  %v1292_v17 = vadd.f32 %v3458_v16, %v1291_v13  ;;  %v1580_v18 = vpop.f32.mrb[106].mxu0  ;;  %v1293_v19 = vpop.f32.mrb[107].mxu1 }
 0x1e8   :  { %v1582_v15 = vpop.f32.mrb[107].mxu0 }
 0x1e9   :  { %v1676_v20 = vmax.f32 %v1578_v14, 0.0  ;;  %v1581_v21 = vadd.f32 %v1580_v18, %v1292_v17 }
 0x1eb   :  { %v2290_v22 = vpack.c.bf16 %v1676_v20, %v1676_v20  ;;  %v1677_v23 = vmax.f32 %v1581_v21, 0.0 }
 0x1ec   :  { %v1296_v24 = vpop.f32.mrb[108].mxu1 }
 0x1ed   :  { %1997 = vst.msk [vmem:[%s3522_s3 + $0xd0] sm:$0xf] %vm1944_vm0, %v2290_v22  ;;  %v2291_v25 = vpack.c.bf16 %v1677_v23, %v1677_v23  ;;  %v1297_v26 = vadd.f32 %v3458_v16, %v1296_v24  ;;  %v1585_v27 = vpop.f32.mrb[108].mxu0  ;;  %v1298_v28 = vpop.f32.mrb[109].mxu1 }
 0x1ee   :  { %v1587_v29 = vpop.f32.mrb[109].mxu0  ;;  %v1299_v30 = vpop.f32.mrb[110].mxu1 }
 0x1ef   :  { %1998 = vst.msk [vmem:[%s3522_s3 + $0xd4] sm:$0xf] %vm1944_vm0, %v2291_v25  ;;  %v1586_v31 = vadd.f32 %v1585_v27, %v1297_v26  ;;  %v1300_v32 = vadd.f32 %v3458_v16, %v1299_v30  ;;  %v1588_v33 = vpop.f32.mrb[110].mxu0  ;;  %v1301_v34 = vpop.f32.mrb[111].mxu1 }
 0x1f0   :  { %v1590_v35 = vpop.f32.mrb[111].mxu0 }
 0x1f1   :  { %v1678_v36 = vmax.f32 %v1586_v31, 0.0  ;;  %v1589_v37 = vadd.f32 %v1588_v33, %v1300_v32 }
 0x1f3   :  { %v2292_v38 = vpack.c.bf16 %v1678_v36, %v1678_v36  ;;  %v1679_v39 = vmax.f32 %v1589_v37, 0.0 }
 0x1f4   :  { %v1304_v40 = vpop.f32.mrb[112].mxu1 }
 0x1f5   :  { %1999 = vst.msk [vmem:[%s3522_s3 + $0xd8] sm:$0xf] %vm1944_vm0, %v2292_v38  ;;  %v2293_v41 = vpack.c.bf16 %v1679_v39, %v1679_v39  ;;  %v1305_v42 = vadd.f32 %v3458_v16, %v1304_v40  ;;  %v1593_v43 = vpop.f32.mrb[112].mxu0  ;;  %v1306_v44 = vpop.f32.mrb[113].mxu1 }
 0x1f6   :  { %v1595_v45 = vpop.f32.mrb[113].mxu0  ;;  %v1307_v46 = vpop.f32.mrb[114].mxu1 }
 0x1f7   :  { %2000 = vst.msk [vmem:[%s3522_s3 + $0xdc] sm:$0xf] %vm1944_vm0, %v2293_v41  ;;  %v1594_v47 = vadd.f32 %v1593_v43, %v1305_v42  ;;  %v1308_v48 = vadd.f32 %v3458_v16, %v1307_v46  ;;  %v1596_v49 = vpop.f32.mrb[114].mxu0  ;;  %v1309_v50 = vpop.f32.mrb[115].mxu1 }
 0x1f8   :  { %v1598_v51 = vpop.f32.mrb[115].mxu0 }
 0x1f9   :  { %v1680_v52 = vmax.f32 %v1594_v47, 0.0  ;;  %v1597_v53 = vadd.f32 %v1596_v49, %v1308_v48 }
 0x1fb   :  { %v2294_v54 = vpack.c.bf16 %v1680_v52, %v1680_v52  ;;  %v1681_v55 = vmax.f32 %v1597_v53, 0.0 }
 0x1fc   :  { %v1312_v56 = vpop.f32.mrb[116].mxu1 }
 0x1fd   :  { %2001 = vst.msk [vmem:[%s3522_s3 + $0xe0] sm:$0xf] %vm1944_vm0, %v2294_v54  ;;  %v2295_v57 = vpack.c.bf16 %v1681_v55, %v1681_v55  ;;  %v1313_v58 = vadd.f32 %v3458_v16, %v1312_v56  ;;  %v1601_v59 = vpop.f32.mrb[116].mxu0  ;;  %v1314_v60 = vpop.f32.mrb[117].mxu1 }
 0x1fe   :  { %v1603_v61 = vpop.f32.mrb[117].mxu0  ;;  %v1315_v62 = vpop.f32.mrb[118].mxu1 }
 0x1ff   :  { %2002 = vst.msk [vmem:[%s3522_s3 + $0xe4] sm:$0xf] %vm1944_vm0, %v2295_v57  ;;  %v1602_v63 = vadd.f32 %v1601_v59, %v1313_v58  ;;  %v1316_v0 = vadd.f32 %v3458_v16, %v1315_v62  ;;  %v1604_v1 = vpop.f32.mrb[118].mxu0  ;;  %v1317_v2 = vpop.f32.mrb[119].mxu1 }
 0x200   :  { %v1606_v3 = vpop.f32.mrb[119].mxu0 }
 0x201   :  { %v1682_v4 = vmax.f32 %v1602_v63, 0.0  ;;  %v1605_v5 = vadd.f32 %v1604_v1, %v1316_v0 }
 0x203   :  { %v2296_v6 = vpack.c.bf16 %v1682_v4, %v1682_v4  ;;  %v1683_v7 = vmax.f32 %v1605_v5, 0.0 }
 0x204   :  { %v1320_v8 = vpop.f32.mrb[120].mxu1 }
 0x205   :  { %2003 = vst.msk [vmem:[%s3522_s3 + $0xe8] sm:$0xf] %vm1944_vm0, %v2296_v6  ;;  %v2297_v9 = vpack.c.bf16 %v1683_v7, %v1683_v7  ;;  %v1321_v10 = vadd.f32 %v3458_v16, %v1320_v8  ;;  %v1609_v11 = vpop.f32.mrb[120].mxu0  ;;  %v1322_v12 = vpop.f32.mrb[121].mxu1 }
 0x206   :  { %v1611_v13 = vpop.f32.mrb[121].mxu0  ;;  %v1323_v14 = vpop.f32.mrb[122].mxu1 }
 0x207   :  { %2004 = vst.msk [vmem:[%s3522_s3 + $0xec] sm:$0xf] %vm1944_vm0, %v2297_v9  ;;  %v1610_v17 = vadd.f32 %v1609_v11, %v1321_v10  ;;  %v1324_v18 = vadd.f32 %v3458_v16, %v1323_v14  ;;  %v1612_v19 = vpop.f32.mrb[122].mxu0  ;;  %v1325_v15 = vpop.f32.mrb[123].mxu1 }
 0x208   :  { %v1614_v20 = vpop.f32.mrb[123].mxu0 }
 0x209   :  { %v1684_v21 = vmax.f32 %v1610_v17, 0.0  ;;  %v1613_v22 = vadd.f32 %v1612_v19, %v1324_v18 }
 0x20b   :  { %v2298_v23 = vpack.c.bf16 %v1684_v21, %v1684_v21  ;;  %v1685_v24 = vmax.f32 %v1613_v22, 0.0 }
 0x20c   :  { %v1328_v25 = vpop.f32.mrb[124].mxu1 }
 0x20d   :  { %2005 = vst.msk [vmem:[%s3522_s3 + $0xf0] sm:$0xf] %vm1944_vm0, %v2298_v23  ;;  %v2299_v26 = vpack.c.bf16 %v1685_v24, %v1685_v24  ;;  %v1329_v27 = vadd.f32 %v3458_v16, %v1328_v25  ;;  %v1617_v28 = vpop.f32.mrb[124].mxu0  ;;  %v1330_v29 = vpop.f32.mrb[125].mxu1 }
 0x20e   :  { %v1619_v30 = vpop.f32.mrb[125].mxu0  ;;  %v1331_v31 = vpop.f32.mrb[126].mxu1 }
 0x20f   :  { %2006 = vst.msk [vmem:[%s3522_s3 + $0xf4] sm:$0xf] %vm1944_vm0, %v2299_v26  ;;  %v1618_v32 = vadd.f32 %v1617_v28, %v1329_v27  ;;  %v1332_v33 = vadd.f32 %v3458_v16, %v1331_v31  ;;  %v1620_v34 = vpop.f32.mrb[126].mxu0  ;;  %v1333_v35 = vpop.f32.mrb[127].mxu1 }
 0x210   :  { %v1622_v36 = vpop.f32.mrb[127].mxu0 }
 0x211   :  { %v1686_v37 = vmax.f32 %v1618_v32, 0.0  ;;  %v1621_v38 = vadd.f32 %v1620_v34, %v1332_v33 }
 0x213   :  { %v2300_v39 = vpack.c.bf16 %v1686_v37, %v1686_v37  ;;  %v1687_v40 = vmax.f32 %v1621_v38, 0.0 }
 0x215   :  { %2007 = vst.msk [vmem:[%s3522_s3 + $0xf8] sm:$0xf] %vm1944_vm0, %v2300_v39  ;;  %v2301_v41 = vpack.c.bf16 %v1687_v40, %v1687_v40 }
 0x217   :  { %2008 = vst.msk [vmem:[%s3522_s3 + $0xfc] sm:$0xf] %vm1944_vm0, %v2301_v41 }

// kernel: betavae_forward.11
= control target key start
LH: loop header
LB: loop body
LE: loop exit
PB: predicated region body
PF: predicated region fallthrough
CT: control target
= control target key end

     0   :  { %vm744_vm0 = vcmask 519168   ;;  %s1367_s1 = inlined_call_operand.vmem [shape: bf16[512,64], index: 1, kind: input, shape index: {}]   ;;  %s1368_s0 = inlined_call_operand.vmem [shape: bf16[128,512], index: 0, kind: input, shape index: {}]   ;;  %s1369_s2 = inlined_call_operand.vmem [shape: f32[1,64], index: 2, kind: input, shape index: {}]   ;;  %s1370_s3 = inlined_call_operand.vmem [shape: bf16[128,64], index: 3, kind: output, shape index: {}]  }
   0x1   :  { %v990_v0 = vld [vmem:[%s1367_s1 + $0x40] sm:$0xff]   ;;  %v994_v4 = vld [vmem:[%s1367_s1 + $0x48] sm:$0xff]   ;;  %v998_v8 = vld [vmem:[%s1367_s1 + $0x50] sm:$0xff]  }
   0x2   :  { %v991_v1 = vld [vmem:[%s1367_s1 + $0xc0] sm:$0xff]   ;;  %862 = vmatprep.subr.bf16.mxu0 %v990_v0  ;;  %v995_v5 = vld [vmem:[%s1367_s1 + $0xc8] sm:$0xff]   ;;  %v999_v9 = vld [vmem:[%s1367_s1 + $0xd0] sm:$0xff]  }
   0x3   :  { %v992_v2 = vld [vmem:[%s1367_s1] sm:$0xff]   ;;  %926 = vmatprep.subr.bf16.mxu1 %v991_v1  ;;  %v996_v6 = vld [vmem:[%s1367_s1 + $0x8] sm:$0xff]   ;;  %v1000_v10 = vld [vmem:[%s1367_s1 + $0x10] sm:$0xff]  }
   0x4   :  { %v993_v3 = vld [vmem:[%s1367_s1 + $0x80] sm:$0xff]   ;;  %863 = vmatpush3.bf16.msra.mxu0 %v992_v2  ;;  %v997_v7 = vld [vmem:[%s1367_s1 + $0x88] sm:$0xff]   ;;  %v1001_v11 = vld [vmem:[%s1367_s1 + $0x90] sm:$0xff]  }
   0x5   :  { %927 = vmatpush3.bf16.msra.mxu1 %v993_v3  ;;  %864 = vmatprep.subr.bf16.mxu0 %v994_v4  ;;  %v1002_v12 = vld [vmem:[%s1367_s1 + $0x58] sm:$0xff]   ;;  %v1006_v16 = vld [vmem:[%s1367_s1 + $0x60] sm:$0xff]   ;;  %v1010_v20 = vld [vmem:[%s1367_s1 + $0x68] sm:$0xff]  }
   0x6   :  { %928 = vmatprep.subr.bf16.mxu1 %v995_v5  ;;  %v1003_v13 = vld [vmem:[%s1367_s1 + $0xd8] sm:$0xff]   ;;  %v1007_v17 = vld [vmem:[%s1367_s1 + $0xe0] sm:$0xff]   ;;  %v1011_v21 = vld [vmem:[%s1367_s1 + $0xe8] sm:$0xff]  }
   0x7   :  { %v1004_v14 = vld [vmem:[%s1367_s1 + $0x18] sm:$0xff]   ;;  %v1008_v18 = vld [vmem:[%s1367_s1 + $0x20] sm:$0xff]   ;;  %v1012_v22 = vld [vmem:[%s1367_s1 + $0x28] sm:$0xff]  }
   0x8   :  { %865 = vmatpush3.bf16.msra.mxu0 %v996_v6  ;;  %v1005_v15 = vld [vmem:[%s1367_s1 + $0x98] sm:$0xff]   ;;  %v1009_v19 = vld [vmem:[%s1367_s1 + $0xa0] sm:$0xff]   ;;  %v1013_v23 = vld [vmem:[%s1367_s1 + $0xa8] sm:$0xff]  }
   0x9   :  { %929 = vmatpush3.bf16.msra.mxu1 %v997_v7  ;;  %866 = vmatprep.subr.bf16.mxu0 %v998_v8  ;;  %v1014_v24 = vld [vmem:[%s1367_s1 + $0x70] sm:$0xff]   ;;  %v1018_v28 = vld [vmem:[%s1367_s1 + $0x78] sm:$0xff]   ;;  %v1285_v2 = vld [vmem:[%s1369_s2] ss:$0 sm:$0xff] }
   0xa   :  { %930 = vmatprep.subr.bf16.mxu1 %v999_v9  ;;  %v1015_v25 = vld [vmem:[%s1367_s1 + $0xf0] sm:$0xff]   ;;  %v1019_v29 = vld [vmem:[%s1367_s1 + $0xf8] sm:$0xff]  }
   0xb   :  { %v1016_v26 = vld [vmem:[%s1367_s1 + $0x30] sm:$0xff]   ;;  %v1020_v30 = vld [vmem:[%s1367_s1 + $0x38] sm:$0xff]  }
   0xc   :  { %867 = vmatpush3.bf16.msra.mxu0 %v1000_v10  ;;  %v1017_v27 = vld [vmem:[%s1367_s1 + $0xb0] sm:$0xff]   ;;  %v1021_v31 = vld [vmem:[%s1367_s1 + $0xb8] sm:$0xff]  }
   0xd   :  { %931 = vmatpush3.bf16.msra.mxu1 %v1001_v11  ;;  %868 = vmatprep.subr.bf16.mxu0 %v1002_v12  ;;  %v1022_v32 = vld [vmem:[%s1368_s0] ss:$16 sps:$4 sm:$0xff]   ;;  %v1024_v33 = vld [vmem:[%s1368_s0 + $0x4] ss:$16 sps:$4 sm:$0xff]   ;;  %v1025_v34 = vld [vmem:[%s1368_s0 + $0x8] ss:$16 sps:$4 sm:$0xff]  }
   0xe   :  { %932 = vmatprep.subr.bf16.mxu1 %v1003_v13  ;;  %v1027_v35 = vld [vmem:[%s1368_s0 + $0xc] ss:$16 sps:$4 sm:$0xff]   ;;  %502 = vmatprep.mubr.bf16.mxu0 %v1024_v33  ;;  %v1028_v36 = vld [vmem:[%s1368_s0 + $0x24] ss:$16 sps:$4 sm:$0xff]   ;;  %v1032_v38 = vld [vmem:[%s1368_s0 + $0x20] ss:$16 sps:$4 sm:$0xff]  }
   0xf   :  { %599 = vmatprep.mubr.bf16.mxu1 %v1027_v35  ;;  %v1030_v37 = vld [vmem:[%s1368_s0 + $0x2c] ss:$16 sps:$4 sm:$0xff]   ;;  %v1033_v39 = vld [vmem:[%s1368_s0 + $0x28] ss:$16 sps:$4 sm:$0xff]   ;;  %v1034_v40 = vld [vmem:[%s1368_s0 + $0x44] ss:$16 sps:$4 sm:$0xff]  }
  0x10   :  { %869 = vmatpush3.bf16.msra.mxu0 %v1004_v14  ;;  %v1036_v41 = vld [vmem:[%s1368_s0 + $0x4c] ss:$16 sps:$4 sm:$0xff]   ;;  %v1038_v42 = vld [vmem:[%s1368_s0 + $0x40] ss:$16 sps:$4 sm:$0xff]   ;;  %v1039_v43 = vld [vmem:[%s1368_s0 + $0x48] ss:$16 sps:$4 sm:$0xff]  }
  0x11   :  { %933 = vmatpush3.bf16.msra.mxu1 %v1005_v15  ;;  %870 = vmatprep.subr.bf16.mxu0 %v1006_v16  ;;  %v1040_v44 = vld [vmem:[%s1368_s0 + $0x64] ss:$16 sps:$4 sm:$0xff]   ;;  %v1042_v45 = vld [vmem:[%s1368_s0 + $0x6c] ss:$16 sps:$4 sm:$0xff]   ;;  %v1044_v46 = vld [vmem:[%s1368_s0 + $0x60] ss:$16 sps:$4 sm:$0xff]  }
  0x12   :  { %934 = vmatprep.subr.bf16.mxu1 %v1007_v17  ;;  %v1045_v47 = vld [vmem:[%s1368_s0 + $0x68] ss:$16 sps:$4 sm:$0xff]   ;;  %v1046_v48 = vld [vmem:[%s1368_s0 + $0x84] ss:$16 sps:$4 sm:$0xff]   ;;  %v1048_v49 = vld [vmem:[%s1368_s0 + $0x8c] ss:$16 sps:$4 sm:$0xff]  }
  0x13   :  { %v1050_v50 = vld [vmem:[%s1368_s0 + $0x80] ss:$16 sps:$4 sm:$0xff]   ;;  %v1051_v51 = vld [vmem:[%s1368_s0 + $0x88] ss:$16 sps:$4 sm:$0xff]   ;;  %v1052_v52 = vld [vmem:[%s1368_s0 + $0xa4] ss:$16 sps:$4 sm:$0xff]  }
  0x14   :  { %871 = vmatpush3.bf16.msra.mxu0 %v1008_v18  ;;  %v1054_v53 = vld [vmem:[%s1368_s0 + $0xac] ss:$16 sps:$4 sm:$0xff]   ;;  %v1056_v54 = vld [vmem:[%s1368_s0 + $0xa0] ss:$16 sps:$4 sm:$0xff]   ;;  %v1057_v55 = vld [vmem:[%s1368_s0 + $0xa8] ss:$16 sps:$4 sm:$0xff]  }
  0x15   :  { %935 = vmatpush3.bf16.msra.mxu1 %v1009_v19  ;;  %872 = vmatprep.subr.bf16.mxu0 %v1010_v20  ;;  %v1058_v56 = vld [vmem:[%s1368_s0 + $0xc4] ss:$16 sps:$4 sm:$0xff]   ;;  %v1060_v57 = vld [vmem:[%s1368_s0 + $0xcc] ss:$16 sps:$4 sm:$0xff]   ;;  %v1062_v58 = vld [vmem:[%s1368_s0 + $0xc0] ss:$16 sps:$4 sm:$0xff]  }
  0x16   :  { %936 = vmatprep.subr.bf16.mxu1 %v1011_v21  ;;  %v1063_v59 = vld [vmem:[%s1368_s0 + $0xc8] ss:$16 sps:$4 sm:$0xff]   ;;  %v1064_v60 = vld [vmem:[%s1368_s0 + $0xe4] ss:$16 sps:$4 sm:$0xff]   ;;  %v1066_v61 = vld [vmem:[%s1368_s0 + $0xec] ss:$16 sps:$4 sm:$0xff]  }
  0x17   :  { %v1068_v62 = vld [vmem:[%s1368_s0 + $0xe0] ss:$16 sps:$4 sm:$0xff]   ;;  %v1069_v63 = vld [vmem:[%s1368_s0 + $0xe8] ss:$16 sps:$4 sm:$0xff]  }
  0x18   :  { %873 = vmatpush3.bf16.msra.mxu0 %v1012_v22 }
  0x19   :  { %937 = vmatpush3.bf16.msra.mxu1 %v1013_v23  ;;  %874 = vmatprep.subr.bf16.mxu0 %v1014_v24 }
  0x1a   :  { %938 = vmatprep.subr.bf16.mxu1 %v1015_v25 }
  0x1c   :  { %875 = vmatpush3.bf16.msra.mxu0 %v1016_v26 }
  0x1d   :  { %939 = vmatpush3.bf16.msra.mxu1 %v1017_v27  ;;  %876 = vmatprep.subr.bf16.mxu0 %v1018_v28 }
  0x1e   :  { %940 = vmatprep.subr.bf16.mxu1 %v1019_v29 }
  0x20   :  { %877 = vmatpush3.bf16.msra.mxu0 %v1020_v30 }
  0x21   :  { %941 = vmatpush3.bf16.msra.mxu1 %v1021_v31 }
  0x23   :  { %503 = vmatmul.mubr.bf16.vlgmr.msra.gmra.mrb[0].mxu0 %v1022_v32 }
  0x24   :  { %600 = vmatmul.mubr.bf16.vlgmr.msra.gmra.mrb[0].mxu1 %v1025_v34  ;;  %510 = vmatprep.mubr.bf16.mxu0 %v1028_v36 }
  0x25   :  { %607 = vmatprep.mubr.bf16.mxu1 %v1030_v37 }
  0x2b   :  { %511 = vmatmul.mubr.bf16.gmra.mrb[4].mxu0 %v1032_v38 }
  0x2c   :  { %608 = vmatmul.mubr.bf16.gmra.mrb[4].mxu1 %v1033_v39  ;;  %518 = vmatprep.mubr.bf16.mxu0 %v1034_v40 }
  0x2d   :  { %615 = vmatprep.mubr.bf16.mxu1 %v1036_v41 }
  0x33   :  { %519 = vmatmul.mubr.bf16.gmra.mrb[8].mxu0 %v1038_v42 }
  0x34   :  { %616 = vmatmul.mubr.bf16.gmra.mrb[8].mxu1 %v1039_v43  ;;  %526 = vmatprep.mubr.bf16.mxu0 %v1040_v44 }
  0x35   :  { %623 = vmatprep.mubr.bf16.mxu1 %v1042_v45 }
  0x3b   :  { %527 = vmatmul.mubr.bf16.gmra.mrb[12].mxu0 %v1044_v46 }
  0x3c   :  { %624 = vmatmul.mubr.bf16.gmra.mrb[12].mxu1 %v1045_v47  ;;  %534 = vmatprep.mubr.bf16.mxu0 %v1046_v48 }
  0x3d   :  { %631 = vmatprep.mubr.bf16.mxu1 %v1048_v49 }
  0x43   :  { %535 = vmatmul.mubr.bf16.gmra.mrb[16].mxu0 %v1050_v50 }
  0x44   :  { %632 = vmatmul.mubr.bf16.gmra.mrb[16].mxu1 %v1051_v51  ;;  %542 = vmatprep.mubr.bf16.mxu0 %v1052_v52 }
  0x45   :  { %639 = vmatprep.mubr.bf16.mxu1 %v1054_v53 }
  0x4b   :  { %543 = vmatmul.mubr.bf16.gmra.mrb[20].mxu0 %v1056_v54 }
  0x4c   :  { %640 = vmatmul.mubr.bf16.gmra.mrb[20].mxu1 %v1057_v55  ;;  %550 = vmatprep.mubr.bf16.mxu0 %v1058_v56 }
  0x4d   :  { %647 = vmatprep.mubr.bf16.mxu1 %v1060_v57 }
  0x53   :  { %551 = vmatmul.mubr.bf16.gmra.mrb[24].mxu0 %v1062_v58 }
  0x54   :  { %648 = vmatmul.mubr.bf16.gmra.mrb[24].mxu1 %v1063_v59  ;;  %558 = vmatprep.mubr.bf16.mxu0 %v1064_v60 }
  0x55   :  { %655 = vmatprep.mubr.bf16.mxu1 %v1066_v61 }
  0x5b   :  { %559 = vmatmul.mubr.bf16.gmra.mrb[28].mxu0 %v1068_v62 }
  0x5c   :  { %656 = vmatmul.mubr.bf16.gmra.mrb[28].mxu1 %v1069_v63 }
  0xf6   :  { %v878_v0 = vpop.f32.mrb[0].mxu0 }
  0xf7   :  { %v942_v1 = vpop.f32.mrb[0].mxu1  ;;  %v879_v3 = vpop.f32.mrb[1].mxu0 }
  0xf8   :  { %v880_v4 = vadd.f32 %v879_v3, %v878_v0  ;;  %v943_v5 = vpop.f32.mrb[1].mxu1  ;;  %v881_v6 = vpop.f32.mrb[2].mxu0 }
  0xf9   :  { %v944_v7 = vadd.f32 %v943_v5, %v942_v1  ;;  %v945_v8 = vpop.f32.mrb[2].mxu1  ;;  %v882_v9 = vpop.f32.mrb[3].mxu0 }
  0xfa   :  { %v505_v10 = vadd.f32 %v880_v4, %v1285_v2  ;;  %v883_v11 = vadd.f32 %v882_v9, %v881_v6  ;;  %v946_v12 = vpop.f32.mrb[3].mxu1 }
  0xfb   :  { %v947_v13 = vadd.f32 %v946_v12, %v945_v8 }
  0xfc   :  { %v602_v14 = vadd.f32 %v944_v7, %v505_v10  ;;  %v508_v15 = vadd.f32 %v883_v11, %v1285_v2 }
  0xfe   :  { %v664_v16 = vmax.f32 %v602_v14, 0.0  ;;  %v605_v17 = vadd.f32 %v947_v13, %v508_v15  ;;  %v884_v18 = vpop.f32.mrb[4].mxu0 }
  0xff   :  { %v948_v19 = vpop.f32.mrb[4].mxu1  ;;  %v885_v20 = vpop.f32.mrb[5].mxu0 }
 0x100   :  { %v846_v21 = vpack.c.bf16 %v664_v16, %v664_v16  ;;  %v665_v22 = vmax.f32 %v605_v17, 0.0  ;;  %v886_v23 = vadd.f32 %v885_v20, %v884_v18  ;;  %v949_v24 = vpop.f32.mrb[5].mxu1  ;;  %v887_v25 = vpop.f32.mrb[6].mxu0 }
 0x101   :  { %v950_v26 = vadd.f32 %v949_v24, %v948_v19  ;;  %v951_v27 = vpop.f32.mrb[6].mxu1  ;;  %v888_v28 = vpop.f32.mrb[7].mxu0 }
 0x102   :  { %745 = vst.msk [vmem:[%s1370_s3] sm:$0xf] %vm744_vm0, %v846_v21  ;;  %v847_v29 = vpack.c.bf16 %v665_v22, %v665_v22  ;;  %v513_v30 = vadd.f32 %v886_v23, %v1285_v2  ;;  %v889_v31 = vadd.f32 %v888_v28, %v887_v25  ;;  %v952_v32 = vpop.f32.mrb[7].mxu1 }
 0x103   :  { %v953_v33 = vadd.f32 %v952_v32, %v951_v27 }
 0x104   :  { %746 = vst.msk [vmem:[%s1370_s3 + $0x4] sm:$0xf] %vm744_vm0, %v847_v29  ;;  %v610_v34 = vadd.f32 %v950_v26, %v513_v30  ;;  %v516_v35 = vadd.f32 %v889_v31, %v1285_v2 }
 0x106   :  { %v666_v36 = vmax.f32 %v610_v34, 0.0  ;;  %v613_v37 = vadd.f32 %v953_v33, %v516_v35  ;;  %v890_v38 = vpop.f32.mrb[8].mxu0 }
 0x107   :  { %v954_v39 = vpop.f32.mrb[8].mxu1  ;;  %v891_v40 = vpop.f32.mrb[9].mxu0 }
 0x108   :  { %v848_v41 = vpack.c.bf16 %v666_v36, %v666_v36  ;;  %v667_v42 = vmax.f32 %v613_v37, 0.0  ;;  %v892_v43 = vadd.f32 %v891_v40, %v890_v38  ;;  %v955_v44 = vpop.f32.mrb[9].mxu1  ;;  %v893_v45 = vpop.f32.mrb[10].mxu0 }
 0x109   :  { %v956_v46 = vadd.f32 %v955_v44, %v954_v39  ;;  %v957_v47 = vpop.f32.mrb[10].mxu1  ;;  %v894_v48 = vpop.f32.mrb[11].mxu0 }
 0x10a   :  { %747 = vst.msk [vmem:[%s1370_s3 + $0x8] sm:$0xf] %vm744_vm0, %v848_v41  ;;  %v849_v49 = vpack.c.bf16 %v667_v42, %v667_v42  ;;  %v521_v50 = vadd.f32 %v892_v43, %v1285_v2  ;;  %v895_v51 = vadd.f32 %v894_v48, %v893_v45  ;;  %v958_v52 = vpop.f32.mrb[11].mxu1 }
 0x10b   :  { %v959_v53 = vadd.f32 %v958_v52, %v957_v47 }
 0x10c   :  { %748 = vst.msk [vmem:[%s1370_s3 + $0xc] sm:$0xf] %vm744_vm0, %v849_v49  ;;  %v618_v54 = vadd.f32 %v956_v46, %v521_v50  ;;  %v524_v55 = vadd.f32 %v895_v51, %v1285_v2 }
 0x10e   :  { %v668_v56 = vmax.f32 %v618_v54, 0.0  ;;  %v621_v57 = vadd.f32 %v959_v53, %v524_v55  ;;  %v896_v58 = vpop.f32.mrb[12].mxu0 }
 0x10f   :  { %v960_v59 = vpop.f32.mrb[12].mxu1  ;;  %v897_v60 = vpop.f32.mrb[13].mxu0 }
 0x110   :  { %v850_v61 = vpack.c.bf16 %v668_v56, %v668_v56  ;;  %v669_v62 = vmax.f32 %v621_v57, 0.0  ;;  %v898_v63 = vadd.f32 %v897_v60, %v896_v58  ;;  %v961_v0 = vpop.f32.mrb[13].mxu1  ;;  %v899_v1 = vpop.f32.mrb[14].mxu0 }
 0x111   :  { %v962_v3 = vadd.f32 %v961_v0, %v960_v59  ;;  %v963_v4 = vpop.f32.mrb[14].mxu1  ;;  %v900_v5 = vpop.f32.mrb[15].mxu0 }
 0x112   :  { %749 = vst.msk [vmem:[%s1370_s3 + $0x10] sm:$0xf] %vm744_vm0, %v850_v61  ;;  %v851_v6 = vpack.c.bf16 %v669_v62, %v669_v62  ;;  %v529_v7 = vadd.f32 %v898_v63, %v1285_v2  ;;  %v901_v8 = vadd.f32 %v900_v5, %v899_v1  ;;  %v964_v9 = vpop.f32.mrb[15].mxu1 }
 0x113   :  { %v965_v10 = vadd.f32 %v964_v9, %v963_v4 }
 0x114   :  { %750 = vst.msk [vmem:[%s1370_s3 + $0x14] sm:$0xf] %vm744_vm0, %v851_v6  ;;  %v626_v11 = vadd.f32 %v962_v3, %v529_v7  ;;  %v532_v12 = vadd.f32 %v901_v8, %v1285_v2 }
 0x116   :  { %v670_v13 = vmax.f32 %v626_v11, 0.0  ;;  %v629_v14 = vadd.f32 %v965_v10, %v532_v12  ;;  %v902_v15 = vpop.f32.mrb[16].mxu0 }
 0x117   :  { %v966_v16 = vpop.f32.mrb[16].mxu1  ;;  %v903_v17 = vpop.f32.mrb[17].mxu0 }
 0x118   :  { %v852_v18 = vpack.c.bf16 %v670_v13, %v670_v13  ;;  %v671_v19 = vmax.f32 %v629_v14, 0.0  ;;  %v904_v20 = vadd.f32 %v903_v17, %v902_v15  ;;  %v967_v21 = vpop.f32.mrb[17].mxu1  ;;  %v905_v22 = vpop.f32.mrb[18].mxu0 }
 0x119   :  { %v968_v23 = vadd.f32 %v967_v21, %v966_v16  ;;  %v969_v24 = vpop.f32.mrb[18].mxu1  ;;  %v906_v25 = vpop.f32.mrb[19].mxu0 }
 0x11a   :  { %751 = vst.msk [vmem:[%s1370_s3 + $0x18] sm:$0xf] %vm744_vm0, %v852_v18  ;;  %v853_v26 = vpack.c.bf16 %v671_v19, %v671_v19  ;;  %v537_v27 = vadd.f32 %v904_v20, %v1285_v2  ;;  %v907_v28 = vadd.f32 %v906_v25, %v905_v22  ;;  %v970_v29 = vpop.f32.mrb[19].mxu1 }
 0x11b   :  { %v971_v30 = vadd.f32 %v970_v29, %v969_v24 }
 0x11c   :  { %752 = vst.msk [vmem:[%s1370_s3 + $0x1c] sm:$0xf] %vm744_vm0, %v853_v26  ;;  %v634_v31 = vadd.f32 %v968_v23, %v537_v27  ;;  %v540_v32 = vadd.f32 %v907_v28, %v1285_v2 }
 0x11e   :  { %v672_v33 = vmax.f32 %v634_v31, 0.0  ;;  %v637_v34 = vadd.f32 %v971_v30, %v540_v32  ;;  %v908_v35 = vpop.f32.mrb[20].mxu0 }
 0x11f   :  { %v972_v36 = vpop.f32.mrb[20].mxu1  ;;  %v909_v37 = vpop.f32.mrb[21].mxu0 }
 0x120   :  { %v854_v38 = vpack.c.bf16 %v672_v33, %v672_v33  ;;  %v673_v39 = vmax.f32 %v637_v34, 0.0  ;;  %v910_v40 = vadd.f32 %v909_v37, %v908_v35  ;;  %v973_v41 = vpop.f32.mrb[21].mxu1  ;;  %v911_v42 = vpop.f32.mrb[22].mxu0 }
 0x121   :  { %v974_v43 = vadd.f32 %v973_v41, %v972_v36  ;;  %v975_v44 = vpop.f32.mrb[22].mxu1  ;;  %v912_v45 = vpop.f32.mrb[23].mxu0 }
 0x122   :  { %753 = vst.msk [vmem:[%s1370_s3 + $0x20] sm:$0xf] %vm744_vm0, %v854_v38  ;;  %v855_v46 = vpack.c.bf16 %v673_v39, %v673_v39  ;;  %v545_v47 = vadd.f32 %v910_v40, %v1285_v2  ;;  %v913_v48 = vadd.f32 %v912_v45, %v911_v42  ;;  %v976_v49 = vpop.f32.mrb[23].mxu1 }
 0x123   :  { %v977_v50 = vadd.f32 %v976_v49, %v975_v44 }
 0x124   :  { %754 = vst.msk [vmem:[%s1370_s3 + $0x24] sm:$0xf] %vm744_vm0, %v855_v46  ;;  %v642_v51 = vadd.f32 %v974_v43, %v545_v47  ;;  %v548_v52 = vadd.f32 %v913_v48, %v1285_v2 }
 0x126   :  { %v674_v53 = vmax.f32 %v642_v51, 0.0  ;;  %v645_v54 = vadd.f32 %v977_v50, %v548_v52  ;;  %v914_v55 = vpop.f32.mrb[24].mxu0 }
 0x127   :  { %v978_v56 = vpop.f32.mrb[24].mxu1  ;;  %v915_v57 = vpop.f32.mrb[25].mxu0 }
 0x128   :  { %v856_v58 = vpack.c.bf16 %v674_v53, %v674_v53  ;;  %v675_v59 = vmax.f32 %v645_v54, 0.0  ;;  %v916_v60 = vadd.f32 %v915_v57, %v914_v55  ;;  %v979_v61 = vpop.f32.mrb[25].mxu1  ;;  %v917_v62 = vpop.f32.mrb[26].mxu0 }
 0x129   :  { %v980_v63 = vadd.f32 %v979_v61, %v978_v56  ;;  %v981_v0 = vpop.f32.mrb[26].mxu1  ;;  %v918_v1 = vpop.f32.mrb[27].mxu0 }
 0x12a   :  { %755 = vst.msk [vmem:[%s1370_s3 + $0x28] sm:$0xf] %vm744_vm0, %v856_v58  ;;  %v857_v3 = vpack.c.bf16 %v675_v59, %v675_v59  ;;  %v553_v4 = vadd.f32 %v916_v60, %v1285_v2  ;;  %v919_v5 = vadd.f32 %v918_v1, %v917_v62  ;;  %v982_v6 = vpop.f32.mrb[27].mxu1 }
 0x12b   :  { %v983_v7 = vadd.f32 %v982_v6, %v981_v0 }
 0x12c   :  { %756 = vst.msk [vmem:[%s1370_s3 + $0x2c] sm:$0xf] %vm744_vm0, %v857_v3  ;;  %v650_v8 = vadd.f32 %v980_v63, %v553_v4  ;;  %v556_v9 = vadd.f32 %v919_v5, %v1285_v2 }
 0x12e   :  { %v676_v10 = vmax.f32 %v650_v8, 0.0  ;;  %v653_v11 = vadd.f32 %v983_v7, %v556_v9  ;;  %v920_v12 = vpop.f32.mrb[28].mxu0 }
 0x12f   :  { %v984_v13 = vpop.f32.mrb[28].mxu1  ;;  %v921_v14 = vpop.f32.mrb[29].mxu0 }
 0x130   :  { %v858_v15 = vpack.c.bf16 %v676_v10, %v676_v10  ;;  %v677_v16 = vmax.f32 %v653_v11, 0.0  ;;  %v922_v17 = vadd.f32 %v921_v14, %v920_v12  ;;  %v985_v18 = vpop.f32.mrb[29].mxu1  ;;  %v923_v19 = vpop.f32.mrb[30].mxu0 }
 0x131   :  { %v986_v20 = vadd.f32 %v985_v18, %v984_v13  ;;  %v987_v21 = vpop.f32.mrb[30].mxu1  ;;  %v924_v22 = vpop.f32.mrb[31].mxu0 }
 0x132   :  { %757 = vst.msk [vmem:[%s1370_s3 + $0x30] sm:$0xf] %vm744_vm0, %v858_v15  ;;  %v859_v23 = vpack.c.bf16 %v677_v16, %v677_v16  ;;  %v561_v24 = vadd.f32 %v922_v17, %v1285_v2  ;;  %v925_v25 = vadd.f32 %v924_v22, %v923_v19  ;;  %v988_v26 = vpop.f32.mrb[31].mxu1 }
 0x133   :  { %v989_v27 = vadd.f32 %v988_v26, %v987_v21 }
 0x134   :  { %758 = vst.msk [vmem:[%s1370_s3 + $0x34] sm:$0xf] %vm744_vm0, %v859_v23  ;;  %v658_v28 = vadd.f32 %v986_v20, %v561_v24  ;;  %v564_v29 = vadd.f32 %v925_v25, %v1285_v2 }
 0x136   :  { %v678_v30 = vmax.f32 %v658_v28, 0.0  ;;  %v661_v31 = vadd.f32 %v989_v27, %v564_v29 }
 0x138   :  { %v860_v32 = vpack.c.bf16 %v678_v30, %v678_v30  ;;  %v679_v33 = vmax.f32 %v661_v31, 0.0 }
 0x13a   :  { %759 = vst.msk [vmem:[%s1370_s3 + $0x38] sm:$0xf] %vm744_vm0, %v860_v32  ;;  %v861_v34 = vpack.c.bf16 %v679_v33, %v679_v33 }
 0x13c   :  { %760 = vst.msk [vmem:[%s1370_s3 + $0x3c] sm:$0xf] %vm744_vm0, %v861_v34 }

// kernel: betavae_forward.12
= control target key start
LH: loop header
LB: loop body
LE: loop exit
PB: predicated region body
PF: predicated region fallthrough
CT: control target
= control target key end

     0   :  { %vm846_vm0 = vcmask 519168   ;;  %s1399_s1 = inlined_call_operand.vmem [shape: bf16[1024,64], index: 1, kind: input, shape index: {}]   ;;  %s1400_s0 = inlined_call_operand.vmem [shape: bf16[32,1024], index: 0, kind: input, shape index: {}]   ;;  %s1401_s2 = inlined_call_operand.vmem [shape: f32[1,64], index: 2, kind: input, shape index: {}]   ;;  %s1402_s3 = inlined_call_operand.vmem [shape: bf16[32,64], index: 3, kind: output, shape index: {}]  }
   0x1   :  { %v1056_v0 = vld [vmem:[%s1399_s1 + $0x40] sm:$0xff]   ;;  %v1060_v4 = vld [vmem:[%s1399_s1 + $0x48] sm:$0xff]   ;;  %v1064_v8 = vld [vmem:[%s1399_s1 + $0x50] sm:$0xff]  }
   0x2   :  { %v1057_v1 = vld [vmem:[%s1399_s1 + $0xc0] sm:$0xff]   ;;  %944 = vmatprep.subr.bf16.mxu0 %v1056_v0  ;;  %v1061_v5 = vld [vmem:[%s1399_s1 + $0xc8] sm:$0xff]   ;;  %v1065_v9 = vld [vmem:[%s1399_s1 + $0xd0] sm:$0xff]  }
   0x3   :  { %v1058_v2 = vld [vmem:[%s1399_s1] sm:$0xff]   ;;  %972 = vmatprep.subr.bf16.mxu1 %v1057_v1  ;;  %v1062_v6 = vld [vmem:[%s1399_s1 + $0x8] sm:$0xff]   ;;  %v1066_v10 = vld [vmem:[%s1399_s1 + $0x10] sm:$0xff]  }
   0x4   :  { %v1059_v3 = vld [vmem:[%s1399_s1 + $0x80] sm:$0xff]   ;;  %945 = vmatpush3.bf16.msra.mxu0 %v1058_v2  ;;  %v1063_v7 = vld [vmem:[%s1399_s1 + $0x88] sm:$0xff]   ;;  %v1067_v11 = vld [vmem:[%s1399_s1 + $0x90] sm:$0xff]  }
   0x5   :  { %973 = vmatpush3.bf16.msra.mxu1 %v1059_v3  ;;  %946 = vmatprep.subr.bf16.mxu0 %v1060_v4  ;;  %v1068_v12 = vld [vmem:[%s1399_s1 + $0x58] sm:$0xff]   ;;  %v1072_v16 = vld [vmem:[%s1399_s1 + $0x60] sm:$0xff]   ;;  %v1076_v20 = vld [vmem:[%s1399_s1 + $0x68] sm:$0xff]  }
   0x6   :  { %974 = vmatprep.subr.bf16.mxu1 %v1061_v5  ;;  %v1069_v13 = vld [vmem:[%s1399_s1 + $0xd8] sm:$0xff]   ;;  %v1073_v17 = vld [vmem:[%s1399_s1 + $0xe0] sm:$0xff]   ;;  %v1077_v21 = vld [vmem:[%s1399_s1 + $0xe8] sm:$0xff]  }
   0x7   :  { %v1070_v14 = vld [vmem:[%s1399_s1 + $0x18] sm:$0xff]   ;;  %v1074_v18 = vld [vmem:[%s1399_s1 + $0x20] sm:$0xff]   ;;  %v1078_v22 = vld [vmem:[%s1399_s1 + $0x28] sm:$0xff]  }
   0x8   :  { %947 = vmatpush3.bf16.msra.mxu0 %v1062_v6  ;;  %v1071_v15 = vld [vmem:[%s1399_s1 + $0x98] sm:$0xff]   ;;  %v1075_v19 = vld [vmem:[%s1399_s1 + $0xa0] sm:$0xff]   ;;  %v1079_v23 = vld [vmem:[%s1399_s1 + $0xa8] sm:$0xff]  }
   0x9   :  { %975 = vmatpush3.bf16.msra.mxu1 %v1063_v7  ;;  %948 = vmatprep.subr.bf16.mxu0 %v1064_v8  ;;  %v1080_v24 = vld [vmem:[%s1399_s1 + $0x70] sm:$0xff]   ;;  %v1084_v28 = vld [vmem:[%s1399_s1 + $0x78] sm:$0xff]   ;;  %v15_v32 = vld [vmem:[%s1400_s0] sm:$0xff] }
   0xa   :  { %976 = vmatprep.subr.bf16.mxu1 %v1065_v9  ;;  %v1081_v25 = vld [vmem:[%s1399_s1 + $0xf0] sm:$0xff]   ;;  %v1085_v29 = vld [vmem:[%s1399_s1 + $0xf8] sm:$0xff]   ;;  %v19_v33 = vld [vmem:[%s1400_s0 + $0x20] sm:$0xff] }
   0xb   :  { %v1082_v26 = vld [vmem:[%s1399_s1 + $0x30] sm:$0xff]   ;;  %v1086_v30 = vld [vmem:[%s1399_s1 + $0x38] sm:$0xff]   ;;  %v16_v34 = vld [vmem:[%s1400_s0 + $0x8] sm:$0xff]  ;;  %v856_v35 = vcombine.low %v15_v32, %v19_v33  ;;  %v857_v36 = vcombine.high %v15_v32, %v19_v33 }
   0xc   :  { %949 = vmatpush3.bf16.msra.mxu0 %v1066_v10  ;;  %v1083_v27 = vld [vmem:[%s1399_s1 + $0xb0] sm:$0xff]   ;;  %v1087_v31 = vld [vmem:[%s1399_s1 + $0xb8] sm:$0xff]   ;;  %v20_v37 = vld [vmem:[%s1400_s0 + $0x28] sm:$0xff] }
   0xd   :  { %977 = vmatpush3.bf16.msra.mxu1 %v1067_v11  ;;  %950 = vmatprep.subr.bf16.mxu0 %v1068_v12  ;;  %v858_v38 = vcombine.low %v16_v34, %v20_v37  ;;  %v859_v39 = vcombine.high %v16_v34, %v20_v37  ;;  %v1088_v40 = vld [vmem:[%s1399_s1 + $0x140] sm:$0xff]   ;;  %v1092_v44 = vld [vmem:[%s1399_s1 + $0x148] sm:$0xff]   ;;  %v1096_v48 = vld [vmem:[%s1399_s1 + $0x150] sm:$0xff]  }
   0xe   :  { %978 = vmatprep.subr.bf16.mxu1 %v1069_v13  ;;  %662 = vmatprep.mubr.bf16.mxu0 %v857_v36  ;;  %v1089_v41 = vld [vmem:[%s1399_s1 + $0x1c0] sm:$0xff]   ;;  %v1093_v45 = vld [vmem:[%s1399_s1 + $0x1c8] sm:$0xff]   ;;  %v1097_v49 = vld [vmem:[%s1399_s1 + $0x1d0] sm:$0xff]  }
   0xf   :  { %711 = vmatprep.mubr.bf16.mxu1 %v859_v39  ;;  %v1090_v42 = vld [vmem:[%s1399_s1 + $0x100] sm:$0xff]   ;;  %v1094_v46 = vld [vmem:[%s1399_s1 + $0x108] sm:$0xff]   ;;  %v1098_v50 = vld [vmem:[%s1399_s1 + $0x110] sm:$0xff]  }
  0x10   :  { %951 = vmatpush3.bf16.msra.mxu0 %v1070_v14  ;;  %v1091_v43 = vld [vmem:[%s1399_s1 + $0x180] sm:$0xff]   ;;  %v1095_v47 = vld [vmem:[%s1399_s1 + $0x188] sm:$0xff]   ;;  %v1099_v51 = vld [vmem:[%s1399_s1 + $0x190] sm:$0xff]  }
  0x11   :  { %979 = vmatpush3.bf16.msra.mxu1 %v1071_v15  ;;  %952 = vmatprep.subr.bf16.mxu0 %v1072_v16  ;;  %v1100_v52 = vld [vmem:[%s1399_s1 + $0x158] sm:$0xff]   ;;  %v1104_v56 = vld [vmem:[%s1399_s1 + $0x160] sm:$0xff]   ;;  %v1108_v63 = vld [vmem:[%s1399_s1 + $0x168] sm:$0xff]  }
  0x12   :  { %980 = vmatprep.subr.bf16.mxu1 %v1073_v17  ;;  %v1101_v53 = vld [vmem:[%s1399_s1 + $0x1d8] sm:$0xff]   ;;  %v1105_v57 = vld [vmem:[%s1399_s1 + $0x1e0] sm:$0xff]   ;;  %v1109_v1 = vld [vmem:[%s1399_s1 + $0x1e8] sm:$0xff]  }
  0x13   :  { %v1102_v54 = vld [vmem:[%s1399_s1 + $0x118] sm:$0xff]   ;;  %v1106_v58 = vld [vmem:[%s1399_s1 + $0x120] sm:$0xff]   ;;  %v1110_v2 = vld [vmem:[%s1399_s1 + $0x128] sm:$0xff]  }
  0x14   :  { %953 = vmatpush3.bf16.msra.mxu0 %v1074_v18  ;;  %v1103_v55 = vld [vmem:[%s1399_s1 + $0x198] sm:$0xff]   ;;  %v1107_v59 = vld [vmem:[%s1399_s1 + $0x1a0] sm:$0xff]   ;;  %v1111_v3 = vld [vmem:[%s1399_s1 + $0x1a8] sm:$0xff]  }
  0x15   :  { %981 = vmatpush3.bf16.msra.mxu1 %v1075_v19  ;;  %954 = vmatprep.subr.bf16.mxu0 %v1076_v20  ;;  %v23_v60 = vld [vmem:[%s1400_s0 + $0x40] sm:$0xff]  ;;  %v24_v4 = vld [vmem:[%s1400_s0 + $0x48] sm:$0xff]  ;;  %v1112_v8 = vld [vmem:[%s1399_s1 + $0x170] sm:$0xff]  }
  0x16   :  { %982 = vmatprep.subr.bf16.mxu1 %v1077_v21  ;;  %v27_v61 = vld [vmem:[%s1400_s0 + $0x60] sm:$0xff]  ;;  %v28_v5 = vld [vmem:[%s1400_s0 + $0x68] sm:$0xff]  ;;  %v1113_v9 = vld [vmem:[%s1399_s1 + $0x1f0] sm:$0xff]  }
  0x17   :  { %v865_v62 = vcombine.high %v23_v60, %v27_v61  ;;  %v864_v0 = vcombine.low %v23_v60, %v27_v61  ;;  %v867_v6 = vcombine.high %v24_v4, %v28_v5  ;;  %v866_v7 = vcombine.low %v24_v4, %v28_v5  ;;  %v1114_v10 = vld [vmem:[%s1399_s1 + $0x130] sm:$0xff]   ;;  %v1116_v12 = vld [vmem:[%s1399_s1 + $0x178] sm:$0xff]   ;;  %v855_v34 = vld [vmem:[%s1401_s2] ss:$0 sm:$0xff] }
  0x18   :  { %955 = vmatpush3.bf16.msra.mxu0 %v1078_v22  ;;  %v1115_v11 = vld [vmem:[%s1399_s1 + $0x1b0] sm:$0xff]   ;;  %v1117_v13 = vld [vmem:[%s1399_s1 + $0x1f8] sm:$0xff]  }
  0x19   :  { %983 = vmatpush3.bf16.msra.mxu1 %v1079_v23  ;;  %956 = vmatprep.subr.bf16.mxu0 %v1080_v24  ;;  %v1118_v14 = vld [vmem:[%s1399_s1 + $0x138] sm:$0xff]   ;;  %v17_v16 = vld [vmem:[%s1400_s0 + $0x10] sm:$0xff] }
  0x1a   :  { %984 = vmatprep.subr.bf16.mxu1 %v1081_v25  ;;  %v1119_v15 = vld [vmem:[%s1399_s1 + $0x1b8] sm:$0xff]   ;;  %v21_v17 = vld [vmem:[%s1400_s0 + $0x30] sm:$0xff] }
  0x1b   :  { %v18_v18 = vld [vmem:[%s1400_s0 + $0x18] sm:$0xff]  ;;  %v860_v20 = vcombine.low %v17_v16, %v21_v17  ;;  %v861_v21 = vcombine.high %v17_v16, %v21_v17  ;;  %v25_v24 = vld [vmem:[%s1400_s0 + $0x50] sm:$0xff] }
  0x1c   :  { %957 = vmatpush3.bf16.msra.mxu0 %v1082_v26  ;;  %v22_v19 = vld [vmem:[%s1400_s0 + $0x38] sm:$0xff]  ;;  %v29_v25 = vld [vmem:[%s1400_s0 + $0x70] sm:$0xff] }
  0x1d   :  { %985 = vmatpush3.bf16.msra.mxu1 %v1083_v27  ;;  %958 = vmatprep.subr.bf16.mxu0 %v1084_v28  ;;  %v862_v22 = vcombine.low %v18_v18, %v22_v19  ;;  %v863_v23 = vcombine.high %v18_v18, %v22_v19  ;;  %v26_v26 = vld [vmem:[%s1400_s0 + $0x58] sm:$0xff]  ;;  %v869_v27 = vcombine.high %v25_v24, %v29_v25 }
  0x1e   :  { %986 = vmatprep.subr.bf16.mxu1 %v1085_v29  ;;  %v30_v28 = vld [vmem:[%s1400_s0 + $0x78] sm:$0xff] }
  0x1f   :  { %v871_v29 = vcombine.high %v26_v26, %v30_v28 }
  0x20   :  { %959 = vmatpush3.bf16.msra.mxu0 %v1086_v30  ;;  %v868_v30 = vcombine.low %v25_v24, %v29_v25 }
  0x21   :  { %987 = vmatpush3.bf16.msra.mxu1 %v1087_v31  ;;  %1000 = vmatprep.subr.bf16.mxu0 %v1088_v40  ;;  %v870_v31 = vcombine.low %v26_v26, %v30_v28 }
  0x22   :  { %1028 = vmatprep.subr.bf16.mxu1 %v1089_v41 }
  0x23   :  { %663 = vmatmul.mubr.bf16.vlgmr.msra.gmra.mrb[0].mxu0 %v856_v35 }
  0x24   :  { %712 = vmatmul.mubr.bf16.vlgmr.msra.gmra.mrb[0].mxu1 %v858_v38  ;;  %1001 = vmatpush3.bf16.msra.mxu0 %v1090_v42 }
  0x25   :  { %1029 = vmatpush3.bf16.msra.mxu1 %v1091_v43  ;;  %1002 = vmatprep.subr.bf16.mxu0 %v1092_v44 }
  0x26   :  { %1030 = vmatprep.subr.bf16.mxu1 %v1093_v45  ;;  %670 = vmatprep.mubr.bf16.mxu0 %v865_v62 }
  0x27   :  { %719 = vmatprep.mubr.bf16.mxu1 %v867_v6 }
  0x28   :  { %1003 = vmatpush3.bf16.msra.mxu0 %v1094_v46 }
  0x29   :  { %1031 = vmatpush3.bf16.msra.mxu1 %v1095_v47  ;;  %1004 = vmatprep.subr.bf16.mxu0 %v1096_v48 }
  0x2a   :  { %1032 = vmatprep.subr.bf16.mxu1 %v1097_v49 }
  0x2b   :  { %671 = vmatmul.mubr.bf16.gmra.mrb[4].mxu0 %v864_v0 }
  0x2c   :  { %1005 = vmatpush3.bf16.msra.mxu0 %v1098_v50  ;;  %720 = vmatmul.mubr.bf16.gmra.mrb[4].mxu1 %v866_v7 }
  0x2d   :  { %1033 = vmatpush3.bf16.msra.mxu1 %v1099_v51  ;;  %1006 = vmatprep.subr.bf16.mxu0 %v1100_v52 }
  0x2e   :  { %1034 = vmatprep.subr.bf16.mxu1 %v1101_v53  ;;  %760 = vmatprep.mubr.bf16.mxu0 %v861_v21 }
  0x2f   :  { %809 = vmatprep.mubr.bf16.mxu1 %v863_v23 }
  0x30   :  { %1007 = vmatpush3.bf16.msra.mxu0 %v1102_v54 }
  0x31   :  { %1035 = vmatpush3.bf16.msra.mxu1 %v1103_v55  ;;  %1008 = vmatprep.subr.bf16.mxu0 %v1104_v56 }
  0x32   :  { %1036 = vmatprep.subr.bf16.mxu1 %v1105_v57 }
  0x34   :  { %1009 = vmatpush3.bf16.msra.mxu0 %v1106_v58 }
  0x35   :  { %1037 = vmatpush3.bf16.msra.mxu1 %v1107_v59  ;;  %1010 = vmatprep.subr.bf16.mxu0 %v1108_v63 }
  0x36   :  { %1038 = vmatprep.subr.bf16.mxu1 %v1109_v1 }
  0x38   :  { %1011 = vmatpush3.bf16.msra.mxu0 %v1110_v2 }
  0x39   :  { %1039 = vmatpush3.bf16.msra.mxu1 %v1111_v3  ;;  %1012 = vmatprep.subr.bf16.mxu0 %v1112_v8 }
  0x3a   :  { %1040 = vmatprep.subr.bf16.mxu1 %v1113_v9 }
  0x3c   :  { %1013 = vmatpush3.bf16.msra.mxu0 %v1114_v10 }
  0x3d   :  { %1041 = vmatpush3.bf16.msra.mxu1 %v1115_v11  ;;  %1014 = vmatprep.subr.bf16.mxu0 %v1116_v12 }
  0x3e   :  { %1042 = vmatprep.subr.bf16.mxu1 %v1117_v13 }
  0x40   :  { %1015 = vmatpush3.bf16.msra.mxu0 %v1118_v14 }
  0x41   :  { %1043 = vmatpush3.bf16.msra.mxu1 %v1119_v15 }
  0x43   :  { %761 = vmatmul.mubr.bf16.vlgmr.msra.gmra.mrb[8].mxu0 %v860_v20 }
  0x44   :  { %810 = vmatmul.mubr.bf16.vlgmr.msra.gmra.mrb[8].mxu1 %v862_v22  ;;  %768 = vmatprep.mubr.bf16.mxu0 %v869_v27 }
  0x45   :  { %817 = vmatprep.mubr.bf16.mxu1 %v871_v29 }
  0x4b   :  { %769 = vmatmul.mubr.bf16.gmra.mrb[12].mxu0 %v868_v30 }
  0x4c   :  { %818 = vmatmul.mubr.bf16.gmra.mrb[12].mxu1 %v870_v31 }
  0xf6   :  { %v960_v32 = vpop.f32.mrb[0].mxu0 }
  0xf7   :  { %v988_v33 = vpop.f32.mrb[0].mxu1  ;;  %v961_v35 = vpop.f32.mrb[1].mxu0 }
  0xf8   :  { %v962_v36 = vadd.f32 %v961_v35, %v960_v32  ;;  %v989_v37 = vpop.f32.mrb[1].mxu1  ;;  %v963_v38 = vpop.f32.mrb[2].mxu0 }
  0xf9   :  { %v990_v39 = vadd.f32 %v989_v37, %v988_v33  ;;  %v991_v40 = vpop.f32.mrb[2].mxu1  ;;  %v964_v41 = vpop.f32.mrb[3].mxu0 }
  0xfa   :  { %v665_v42 = vadd.f32 %v962_v36, %v855_v34  ;;  %v965_v43 = vadd.f32 %v964_v41, %v963_v38  ;;  %v992_v44 = vpop.f32.mrb[3].mxu1 }
  0xfb   :  { %v993_v45 = vadd.f32 %v992_v44, %v991_v40 }
  0xfc   :  { %v714_v46 = vadd.f32 %v990_v39, %v665_v42  ;;  %v668_v47 = vadd.f32 %v965_v43, %v855_v34 }
  0xfe   :  { %v717_v48 = vadd.f32 %v993_v45, %v668_v47  ;;  %v966_v49 = vpop.f32.mrb[4].mxu0 }
  0xff   :  { %v967_v50 = vpop.f32.mrb[5].mxu0  ;;  %v994_v56 = vpop.f32.mrb[4].mxu1 }
 0x100   :  { %v968_v51 = vadd.f32 %v967_v50, %v966_v49  ;;  %v969_v52 = vpop.f32.mrb[6].mxu0  ;;  %v995_v57 = vpop.f32.mrb[5].mxu1 }
 0x101   :  { %v970_v53 = vpop.f32.mrb[7].mxu0  ;;  %v996_v59 = vadd.f32 %v995_v57, %v994_v56  ;;  %v997_v60 = vpop.f32.mrb[6].mxu1 }
 0x102   :  { %v971_v54 = vadd.f32 %v970_v53, %v969_v52  ;;  %v673_v55 = vadd.f32 %v968_v51, %v855_v34  ;;  %v998_v61 = vpop.f32.mrb[7].mxu1 }
 0x103   :  { %v999_v63 = vadd.f32 %v998_v61, %v997_v60 }
 0x104   :  { %v676_v58 = vadd.f32 %v971_v54, %v855_v34  ;;  %v722_v62 = vadd.f32 %v996_v59, %v673_v55 }
 0x106   :  { %v725_v0 = vadd.f32 %v999_v63, %v676_v58 }
 0x116   :  { %v1016_v1 = vpop.f32.mrb[8].mxu0 }
 0x117   :  { %v1044_v2 = vpop.f32.mrb[8].mxu1  ;;  %v1017_v3 = vpop.f32.mrb[9].mxu0 }
 0x118   :  { %v1045_v4 = vpop.f32.mrb[9].mxu1  ;;  %v1018_v5 = vadd.f32 %v1017_v3, %v1016_v1  ;;  %v1019_v7 = vpop.f32.mrb[10].mxu0 }
 0x119   :  { %v1046_v6 = vadd.f32 %v1045_v4, %v1044_v2  ;;  %v1047_v8 = vpop.f32.mrb[10].mxu1  ;;  %v1020_v9 = vpop.f32.mrb[11].mxu0 }
 0x11a   :  { %v1048_v10 = vpop.f32.mrb[11].mxu1  ;;  %v763_v11 = vadd.f32 %v1018_v5, %v714_v46  ;;  %v1021_v12 = vadd.f32 %v1020_v9, %v1019_v7 }
 0x11b   :  { %v1049_v13 = vadd.f32 %v1048_v10, %v1047_v8 }
 0x11c   :  { %v812_v14 = vadd.f32 %v1046_v6, %v763_v11  ;;  %v766_v15 = vadd.f32 %v1021_v12, %v717_v48 }
 0x11e   :  { %v826_v16 = vmax.f32 %v812_v14, 0.0  ;;  %v815_v17 = vadd.f32 %v1049_v13, %v766_v15  ;;  %v1022_v18 = vpop.f32.mrb[12].mxu0 }
 0x11f   :  { %v1050_v19 = vpop.f32.mrb[12].mxu1  ;;  %v1023_v20 = vpop.f32.mrb[13].mxu0 }
 0x120   :  { %v1051_v21 = vpop.f32.mrb[13].mxu1  ;;  %v940_v22 = vpack.c.bf16 %v826_v16, %v826_v16  ;;  %v827_v23 = vmax.f32 %v815_v17, 0.0  ;;  %v1024_v24 = vadd.f32 %v1023_v20, %v1022_v18  ;;  %v1025_v26 = vpop.f32.mrb[14].mxu0 }
 0x121   :  { %v1052_v25 = vadd.f32 %v1051_v21, %v1050_v19  ;;  %v1053_v27 = vpop.f32.mrb[14].mxu1  ;;  %v1026_v28 = vpop.f32.mrb[15].mxu0 }
 0x122   :  { %v1054_v29 = vpop.f32.mrb[15].mxu1  ;;  %847 = vst.msk [vmem:[%s1402_s3] sm:$0xf] %vm846_vm0, %v940_v22  ;;  %v941_v30 = vpack.c.bf16 %v827_v23, %v827_v23  ;;  %v771_v31 = vadd.f32 %v1024_v24, %v722_v62  ;;  %v1027_v32 = vadd.f32 %v1026_v28, %v1025_v26 }
 0x123   :  { %v1055_v33 = vadd.f32 %v1054_v29, %v1053_v27 }
 0x124   :  { %848 = vst.msk [vmem:[%s1402_s3 + $0x4] sm:$0xf] %vm846_vm0, %v941_v30  ;;  %v820_v34 = vadd.f32 %v1052_v25, %v771_v31  ;;  %v774_v35 = vadd.f32 %v1027_v32, %v725_v0 }
 0x126   :  { %v828_v36 = vmax.f32 %v820_v34, 0.0  ;;  %v823_v37 = vadd.f32 %v1055_v33, %v774_v35 }
 0x128   :  { %v942_v38 = vpack.c.bf16 %v828_v36, %v828_v36  ;;  %v829_v39 = vmax.f32 %v823_v37, 0.0 }
 0x12a   :  { %849 = vst.msk [vmem:[%s1402_s3 + $0x8] sm:$0xf] %vm846_vm0, %v942_v38  ;;  %v943_v40 = vpack.c.bf16 %v829_v39, %v829_v39 }
 0x12c   :  { %850 = vst.msk [vmem:[%s1402_s3 + $0xc] sm:$0xf] %vm846_vm0, %v943_v40 }

// kernel: betavae_forward.14
= control target key start
LH: loop header
LB: loop body
LE: loop exit
PB: predicated region body
PF: predicated region fallthrough
CT: control target
= control target key end

     0   :  { %vm521_vm0 = vcmask 523264   ;;  %s1256_s1 = inlined_call_operand.vmem [shape: bf16[576,256], index: 1, kind: input, shape index: {}]   ;;  %s1257_s0 = inlined_call_operand.vmem [shape: bf16[32,576], index: 0, kind: input, shape index: {}]   ;;  %s1258_s2 = inlined_call_operand.vmem [shape: f32[1,256], index: 2, kind: input, shape index: {}]   ;;  %s1259_s3 = inlined_call_operand.vmem [shape: bf16[32,256], index: 3, kind: output, shape index: {}]  }
   0x1   :  { %v852_v0 = vld [vmem:[%s1256_s1 + $0x4] ss:$8 sps:$4 sm:$0xff]   ;;  %v856_v2 = vld [vmem:[%s1256_s1] ss:$8 sps:$4 sm:$0xff]   ;;  %v858_v4 = vld [vmem:[%s1256_s1 + $0x14] ss:$8 sps:$4 sm:$0xff]  }
   0x2   :  { %v854_v1 = vld [vmem:[%s1256_s1 + $0x104] ss:$8 sps:$4 sm:$0xff]   ;;  %528 = vmatprep.subr.bf16.mxu1 %v852_v0  ;;  %v857_v3 = vld [vmem:[%s1256_s1 + $0x100] ss:$8 sps:$4 sm:$0xff]   ;;  %v860_v5 = vld [vmem:[%s1256_s1 + $0x114] ss:$8 sps:$4 sm:$0xff]  }
   0x3   :  { %581 = vmatprep.subr.bf16.mxu0 %v854_v1  ;;  %529 = vmatpush1.bf16.msra.mxu1 %v856_v2  ;;  %v862_v6 = vld [vmem:[%s1256_s1 + $0x10] ss:$8 sps:$4 sm:$0xff]   ;;  %v864_v8 = vld [vmem:[%s1256_s1 + $0x24] ss:$8 sps:$4 sm:$0xff]   ;;  %v868_v10 = vld [vmem:[%s1256_s1 + $0x20] ss:$8 sps:$4 sm:$0xff]  }
   0x4   :  { %582 = vmatpush1.bf16.msra.mxu0 %v857_v3  ;;  %530 = vmatprep.subr.bf16.mxu1 %v858_v4  ;;  %v863_v7 = vld [vmem:[%s1256_s1 + $0x110] ss:$8 sps:$4 sm:$0xff]   ;;  %v866_v9 = vld [vmem:[%s1256_s1 + $0x124] ss:$8 sps:$4 sm:$0xff]   ;;  %v869_v11 = vld [vmem:[%s1256_s1 + $0x120] ss:$8 sps:$4 sm:$0xff]  }
   0x5   :  { %583 = vmatprep.subr.bf16.mxu0 %v860_v5  ;;  %v870_v12 = vld [vmem:[%s1256_s1 + $0x34] ss:$8 sps:$4 sm:$0xff]   ;;  %v874_v14 = vld [vmem:[%s1256_s1 + $0x30] ss:$8 sps:$4 sm:$0xff]   ;;  %v876_v16 = vld [vmem:[%s1256_s1 + $0x44] ss:$8 sps:$4 sm:$0xff]  }
   0x6   :  { %v872_v13 = vld [vmem:[%s1256_s1 + $0x134] ss:$8 sps:$4 sm:$0xff]   ;;  %v875_v15 = vld [vmem:[%s1256_s1 + $0x130] ss:$8 sps:$4 sm:$0xff]   ;;  %v878_v17 = vld [vmem:[%s1256_s1 + $0x144] ss:$8 sps:$4 sm:$0xff]  }
   0x7   :  { %531 = vmatpush1.bf16.msra.mxu1 %v862_v6  ;;  %v880_v18 = vld [vmem:[%s1256_s1 + $0x40] ss:$8 sps:$4 sm:$0xff]   ;;  %v882_v20 = vld [vmem:[%s1256_s1 + $0x54] ss:$8 sps:$4 sm:$0xff]   ;;  %v886_v22 = vld [vmem:[%s1256_s1 + $0x50] ss:$8 sps:$4 sm:$0xff]  }
   0x8   :  { %584 = vmatpush1.bf16.msra.mxu0 %v863_v7  ;;  %532 = vmatprep.subr.bf16.mxu1 %v864_v8  ;;  %v881_v19 = vld [vmem:[%s1256_s1 + $0x140] ss:$8 sps:$4 sm:$0xff]   ;;  %v884_v21 = vld [vmem:[%s1256_s1 + $0x154] ss:$8 sps:$4 sm:$0xff]   ;;  %v887_v23 = vld [vmem:[%s1256_s1 + $0x150] ss:$8 sps:$4 sm:$0xff]  }
   0x9   :  { %585 = vmatprep.subr.bf16.mxu0 %v866_v9  ;;  %v888_v24 = vld [vmem:[%s1256_s1 + $0x64] ss:$8 sps:$4 sm:$0xff]   ;;  %v892_v26 = vld [vmem:[%s1256_s1 + $0x60] ss:$8 sps:$4 sm:$0xff]   ;;  %v894_v28 = vld [vmem:[%s1256_s1 + $0x74] ss:$8 sps:$4 sm:$0xff]  }
   0xa   :  { %v890_v25 = vld [vmem:[%s1256_s1 + $0x164] ss:$8 sps:$4 sm:$0xff]   ;;  %v893_v27 = vld [vmem:[%s1256_s1 + $0x160] ss:$8 sps:$4 sm:$0xff]   ;;  %v896_v29 = vld [vmem:[%s1256_s1 + $0x174] ss:$8 sps:$4 sm:$0xff]  }
   0xb   :  { %533 = vmatpush1.bf16.msra.mxu1 %v868_v10  ;;  %v898_v30 = vld [vmem:[%s1256_s1 + $0x70] ss:$8 sps:$4 sm:$0xff]   ;;  %v900_v32 = vld [vmem:[%s1256_s1 + $0x84] ss:$8 sps:$4 sm:$0xff]   ;;  %v904_v34 = vld [vmem:[%s1256_s1 + $0x80] ss:$8 sps:$4 sm:$0xff]  }
   0xc   :  { %586 = vmatpush1.bf16.msra.mxu0 %v869_v11  ;;  %534 = vmatprep.subr.bf16.mxu1 %v870_v12  ;;  %v899_v31 = vld [vmem:[%s1256_s1 + $0x170] ss:$8 sps:$4 sm:$0xff]   ;;  %v902_v33 = vld [vmem:[%s1256_s1 + $0x184] ss:$8 sps:$4 sm:$0xff]   ;;  %v905_v35 = vld [vmem:[%s1256_s1 + $0x180] ss:$8 sps:$4 sm:$0xff]  }
   0xd   :  { %587 = vmatprep.subr.bf16.mxu0 %v872_v13  ;;  %v906_v36 = vld [vmem:[%s1256_s1 + $0x94] ss:$8 sps:$4 sm:$0xff]   ;;  %v910_v38 = vld [vmem:[%s1256_s1 + $0x90] ss:$8 sps:$4 sm:$0xff]   ;;  %v912_v40 = vld [vmem:[%s1256_s1 + $0xa4] ss:$8 sps:$4 sm:$0xff]  }
   0xe   :  { %v908_v37 = vld [vmem:[%s1256_s1 + $0x194] ss:$8 sps:$4 sm:$0xff]   ;;  %v911_v39 = vld [vmem:[%s1256_s1 + $0x190] ss:$8 sps:$4 sm:$0xff]   ;;  %v914_v41 = vld [vmem:[%s1256_s1 + $0x1a4] ss:$8 sps:$4 sm:$0xff]  }
   0xf   :  { %535 = vmatpush1.bf16.msra.mxu1 %v874_v14  ;;  %v916_v42 = vld [vmem:[%s1256_s1 + $0xa0] ss:$8 sps:$4 sm:$0xff]   ;;  %v918_v44 = vld [vmem:[%s1256_s1 + $0xb4] ss:$8 sps:$4 sm:$0xff]   ;;  %v922_v46 = vld [vmem:[%s1256_s1 + $0xb0] ss:$8 sps:$4 sm:$0xff]  }
  0x10   :  { %588 = vmatpush1.bf16.msra.mxu0 %v875_v15  ;;  %536 = vmatprep.subr.bf16.mxu1 %v876_v16  ;;  %v917_v43 = vld [vmem:[%s1256_s1 + $0x1a0] ss:$8 sps:$4 sm:$0xff]   ;;  %v920_v45 = vld [vmem:[%s1256_s1 + $0x1b4] ss:$8 sps:$4 sm:$0xff]   ;;  %v923_v47 = vld [vmem:[%s1256_s1 + $0x1b0] ss:$8 sps:$4 sm:$0xff]  }
  0x11   :  { %589 = vmatprep.subr.bf16.mxu0 %v878_v17  ;;  %v924_v48 = vld [vmem:[%s1256_s1 + $0xc4] ss:$8 sps:$4 sm:$0xff]   ;;  %v928_v52 = vld [vmem:[%s1256_s1 + $0xc0] ss:$8 sps:$4 sm:$0xff]   ;;  %v930_v54 = vld [vmem:[%s1256_s1 + $0xd4] ss:$8 sps:$4 sm:$0xff]  }
  0x12   :  { %v950_v49 = vld [vmem:[%s1257_s0 + $0x4] ss:$20 sps:$4 sm:$0xff]   ;;  %v953_v51 = vld [vmem:[%s1257_s0 + $0xc] ss:$20 sps:$4 sm:$0xff]   ;;  %v932_v55 = vld [vmem:[%s1256_s1 + $0x1d4] ss:$8 sps:$4 sm:$0xff]  }
  0x13   :  { %537 = vmatpush1.bf16.msra.mxu1 %v880_v18  ;;  %v926_v50 = vld [vmem:[%s1256_s1 + $0x1c4] ss:$8 sps:$4 sm:$0xff]   ;;  %560 = vmatprep.mubr.bf16.mxu1 %v950_v49  ;;  %v929_v53 = vld [vmem:[%s1256_s1 + $0x1c0] ss:$8 sps:$4 sm:$0xff]   ;;  %v934_v56 = vld [vmem:[%s1256_s1 + $0xd0] ss:$8 sps:$4 sm:$0xff]  }
  0x14   :  { %590 = vmatpush1.bf16.msra.mxu0 %v881_v19  ;;  %538 = vmatprep.subr.bf16.mxu1 %v882_v20  ;;  %v935_v57 = vld [vmem:[%s1256_s1 + $0x1d0] ss:$8 sps:$4 sm:$0xff]   ;;  %v936_v58 = vld [vmem:[%s1256_s1 + $0xe4] ss:$8 sps:$4 sm:$0xff]   ;;  %v940_v60 = vld [vmem:[%s1256_s1 + $0xe0] ss:$8 sps:$4 sm:$0xff]   ;;  %v101_v19 = vlaneseq }
  0x15   :  { %591 = vmatprep.subr.bf16.mxu0 %v884_v21  ;;  %613 = vmatprep.mubr.bf16.mxu0 %v953_v51  ;;  %v938_v59 = vld [vmem:[%s1256_s1 + $0x1e4] ss:$8 sps:$4 sm:$0xff]   ;;  %v941_v61 = vld [vmem:[%s1256_s1 + $0x1e0] ss:$8 sps:$4 sm:$0xff]   ;;  %v942_v62 = vld [vmem:[%s1256_s1 + $0xf4] ss:$8 sps:$4 sm:$0xff]  }
  0x16   :  { %v944_v63 = vld [vmem:[%s1256_s1 + $0x1f4] ss:$8 sps:$4 sm:$0xff]   ;;  %v946_v0 = vld [vmem:[%s1256_s1 + $0xf0] ss:$8 sps:$4 sm:$0xff]   ;;  %v956_v2 = vld [vmem:[%s1256_s1 + $0x204] ss:$8 sps:$4 sm:$0xff]  }
  0x17   :  { %539 = vmatpush1.bf16.msra.mxu1 %v886_v22  ;;  %v947_v1 = vld [vmem:[%s1256_s1 + $0x1f0] ss:$8 sps:$4 sm:$0xff]   ;;  %v948_v3 = vld [vmem:[%s1257_s0] ss:$20 sps:$4 sm:$0xff]   ;;  %v951_v4 = vld [vmem:[%s1257_s0 + $0x8] ss:$20 sps:$4 sm:$0xff]  }
  0x18   :  { %592 = vmatpush1.bf16.msra.mxu0 %v887_v23  ;;  %540 = vmatprep.subr.bf16.mxu1 %v888_v24  ;;  %v954_v5 = vld [vmem:[%s1256_s1 + $0x200] ss:$8 sps:$4 sm:$0xff]   ;;  %v959_v6 = vld [vmem:[%s1256_s1 + $0x214] ss:$8 sps:$4 sm:$0xff]   ;;  %v957_v9 = vld [vmem:[%s1256_s1 + $0x210] ss:$8 sps:$4 sm:$0xff]  }
  0x19   :  { %593 = vmatprep.subr.bf16.mxu0 %v890_v25  ;;  %v960_v7 = vld [vmem:[%s1257_s0 + $0x2c] ss:$20 sps:$4 sm:$0xff]   ;;  %v962_v8 = vld [vmem:[%s1257_s0 + $0x34] ss:$20 sps:$4 sm:$0xff]   ;;  %v965_v12 = vld [vmem:[%s1257_s0 + $0x30] ss:$20 sps:$4 sm:$0xff]  }
  0x1a   :  { %v968_v10 = vld [vmem:[%s1256_s1 + $0x224] ss:$8 sps:$4 sm:$0xff]   ;;  %v964_v11 = vld [vmem:[%s1257_s0 + $0x28] ss:$20 sps:$4 sm:$0xff]   ;;  %v969_v15 = vld [vmem:[%s1256_s1 + $0x230] ss:$8 sps:$4 sm:$0xff]  }
  0x1b   :  { %541 = vmatpush1.bf16.msra.mxu1 %v892_v26  ;;  %v966_v13 = vld [vmem:[%s1256_s1 + $0x220] ss:$8 sps:$4 sm:$0xff]   ;;  %v971_v14 = vld [vmem:[%s1256_s1 + $0x234] ss:$8 sps:$4 sm:$0xff]   ;;  %v974_v16 = vmov 0   ;;  %v102_v20 = vshrl.u32 %v101_v19, 7 }
  0x1c   :  { %594 = vmatpush1.bf16.msra.mxu0 %v893_v27  ;;  %542 = vmatprep.subr.bf16.mxu1 %v894_v28  ;;  %v972_v17 = vld [vmem:[%s1257_s0 + $0x10] ss:$20 sps:$4 sm:$0xff]   ;;  %v973_v18 = vld [vmem:[%s1257_s0 + $0x38] ss:$20 sps:$4 sm:$0xff]   ;;  %v99_v26 = vld [vmem:[%s1258_s2] sm:$0x3] }
  0x1d   :  { %595 = vmatprep.subr.bf16.mxu0 %v896_v29  ;;  %v103_v24 = vsub.s32 0, %v102_v20  ;;  %v107_v27 = vsub.s32 1, %v102_v20 }
  0x1f   :  { %543 = vmatpush1.bf16.msra.mxu1 %v898_v30  ;;  %v104_v28 = vrot.slane %v99_v26, %v103_v24  ;;  %v108_v29 = vrot.slane %v99_v26, %v107_v27 }
  0x20   :  { %596 = vmatpush1.bf16.msra.mxu0 %v899_v31  ;;  %544 = vmatprep.subr.bf16.mxu1 %v900_v32 }
  0x21   :  { %597 = vmatprep.subr.bf16.mxu0 %v902_v33 }
  0x23   :  { %545 = vmatpush1.bf16.msra.mxu1 %v904_v34 }
  0x24   :  { %598 = vmatpush1.bf16.msra.mxu0 %v905_v35  ;;  %546 = vmatprep.subr.bf16.mxu1 %v906_v36 }
  0x25   :  { %599 = vmatprep.subr.bf16.mxu0 %v908_v37 }
  0x27   :  { %547 = vmatpush1.bf16.msra.mxu1 %v910_v38 }
  0x28   :  { %600 = vmatpush1.bf16.msra.mxu0 %v911_v39  ;;  %548 = vmatprep.subr.bf16.mxu1 %v912_v40 }
  0x29   :  { %601 = vmatprep.subr.bf16.mxu0 %v914_v41 }
  0x2b   :  { %549 = vmatpush1.bf16.msra.mxu1 %v916_v42 }
  0x2c   :  { %602 = vmatpush1.bf16.msra.mxu0 %v917_v43  ;;  %550 = vmatprep.subr.bf16.mxu1 %v918_v44 }
  0x2d   :  { %603 = vmatprep.subr.bf16.mxu0 %v920_v45 }
  0x2f   :  { %551 = vmatpush1.bf16.msra.mxu1 %v922_v46 }
  0x30   :  { %604 = vmatpush1.bf16.msra.mxu0 %v923_v47  ;;  %552 = vmatprep.subr.bf16.mxu1 %v924_v48 }
  0x31   :  { %605 = vmatprep.subr.bf16.mxu0 %v926_v50 }
  0x33   :  { %553 = vmatpush1.bf16.msra.mxu1 %v928_v52 }
  0x34   :  { %606 = vmatpush1.bf16.msra.mxu0 %v929_v53  ;;  %554 = vmatprep.subr.bf16.mxu1 %v930_v54 }
  0x35   :  { %607 = vmatprep.subr.bf16.mxu0 %v932_v55 }
  0x37   :  { %555 = vmatpush1.bf16.msra.mxu1 %v934_v56 }
  0x38   :  { %608 = vmatpush1.bf16.msra.mxu0 %v935_v57  ;;  %556 = vmatprep.subr.bf16.mxu1 %v936_v58 }
  0x39   :  { %609 = vmatprep.subr.bf16.mxu0 %v938_v59 }
  0x3b   :  { %557 = vmatpush1.bf16.msra.mxu1 %v940_v60 }
  0x3c   :  { %610 = vmatpush1.bf16.msra.mxu0 %v941_v61  ;;  %558 = vmatprep.subr.bf16.mxu1 %v942_v62 }
  0x3d   :  { %611 = vmatprep.subr.bf16.mxu0 %v944_v63 }
  0x3f   :  { %559 = vmatpush1.bf16.msra.mxu1 %v946_v0 }
  0x40   :  { %612 = vmatpush1.bf16.msra.mxu0 %v947_v1  ;;  %819 = vmatprep.subr.bf16.mxu1 %v956_v2 }
  0x41   :  { %634 = vmatprep.subr.bf16.mxu0 %v956_v2 }
  0x42   :  { %561 = vmatmul.mubr.bf16.vlgmr.msra.gmra.mrb[0].mxu1 %v948_v3 }
  0x43   :  { %614 = vmatmul.mubr.bf16.vlgmr.msra.gmra.mrb[0].mxu0 %v951_v4  ;;  %823 = vmatpush1.bf16.msra.mxu1 %v954_v5 }
  0x44   :  { %635 = vmatpush1.bf16.msra.mxu0 %v954_v5  ;;  %820 = vmatprep.subr.bf16.mxu1 %v959_v6 }
  0x45   :  { %636 = vmatprep.subr.bf16.mxu0 %v959_v6  ;;  %570 = vmatprep.mubr.bf16.mxu1 %v960_v7 }
  0x46   :  { %623 = vmatprep.mubr.bf16.mxu0 %v962_v8 }
  0x47   :  { %824 = vmatpush1.bf16.msra.mxu1 %v957_v9 }
  0x48   :  { %637 = vmatpush1.bf16.msra.mxu0 %v957_v9  ;;  %821 = vmatprep.subr.bf16.mxu1 %v968_v10 }
  0x49   :  { %638 = vmatprep.subr.bf16.mxu0 %v968_v10 }
  0x4a   :  { %571 = vmatmul.mubr.bf16.gmra.mrb[4].mxu1 %v964_v11 }
  0x4b   :  { %624 = vmatmul.mubr.bf16.gmra.mrb[4].mxu0 %v965_v12  ;;  %825 = vmatpush1.bf16.msra.mxu1 %v966_v13 }
  0x4c   :  { %639 = vmatpush1.bf16.msra.mxu0 %v966_v13  ;;  %822 = vmatprep.subr.bf16.mxu1 %v971_v14 }
  0x4d   :  { %640 = vmatprep.subr.bf16.mxu0 %v971_v14  ;;  %666 = vmatprep.mubr.bf16.mxu0 %v974_v16 }
  0x4e   :  { %676 = vmatprep.mubr.bf16.mxu1 %v974_v16 }
  0x4f   :  { %826 = vmatpush1.bf16.msra.mxu1 %v969_v15 }
  0x50   :  { %641 = vmatpush1.bf16.msra.mxu0 %v969_v15 }
  0x52   :  { %810 = vmatmul.mubr.msk.bf16.vlgmr.msra.gmra.mrb[8].mxu1 %vm521_vm0, %v973_v18 }
  0x53   :  { %809 = vmatmul.mubr.msk.bf16.vlgmr.msra.gmra.mrb[0].mxu0 %vm521_vm0, %v972_v17 }
 0x115   :  { %v562_v21 = vpop.f32.mrb[0].mxu1 }
 0x116   :  { %v564_v22 = vpop.f32.mrb[1].mxu1  ;;  %v563_v46 = vadd.f32 %v562_v21, %v104_v28 }
 0x117   :  { %v566_v23 = vpop.f32.mrb[2].mxu1  ;;  %v565_v47 = vadd.f32 %v564_v22, %v108_v29 }
 0x118   :  { %v568_v25 = vpop.f32.mrb[3].mxu1  ;;  %v567_v50 = vadd.f32 %v566_v23, %v104_v28 }
 0x119   :  { %v569_v55 = vadd.f32 %v568_v25, %v108_v29 }
 0x11d   :  { %v572_v30 = vpop.f32.mrb[4].mxu1 }
 0x11e   :  { %v625_v31 = vpop.f32.mrb[4].mxu0  ;;  %v573_v32 = vadd.f32 %v572_v30, %v104_v28  ;;  %v574_v33 = vpop.f32.mrb[5].mxu1 }
 0x11f   :  { %v627_v34 = vpop.f32.mrb[5].mxu0  ;;  %v575_v35 = vadd.f32 %v574_v33, %v108_v29  ;;  %v576_v36 = vpop.f32.mrb[6].mxu1 }
 0x120   :  { %v629_v37 = vpop.f32.mrb[6].mxu0  ;;  %v626_v38 = vadd.f32 %v625_v31, %v573_v32  ;;  %v577_v39 = vadd.f32 %v576_v36, %v104_v28  ;;  %v578_v40 = vpop.f32.mrb[7].mxu1 }
 0x121   :  { %v631_v41 = vpop.f32.mrb[7].mxu0  ;;  %v628_v42 = vadd.f32 %v627_v34, %v575_v35  ;;  %v579_v43 = vadd.f32 %v578_v40, %v108_v29 }
 0x122   :  { %v630_v44 = vadd.f32 %v629_v37, %v577_v39 }
 0x123   :  { %v632_v45 = vadd.f32 %v631_v41, %v579_v43 }
 0x125   :  { %v678_v49 = vpop.f32.mrb[8].mxu1 }
 0x126   :  { %v668_v48 = vpop.f32.mrb[0].mxu0  ;;  %v679_v52 = vadd.f32 %v678_v49, %v626_v38  ;;  %v680_v54 = vpop.f32.mrb[9].mxu1 }
 0x127   :  { %v828_v51 = vadd.f32 %v668_v48, %v563_v46  ;;  %v670_v53 = vpop.f32.mrb[1].mxu0  ;;  %v681_v57 = vadd.f32 %v680_v54, %v628_v42  ;;  %v682_v59 = vpop.f32.mrb[10].mxu1 }
 0x128   :  { %v830_v56 = vadd.f32 %v670_v53, %v565_v47  ;;  %v672_v58 = vpop.f32.mrb[2].mxu0  ;;  %v691_v61 = vmax.f32 %v679_v52, 0.0  ;;  %v683_v63 = vadd.f32 %v682_v59, %v630_v44  ;;  %v684_v1 = vpop.f32.mrb[11].mxu1 }
 0x129   :  { %v687_v60 = vmax.f32 %v828_v51, 0.0  ;;  %v832_v62 = vadd.f32 %v672_v58, %v567_v50  ;;  %v674_v0 = vpop.f32.mrb[3].mxu0  ;;  %v692_v3 = vmax.f32 %v681_v57, 0.0  ;;  %v685_v5 = vadd.f32 %v684_v1, %v632_v45 }
 0x12a   :  { %v688_v2 = vmax.f32 %v830_v56, 0.0  ;;  %v834_v4 = vadd.f32 %v674_v0, %v569_v55  ;;  %v693_v7 = vmax.f32 %v683_v63, 0.0 }
 0x12b   :  { %v689_v6 = vmax.f32 %v832_v62, 0.0  ;;  %v817_v9 = vpack.c.bf16 %v692_v3, %v691_v61  ;;  %v694_v11 = vmax.f32 %v685_v5, 0.0 }
 0x12c   :  { %v815_v8 = vpack.c.bf16 %v688_v2, %v687_v60  ;;  %v690_v10 = vmax.f32 %v834_v4, 0.0 }
 0x12d   :  { %721 = vst [vmem:[%s1259_s3 + $0x10] sm:$0xff] %v817_v9  ;;  %v818_v13 = vpack.c.bf16 %v694_v11, %v693_v7 }
 0x12e   :  { %719 = vst [vmem:[%s1259_s3] sm:$0xff] %v815_v8  ;;  %v816_v12 = vpack.c.bf16 %v690_v10, %v689_v6 }
 0x12f   :  { %722 = vst [vmem:[%s1259_s3 + $0x18] sm:$0xff] %v818_v13 }
 0x130   :  { %720 = vst [vmem:[%s1259_s3 + $0x8] sm:$0xff] %v816_v12 }

// kernel: betavae_forward.13
= control target key start
LH: loop header
LB: loop body
LE: loop exit
PB: predicated region body
PF: predicated region fallthrough
CT: control target
= control target key end

     0   :  { %20 = vsyncpa [#allocation3], 0  ;;  %v178_v7 = vlaneseq  ;;  %v3223_v8 = vmov 1966171168   ;;  %s4319_s0 = inlined_call_operand.vmem [shape: bf16[2,1024], index: 0, kind: input, shape index: {}]   ;;  %s4320_s1 = inlined_call_operand.vmem [shape: f32[2,20], index: 1, kind: input, shape index: {}]   ;;  %s4321_s2 = inlined_call_operand.vmem [shape: bf16[1024,256], index: 2, kind: input, shape index: {}]   ;;  %s4322_s3 = inlined_call_operand.vmem [shape: f32[1,256], index: 3, kind: input, shape index: {}]   ;;  %s4323_s4 = inlined_call_operand.vmem [shape: bf16[256,20], index: 4, kind: input, shape index: {}]   ;;  %s4324_s5 = inlined_call_operand.vmem [shape: f32[1,20], index: 5, kind: input, shape index: {}]   ;;  %s4325_s6 = inlined_call_operand.vmem [shape: bf16[256,20], index: 6, kind: input, shape index: {}]   ;;  %s4326_s7 = inlined_call_operand.vmem [shape: f32[1,20], index: 7, kind: input, shape index: {}]   ;;  %s4327_s8 = inlined_call_operand.vmem [shape: bf16[20,256], index: 8, kind: input, shape index: {}]   ;;  %s4328_s9 = inlined_call_operand.vmem [shape: f32[1,256], index: 9, kind: input, shape index: {}]   ;;  %s4329_s10 = inlined_call_operand.vmem [shape: bf16[256,1024], index: 10, kind: input, shape index: {}]   ;;  %s4330_s11 = inlined_call_operand.vmem [shape: f32[1,1024], index: 11, kind: input, shape index: {}]   ;;  %s4331_s12 = inlined_call_operand.hbm [shape: f32[2,20], index: 12, kind: output, shape index: {0}]   ;;  %s4332_s13 = inlined_call_operand.hbm [shape: f32[2,20], index: 13, kind: output, shape index: {1}]   ;;  %s4333_s14 = inlined_call_operand.vmem [shape: bf16[2,1024], index: 14, kind: output, shape index: {2}]  }
   0x1   :  { %v2943_v0 = vld [vmem:[%s4321_s2 + $0x4] ss:$8 sps:$4 sm:$0xff]   ;;  %v2945_v1 = vld [vmem:[%s4321_s2] ss:$8 sps:$4 sm:$0xff]   ;;  %v2946_v2 = vld [vmem:[%s4321_s2 + $0x14] ss:$8 sps:$4 sm:$0xff]   ;;  %v191_v9 = vunpack.c.l.s4 %v3223_v8 }
   0x2   :  { %886 = vmatprep.subr.bf16.mxu0 %v2943_v0  ;;  %v2948_v3 = vld [vmem:[%s4321_s2 + $0x10] ss:$8 sps:$4 sm:$0xff]   ;;  %v2949_v4 = vld [vmem:[%s4321_s2 + $0x24] ss:$8 sps:$4 sm:$0xff]   ;;  %v2951_v5 = vld [vmem:[%s4321_s2 + $0x20] ss:$8 sps:$4 sm:$0xff]  }
   0x3   :  { %887 = vmatpush1.bf16.msra.mxu0 %v2945_v1  ;;  %v2952_v6 = vld [vmem:[%s4321_s2 + $0x34] ss:$8 sps:$4 sm:$0xff]   ;;  %v2954_v10 = vld [vmem:[%s4321_s2 + $0x30] ss:$8 sps:$4 sm:$0xff]   ;;  %v2955_v11 = vld [vmem:[%s4321_s2 + $0x44] ss:$8 sps:$4 sm:$0xff]   ;;  %v192_v13 = vunpack.c.0.s8 %v191_v9 }
   0x4   :  { %888 = vmatprep.subr.bf16.mxu0 %v2946_v2  ;;  %v3329_v12 = vshrl.u32 %v178_v7, 7  ;;  %v2957_v14 = vld [vmem:[%s4321_s2 + $0x40] ss:$8 sps:$4 sm:$0xff]   ;;  %v2958_v15 = vld [vmem:[%s4321_s2 + $0x54] ss:$8 sps:$4 sm:$0xff]  }
   0x5   :  { %v2960_v17 = vld [vmem:[%s4321_s2 + $0x50] ss:$8 sps:$4 sm:$0xff]   ;;  %v2961_v18 = vld [vmem:[%s4321_s2 + $0x64] ss:$8 sps:$4 sm:$0xff]   ;;  %v2963_v21 = vld [vmem:[%s4321_s2 + $0x60] ss:$8 sps:$4 sm:$0xff]  }
   0x6   :  { %v3338_v16 = vsub.s32 %v192_v13, %v3329_v12  ;;  %v3349_v19 = vld [vmem:[%s4319_s0] sm:$0xff]  ;;  %v2964_v22 = vld [vmem:[%s4321_s2 + $0x74] ss:$8 sps:$4 sm:$0xff]   ;;  %v2966_v25 = vld [vmem:[%s4321_s2 + $0x70] ss:$8 sps:$4 sm:$0xff]  }
   0x7   :  { %889 = vmatpush1.bf16.msra.mxu0 %v2948_v3  ;;  %v2967_v26 = vld [vmem:[%s4321_s2 + $0x84] ss:$8 sps:$4 sm:$0xff]   ;;  %v2969_v27 = vld [vmem:[%s4321_s2 + $0x80] ss:$8 sps:$4 sm:$0xff]   ;;  %v2970_v28 = vld [vmem:[%s4321_s2 + $0x94] ss:$8 sps:$4 sm:$0xff]  }
   0x8   :  { %890 = vmatprep.subr.bf16.mxu0 %v2949_v4  ;;  %v196_v20 = vrot.slane %v3349_v19, %v3338_v16  ;;  %v2972_v29 = vld [vmem:[%s4321_s2 + $0x90] ss:$8 sps:$4 sm:$0xff]   ;;  %v2973_v30 = vld [vmem:[%s4321_s2 + $0xa4] ss:$8 sps:$4 sm:$0xff]   ;;  %v2975_v31 = vld [vmem:[%s4321_s2 + $0xa0] ss:$8 sps:$4 sm:$0xff]  }
   0x9   :  { %v2976_v32 = vld [vmem:[%s4321_s2 + $0xb4] ss:$8 sps:$4 sm:$0xff]   ;;  %v2978_v33 = vld [vmem:[%s4321_s2 + $0xb0] ss:$8 sps:$4 sm:$0xff]   ;;  %v2979_v34 = vld [vmem:[%s4321_s2 + $0xc4] ss:$8 sps:$4 sm:$0xff]  }
   0xa   :  { %v204_v23 = vcombine.high %v196_v20, %v196_v20  ;;  %v2981_v35 = vld [vmem:[%s4321_s2 + $0xc0] ss:$8 sps:$4 sm:$0xff]   ;;  %v2982_v36 = vld [vmem:[%s4321_s2 + $0xd4] ss:$8 sps:$4 sm:$0xff]   ;;  %v2984_v37 = vld [vmem:[%s4321_s2 + $0xd0] ss:$8 sps:$4 sm:$0xff]   ;;  %v3415_v43 = vrot.slane %v196_v20, %v3338_v16 }
   0xb   :  { %891 = vmatpush1.bf16.msra.mxu0 %v2951_v5  ;;  %v2985_v38 = vld [vmem:[%s4321_s2 + $0xe4] ss:$8 sps:$4 sm:$0xff]   ;;  %v2987_v39 = vld [vmem:[%s4321_s2 + $0xe0] ss:$8 sps:$4 sm:$0xff]   ;;  %v2988_v40 = vld [vmem:[%s4321_s2 + $0xf4] ss:$8 sps:$4 sm:$0xff]  }
   0xc   :  { %892 = vmatprep.subr.bf16.mxu0 %v2952_v6  ;;  %v226_v24 = vrot.slane %v204_v23, %v3338_v16  ;;  %v2990_v41 = vld [vmem:[%s4321_s2 + $0xf0] ss:$8 sps:$4 sm:$0xff]   ;;  %v2994_v42 = vld [vmem:[%s4321_s2 + $0x104] ss:$8 sps:$4 sm:$0xff]   ;;  %v2992_v45 = vld [vmem:[%s4321_s2 + $0x100] ss:$8 sps:$4 sm:$0xff]  }
   0xd   :  { %v2997_v46 = vld [vmem:[%s4321_s2 + $0x114] ss:$8 sps:$4 sm:$0xff]   ;;  %v2995_v47 = vld [vmem:[%s4321_s2 + $0x110] ss:$8 sps:$4 sm:$0xff]   ;;  %v3000_v48 = vld [vmem:[%s4321_s2 + $0x124] ss:$8 sps:$4 sm:$0xff]  }
   0xe   :  { %918 = vmatprep.mubr.bf16.mxu0 %v226_v24  ;;  %v236_v44 = vcombine.high %v226_v24, %v226_v24  ;;  %v2998_v49 = vld [vmem:[%s4321_s2 + $0x120] ss:$8 sps:$4 sm:$0xff]   ;;  %v3003_v50 = vld [vmem:[%s4321_s2 + $0x134] ss:$8 sps:$4 sm:$0xff]   ;;  %v3001_v51 = vld [vmem:[%s4321_s2 + $0x130] ss:$8 sps:$4 sm:$0xff]  }
   0xf   :  { %893 = vmatpush1.bf16.msra.mxu0 %v2954_v10  ;;  %v3006_v52 = vld [vmem:[%s4321_s2 + $0x144] ss:$8 sps:$4 sm:$0xff]   ;;  %v3004_v53 = vld [vmem:[%s4321_s2 + $0x140] ss:$8 sps:$4 sm:$0xff]   ;;  %v3009_v54 = vld [vmem:[%s4321_s2 + $0x154] ss:$8 sps:$4 sm:$0xff]  }
  0x10   :  { %894 = vmatprep.subr.bf16.mxu0 %v2955_v11  ;;  %v3007_v55 = vld [vmem:[%s4321_s2 + $0x150] ss:$8 sps:$4 sm:$0xff]   ;;  %v3012_v56 = vld [vmem:[%s4321_s2 + $0x164] ss:$8 sps:$4 sm:$0xff]   ;;  %v3010_v57 = vld [vmem:[%s4321_s2 + $0x160] ss:$8 sps:$4 sm:$0xff]  }
  0x11   :  { %v3015_v58 = vld [vmem:[%s4321_s2 + $0x174] ss:$8 sps:$4 sm:$0xff]   ;;  %v3013_v59 = vld [vmem:[%s4321_s2 + $0x170] ss:$8 sps:$4 sm:$0xff]   ;;  %v3018_v60 = vld [vmem:[%s4321_s2 + $0x184] ss:$8 sps:$4 sm:$0xff]  }
  0x12   :  { %v3016_v61 = vld [vmem:[%s4321_s2 + $0x180] ss:$8 sps:$4 sm:$0xff]   ;;  %v3021_v62 = vld [vmem:[%s4321_s2 + $0x194] ss:$8 sps:$4 sm:$0xff]   ;;  %v3019_v63 = vld [vmem:[%s4321_s2 + $0x190] ss:$8 sps:$4 sm:$0xff]  }
  0x13   :  { %895 = vmatpush1.bf16.msra.mxu0 %v2957_v14  ;;  %v3024_v0 = vld [vmem:[%s4321_s2 + $0x1a4] ss:$8 sps:$4 sm:$0xff]   ;;  %v3022_v1 = vld [vmem:[%s4321_s2 + $0x1a0] ss:$8 sps:$4 sm:$0xff]   ;;  %v3027_v2 = vld [vmem:[%s4321_s2 + $0x1b4] ss:$8 sps:$4 sm:$0xff]  }
  0x14   :  { %896 = vmatprep.subr.bf16.mxu0 %v2958_v15 }
  0x17   :  { %897 = vmatpush1.bf16.msra.mxu0 %v2960_v17 }
  0x18   :  { %898 = vmatprep.subr.bf16.mxu0 %v2961_v18 }
  0x1b   :  { %899 = vmatpush1.bf16.msra.mxu0 %v2963_v21 }
  0x1c   :  { %900 = vmatprep.subr.bf16.mxu0 %v2964_v22 }
  0x1f   :  { %901 = vmatpush1.bf16.msra.mxu0 %v2966_v25 }
  0x20   :  { %902 = vmatprep.subr.bf16.mxu0 %v2967_v26 }
  0x23   :  { %903 = vmatpush1.bf16.msra.mxu0 %v2969_v27 }
  0x24   :  { %904 = vmatprep.subr.bf16.mxu0 %v2970_v28 }
  0x27   :  { %905 = vmatpush1.bf16.msra.mxu0 %v2972_v29 }
  0x28   :  { %906 = vmatprep.subr.bf16.mxu0 %v2973_v30 }
  0x2b   :  { %907 = vmatpush1.bf16.msra.mxu0 %v2975_v31 }
  0x2c   :  { %908 = vmatprep.subr.bf16.mxu0 %v2976_v32 }
  0x2f   :  { %909 = vmatpush1.bf16.msra.mxu0 %v2978_v33 }
  0x30   :  { %910 = vmatprep.subr.bf16.mxu0 %v2979_v34 }
  0x33   :  { %911 = vmatpush1.bf16.msra.mxu0 %v2981_v35 }
  0x34   :  { %912 = vmatprep.subr.bf16.mxu0 %v2982_v36 }
  0x37   :  { %913 = vmatpush1.bf16.msra.mxu0 %v2984_v37 }
  0x38   :  { %914 = vmatprep.subr.bf16.mxu0 %v2985_v38 }
  0x3b   :  { %915 = vmatpush1.bf16.msra.mxu0 %v2987_v39 }
  0x3c   :  { %916 = vmatprep.subr.bf16.mxu0 %v2988_v40 }
  0x3f   :  { %917 = vmatpush1.bf16.msra.mxu0 %v2990_v41 }
  0x40   :  { %927 = vmatprep.subr.bf16.mxu0 %v2994_v42 }
  0x42   :  { %919 = vmatmul.mubr.bf16.vlgmr.msra.gmra.mrb[0].mxu0 %v3415_v43 }
  0x43   :  { %928 = vmatpush1.bf16.msra.mxu0 %v2992_v45  ;;  %959 = vmatprep.mubr.bf16.mxu0 %v236_v44 }
  0x44   :  { %929 = vmatprep.subr.bf16.mxu0 %v2997_v46 }
  0x47   :  { %930 = vmatpush1.bf16.msra.mxu0 %v2995_v47 }
  0x48   :  { %931 = vmatprep.subr.bf16.mxu0 %v3000_v48 }
  0x4b   :  { %932 = vmatpush1.bf16.msra.mxu0 %v2998_v49 }
  0x4c   :  { %933 = vmatprep.subr.bf16.mxu0 %v3003_v50 }
  0x4f   :  { %934 = vmatpush1.bf16.msra.mxu0 %v3001_v51 }
  0x50   :  { %935 = vmatprep.subr.bf16.mxu0 %v3006_v52 }
  0x53   :  { %936 = vmatpush1.bf16.msra.mxu0 %v3004_v53 }
  0x54   :  { %937 = vmatprep.subr.bf16.mxu0 %v3009_v54 }
  0x57   :  { %938 = vmatpush1.bf16.msra.mxu0 %v3007_v55 }
  0x58   :  { %939 = vmatprep.subr.bf16.mxu0 %v3012_v56 }
  0x5b   :  { %940 = vmatpush1.bf16.msra.mxu0 %v3010_v57 }
  0x5c   :  { %941 = vmatprep.subr.bf16.mxu0 %v3015_v58 }
  0x5f   :  { %942 = vmatpush1.bf16.msra.mxu0 %v3013_v59 }
  0x60   :  { %943 = vmatprep.subr.bf16.mxu0 %v3018_v60 }
  0x63   :  { %944 = vmatpush1.bf16.msra.mxu0 %v3016_v61 }
  0x64   :  { %945 = vmatprep.subr.bf16.mxu0 %v3021_v62 }
  0x67   :  { %946 = vmatpush1.bf16.msra.mxu0 %v3019_v63 }
  0x68   :  { %947 = vmatprep.subr.bf16.mxu0 %v3024_v0 }
  0x69   :  { %21 = vsyncpa [#allocation5], 0  ;;  %v3025_v3 = vld [vmem:[%s4321_s2 + $0x1b0] ss:$8 sps:$4 sm:$0xff]   ;;  %v3030_v4 = vld [vmem:[%s4321_s2 + $0x1c4] ss:$8 sps:$4 sm:$0xff]   ;;  %v189_v7 = vcombine.high %v3349_v19, %v3349_v19  ;;  %v234_v18 = vcombine.high %v3415_v43, %v3415_v43 }
  0x6a   :  { %v3028_v5 = vld [vmem:[%s4321_s2 + $0x1c0] ss:$8 sps:$4 sm:$0xff]   ;;  %v3033_v6 = vld [vmem:[%s4321_s2 + $0x1d4] ss:$8 sps:$4 sm:$0xff]   ;;  %v3031_v8 = vld [vmem:[%s4321_s2 + $0x1d0] ss:$8 sps:$4 sm:$0xff]  }
  0x6b   :  { %948 = vmatpush1.bf16.msra.mxu0 %v3022_v1  ;;  %v3036_v9 = vld [vmem:[%s4321_s2 + $0x1e4] ss:$8 sps:$4 sm:$0xff]   ;;  %v3034_v10 = vld [vmem:[%s4321_s2 + $0x1e0] ss:$8 sps:$4 sm:$0xff]   ;;  %v3508_v11 = vrot.slane %v189_v7, %v3338_v16  ;;  %v3039_v13 = vld [vmem:[%s4321_s2 + $0x1f4] ss:$8 sps:$4 sm:$0xff]  }
  0x6c   :  { %949 = vmatprep.subr.bf16.mxu0 %v3027_v2  ;;  %v3037_v14 = vld [vmem:[%s4321_s2 + $0x1f0] ss:$8 sps:$4 sm:$0xff]   ;;  %v3042_v17 = vld [vmem:[%s4321_s2 + $0x204] ss:$8 sps:$4 sm:$0xff]   ;;  %v3040_v19 = vld [vmem:[%s4321_s2 + $0x200] ss:$8 sps:$4 sm:$0xff]  }
  0x6d   :  { %v205_v15 = vcombine.high %v3508_v11, %v3508_v11  ;;  %v3045_v21 = vld [vmem:[%s4321_s2 + $0x214] ss:$8 sps:$4 sm:$0xff]   ;;  %v3136_v22 = vld [vmem:[%s4323_s4 + $0x40] sm:$0xff]   ;;  %v3138_v24 = vld [vmem:[%s4323_s4 + $0x48] sm:$0xff]   ;;  %v3661_v0 = vrot.slane %v3508_v11, %v3338_v16  ;;  %vm1448_vm0 = vcmask 1041408   ;;  %vm1404_vm1 = vcmask 156672  }
  0x6e   :  { %v3137_v23 = vld [vmem:[%s4323_s4] sm:$0xff]   ;;  %v3043_v25 = vld [vmem:[%s4321_s2 + $0x210] ss:$8 sps:$4 sm:$0xff]   ;;  %2881 = vmatprep.subr.bf16.mxu1 %v3136_v22  ;;  %v3139_v27 = vld [vmem:[%s4323_s4 + $0x8] sm:$0xff]   ;;  %vm1444_vm2 = vcmask 162816   ;;  %s3226_s27 = smov [#allocation4]  }
  0x6f   :  { %950 = vmatpush1.bf16.msra.mxu0 %v3025_v3  ;;  %v3527_v20 = vrot.slane %v205_v15, %v3338_v16  ;;  %v3048_v26 = vld [vmem:[%s4321_s2 + $0x224] ss:$8 sps:$4 sm:$0xff]   ;;  %2882 = vmatpush3.bf16.msra.mxu1 %v3137_v23  ;;  %v3140_v28 = vld [vmem:[%s4323_s4 + $0x50] sm:$0xff]   ;;  %v3046_v29 = vld [vmem:[%s4321_s2 + $0x220] ss:$8 sps:$4 sm:$0xff]   ;;  %s2565_s28 = sshll.u32 %s3226_s27, 4  ;;  %s2566_s28 = int_to_ptr.vmem [resolvable:$true] %s2565_s28 }
  0x70   :  { %951 = vmatprep.subr.bf16.mxu0 %v3030_v4  ;;  %2883 = vmatprep.subr.bf16.mxu1 %v3138_v24  ;;  %v3051_v30 = vld [vmem:[%s4321_s2 + $0x234] ss:$8 sps:$4 sm:$0xff]   ;;  %v3049_v33 = vld [vmem:[%s4321_s2 + $0x230] ss:$8 sps:$4 sm:$0xff]   ;;  %v3054_v34 = vld [vmem:[%s4321_s2 + $0x244] ss:$8 sps:$4 sm:$0xff]  }
  0x71   :  { %v3141_v31 = vld [vmem:[%s4323_s4 + $0x10] sm:$0xff]   ;;  %v3142_v32 = vld [vmem:[%s4323_s4 + $0x58] sm:$0xff]   ;;  %v3144_v36 = vld [vmem:[%s4323_s4 + $0x60] sm:$0xff]   ;;  %v237_v2 = vcombine.high %v3527_v20, %v3527_v20 }
  0x72   :  { %v3143_v35 = vld [vmem:[%s4323_s4 + $0x18] sm:$0xff]   ;;  %v3052_v37 = vld [vmem:[%s4321_s2 + $0x240] ss:$8 sps:$4 sm:$0xff]   ;;  %v3060_v42 = vld [vmem:[%s4321_s2 + $0x264] ss:$8 sps:$4 sm:$0xff]  }
  0x73   :  { %952 = vmatpush1.bf16.msra.mxu0 %v3028_v5  ;;  %2884 = vmatpush3.bf16.msra.mxu1 %v3139_v27  ;;  %v3057_v38 = vld [vmem:[%s4321_s2 + $0x254] ss:$8 sps:$4 sm:$0xff]   ;;  %v3145_v39 = vld [vmem:[%s4323_s4 + $0x20] sm:$0xff]   ;;  %v3146_v40 = vld [vmem:[%s4323_s4 + $0x68] sm:$0xff]  }
  0x74   :  { %953 = vmatprep.subr.bf16.mxu0 %v3033_v6  ;;  %2885 = vmatprep.subr.bf16.mxu1 %v3140_v28  ;;  %v3055_v41 = vld [vmem:[%s4321_s2 + $0x250] ss:$8 sps:$4 sm:$0xff]   ;;  %v3147_v43 = vld [vmem:[%s4323_s4 + $0x28] sm:$0xff]   ;;  %v3063_v45 = vld [vmem:[%s4321_s2 + $0x274] ss:$8 sps:$4 sm:$0xff]  }
  0x75   :  { %v3058_v44 = vld [vmem:[%s4321_s2 + $0x260] ss:$8 sps:$4 sm:$0xff]   ;;  %v3061_v46 = vld [vmem:[%s4321_s2 + $0x270] ss:$8 sps:$4 sm:$0xff]   ;;  %v3066_v47 = vld [vmem:[%s4321_s2 + $0x284] ss:$8 sps:$4 sm:$0xff]  }
  0x76   :  { %v3064_v48 = vld [vmem:[%s4321_s2 + $0x280] ss:$8 sps:$4 sm:$0xff]   ;;  %v3069_v49 = vld [vmem:[%s4321_s2 + $0x294] ss:$8 sps:$4 sm:$0xff]   ;;  %v3067_v50 = vld [vmem:[%s4321_s2 + $0x290] ss:$8 sps:$4 sm:$0xff]  }
  0x77   :  { %954 = vmatpush1.bf16.msra.mxu0 %v3031_v8  ;;  %2886 = vmatpush3.bf16.msra.mxu1 %v3141_v31  ;;  %v3072_v51 = vld [vmem:[%s4321_s2 + $0x2a4] ss:$8 sps:$4 sm:$0xff]   ;;  %v3070_v52 = vld [vmem:[%s4321_s2 + $0x2a0] ss:$8 sps:$4 sm:$0xff]   ;;  %v3075_v53 = vld [vmem:[%s4321_s2 + $0x2b4] ss:$8 sps:$4 sm:$0xff]  }
  0x78   :  { %955 = vmatprep.subr.bf16.mxu0 %v3036_v9  ;;  %2887 = vmatprep.subr.bf16.mxu1 %v3142_v32  ;;  %v3073_v54 = vld [vmem:[%s4321_s2 + $0x2b0] ss:$8 sps:$4 sm:$0xff]   ;;  %v3078_v55 = vld [vmem:[%s4321_s2 + $0x2c4] ss:$8 sps:$4 sm:$0xff]   ;;  %v3076_v56 = vld [vmem:[%s4321_s2 + $0x2c0] ss:$8 sps:$4 sm:$0xff]  }
  0x79   :  { %v3081_v57 = vld [vmem:[%s4321_s2 + $0x2d4] ss:$8 sps:$4 sm:$0xff]   ;;  %v3079_v58 = vld [vmem:[%s4321_s2 + $0x2d0] ss:$8 sps:$4 sm:$0xff]   ;;  %v3084_v59 = vld [vmem:[%s4321_s2 + $0x2e4] ss:$8 sps:$4 sm:$0xff]  }
  0x7a   :  { %v3082_v60 = vld [vmem:[%s4321_s2 + $0x2e0] ss:$8 sps:$4 sm:$0xff]   ;;  %v3087_v61 = vld [vmem:[%s4321_s2 + $0x2f4] ss:$8 sps:$4 sm:$0xff]   ;;  %v3085_v62 = vld [vmem:[%s4321_s2 + $0x2f0] ss:$8 sps:$4 sm:$0xff]  }
  0x7b   :  { %956 = vmatpush1.bf16.msra.mxu0 %v3034_v10  ;;  %2888 = vmatpush3.bf16.msra.mxu1 %v3143_v35  ;;  %v3090_v63 = vld [vmem:[%s4321_s2 + $0x304] ss:$8 sps:$4 sm:$0xff]   ;;  %v3088_v1 = vld [vmem:[%s4321_s2 + $0x300] ss:$8 sps:$4 sm:$0xff]   ;;  %v3093_v3 = vld [vmem:[%s4321_s2 + $0x314] ss:$8 sps:$4 sm:$0xff]   ;;  %v235_v35 = vcombine.high %v3661_v0, %v3661_v0 }
  0x7c   :  { %957 = vmatprep.subr.bf16.mxu0 %v3039_v13  ;;  %2889 = vmatprep.subr.bf16.mxu1 %v3144_v36  ;;  %v3091_v4 = vld [vmem:[%s4321_s2 + $0x310] ss:$8 sps:$4 sm:$0xff]   ;;  %v3096_v5 = vld [vmem:[%s4321_s2 + $0x324] ss:$8 sps:$4 sm:$0xff]   ;;  %v3094_v6 = vld [vmem:[%s4321_s2 + $0x320] ss:$8 sps:$4 sm:$0xff]  }
  0x7d   :  { %v3099_v7 = vld [vmem:[%s4321_s2 + $0x334] ss:$8 sps:$4 sm:$0xff]   ;;  %v3097_v8 = vld [vmem:[%s4321_s2 + $0x330] ss:$8 sps:$4 sm:$0xff]   ;;  %v3102_v9 = vld [vmem:[%s4321_s2 + $0x344] ss:$8 sps:$4 sm:$0xff]  }
  0x7e   :  { %v3100_v10 = vld [vmem:[%s4321_s2 + $0x340] ss:$8 sps:$4 sm:$0xff]   ;;  %v3105_v11 = vld [vmem:[%s4321_s2 + $0x354] ss:$8 sps:$4 sm:$0xff]   ;;  %v3103_v13 = vld [vmem:[%s4321_s2 + $0x350] ss:$8 sps:$4 sm:$0xff]  }
  0x7f   :  { %958 = vmatpush1.bf16.msra.mxu0 %v3037_v14  ;;  %2890 = vmatpush3.bf16.msra.mxu1 %v3145_v39  ;;  %v3108_v14 = vld [vmem:[%s4321_s2 + $0x364] ss:$8 sps:$4 sm:$0xff]   ;;  %v3106_v15 = vld [vmem:[%s4321_s2 + $0x360] ss:$8 sps:$4 sm:$0xff]   ;;  %v3115_v22 = vld [vmem:[%s4321_s2 + $0x390] ss:$8 sps:$4 sm:$0xff]  }
  0x80   :  { %968 = vmatprep.subr.bf16.mxu0 %v3042_v17  ;;  %2891 = vmatprep.subr.bf16.mxu1 %v3146_v40  ;;  %v3111_v17 = vld [vmem:[%s4321_s2 + $0x374] ss:$8 sps:$4 sm:$0xff]   ;;  %v3120_v23 = vld [vmem:[%s4321_s2 + $0x3a4] ss:$8 sps:$4 sm:$0xff]   ;;  %v3118_v24 = vld [vmem:[%s4321_s2 + $0x3a0] ss:$8 sps:$4 sm:$0xff]  }
  0x81   :  { %v3126_v27 = vld [vmem:[%s4321_s2 + $0x3c4] ss:$8 sps:$4 sm:$0xff]   ;;  %v3124_v28 = vld [vmem:[%s4321_s2 + $0x3c0] ss:$8 sps:$4 sm:$0xff]   ;;  %v3148_v36 = vld [vmem:[%s4323_s4 + $0x70] sm:$0xff]  }
  0x82   :  { %960 = vmatmul.mubr.bf16.vlgmr.msra.gmra.mrb[0].mxu0 %v234_v18  ;;  %v3109_v18 = vld [vmem:[%s4321_s2 + $0x370] ss:$8 sps:$4 sm:$0xff]   ;;  %v3132_v31 = vld [vmem:[%s4321_s2 + $0x3e4] ss:$8 sps:$4 sm:$0xff]   ;;  %v3130_v32 = vld [vmem:[%s4321_s2 + $0x3e0] ss:$8 sps:$4 sm:$0xff]  }
  0x83   :  { %969 = vmatpush1.bf16.msra.mxu0 %v3040_v19  ;;  %1000 = vmatprep.mubr.bf16.mxu0 %v3527_v20  ;;  %v3114_v19 = vld [vmem:[%s4321_s2 + $0x384] ss:$8 sps:$4 sm:$0xff]   ;;  %v3112_v20 = vld [vmem:[%s4321_s2 + $0x380] ss:$8 sps:$4 sm:$0xff]   ;;  %v3151_v39 = vld [vmem:[%s4323_s4 + $0x38] sm:$0xff]  }
  0x84   :  { %970 = vmatprep.subr.bf16.mxu0 %v3045_v21  ;;  %2892 = vmatpush3.bf16.msra.mxu1 %v3147_v43  ;;  %v3117_v21 = vld [vmem:[%s4321_s2 + $0x394] ss:$8 sps:$4 sm:$0xff]   ;;  %v3152_v40 = vld [vmem:[%s4325_s6 + $0x40] sm:$0xff]   ;;  %v3783_v43 = vsub.s32 1, %v3329_v12 }
  0x85   :  { %2893 = vmatprep.subr.bf16.mxu1 %v3148_v36  ;;  %v1535_v36 = vld [vmem:[%s4329_s10 + $0x118] sm:$0xff] }
  0x87   :  { %971 = vmatpush1.bf16.msra.mxu0 %v3043_v25  ;;  %v3123_v25 = vld [vmem:[%s4321_s2 + $0x3b4] ss:$8 sps:$4 sm:$0xff]  }
  0x88   :  { %972 = vmatprep.subr.bf16.mxu0 %v3048_v26  ;;  %v3121_v26 = vld [vmem:[%s4321_s2 + $0x3b0] ss:$8 sps:$4 sm:$0xff]  }
  0x8b   :  { %973 = vmatpush1.bf16.msra.mxu0 %v3046_v29  ;;  %v3129_v29 = vld [vmem:[%s4321_s2 + $0x3d4] ss:$8 sps:$4 sm:$0xff]  }
  0x8c   :  { %974 = vmatprep.subr.bf16.mxu0 %v3051_v30  ;;  %v3127_v30 = vld [vmem:[%s4321_s2 + $0x3d0] ss:$8 sps:$4 sm:$0xff]  }
  0x8f   :  { %975 = vmatpush1.bf16.msra.mxu0 %v3049_v33  ;;  %v3135_v33 = vld [vmem:[%s4321_s2 + $0x3f4] ss:$8 sps:$4 sm:$0xff]  }
  0x90   :  { %976 = vmatprep.subr.bf16.mxu0 %v3054_v34  ;;  %v3133_v34 = vld [vmem:[%s4321_s2 + $0x3f0] ss:$8 sps:$4 sm:$0xff]  }
  0x93   :  { %977 = vmatpush1.bf16.msra.mxu0 %v3052_v37  ;;  %v3149_v37 = vld [vmem:[%s4323_s4 + $0x30] sm:$0xff]  }
  0x94   :  { %978 = vmatprep.subr.bf16.mxu0 %v3057_v38  ;;  %2894 = vmatpush3.bf16.msra.mxu1 %v3149_v37  ;;  %v3150_v38 = vld [vmem:[%s4323_s4 + $0x78] sm:$0xff]  }
  0x95   :  { %2895 = vmatprep.subr.bf16.mxu1 %v3150_v38  ;;  %v1539_v37 = vld [vmem:[%s4329_s10 + $0x138] sm:$0xff] }
  0x96   :  { %v2787_v38 = vcombine.low %v1535_v36, %v1539_v37 }
  0x97   :  { %979 = vmatpush1.bf16.msra.mxu0 %v3055_v41  ;;  %v3777_v41 = vsub.s32 0, %v3329_v12 }
  0x98   :  { %980 = vmatprep.subr.bf16.mxu0 %v3060_v42  ;;  %2896 = vmatpush3.bf16.msra.mxu1 %v3151_v39  ;;  %v176_v42 = vld [vmem:[%s4322_s3] sm:$0x3]  ;;  %v2788_v39 = vcombine.high %v1535_v36, %v1539_v37 }
  0x99   :  { %2903 = vmatprep.subr.bf16.mxu1 %v3152_v40  ;;  %v1543_v40 = vld [vmem:[%s4329_s10 + $0x158] sm:$0xff] }
  0x9b   :  { %981 = vmatpush1.bf16.msra.mxu0 %v3058_v44  ;;  %v181_v44 = vrot.slane %v176_v42, %v3777_v41 }
  0x9c   :  { %982 = vmatprep.subr.bf16.mxu0 %v3063_v45  ;;  %v185_v45 = vrot.slane %v176_v42, %v3783_v43  ;;  %v1547_v42 = vld [vmem:[%s4329_s10 + $0x178] sm:$0xff] }
  0x9f   :  { %983 = vmatpush1.bf16.msra.mxu0 %v3061_v46 }
  0xa0   :  { %984 = vmatprep.subr.bf16.mxu0 %v3066_v47 }
  0xa3   :  { %985 = vmatpush1.bf16.msra.mxu0 %v3064_v48 }
  0xa4   :  { %986 = vmatprep.subr.bf16.mxu0 %v3069_v49 }
  0xa7   :  { %987 = vmatpush1.bf16.msra.mxu0 %v3067_v50 }
  0xa8   :  { %988 = vmatprep.subr.bf16.mxu0 %v3072_v51 }
  0xab   :  { %989 = vmatpush1.bf16.msra.mxu0 %v3070_v52 }
  0xac   :  { %990 = vmatprep.subr.bf16.mxu0 %v3075_v53 }
  0xaf   :  { %991 = vmatpush1.bf16.msra.mxu0 %v3073_v54 }
  0xb0   :  { %992 = vmatprep.subr.bf16.mxu0 %v3078_v55  ;;  %v3153_v55 = vld [vmem:[%s4325_s6] sm:$0xff]  }
  0xb3   :  { %993 = vmatpush1.bf16.msra.mxu0 %v3076_v56 }
  0xb4   :  { %994 = vmatprep.subr.bf16.mxu0 %v3081_v57  ;;  %v3154_v57 = vld [vmem:[%s4325_s6 + $0x48] sm:$0xff]  }
  0xb7   :  { %995 = vmatpush1.bf16.msra.mxu0 %v3079_v58  ;;  %v3155_v58 = vld [vmem:[%s4325_s6 + $0x8] sm:$0xff]  }
  0xb8   :  { %996 = vmatprep.subr.bf16.mxu0 %v3084_v59  ;;  %v3156_v59 = vld [vmem:[%s4325_s6 + $0x50] sm:$0xff]  }
  0xbb   :  { %997 = vmatpush1.bf16.msra.mxu0 %v3082_v60  ;;  %v3157_v60 = vld [vmem:[%s4325_s6 + $0x10] sm:$0xff]  }
  0xbc   :  { %998 = vmatprep.subr.bf16.mxu0 %v3087_v61  ;;  %v3158_v61 = vld [vmem:[%s4325_s6 + $0x58] sm:$0xff]  }
  0xbf   :  { %999 = vmatpush1.bf16.msra.mxu0 %v3085_v62  ;;  %v3159_v62 = vld [vmem:[%s4325_s6 + $0x18] sm:$0xff]  }
  0xc0   :  { %1009 = vmatprep.subr.bf16.mxu0 %v3090_v63  ;;  %v3160_v63 = vld [vmem:[%s4325_s6 + $0x60] sm:$0xff]  }
  0xc2   :  { %1001 = vmatmul.mubr.bf16.vlgmr.msra.gmra.mrb[0].mxu0 %v3661_v0  ;;  %v3161_v0 = vld [vmem:[%s4325_s6 + $0x20] sm:$0xff]  }
  0xc3   :  { %1010 = vmatpush1.bf16.msra.mxu0 %v3088_v1  ;;  %1041 = vmatprep.mubr.bf16.mxu0 %v237_v2  ;;  %v3162_v1 = vld [vmem:[%s4325_s6 + $0x68] sm:$0xff]  }
  0xc4   :  { %1011 = vmatprep.subr.bf16.mxu0 %v3093_v3  ;;  %v3163_v2 = vld [vmem:[%s4325_s6 + $0x28] sm:$0xff]   ;;  %v3164_v3 = vld [vmem:[%s4325_s6 + $0x70] sm:$0xff]  }
  0xc7   :  { %1012 = vmatpush1.bf16.msra.mxu0 %v3091_v4  ;;  %v3165_v4 = vld [vmem:[%s4325_s6 + $0x30] sm:$0xff]  }
  0xc8   :  { %1013 = vmatprep.subr.bf16.mxu0 %v3096_v5  ;;  %v3166_v5 = vld [vmem:[%s4325_s6 + $0x78] sm:$0xff]  }
  0xcb   :  { %1014 = vmatpush1.bf16.msra.mxu0 %v3094_v6  ;;  %v3167_v6 = vld [vmem:[%s4325_s6 + $0x38] sm:$0xff]  }
  0xcc   :  { %1015 = vmatprep.subr.bf16.mxu0 %v3099_v7  ;;  %v3168_v7 = vld [vmem:[%s4327_s8] ss:$8 sps:$4 sm:$0xff]  }
  0xcf   :  { %1016 = vmatpush1.bf16.msra.mxu0 %v3097_v8  ;;  %v3170_v8 = vld [vmem:[%s4327_s8 + $0x4] ss:$8 sps:$4 sm:$0xff]  }
  0xd0   :  { %1017 = vmatprep.subr.bf16.mxu0 %v3102_v9  ;;  %v1416_v9 = vld [vmem:[%s4327_s8 + $0x10] sm:$0x33] }
  0xd3   :  { %1018 = vmatpush1.bf16.msra.mxu0 %v3100_v10  ;;  %v2746_v10 = vcombine.high %v1416_v9, %v1416_v9 }
  0xd4   :  { %1019 = vmatprep.subr.bf16.mxu0 %v3105_v11  ;;  %v2745_v11 = vcombine.low %v1416_v9, %v1416_v9 }
  0xd7   :  { %1020 = vmatpush1.bf16.msra.mxu0 %v3103_v13  ;;  %v3224_v13 = vmov 0  }
  0xd8   :  { %1021 = vmatprep.subr.bf16.mxu0 %v3108_v14  ;;  %v1450_v14 = vsel %vm1448_vm0, %v2745_v11, 0  ;;  %v1611_v11 = vld [vmem:[%s4329_s10 + $0x378] sm:$0xff] }
  0xdb   :  { %1022 = vmatpush1.bf16.msra.mxu0 %v3106_v15  ;;  %v3844_v15 = vld [vmem:[%s4329_s10] sm:$0xff] }
  0xdc   :  { %1023 = vmatprep.subr.bf16.mxu0 %v3111_v17  ;;  %v3849_v17 = vld [vmem:[%s4329_s10 + $0x20] sm:$0xff] }
  0xdf   :  { %1024 = vmatpush1.bf16.msra.mxu0 %v3109_v18  ;;  %v2749_v18 = vcombine.low %v3844_v15, %v3849_v17 }
  0xe0   :  { %1025 = vmatprep.subr.bf16.mxu0 %v3114_v19  ;;  %v2750_v19 = vcombine.high %v3844_v15, %v3849_v17  ;;  %v1532_v15 = vld [vmem:[%s4329_s10 + $0x100] sm:$0xff] }
  0xe1   :  { %v1536_v17 = vld [vmem:[%s4329_s10 + $0x120] sm:$0xff] }
  0xe3   :  { %1026 = vmatpush1.bf16.msra.mxu0 %v3112_v20  ;;  %v1503_v20 = vld [vmem:[%s4329_s10 + $0x18] sm:$0xff] }
  0xe4   :  { %1027 = vmatprep.subr.bf16.mxu0 %v3117_v21  ;;  %v1507_v21 = vld [vmem:[%s4329_s10 + $0x38] sm:$0xff] }
  0xe7   :  { %1028 = vmatpush1.bf16.msra.mxu0 %v3115_v22  ;;  %v2755_v22 = vcombine.low %v1503_v20, %v1507_v21 }
  0xe8   :  { %1029 = vmatprep.subr.bf16.mxu0 %v3120_v23  ;;  %v2756_v23 = vcombine.high %v1503_v20, %v1507_v21  ;;  %v2709_v20 = vld [vmem:[%s4324_s5] ss:$0 sm:$0xff] }
  0xeb   :  { %1030 = vmatpush1.bf16.msra.mxu0 %v3118_v24  ;;  %v1511_v24 = vld [vmem:[%s4329_s10 + $0x58] sm:$0xff] }
  0xec   :  { %1031 = vmatprep.subr.bf16.mxu0 %v3123_v25  ;;  %v1515_v25 = vld [vmem:[%s4329_s10 + $0x78] sm:$0xff] }
  0xef   :  { %1032 = vmatpush1.bf16.msra.mxu0 %v3121_v26  ;;  %v2763_v26 = vcombine.low %v1511_v24, %v1515_v25 }
  0xf0   :  { %1033 = vmatprep.subr.bf16.mxu0 %v3126_v27  ;;  %v2764_v27 = vcombine.high %v1511_v24, %v1515_v25 }
  0xf3   :  { %1034 = vmatpush1.bf16.msra.mxu0 %v3124_v28  ;;  %v1519_v28 = vld [vmem:[%s4329_s10 + $0x98] sm:$0xff] }
  0xf4   :  { %1035 = vmatprep.subr.bf16.mxu0 %v3129_v29  ;;  %v1523_v29 = vld [vmem:[%s4329_s10 + $0xb8] sm:$0xff] }
  0xf7   :  { %1036 = vmatpush1.bf16.msra.mxu0 %v3127_v30  ;;  %v2771_v30 = vcombine.low %v1519_v28, %v1523_v29 }
  0xf8   :  { %1037 = vmatprep.subr.bf16.mxu0 %v3132_v31  ;;  %v2772_v31 = vcombine.high %v1519_v28, %v1523_v29 }
  0xfb   :  { %1038 = vmatpush1.bf16.msra.mxu0 %v3130_v32  ;;  %v1527_v32 = vld [vmem:[%s4329_s10 + $0xd8] sm:$0xff] }
  0xfc   :  { %1039 = vmatprep.subr.bf16.mxu0 %v3135_v33  ;;  %v1531_v33 = vld [vmem:[%s4329_s10 + $0xf8] sm:$0xff] }
  0xff   :  { %1040 = vmatpush1.bf16.msra.mxu0 %v3133_v34  ;;  %v2779_v34 = vcombine.low %v1527_v32, %v1531_v33 }
 0x100   :  { %2433 = vmatprep.subr.bf16.mxu0 %v2756_v23 }
 0x102   :  { %1042 = vmatmul.mubr.bf16.vlgmr.msra.gmra.mrb[0].mxu0 %v235_v35  ;;  %v2780_v35 = vcombine.high %v1527_v32, %v1531_v33 }
 0x103   :  { %2434 = vmatpush1.bf16.msra.mxu0 %v2755_v22 }
 0x104   :  { %2435 = vmatprep.subr.bf16.mxu0 %v2764_v27  ;;  %v2726_v27 = vld [vmem:[%s4326_s7] ss:$0 sm:$0xff] }
 0x107   :  { %2436 = vmatpush1.bf16.msra.mxu0 %v2763_v26 }
 0x108   :  { %2437 = vmatprep.subr.bf16.mxu0 %v2772_v31 }
 0x10b   :  { %2438 = vmatpush1.bf16.msra.mxu0 %v2771_v30 }
 0x10c   :  { %2439 = vmatprep.subr.bf16.mxu0 %v2780_v35  ;;  %v1407_v35 = vld [vmem:[%s4320_s1] sm:$0x3] }
 0x10f   :  { %2440 = vmatpush1.bf16.msra.mxu0 %v2779_v34 }
 0x110   :  { %2441 = vmatprep.subr.bf16.mxu0 %v2788_v39  ;;  %v1512_v39 = vld [vmem:[%s4329_s10 + $0x60] sm:$0xff] }
 0x113   :  { %2442 = vmatpush1.bf16.msra.mxu0 %v2787_v38  ;;  %v1508_v38 = vld [vmem:[%s4329_s10 + $0x40] sm:$0xff] }
 0x1d5   :  { %v1043_v46 = vpop.f32.mrb[0].mxu0 }
 0x1d6   :  { %v2925_v47 = vadd.f32 %v1043_v46, %v181_v44  ;;  %v1045_v48 = vpop.f32.mrb[1].mxu0  ;;  %v2795_v44 = vcombine.low %v1543_v40, %v1547_v42  ;;  %v1551_v46 = vld [vmem:[%s4329_s10 + $0x198] sm:$0xff] }
 0x1d7   :  { %v2926_v49 = vadd.f32 %v1045_v48, %v185_v45  ;;  %v1047_v50 = vpop.f32.mrb[2].mxu0  ;;  %v2796_v45 = vcombine.high %v1543_v40, %v1547_v42 }
 0x1d8   :  { %v1050_v51 = vmax.f32 %v2925_v47, 0.0  ;;  %v1048_v52 = vpop.f32.mrb[3].mxu0  ;;  %v1555_v47 = vld [vmem:[%s4329_s10 + $0x1b8] sm:$0xff] }
 0x1d9   :  { %v1051_v53 = vmax.f32 %v2926_v49, 0.0  ;;  %2443 = vmatprep.subr.bf16.mxu0 %v2796_v45  ;;  %v2803_v48 = vcombine.low %v1551_v46, %v1555_v47  ;;  %v2804_v49 = vcombine.high %v1551_v46, %v1555_v47  ;;  %v1559_v50 = vld [vmem:[%s4329_s10 + $0x1d8] sm:$0xff]  ;;  %v1516_v45 = vld [vmem:[%s4329_s10 + $0x80] sm:$0xff]  ;;  %v2757_v47 = vcombine.low %v1508_v38, %v1512_v39 }
 0x1da   :  { %v1052_v56 = vpack.c.bf16 %v1050_v51, %v1050_v51  ;;  %2444 = vmatpush1.bf16.msra.mxu0 %v2795_v44  ;;  %v1563_v51 = vld [vmem:[%s4329_s10 + $0x1f8] sm:$0xff]  ;;  %v2758_v44 = vcombine.high %v1508_v38, %v1512_v39  ;;  %v1520_v46 = vld [vmem:[%s4329_s10 + $0xa0] sm:$0xff] }
 0x1db   :  { %v1053_v54 = vpack.c.bf16 %v1051_v53, %v1051_v53  ;;  %2445 = vmatprep.subr.bf16.mxu0 %v2804_v49  ;;  %v2811_v52 = vcombine.low %v1559_v50, %v1563_v51  ;;  %v2812_v53 = vcombine.high %v1559_v50, %v1563_v51  ;;  %v1524_v49 = vld [vmem:[%s4329_s10 + $0xc0] sm:$0xff]  ;;  %v2765_v51 = vcombine.low %v1516_v45, %v1520_v46 }
 0x1dc   :  { %v1528_v50 = vld [vmem:[%s4329_s10 + $0xe0] sm:$0xff] }
 0x1dd   :  { %1221 = vmatprep.mubr.bf16.mxu1 %v1053_v54 }
 0x1de   :  { %1222 = vmatmul.mubr.bf16.vlgmr.msra.gmra.mrb[0].mxu1 %v1052_v56  ;;  %2446 = vmatpush1.bf16.msra.mxu0 %v2803_v48  ;;  %v2766_v48 = vcombine.high %v1516_v45, %v1520_v46  ;;  %v1623_v45 = vld [vmem:[%s4329_s10 + $0x3d8] sm:$0xff] }
 0x1df   :  { %2904 = vmatpush3.bf16.msra.mxu1 %v3153_v55  ;;  %1396 = vmatprep.mubr.bf16.mxu1 %v1053_v54  ;;  %v1567_v54 = vld [vmem:[%s4329_s10 + $0x218] sm:$0xff] }
 0x1e0   :  { %2905 = vmatprep.subr.bf16.mxu1 %v3154_v57  ;;  %2447 = vmatprep.subr.bf16.mxu0 %v2812_v53  ;;  %v1571_v55 = vld [vmem:[%s4329_s10 + $0x238] sm:$0xff]  ;;  %v2782_v53 = vcombine.high %v1532_v15, %v1536_v17 }
 0x1e1   :  { %v2820_v57 = vcombine.high %v1567_v54, %v1571_v55  ;;  %v1627_v46 = vld [vmem:[%s4329_s10 + $0x3f8] sm:$0xff] }
 0x1e2   :  { %2448 = vmatpush1.bf16.msra.mxu0 %v2811_v52  ;;  %v2774_v52 = vcombine.high %v1524_v49, %v1528_v50 }
 0x1e3   :  { %2906 = vmatpush3.bf16.msra.mxu1 %v3155_v58  ;;  %2449 = vmatprep.subr.bf16.mxu0 %v2820_v57  ;;  %v1575_v58 = vld [vmem:[%s4329_s10 + $0x258] sm:$0xff] }
 0x1e4   :  { %2907 = vmatprep.subr.bf16.mxu1 %v3156_v59  ;;  %v1579_v59 = vld [vmem:[%s4329_s10 + $0x278] sm:$0xff] }
 0x1e7   :  { %2908 = vmatpush3.bf16.msra.mxu1 %v3157_v60  ;;  %v2827_v60 = vcombine.low %v1575_v58, %v1579_v59 }
 0x1e8   :  { %2909 = vmatprep.subr.bf16.mxu1 %v3158_v61  ;;  %v2828_v61 = vcombine.high %v1575_v58, %v1579_v59  ;;  %v1548_v58 = vld [vmem:[%s4329_s10 + $0x180] sm:$0xff] }
 0x1e9   :  { %v1552_v59 = vld [vmem:[%s4329_s10 + $0x1a0] sm:$0xff] }
 0x1eb   :  { %2910 = vmatpush3.bf16.msra.mxu1 %v3159_v62  ;;  %v1583_v62 = vld [vmem:[%s4329_s10 + $0x298] sm:$0xff] }
 0x1ec   :  { %2911 = vmatprep.subr.bf16.mxu1 %v3160_v63  ;;  %v1587_v63 = vld [vmem:[%s4329_s10 + $0x2b8] sm:$0xff] }
 0x1ef   :  { %2912 = vmatpush3.bf16.msra.mxu1 %v3161_v0  ;;  %v2835_v0 = vcombine.low %v1583_v62, %v1587_v63 }
 0x1f0   :  { %2913 = vmatprep.subr.bf16.mxu1 %v3162_v1  ;;  %v2836_v1 = vcombine.high %v1583_v62, %v1587_v63  ;;  %v1556_v62 = vld [vmem:[%s4329_s10 + $0x1c0] sm:$0xff] }
 0x1f1   :  { %v1560_v63 = vld [vmem:[%s4329_s10 + $0x1e0] sm:$0xff] }
 0x1f3   :  { %2914 = vmatpush3.bf16.msra.mxu1 %v3163_v2  ;;  %v1591_v2 = vld [vmem:[%s4329_s10 + $0x2d8] sm:$0xff] }
 0x1f4   :  { %2915 = vmatprep.subr.bf16.mxu1 %v3164_v3  ;;  %v1595_v3 = vld [vmem:[%s4329_s10 + $0x2f8] sm:$0xff] }
 0x1f7   :  { %2916 = vmatpush3.bf16.msra.mxu1 %v3165_v4  ;;  %v2843_v4 = vcombine.low %v1591_v2, %v1595_v3 }
 0x1f8   :  { %2917 = vmatprep.subr.bf16.mxu1 %v3166_v5  ;;  %v2844_v5 = vcombine.high %v1591_v2, %v1595_v3  ;;  %v1564_v2 = vld [vmem:[%s4329_s10 + $0x200] sm:$0xff] }
 0x1f9   :  { %v1568_v3 = vld [vmem:[%s4329_s10 + $0x220] sm:$0xff] }
 0x1fb   :  { %2918 = vmatpush3.bf16.msra.mxu1 %v3167_v6  ;;  %v1599_v6 = vld [vmem:[%s4329_s10 + $0x318] sm:$0xff] }
 0x1fc   :  { %1455 = vmatprep.subr.bf16.mxu1 %v3170_v8 }
 0x1fe   :  { %1397 = vmatmul.mubr.bf16.vlgmr.msra.gmra.mrb[4].mxu1 %v1052_v56  ;;  %v2819_v56 = vcombine.low %v1567_v54, %v1571_v55  ;;  %v1540_v54 = vld [vmem:[%s4329_s10 + $0x140] sm:$0xff] }
 0x1ff   :  { %1487 = vmatprep.mubr.bf16.mxu1 %v3224_v13  ;;  %1456 = vmatpush1.bf16.msra.mxu1 %v3168_v7  ;;  %v1603_v7 = vld [vmem:[%s4329_s10 + $0x338] sm:$0xff]  ;;  %v1544_v55 = vld [vmem:[%s4329_s10 + $0x160] sm:$0xff] }
 0x200   :  { %2747 = vmatprep.subr.msk.bf16.mxu1 %vm1448_vm0, %v2746_v10  ;;  %2450 = vmatpush1.bf16.msra.mxu0 %v2819_v56  ;;  %v2851_v8 = vcombine.low %v1599_v6, %v1603_v7  ;;  %v2852_v9 = vcombine.high %v1599_v6, %v1603_v7  ;;  %v1607_v10 = vld [vmem:[%s4329_s10 + $0x358] sm:$0xff]  ;;  %v2781_v56 = vcombine.low %v1532_v15, %v1536_v17  ;;  %v1572_v6 = vld [vmem:[%s4329_s10 + $0x240] sm:$0xff] }
 0x201   :  { %2451 = vmatprep.subr.bf16.mxu0 %v2828_v61  ;;  %v2859_v13 = vcombine.low %v1607_v10, %v1611_v11  ;;  %v2790_v57 = vcombine.high %v1540_v54, %v1544_v55  ;;  %v2798_v61 = vcombine.high %v1548_v58, %v1552_v59  ;;  %v1576_v7 = vld [vmem:[%s4329_s10 + $0x260] sm:$0xff] }
 0x202   :  { %v1417_v17 = vld [vmem:[%s4328_s9] sm:$0x3] }
 0x203   :  { %1458 = vmatpush1.bf16.msra.mxu1 %v1450_v14  ;;  %v2860_v14 = vcombine.high %v1607_v10, %v1611_v11  ;;  %v1580_v10 = vld [vmem:[%s4329_s10 + $0x280] sm:$0xff] }
 0x204   :  { %2310 = vmatprep.subr.bf16.mxu1 %v2750_v19  ;;  %2452 = vmatpush1.bf16.msra.mxu0 %v2827_v60  ;;  %v2789_v60 = vcombine.low %v1540_v54, %v1544_v55  ;;  %v1584_v11 = vld [vmem:[%s4329_s10 + $0x2a0] sm:$0xff] }
 0x205   :  { %2453 = vmatprep.subr.bf16.mxu0 %v2836_v1  ;;  %v2806_v1 = vcombine.high %v1556_v62, %v1560_v63 }
 0x208   :  { %2454 = vmatpush1.bf16.msra.mxu0 %v2835_v0  ;;  %v2797_v0 = vcombine.low %v1548_v58, %v1552_v59 }
 0x209   :  { %2455 = vmatprep.subr.bf16.mxu0 %v2844_v5  ;;  %v2814_v5 = vcombine.high %v1564_v2, %v1568_v3 }
 0x20c   :  { %2456 = vmatpush1.bf16.msra.mxu0 %v2843_v4  ;;  %v2805_v4 = vcombine.low %v1556_v62, %v1560_v63  ;;  %v1509_v62 = vld [vmem:[%s4329_s10 + $0x48] sm:$0xff] }
 0x20d   :  { %2457 = vmatprep.subr.bf16.mxu0 %v2852_v9  ;;  %v2822_v9 = vcombine.high %v1572_v6, %v1576_v7  ;;  %v1513_v63 = vld [vmem:[%s4329_s10 + $0x68] sm:$0xff] }
 0x210   :  { %2458 = vmatpush1.bf16.msra.mxu0 %v2851_v8  ;;  %v2813_v8 = vcombine.low %v1564_v2, %v1568_v3  ;;  %v2760_v2 = vcombine.high %v1509_v62, %v1513_v63  ;;  %v1517_v3 = vld [vmem:[%s4329_s10 + $0x88] sm:$0xff] }
 0x211   :  { %2459 = vmatprep.subr.bf16.mxu0 %v2860_v14  ;;  %v2830_v14 = vcombine.high %v1580_v10, %v1584_v11 }
 0x214   :  { %2460 = vmatpush1.bf16.msra.mxu0 %v2859_v13  ;;  %v2821_v13 = vcombine.low %v1572_v6, %v1576_v7  ;;  %v1525_v7 = vld [vmem:[%s4329_s10 + $0xc8] sm:$0xff] }
 0x2b1   :  { %v2897_v19 = vpop.f32.mrb[0].mxu1 }
 0x2b2   :  { %v2898_v21 = vpop.f32.mrb[1].mxu1 }
 0x2b3   :  { %v2899_v22 = vadd.f32 %v2898_v21, %v2897_v19  ;;  %v2900_v23 = vpop.f32.mrb[2].mxu1  ;;  %v1588_v19 = vld [vmem:[%s4329_s10 + $0x2c0] sm:$0xff]  ;;  %v2829_v21 = vcombine.low %v1580_v10, %v1584_v11  ;;  %v1533_v11 = vld [vmem:[%s4329_s10 + $0x108] sm:$0xff] }
 0x2b4   :  { %v2901_v24 = vpop.f32.mrb[3].mxu1  ;;  %v1596_v23 = vld [vmem:[%s4329_s10 + $0x300] sm:$0xff] }
 0x2b5   :  { %v1224_v25 = vadd.f32 %v2899_v22, %v2709_v20  ;;  %v1592_v20 = vld [vmem:[%s4329_s10 + $0x2e0] sm:$0xff] }
 0x2b6   :  { %v2838_v22 = vcombine.high %v1588_v19, %v1592_v20  ;;  %v1600_v24 = vld [vmem:[%s4329_s10 + $0x320] sm:$0xff] }
 0x2b7   :  { %1405 = vst.msk [vmem:[#allocation2] sm:$0x3] %vm1404_vm1, %v1224_v25 }
 0x2d1   :  { %v2919_v26 = vpop.f32.mrb[4].mxu1 }
 0x2d2   :  { %v2920_v28 = vpop.f32.mrb[5].mxu1 }
 0x2d3   :  { %v2921_v29 = vadd.f32 %v2920_v28, %v2919_v26  ;;  %v2922_v30 = vpop.f32.mrb[6].mxu1  ;;  %v2846_v26 = vcombine.high %v1596_v23, %v1600_v24  ;;  %v1608_v28 = vld [vmem:[%s4329_s10 + $0x360] sm:$0xff] }
 0x2d4   :  { %v2923_v31 = vpop.f32.mrb[7].mxu1 }
 0x2d5   :  { %v1399_v32 = vadd.f32 %v2921_v29, %v2726_v27  ;;  %v1604_v27 = vld [vmem:[%s4329_s10 + $0x340] sm:$0xff]  ;;  %v2845_v29 = vcombine.low %v1596_v23, %v1600_v24  ;;  %v1549_v24 = vld [vmem:[%s4329_s10 + $0x188] sm:$0xff] }
 0x2d6   :  { %v2854_v30 = vcombine.high %v1604_v27, %v1608_v28  ;;  %v2853_v31 = vcombine.low %v1604_v27, %v1608_v28  ;;  %v1557_v28 = vld [vmem:[%s4329_s10 + $0x1c8] sm:$0xff] }
 0x2d7   :  { %v1408_v33 = vmul.f32 0.5, %v1399_v32  ;;  %1406 = vst.msk [vmem:[#allocation4] sm:$0x3] %vm1404_vm1, %v1399_v32  ;;  %v1612_v32 = vld [vmem:[%s4329_s10 + $0x380] sm:$0xff] }
 0x2d9   :  { %v1409_v34 = vmul.f32 1.442695, %v1408_v33  ;;  %v1616_v33 = vld [vmem:[%s4329_s10 + $0x3a0] sm:$0xff] }
 0x2db   :  { %3173 = vpow2.f32 %v1409_v34  ;;  %v2862_v34 = vcombine.high %v1612_v32, %v1616_v33 }
 0x2e5   :  { %v3174_v36 = vpop.eup %3173 }
 0x2e6   :  { %v1411_v37 = vmul.f32 %v3174_v36, %v1407_v35  ;;  %v1615_v35 = vld [vmem:[%s4329_s10 + $0x398] sm:$0xff] }
 0x2e7   :  { %v1619_v36 = vld [vmem:[%s4329_s10 + $0x3b8] sm:$0xff] }
 0x2e8   :  { %v1412_v40 = vadd.f32 %v1411_v37, %v1224_v25  ;;  %v2837_v25 = vcombine.low %v1588_v19, %v1592_v20  ;;  %v2861_v37 = vcombine.low %v1612_v32, %v1616_v33  ;;  %v2868_v38 = vcombine.high %v1615_v35, %v1619_v36  ;;  %v1541_v20 = vld [vmem:[%s4329_s10 + $0x148] sm:$0xff] }
 0x2e9   :  { %v2867_v39 = vcombine.low %v1615_v35, %v1619_v36  ;;  %v1565_v32 = vld [vmem:[%s4329_s10 + $0x208] sm:$0xff] }
 0x2ea   :  { %v1413_v42 = vpack.c.bf16 %v1412_v40, %v1412_v40  ;;  %2461 = vmatprep.subr.bf16.mxu0 %v2868_v38  ;;  %v1620_v40 = vld [vmem:[%s4329_s10 + $0x3c0] sm:$0xff]  ;;  %v1569_v33 = vld [vmem:[%s4329_s10 + $0x228] sm:$0xff] }
 0x2eb   :  { %2462 = vmatpush1.bf16.msra.mxu0 %v2867_v39  ;;  %v2816_v35 = vcombine.high %v1565_v32, %v1569_v33  ;;  %v1573_v36 = vld [vmem:[%s4329_s10 + $0x248] sm:$0xff]  ;;  %v2815_v38 = vcombine.low %v1565_v32, %v1569_v33  ;;  %v1558_v33 = vld [vmem:[%s4329_s10 + $0x1d0] sm:$0xff] }
 0x2ec   :  { %2748 = vmatmul.mubr.msk.bf16.vlgmr.msra.gmra.mrb[8].mxu1 %vm1444_vm2, %v1413_v42  ;;  %v1624_v42 = vld [vmem:[%s4329_s10 + $0x3e0] sm:$0xff] }
 0x2ed   :  { %2311 = vmatpush1.bf16.msra.mxu1 %v2749_v18  ;;  %v2773_v18 = vcombine.low %v1524_v49, %v1528_v50  ;;  %v2875_v49 = vcombine.low %v1623_v45, %v1627_v46  ;;  %v1501_v50 = vld [vmem:[%s4329_s10 + $0x8] sm:$0xff] }
 0x2ee   :  { %2312 = vmatprep.subr.bf16.mxu1 %v2758_v44  ;;  %v2870_v44 = vcombine.high %v1620_v40, %v1624_v42 }
 0x2f1   :  { %2313 = vmatpush1.bf16.msra.mxu1 %v2757_v47  ;;  %v2869_v47 = vcombine.low %v1620_v40, %v1624_v42  ;;  %v1581_v40 = vld [vmem:[%s4329_s10 + $0x288] sm:$0xff] }
 0x2f2   :  { %2314 = vmatprep.subr.bf16.mxu1 %v2766_v48  ;;  %v2876_v48 = vcombine.high %v1623_v45, %v1627_v46  ;;  %v1585_v42 = vld [vmem:[%s4329_s10 + $0x2a8] sm:$0xff] }
 0x2f3   :  { %v2832_v45 = vcombine.high %v1581_v40, %v1585_v42  ;;  %v1589_v46 = vld [vmem:[%s4329_s10 + $0x2c8] sm:$0xff] }
 0x2f4   :  { %2463 = vmatprep.subr.bf16.mxu0 %v2876_v48  ;;  %v2831_v48 = vcombine.low %v1581_v40, %v1585_v42  ;;  %v1574_v42 = vld [vmem:[%s4329_s10 + $0x250] sm:$0xff] }
 0x2f5   :  { %2315 = vmatpush1.bf16.msra.mxu1 %v2765_v51  ;;  %v1505_v51 = vld [vmem:[%s4329_s10 + $0x28] sm:$0xff]  ;;  %2464 = vmatpush1.bf16.msra.mxu0 %v2875_v49 }
 0x2f6   :  { %2316 = vmatprep.subr.bf16.mxu1 %v2774_v52  ;;  %v2752_v52 = vcombine.high %v1501_v50, %v1505_v51  ;;  %v2751_v15 = vcombine.low %v1501_v50, %v1505_v51  ;;  %v1597_v50 = vld [vmem:[%s4329_s10 + $0x308] sm:$0xff] }
 0x2f7   :  { %v1601_v51 = vld [vmem:[%s4329_s10 + $0x328] sm:$0xff] }
 0x2f9   :  { %2317 = vmatpush1.bf16.msra.mxu1 %v2773_v18  ;;  %v1422_v18 = vrot.slane %v1417_v17, %v3777_v41 }
 0x2fa   :  { %2318 = vmatprep.subr.bf16.mxu1 %v2782_v53  ;;  %v1426_v53 = vrot.slane %v1417_v17, %v3783_v43  ;;  %v1605_v17 = vld [vmem:[%s4329_s10 + $0x348] sm:$0xff] }
 0x2fd   :  { %2319 = vmatpush1.bf16.msra.mxu1 %v2781_v56 }
 0x2fe   :  { %2320 = vmatprep.subr.bf16.mxu1 %v2790_v57 }
 0x301   :  { %2321 = vmatpush1.bf16.msra.mxu1 %v2789_v60 }
 0x302   :  { %2322 = vmatprep.subr.bf16.mxu1 %v2798_v61 }
 0x305   :  { %2323 = vmatpush1.bf16.msra.mxu1 %v2797_v0 }
 0x306   :  { %2324 = vmatprep.subr.bf16.mxu1 %v2806_v1 }
 0x309   :  { %2325 = vmatpush1.bf16.msra.mxu1 %v2805_v4  ;;  %v1521_v4 = vld [vmem:[%s4329_s10 + $0xa8] sm:$0xff] }
 0x30a   :  { %2326 = vmatprep.subr.bf16.mxu1 %v2814_v5  ;;  %v2759_v5 = vcombine.low %v1509_v62, %v1513_v63  ;;  %v2768_v6 = vcombine.high %v1517_v3, %v1521_v4  ;;  %v1502_v63 = vld [vmem:[%s4329_s10 + $0x10] sm:$0xff] }
 0x30d   :  { %2327 = vmatpush1.bf16.msra.mxu1 %v2813_v8  ;;  %v1529_v8 = vld [vmem:[%s4329_s10 + $0xe8] sm:$0xff] }
 0x30e   :  { %2328 = vmatprep.subr.bf16.mxu1 %v2822_v9  ;;  %v2767_v9 = vcombine.low %v1517_v3, %v1521_v4  ;;  %v2776_v10 = vcombine.high %v1525_v7, %v1529_v8 }
 0x311   :  { %2329 = vmatpush1.bf16.msra.mxu1 %v2821_v13  ;;  %v1537_v13 = vld [vmem:[%s4329_s10 + $0x128] sm:$0xff] }
 0x312   :  { %2330 = vmatprep.subr.bf16.mxu1 %v2830_v14  ;;  %v2775_v14 = vcombine.low %v1525_v7, %v1529_v8  ;;  %v2784_v19 = vcombine.high %v1533_v11, %v1537_v13 }
 0x315   :  { %2331 = vmatpush1.bf16.msra.mxu1 %v2829_v21  ;;  %v1545_v21 = vld [vmem:[%s4329_s10 + $0x168] sm:$0xff] }
 0x316   :  { %2332 = vmatprep.subr.bf16.mxu1 %v2838_v22  ;;  %v2783_v22 = vcombine.low %v1533_v11, %v1537_v13  ;;  %v2792_v23 = vcombine.high %v1541_v20, %v1545_v21 }
 0x319   :  { %2333 = vmatpush1.bf16.msra.mxu1 %v2837_v25  ;;  %v1553_v25 = vld [vmem:[%s4329_s10 + $0x1a8] sm:$0xff] }
 0x31a   :  { %2334 = vmatprep.subr.bf16.mxu1 %v2846_v26  ;;  %v2791_v26 = vcombine.low %v1541_v20, %v1545_v21  ;;  %v2800_v27 = vcombine.high %v1549_v24, %v1553_v25 }
 0x31d   :  { %2335 = vmatpush1.bf16.msra.mxu1 %v2845_v29  ;;  %v1561_v29 = vld [vmem:[%s4329_s10 + $0x1e8] sm:$0xff] }
 0x31e   :  { %2336 = vmatprep.subr.bf16.mxu1 %v2854_v30  ;;  %v2799_v30 = vcombine.low %v1549_v24, %v1553_v25  ;;  %v1542_v25 = vld [vmem:[%s4329_s10 + $0x150] sm:$0xff] }
 0x321   :  { %2337 = vmatpush1.bf16.msra.mxu1 %v2853_v31  ;;  %v2808_v31 = vcombine.high %v1557_v28, %v1561_v29 }
 0x322   :  { %2338 = vmatprep.subr.bf16.mxu1 %v2862_v34  ;;  %v2807_v34 = vcombine.low %v1557_v28, %v1561_v29  ;;  %v1550_v29 = vld [vmem:[%s4329_s10 + $0x190] sm:$0xff] }
 0x325   :  { %2339 = vmatpush1.bf16.msra.mxu1 %v2861_v37  ;;  %v1577_v37 = vld [vmem:[%s4329_s10 + $0x268] sm:$0xff] }
 0x326   :  { %2340 = vmatprep.subr.bf16.mxu1 %v2870_v44  ;;  %v2824_v39 = vcombine.high %v1573_v36, %v1577_v37  ;;  %v2823_v44 = vcombine.low %v1573_v36, %v1577_v37  ;;  %v1566_v37 = vld [vmem:[%s4329_s10 + $0x210] sm:$0xff] }
 0x329   :  { %2341 = vmatpush1.bf16.msra.mxu1 %v2869_v47  ;;  %v1593_v47 = vld [vmem:[%s4329_s10 + $0x2e8] sm:$0xff] }
 0x32a   :  { %2351 = vmatprep.subr.bf16.mxu1 %v2752_v52  ;;  %v2840_v49 = vcombine.high %v1589_v46, %v1593_v47  ;;  %v2839_v52 = vcombine.low %v1589_v46, %v1593_v47  ;;  %v1582_v47 = vld [vmem:[%s4329_s10 + $0x290] sm:$0xff] }
 0x3bf   :  { %v1489_v54 = vpop.f32.mrb[8].mxu1 }
 0x3c0   :  { %v1490_v55 = vadd.f32 %v1489_v54, %v1422_v18  ;;  %v1491_v56 = vpop.f32.mrb[9].mxu1  ;;  %v1609_v18 = vld [vmem:[%s4329_s10 + $0x368] sm:$0xff] }
 0x3c1   :  { %v1492_v57 = vadd.f32 %v1491_v56, %v1426_v53  ;;  %v1493_v58 = vpop.f32.mrb[10].mxu1  ;;  %v2847_v53 = vcombine.low %v1597_v50, %v1601_v51  ;;  %v2856_v54 = vcombine.high %v1605_v17, %v1609_v18  ;;  %v1617_v56 = vld [vmem:[%s4329_s10 + $0x3a8] sm:$0xff] }
 0x3c2   :  { %v1496_v59 = vmax.f32 %v1490_v55, 0.0  ;;  %v1494_v60 = vpop.f32.mrb[11].mxu1  ;;  %v1613_v55 = vld [vmem:[%s4329_s10 + $0x388] sm:$0xff] }
 0x3c3   :  { %v1497_v61 = vmax.f32 %v1492_v57, 0.0  ;;  %v2855_v57 = vcombine.low %v1605_v17, %v1609_v18  ;;  %v2864_v58 = vcombine.high %v1613_v55, %v1617_v56  ;;  %v1625_v60 = vld [vmem:[%s4329_s10 + $0x3e8] sm:$0xff]  ;;  %v1598_v18 = vld [vmem:[%s4329_s10 + $0x310] sm:$0xff] }
 0x3c4   :  { %v4072_v1 = vpack.c.bf16 %v1496_v59, %v1496_v59  ;;  %v1621_v59 = vld [vmem:[%s4329_s10 + $0x3c8] sm:$0xff] }
 0x3c5   :  { %v4070_v0 = vpack.c.bf16 %v1497_v61, %v1497_v61  ;;  %v2863_v61 = vcombine.low %v1613_v55, %v1617_v56  ;;  %v2872_v62 = vcombine.high %v1621_v59, %v1625_v60  ;;  %v2871_v3 = vcombine.low %v1621_v59, %v1625_v60  ;;  %v1606_v56 = vld [vmem:[%s4329_s10 + $0x350] sm:$0xff] }
 0x3c6   :  { %v1614_v60 = vld [vmem:[%s4329_s10 + $0x390] sm:$0xff] }
 0x3c7   :  { %2342 = vmatprep.mubr.bf16.mxu1 %v4070_v0  ;;  %2465 = vmatprep.mubr.bf16.mxu0 %v4070_v0 }
 0x3c8   :  { %2343 = vmatmul.mubr.bf16.vlgmr.msra.gmra.mrb[12].mxu1 %v4072_v1  ;;  %2466 = vmatmul.mubr.bf16.vlgmr.msra.gmra.mrb[4].mxu0 %v4072_v1 }
 0x3c9   :  { %2352 = vmatpush1.bf16.msra.mxu1 %v2751_v15  ;;  %2383 = vmatprep.mubr.bf16.mxu1 %v4070_v0  ;;  %v2848_v15 = vcombine.high %v1597_v50, %v1601_v51  ;;  %v1590_v51 = vld [vmem:[%s4329_s10 + $0x2d0] sm:$0xff] }
 0x3ca   :  { %2353 = vmatprep.subr.bf16.mxu1 %v2760_v2  ;;  %v1506_v2 = vld [vmem:[%s4329_s10 + $0x30] sm:$0xff] }
 0x3cb   :  { %v2754_v4 = vcombine.high %v1502_v63, %v1506_v2  ;;  %v2753_v7 = vcombine.low %v1502_v63, %v1506_v2  ;;  %v1622_v2 = vld [vmem:[%s4329_s10 + $0x3d0] sm:$0xff] }
 0x3cd   :  { %2354 = vmatpush1.bf16.msra.mxu1 %v2759_v5  ;;  %v1510_v5 = vld [vmem:[%s4329_s10 + $0x50] sm:$0xff] }
 0x3ce   :  { %2355 = vmatprep.subr.bf16.mxu1 %v2768_v6  ;;  %v1514_v6 = vld [vmem:[%s4329_s10 + $0x70] sm:$0xff] }
 0x3cf   :  { %v2762_v8 = vcombine.high %v1510_v5, %v1514_v6  ;;  %v2761_v11 = vcombine.low %v1510_v5, %v1514_v6 }
 0x3d1   :  { %2356 = vmatpush1.bf16.msra.mxu1 %v2767_v9  ;;  %v1518_v9 = vld [vmem:[%s4329_s10 + $0x90] sm:$0xff] }
 0x3d2   :  { %2357 = vmatprep.subr.bf16.mxu1 %v2776_v10  ;;  %v1522_v10 = vld [vmem:[%s4329_s10 + $0xb0] sm:$0xff] }
 0x3d3   :  { %v2770_v13 = vcombine.high %v1518_v9, %v1522_v10  ;;  %v2769_v20 = vcombine.low %v1518_v9, %v1522_v10  ;;  %v1660_v9 = vsub.s32 7, %v3329_v12 }
 0x3d5   :  { %2358 = vmatpush1.bf16.msra.mxu1 %v2775_v14  ;;  %v1526_v14 = vld [vmem:[%s4329_s10 + $0xd0] sm:$0xff] }
 0x3d6   :  { %2359 = vmatprep.subr.bf16.mxu1 %v2784_v19  ;;  %v1530_v19 = vld [vmem:[%s4329_s10 + $0xf0] sm:$0xff] }
 0x3d7   :  { %v2778_v21 = vcombine.high %v1526_v14, %v1530_v19 }
 0x3d9   :  { %2360 = vmatpush1.bf16.msra.mxu1 %v2783_v22  ;;  %v1534_v22 = vld [vmem:[%s4329_s10 + $0x110] sm:$0xff] }
 0x3da   :  { %2361 = vmatprep.subr.bf16.mxu1 %v2792_v23  ;;  %v2777_v23 = vcombine.low %v1526_v14, %v1530_v19 }
 0x3dd   :  { %2362 = vmatpush1.bf16.msra.mxu1 %v2791_v26  ;;  %v1546_v26 = vld [vmem:[%s4329_s10 + $0x170] sm:$0xff] }
 0x3de   :  { %2363 = vmatprep.subr.bf16.mxu1 %v2800_v27  ;;  %v2794_v28 = vcombine.high %v1542_v25, %v1546_v26 }
 0x3e1   :  { %2364 = vmatpush1.bf16.msra.mxu1 %v2799_v30  ;;  %v1554_v30 = vld [vmem:[%s4329_s10 + $0x1b0] sm:$0xff] }
 0x3e2   :  { %2365 = vmatprep.subr.bf16.mxu1 %v2808_v31  ;;  %v2793_v31 = vcombine.low %v1542_v25, %v1546_v26  ;;  %v2802_v32 = vcombine.high %v1550_v29, %v1554_v30 }
 0x3e5   :  { %2366 = vmatpush1.bf16.msra.mxu1 %v2807_v34  ;;  %v1562_v34 = vld [vmem:[%s4329_s10 + $0x1f0] sm:$0xff] }
 0x3e6   :  { %2367 = vmatprep.subr.bf16.mxu1 %v2816_v35  ;;  %v2801_v35 = vcombine.low %v1550_v29, %v1554_v30  ;;  %v2810_v36 = vcombine.high %v1558_v33, %v1562_v34 }
 0x3e9   :  { %2368 = vmatpush1.bf16.msra.mxu1 %v2815_v38  ;;  %v1570_v38 = vld [vmem:[%s4329_s10 + $0x230] sm:$0xff] }
 0x3ea   :  { %2369 = vmatprep.subr.bf16.mxu1 %v2824_v39  ;;  %v2809_v39 = vcombine.low %v1558_v33, %v1562_v34  ;;  %v2818_v40 = vcombine.high %v1566_v37, %v1570_v38 }
 0x3ed   :  { %2370 = vmatpush1.bf16.msra.mxu1 %v2823_v44  ;;  %v1578_v44 = vld [vmem:[%s4329_s10 + $0x270] sm:$0xff] }
 0x3ee   :  { %2371 = vmatprep.subr.bf16.mxu1 %v2832_v45  ;;  %v2817_v45 = vcombine.low %v1566_v37, %v1570_v38  ;;  %v2826_v46 = vcombine.high %v1574_v42, %v1578_v44 }
 0x3f1   :  { %2372 = vmatpush1.bf16.msra.mxu1 %v2831_v48  ;;  %v1586_v48 = vld [vmem:[%s4329_s10 + $0x2b0] sm:$0xff] }
 0x3f2   :  { %2373 = vmatprep.subr.bf16.mxu1 %v2840_v49  ;;  %v2825_v49 = vcombine.low %v1574_v42, %v1578_v44  ;;  %v2834_v50 = vcombine.high %v1582_v47, %v1586_v48 }
 0x3f5   :  { %2374 = vmatpush1.bf16.msra.mxu1 %v2839_v52  ;;  %v1594_v52 = vld [vmem:[%s4329_s10 + $0x2f0] sm:$0xff] }
 0x3f6   :  { %2375 = vmatprep.subr.bf16.mxu1 %v2848_v15  ;;  %v2833_v15 = vcombine.low %v1582_v47, %v1586_v48  ;;  %v2842_v17 = vcombine.high %v1590_v51, %v1594_v52 }
 0x3f9   :  { %2376 = vmatpush1.bf16.msra.mxu1 %v2847_v53  ;;  %v1602_v53 = vld [vmem:[%s4329_s10 + $0x330] sm:$0xff] }
 0x3fa   :  { %2377 = vmatprep.subr.bf16.mxu1 %v2856_v54  ;;  %v2841_v54 = vcombine.low %v1590_v51, %v1594_v52  ;;  %v2850_v55 = vcombine.high %v1598_v18, %v1602_v53 }
 0x3fd   :  { %2378 = vmatpush1.bf16.msra.mxu1 %v2855_v57  ;;  %v1610_v57 = vld [vmem:[%s4329_s10 + $0x370] sm:$0xff] }
 0x3fe   :  { %2379 = vmatprep.subr.bf16.mxu1 %v2864_v58  ;;  %v2849_v58 = vcombine.low %v1598_v18, %v1602_v53  ;;  %v2858_v59 = vcombine.high %v1606_v56, %v1610_v57 }
 0x401   :  { %2380 = vmatpush1.bf16.msra.mxu1 %v2863_v61  ;;  %v1618_v61 = vld [vmem:[%s4329_s10 + $0x3b0] sm:$0xff] }
 0x402   :  { %2381 = vmatprep.subr.bf16.mxu1 %v2872_v62  ;;  %v2857_v62 = vcombine.low %v1606_v56, %v1610_v57  ;;  %v2866_v63 = vcombine.high %v1614_v60, %v1618_v61 }
 0x405   :  { %2382 = vmatpush1.bf16.msra.mxu1 %v2871_v3  ;;  %v1626_v3 = vld [vmem:[%s4329_s10 + $0x3f0] sm:$0xff] }
 0x406   :  { %2392 = vmatprep.subr.bf16.mxu1 %v2754_v4  ;;  %v2865_v4 = vcombine.low %v1614_v60, %v1618_v61  ;;  %v2874_v5 = vcombine.high %v1622_v2, %v1626_v3  ;;  %v2873_v6 = vcombine.low %v1622_v2, %v1626_v3 }
 0x408   :  { %2384 = vmatmul.mubr.bf16.vlgmr.msra.gmra.mrb[16].mxu1 %v4072_v1 }
 0x409   :  { %2393 = vmatpush1.bf16.msra.mxu1 %v2753_v7  ;;  %2424 = vmatprep.mubr.bf16.mxu1 %v4070_v0  ;;  %v1538_v0 = vld [vmem:[%s4329_s10 + $0x130] sm:$0xff]  ;;  %v1656_v7 = vsub.s32 6, %v3329_v12  ;;  %s3225_s10 = smov [#allocation2]  }
 0x40a   :  { %2394 = vmatprep.subr.bf16.mxu1 %v2762_v8  ;;  %v2786_v24 = vcombine.high %v1534_v22, %v1538_v0  ;;  %v2785_v27 = vcombine.low %v1534_v22, %v1538_v0  ;;  %v4266_v8 = vld [vmem:[%s4330_s11] sm:$0xff]  ;;  %s2555_s11 = sshll.u32 %s3225_s10, 4  ;;  %s2556_s11 = int_to_ptr.vmem [resolvable:$true] %s2555_s11 }
 0x40b   :  { %v1633_v10 = vrot.slane %v4266_v8, %v3777_v41  ;;  %v1661_v14 = vrot.slane %v4266_v8, %v1660_v9  ;;  %s3175_s29 = scalar_lea.vmem %s2556_s11, 32  ;;  %p3180_p1 = scmp.lt.s32.totalorder %s2556_s11, %s2556_s11 }
 0x40c   :  { %p3176_p0 = scmp.ne.s32.totalorder %s2556_s11, %s3175_s29  ;;  %p3181_p2 = scmp.lt.s32.totalorder %s3175_s29, %s3175_s29 }
 0x40d   :  { %2395 = vmatpush1.bf16.msra.mxu1 %v2761_v11  ;;  %v1657_v11 = vrot.slane %v4266_v8, %v1656_v7 }
 0x40e   :  { %2396 = vmatprep.subr.bf16.mxu1 %v2770_v13  ;;  %v1637_v13 = vrot.slane %v4266_v8, %v3783_v43  ;;  %p3182_p3 = por %p3181_p2, %p3180_p1 }
 0x410   :  { %p3183_p4 = pnand %p3182_p3, %p3176_p0 }
 0x411   :  { %2397 = vmatpush1.bf16.msra.mxu1 %v2769_v20 }
 0x412   :  { %2398 = vmatprep.subr.bf16.mxu1 %v2778_v21 }
 0x415   :  { %2399 = vmatpush1.bf16.msra.mxu1 %v2777_v23 }
 0x416   :  { %2400 = vmatprep.subr.bf16.mxu1 %v2786_v24 }
 0x419   :  { %2401 = vmatpush1.bf16.msra.mxu1 %v2785_v27 }
 0x41a   :  { %2402 = vmatprep.subr.bf16.mxu1 %v2794_v28 }
 0x41d   :  { %2403 = vmatpush1.bf16.msra.mxu1 %v2793_v31 }
 0x41e   :  { %2404 = vmatprep.subr.bf16.mxu1 %v2802_v32 }
 0x421   :  { %2405 = vmatpush1.bf16.msra.mxu1 %v2801_v35 }
 0x422   :  { %2406 = vmatprep.subr.bf16.mxu1 %v2810_v36 }
 0x425   :  { %2407 = vmatpush1.bf16.msra.mxu1 %v2809_v39 }
 0x426   :  { %2408 = vmatprep.subr.bf16.mxu1 %v2818_v40 }
 0x429   :  { %2409 = vmatpush1.bf16.msra.mxu1 %v2817_v45 }
 0x42a   :  { %2410 = vmatprep.subr.bf16.mxu1 %v2826_v46 }
 0x42d   :  { %2411 = vmatpush1.bf16.msra.mxu1 %v2825_v49 }
 0x42e   :  { %2412 = vmatprep.subr.bf16.mxu1 %v2834_v50 }
 0x431   :  { %2413 = vmatpush1.bf16.msra.mxu1 %v2833_v15 }
 0x432   :  { %2414 = vmatprep.subr.bf16.mxu1 %v2842_v17 }
 0x435   :  { %2415 = vmatpush1.bf16.msra.mxu1 %v2841_v54 }
 0x436   :  { %2416 = vmatprep.subr.bf16.mxu1 %v2850_v55 }
 0x439   :  { %2417 = vmatpush1.bf16.msra.mxu1 %v2849_v58 }
 0x43a   :  { %2418 = vmatprep.subr.bf16.mxu1 %v2858_v59 }
 0x43d   :  { %2419 = vmatpush1.bf16.msra.mxu1 %v2857_v62 }
 0x43e   :  { %2420 = vmatprep.subr.bf16.mxu1 %v2866_v63 }
 0x441   :  { %2421 = vmatpush1.bf16.msra.mxu1 %v2865_v4 }
 0x442   :  { %2422 = vmatprep.subr.bf16.mxu1 %v2874_v5 }
 0x445   :  { %2423 = vmatpush1.bf16.msra.mxu1 %v2873_v6 }
 0x448   :  { %2425 = vmatmul.mubr.bf16.vlgmr.msra.gmra.mrb[20].mxu1 %v4072_v1 }
 0x49b   :  { %v2344_v1 = vpop.f32.mrb[12].mxu1  ;;  %v2467_v19 = vpop.f32.mrb[4].mxu0 }
 0x49c   :  { %v2345_v20 = vadd.f32 %v2344_v1, %v1633_v10  ;;  %v2468_v21 = vadd.f32 %v2467_v19, %v1657_v11  ;;  %v2346_v22 = vpop.f32.mrb[13].mxu1  ;;  %v2469_v0 = vpop.f32.mrb[5].mxu0 }
 0x49d   :  { %v2347_v23 = vadd.f32 %v2346_v22, %v1637_v13  ;;  %v2470_v24 = vadd.f32 %v2469_v0, %v1661_v14  ;;  %v2348_v25 = vpop.f32.mrb[14].mxu1  ;;  %v2471_v26 = vpop.f32.mrb[6].mxu0 }
 0x49e   :  { %v2474_v27 = vmax.f32 %v2345_v20, 0.0  ;;  %v2480_v28 = vmax.f32 %v2468_v21, 0.0  ;;  %v2349_v41 = vpop.f32.mrb[15].mxu1  ;;  %v2472_v29 = vpop.f32.mrb[7].mxu0 }
 0x49f   :  { %v2475_v30 = vmax.f32 %v2347_v23, 0.0  ;;  %v2481_v31 = vmax.f32 %v2470_v24, 0.0 }
 0x4a1   :  { %v2877_v32 = vpack.c.bf16 %v2475_v30, %v2474_v27  ;;  %v4275_v43 = vpack.c.bf16 %v2481_v31, %v2480_v28 }
 0x4a2   :  { %3186 = shalt.err (!%p3183_p4)
}
 0x4a3   :  { %s3187_s0 = scalar_lea.hbm %s4331_s12, 32 }
 0x4a4   :  { %p3188_p5 = scmp.ne.s32.totalorder %s4331_s12, %s3187_s0  ;;  %p3191_p6 = scmp.lt.u32.totalorder %s3187_s0, %s4331_s12 }
 0x4a6   :  { %p3193_p7 = pnand %p3191_p6, %p3188_p5 }
 0x4a8   :  { %3196 = shalt.err (!%p3193_p7)
}
 0x4a9   :  { %2558 = dma.vmem_to_hbm [thread:$0]  %s2556_s11, 32, %s4331_s12, [#allocation3]  }
 0x4aa   :  { %s3197_s8 = scalar_lea.vmem %s2566_s28, 32  ;;  %p3202_p9 = scmp.lt.s32.totalorder %s2566_s28, %s2566_s28 }
 0x4ab   :  { %p3198_p8 = scmp.ne.s32.totalorder %s2566_s28, %s3197_s8  ;;  %p3203_p10 = scmp.lt.s32.totalorder %s3197_s8, %s3197_s8 }
 0x4ad   :  { %p3204_p11 = por %p3203_p10, %p3202_p9 }
 0x4af   :  { %p3205_p12 = pnand %p3204_p11, %p3198_p8 }
 0x4b1   :  { %3208 = shalt.err (!%p3205_p12)
}
 0x4b2   :  { %s3209_s4 = scalar_lea.hbm %s4332_s13, 32 }
 0x4b3   :  { %p3210_p13 = scmp.ne.s32.totalorder %s4332_s13, %s3209_s4  ;;  %p3213_p0 = scmp.lt.u32.totalorder %s3209_s4, %s4332_s13 }
 0x4b5   :  { %p3215_p1 = pnand %p3213_p0, %p3210_p13 }
 0x4b7   :  { %3218 = shalt.err (!%p3215_p1)
}
 0x4b8   :  { %2568 = dma.vmem_to_hbm [thread:$0]  %s2566_s28, 32, %s4332_s13, [#allocation5]   ;;  %v1640_v33 = vsub.s32 2, %v3329_v12  ;;  %v1644_v34 = vsub.s32 3, %v3329_v12  ;;  %v2508_v48 = vrot.slane %v2877_v32, %v3338_v16  ;;  %v1648_v51 = vsub.s32 4, %v3329_v12 }
 0x4b9   :  { %v1652_v52 = vsub.s32 5, %v3329_v12  ;;  %v2529_v61 = vrot.slane %v4275_v43, %v3338_v16 }
 0x4ba   :  { %v1641_v35 = vrot.slane %v4266_v8, %v1640_v33  ;;  %v1645_v36 = vrot.slane %v4266_v8, %v1644_v34  ;;  %v1649_v15 = vrot.slane %v4266_v8, %v1648_v51 }
 0x4bb   :  { %v1653_v17 = vrot.slane %v4266_v8, %v1652_v52 }
 0x4db   :  { %v2385_v37 = vpop.f32.mrb[16].mxu1 }
 0x4dc   :  { %v2386_v38 = vadd.f32 %v2385_v37, %v1641_v35  ;;  %v2387_v39 = vpop.f32.mrb[17].mxu1 }
 0x4dd   :  { %v2388_v40 = vadd.f32 %v2387_v39, %v1645_v36  ;;  %v2389_v42 = vpop.f32.mrb[18].mxu1 }
 0x4de   :  { %v2476_v44 = vmax.f32 %v2386_v38, 0.0  ;;  %v2390_v45 = vpop.f32.mrb[19].mxu1 }
 0x4df   :  { %v2477_v46 = vmax.f32 %v2388_v40, 0.0 }
 0x4e1   :  { %v2878_v47 = vpack.c.bf16 %v2477_v46, %v2476_v44 }
 0x4e3   :  { %v2515_v49 = vrot.slane %v2878_v47, %v3338_v16 }
 0x4e5   :  { %v2530_v50 = vcombine.low %v2508_v48, %v2515_v49 }
 0x4e7   :  { %v2538_v12 = vrot.slane %v2530_v50, %v3338_v16 }
 0x51b   :  { %v2426_v18 = vpop.f32.mrb[20].mxu1 }
 0x51c   :  { %v2427_v53 = vadd.f32 %v2426_v18, %v1649_v15  ;;  %v2428_v54 = vpop.f32.mrb[21].mxu1 }
 0x51d   :  { %v2429_v55 = vadd.f32 %v2428_v54, %v1653_v17  ;;  %v2430_v56 = vpop.f32.mrb[22].mxu1 }
 0x51e   :  { %v2478_v57 = vmax.f32 %v2427_v53, 0.0  ;;  %v2431_v58 = vpop.f32.mrb[23].mxu1 }
 0x51f   :  { %v2479_v59 = vmax.f32 %v2429_v55, 0.0 }
 0x521   :  { %v2879_v60 = vpack.c.bf16 %v2479_v59, %v2478_v57 }
 0x523   :  { %v2522_v62 = vrot.slane %v2879_v60, %v3338_v16 }
 0x525   :  { %v2531_v63 = vcombine.low %v2522_v62, %v2529_v61 }
 0x527   :  { %v2545_v2 = vrot.slane %v2531_v63, %v3338_v16 }
 0x529   :  { %v2546_v3 = vcombine.low %v2538_v12, %v2545_v2 }
 0x52b   :  { %2548 = vst [vmem:[%s4333_s14] sm:$0xff] %v2546_v3 }
 0x52c   :  { %3219 = dma.done.wait [#allocation3], 32  }
 0x52d   :  { %3220 = vsyncadd [#allocation3], 4294967264 }
 0x52e   :  { %3221 = dma.done.wait [#allocation5], 32  }
 0x52f   :  { %3222 = vsyncadd [#allocation5], 4294967264 }
 0x530   :  { %2579 = vsyncpa [#allocation3], 1 }
 0x531   :  { %2580 = vsyncpa [#allocation5], 1 }

// kernel: betavae_forward.15
= control target key start
LH: loop header
LB: loop body
LE: loop exit
PB: predicated region body
PF: predicated region fallthrough
CT: control target
= control target key end

     0   :  { %vm558_vm0 = vcmask 523264   ;;  %s1733_s1 = inlined_call_operand.vmem [shape: bf16[576,128], index: 1, kind: input, shape index: {}]   ;;  %s1734_s0 = inlined_call_operand.vmem [shape: bf16[128,576], index: 0, kind: input, shape index: {}]   ;;  %s1735_s2 = inlined_call_operand.vmem [shape: f32[1,128], index: 2, kind: input, shape index: {}]   ;;  %s1736_s3 = inlined_call_operand.vmem [shape: bf16[128,128], index: 3, kind: output, shape index: {}]  }
   0x1   :  { %v1310_v0 = vld [vmem:[%s1733_s1 + $0x40] sm:$0xff]   ;;  %v1314_v4 = vld [vmem:[%s1733_s1 + $0x48] sm:$0xff]   ;;  %v1318_v8 = vld [vmem:[%s1733_s1 + $0x50] sm:$0xff]  }
   0x2   :  { %v1311_v1 = vld [vmem:[%s1733_s1 + $0xc0] sm:$0xff]   ;;  %1138 = vmatprep.subr.bf16.mxu0 %v1310_v0  ;;  %v1315_v5 = vld [vmem:[%s1733_s1 + $0xc8] sm:$0xff]   ;;  %v1319_v9 = vld [vmem:[%s1733_s1 + $0xd0] sm:$0xff]  }
   0x3   :  { %v1312_v2 = vld [vmem:[%s1733_s1] sm:$0xff]   ;;  %1202 = vmatprep.subr.bf16.mxu1 %v1311_v1  ;;  %v1316_v6 = vld [vmem:[%s1733_s1 + $0x8] sm:$0xff]   ;;  %v1320_v10 = vld [vmem:[%s1733_s1 + $0x10] sm:$0xff]  }
   0x4   :  { %v1313_v3 = vld [vmem:[%s1733_s1 + $0x80] sm:$0xff]   ;;  %1139 = vmatpush3.bf16.msra.mxu0 %v1312_v2  ;;  %v1317_v7 = vld [vmem:[%s1733_s1 + $0x88] sm:$0xff]   ;;  %v1321_v11 = vld [vmem:[%s1733_s1 + $0x90] sm:$0xff]  }
   0x5   :  { %1203 = vmatpush3.bf16.msra.mxu1 %v1313_v3  ;;  %1140 = vmatprep.subr.bf16.mxu0 %v1314_v4  ;;  %v1322_v12 = vld [vmem:[%s1733_s1 + $0x58] sm:$0xff]   ;;  %v1326_v16 = vld [vmem:[%s1733_s1 + $0x60] sm:$0xff]   ;;  %v1330_v20 = vld [vmem:[%s1733_s1 + $0x68] sm:$0xff]  }
   0x6   :  { %1204 = vmatprep.subr.bf16.mxu1 %v1315_v5  ;;  %v1323_v13 = vld [vmem:[%s1733_s1 + $0xd8] sm:$0xff]   ;;  %v1327_v17 = vld [vmem:[%s1733_s1 + $0xe0] sm:$0xff]   ;;  %v1331_v21 = vld [vmem:[%s1733_s1 + $0xe8] sm:$0xff]  }
   0x7   :  { %v1324_v14 = vld [vmem:[%s1733_s1 + $0x18] sm:$0xff]   ;;  %v1328_v18 = vld [vmem:[%s1733_s1 + $0x20] sm:$0xff]   ;;  %v1332_v22 = vld [vmem:[%s1733_s1 + $0x28] sm:$0xff]  }
   0x8   :  { %1141 = vmatpush3.bf16.msra.mxu0 %v1316_v6  ;;  %v1325_v15 = vld [vmem:[%s1733_s1 + $0x98] sm:$0xff]   ;;  %v1329_v19 = vld [vmem:[%s1733_s1 + $0xa0] sm:$0xff]   ;;  %v1333_v23 = vld [vmem:[%s1733_s1 + $0xa8] sm:$0xff]  }
   0x9   :  { %1205 = vmatpush3.bf16.msra.mxu1 %v1317_v7  ;;  %1142 = vmatprep.subr.bf16.mxu0 %v1318_v8  ;;  %v1334_v24 = vld [vmem:[%s1733_s1 + $0x70] sm:$0xff]   ;;  %v1338_v28 = vld [vmem:[%s1733_s1 + $0x78] sm:$0xff]   ;;  %v1347_v35 = vld [vmem:[%s1734_s0 + $0xc] ss:$20 sps:$4 sm:$0xff]  }
   0xa   :  { %1206 = vmatprep.subr.bf16.mxu1 %v1319_v9  ;;  %v1335_v25 = vld [vmem:[%s1733_s1 + $0xf0] sm:$0xff]   ;;  %v1339_v29 = vld [vmem:[%s1733_s1 + $0xf8] sm:$0xff]   ;;  %v1348_v36 = vld [vmem:[%s1733_s1 + $0x100] sm:$0xff]   ;;  %712 = vmatprep.mubr.bf16.mxu1 %v1347_v35 }
   0xb   :  { %v1336_v26 = vld [vmem:[%s1733_s1 + $0x30] sm:$0xff]   ;;  %v1340_v30 = vld [vmem:[%s1733_s1 + $0x38] sm:$0xff]   ;;  %v1349_v37 = vld [vmem:[%s1734_s0 + $0x2c] ss:$20 sps:$4 sm:$0xff]  }
   0xc   :  { %1143 = vmatpush3.bf16.msra.mxu0 %v1320_v10  ;;  %v1337_v27 = vld [vmem:[%s1733_s1 + $0xb0] sm:$0xff]   ;;  %v1341_v31 = vld [vmem:[%s1733_s1 + $0xb8] sm:$0xff]   ;;  %v1361_v42 = vld [vmem:[%s1733_s1 + $0x108] sm:$0xff]  }
   0xd   :  { %1207 = vmatpush3.bf16.msra.mxu1 %v1321_v11  ;;  %1144 = vmatprep.subr.bf16.mxu0 %v1322_v12  ;;  %v1342_v32 = vld [vmem:[%s1734_s0] ss:$20 sps:$4 sm:$0xff]   ;;  %v1344_v33 = vld [vmem:[%s1734_s0 + $0x4] ss:$20 sps:$4 sm:$0xff]   ;;  %v1345_v34 = vld [vmem:[%s1734_s0 + $0x8] ss:$20 sps:$4 sm:$0xff]  }
   0xe   :  { %1208 = vmatprep.subr.bf16.mxu1 %v1323_v13  ;;  %615 = vmatprep.mubr.bf16.mxu0 %v1344_v33  ;;  %v1351_v38 = vld [vmem:[%s1734_s0 + $0x34] ss:$20 sps:$4 sm:$0xff]   ;;  %v1354_v40 = vld [vmem:[%s1734_s0 + $0x30] ss:$20 sps:$4 sm:$0xff]   ;;  %v1360_v45 = vld [vmem:[%s1734_s0 + $0x58] ss:$20 sps:$4 sm:$0xff]  }
   0xf   :  { %v1353_v39 = vld [vmem:[%s1734_s0 + $0x28] ss:$20 sps:$4 sm:$0xff]   ;;  %v1359_v44 = vld [vmem:[%s1734_s0 + $0x50] ss:$20 sps:$4 sm:$0xff]   ;;  %v1366_v50 = vld [vmem:[%s1734_s0 + $0x78] ss:$20 sps:$4 sm:$0xff]  }
  0x10   :  { %1145 = vmatpush3.bf16.msra.mxu0 %v1324_v14  ;;  %v1355_v41 = vld [vmem:[%s1734_s0 + $0x54] ss:$20 sps:$4 sm:$0xff]   ;;  %v1357_v43 = vld [vmem:[%s1734_s0 + $0x5c] ss:$20 sps:$4 sm:$0xff]   ;;  %v1364_v48 = vld [vmem:[%s1734_s0 + $0x84] ss:$20 sps:$4 sm:$0xff]  }
  0x11   :  { %1209 = vmatpush3.bf16.msra.mxu1 %v1325_v15  ;;  %1146 = vmatprep.subr.bf16.mxu0 %v1326_v16  ;;  %v1374_v46 = vld [vmem:[%s1733_s1 + $0x110] sm:$0xff]   ;;  %v1387_v49 = vld [vmem:[%s1733_s1 + $0x118] sm:$0xff]   ;;  %v1370_v53 = vld [vmem:[%s1734_s0 + $0xac] ss:$20 sps:$4 sm:$0xff]  }
  0x12   :  { %1210 = vmatprep.subr.bf16.mxu1 %v1327_v17  ;;  %v1362_v47 = vld [vmem:[%s1734_s0 + $0x7c] ss:$20 sps:$4 sm:$0xff]   ;;  %v1367_v51 = vld [vmem:[%s1734_s0 + $0x80] ss:$20 sps:$4 sm:$0xff]   ;;  %v1368_v52 = vld [vmem:[%s1734_s0 + $0xa4] ss:$20 sps:$4 sm:$0xff]  }
  0x13   :  { %v1372_v54 = vld [vmem:[%s1734_s0 + $0xa0] ss:$20 sps:$4 sm:$0xff]   ;;  %v1373_v55 = vld [vmem:[%s1734_s0 + $0xa8] ss:$20 sps:$4 sm:$0xff]   ;;  %v1380_v59 = vld [vmem:[%s1734_s0 + $0xd0] ss:$20 sps:$4 sm:$0xff]  }
  0x14   :  { %1147 = vmatpush3.bf16.msra.mxu0 %v1328_v18  ;;  %v1375_v56 = vld [vmem:[%s1734_s0 + $0xcc] ss:$20 sps:$4 sm:$0xff]   ;;  %v1377_v57 = vld [vmem:[%s1734_s0 + $0xd4] ss:$20 sps:$4 sm:$0xff]   ;;  %v1383_v61 = vld [vmem:[%s1734_s0 + $0xfc] ss:$20 sps:$4 sm:$0xff]  }
  0x15   :  { %1211 = vmatpush3.bf16.msra.mxu1 %v1329_v19  ;;  %1148 = vmatprep.subr.bf16.mxu0 %v1330_v20  ;;  %v1379_v58 = vld [vmem:[%s1734_s0 + $0xc8] ss:$20 sps:$4 sm:$0xff]   ;;  %v1385_v62 = vld [vmem:[%s1734_s0 + $0xf0] ss:$20 sps:$4 sm:$0xff]   ;;  %v1386_v63 = vld [vmem:[%s1734_s0 + $0xf8] ss:$20 sps:$4 sm:$0xff]  }
  0x16   :  { %1212 = vmatprep.subr.bf16.mxu1 %v1331_v21  ;;  %v1381_v60 = vld [vmem:[%s1734_s0 + $0xf4] ss:$20 sps:$4 sm:$0xff]   ;;  %v1388_v0 = vld [vmem:[%s1734_s0 + $0x11c] ss:$20 sps:$4 sm:$0xff]   ;;  %v1390_v1 = vld [vmem:[%s1734_s0 + $0x124] ss:$20 sps:$4 sm:$0xff]  }
  0x17   :  { %v1392_v2 = vld [vmem:[%s1734_s0 + $0x118] ss:$20 sps:$4 sm:$0xff]   ;;  %v1393_v3 = vld [vmem:[%s1734_s0 + $0x120] ss:$20 sps:$4 sm:$0xff]   ;;  %v1394_v4 = vld [vmem:[%s1734_s0 + $0x10] ss:$20 sps:$4 sm:$0xff]  }
  0x18   :  { %1149 = vmatpush3.bf16.msra.mxu0 %v1332_v22  ;;  %v1395_v5 = vld [vmem:[%s1734_s0 + $0xb0] ss:$20 sps:$4 sm:$0xff]   ;;  %v1396_v6 = vld [vmem:[%s1734_s0 + $0x38] ss:$20 sps:$4 sm:$0xff]   ;;  %v1398_v8 = vld [vmem:[%s1734_s0 + $0x60] ss:$20 sps:$4 sm:$0xff]  }
  0x19   :  { %1213 = vmatpush3.bf16.msra.mxu1 %v1333_v23  ;;  %1150 = vmatprep.subr.bf16.mxu0 %v1334_v24  ;;  %v1397_v7 = vld [vmem:[%s1734_s0 + $0xd8] ss:$20 sps:$4 sm:$0xff]   ;;  %v1399_v9 = vld [vmem:[%s1734_s0 + $0x100] ss:$20 sps:$4 sm:$0xff]   ;;  %v1400_v10 = vld [vmem:[%s1734_s0 + $0x88] ss:$20 sps:$4 sm:$0xff]  }
  0x1a   :  { %1214 = vmatprep.subr.bf16.mxu1 %v1335_v25  ;;  %v1401_v11 = vld [vmem:[%s1734_s0 + $0x128] ss:$20 sps:$4 sm:$0xff]   ;;  %v1661_v14 = vld [vmem:[%s1735_s2] ss:$0 sm:$0xff] }
  0x1c   :  { %1151 = vmatpush3.bf16.msra.mxu0 %v1336_v26 }
  0x1d   :  { %1215 = vmatpush3.bf16.msra.mxu1 %v1337_v27  ;;  %1152 = vmatprep.subr.bf16.mxu0 %v1338_v28 }
  0x1e   :  { %1216 = vmatprep.subr.bf16.mxu1 %v1339_v29 }
  0x20   :  { %1153 = vmatpush3.bf16.msra.mxu0 %v1340_v30 }
  0x21   :  { %1217 = vmatpush3.bf16.msra.mxu1 %v1341_v31  ;;  %1278 = vmatprep.subr.bf16.mxu0 %v1348_v36 }
  0x22   :  { %1302 = vmatprep.subr.bf16.mxu1 %v1348_v36 }
  0x23   :  { %616 = vmatmul.mubr.bf16.vlgmr.msra.gmra.mrb[0].mxu0 %v1342_v32 }
  0x24   :  { %713 = vmatmul.mubr.bf16.vlgmr.msra.gmra.mrb[0].mxu1 %v1345_v34  ;;  %1279 = vmatpush3.bf16.msra.mxu0 %v1348_v36 }
  0x25   :  { %1306 = vmatpush3.bf16.msra.mxu1 %v1348_v36  ;;  %623 = vmatprep.mubr.bf16.mxu0 %v1349_v37 }
  0x26   :  { %720 = vmatprep.mubr.bf16.mxu1 %v1351_v38  ;;  %1280 = vmatprep.subr.bf16.mxu0 %v1361_v42 }
  0x27   :  { %1303 = vmatprep.subr.bf16.mxu1 %v1361_v42 }
  0x28   :  { %1281 = vmatpush3.bf16.msra.mxu0 %v1361_v42 }
  0x29   :  { %1307 = vmatpush3.bf16.msra.mxu1 %v1361_v42  ;;  %1282 = vmatprep.subr.bf16.mxu0 %v1374_v46 }
  0x2a   :  { %1304 = vmatprep.subr.bf16.mxu1 %v1374_v46 }
  0x2b   :  { %624 = vmatmul.mubr.bf16.gmra.mrb[4].mxu0 %v1353_v39 }
  0x2c   :  { %721 = vmatmul.mubr.bf16.gmra.mrb[4].mxu1 %v1354_v40  ;;  %631 = vmatprep.mubr.bf16.mxu0 %v1355_v41 }
  0x2d   :  { %728 = vmatprep.mubr.bf16.mxu1 %v1357_v43  ;;  %1283 = vmatpush3.bf16.msra.mxu0 %v1374_v46 }
  0x2e   :  { %1308 = vmatpush3.bf16.msra.mxu1 %v1374_v46  ;;  %1284 = vmatprep.subr.bf16.mxu0 %v1387_v49 }
  0x2f   :  { %1305 = vmatprep.subr.bf16.mxu1 %v1387_v49 }
  0x31   :  { %1285 = vmatpush3.bf16.msra.mxu0 %v1387_v49 }
  0x32   :  { %1309 = vmatpush3.bf16.msra.mxu1 %v1387_v49 }
  0x33   :  { %632 = vmatmul.mubr.bf16.gmra.mrb[8].mxu0 %v1359_v44 }
  0x34   :  { %729 = vmatmul.mubr.bf16.gmra.mrb[8].mxu1 %v1360_v45  ;;  %639 = vmatprep.mubr.bf16.mxu0 %v1362_v47 }
  0x35   :  { %736 = vmatprep.mubr.bf16.mxu1 %v1364_v48 }
  0x3b   :  { %640 = vmatmul.mubr.bf16.gmra.mrb[12].mxu0 %v1366_v50 }
  0x3c   :  { %737 = vmatmul.mubr.bf16.gmra.mrb[12].mxu1 %v1367_v51  ;;  %647 = vmatprep.mubr.bf16.mxu0 %v1368_v52 }
  0x3d   :  { %744 = vmatprep.mubr.bf16.mxu1 %v1370_v53 }
  0x43   :  { %648 = vmatmul.mubr.bf16.gmra.mrb[16].mxu0 %v1372_v54 }
  0x44   :  { %745 = vmatmul.mubr.bf16.gmra.mrb[16].mxu1 %v1373_v55  ;;  %655 = vmatprep.mubr.bf16.mxu0 %v1375_v56 }
  0x45   :  { %752 = vmatprep.mubr.bf16.mxu1 %v1377_v57 }
  0x4b   :  { %656 = vmatmul.mubr.bf16.gmra.mrb[20].mxu0 %v1379_v58 }
  0x4c   :  { %753 = vmatmul.mubr.bf16.gmra.mrb[20].mxu1 %v1380_v59  ;;  %663 = vmatprep.mubr.bf16.mxu0 %v1381_v60 }
  0x4d   :  { %760 = vmatprep.mubr.bf16.mxu1 %v1383_v61 }
  0x53   :  { %664 = vmatmul.mubr.bf16.gmra.mrb[24].mxu0 %v1385_v62 }
  0x54   :  { %761 = vmatmul.mubr.bf16.gmra.mrb[24].mxu1 %v1386_v63  ;;  %671 = vmatprep.mubr.bf16.mxu0 %v1388_v0 }
  0x55   :  { %768 = vmatprep.mubr.bf16.mxu1 %v1390_v1 }
  0x5b   :  { %672 = vmatmul.mubr.bf16.gmra.mrb[28].mxu0 %v1392_v2 }
  0x5c   :  { %769 = vmatmul.mubr.bf16.gmra.mrb[28].mxu1 %v1393_v3  ;;  %1286 = vmatprep.mubr.msk.bf16.mxu0 %vm558_vm0, %v1394_v4 }
  0x5d   :  { %1294 = vmatprep.mubr.msk.bf16.mxu1 %vm558_vm0, %v1395_v5 }
  0x63   :  { %1287 = vmatmul.mubr.msk.bf16.vlgmr.msra.gmra.mrb[32].mxu0 %vm558_vm0, %v1396_v6 }
  0x64   :  { %1295 = vmatmul.mubr.msk.bf16.vlgmr.msra.gmra.mrb[32].mxu1 %vm558_vm0, %v1397_v7  ;;  %1290 = vmatprep.mubr.msk.bf16.mxu0 %vm558_vm0, %v1398_v8 }
  0x65   :  { %1298 = vmatprep.mubr.msk.bf16.mxu1 %vm558_vm0, %v1399_v9 }
  0x6b   :  { %1291 = vmatmul.mubr.msk.bf16.gmra.mrb[36].mxu0 %vm558_vm0, %v1400_v10 }
  0x6c   :  { %1299 = vmatmul.mubr.msk.bf16.gmra.mrb[36].mxu1 %vm558_vm0, %v1401_v11 }
  0xf6   :  { %v1154_v12 = vpop.f32.mrb[0].mxu0 }
  0xf7   :  { %v1218_v13 = vpop.f32.mrb[0].mxu1  ;;  %v1155_v15 = vpop.f32.mrb[1].mxu0 }
  0xf8   :  { %v1156_v16 = vadd.f32 %v1155_v15, %v1154_v12  ;;  %v1219_v17 = vpop.f32.mrb[1].mxu1  ;;  %v1157_v18 = vpop.f32.mrb[2].mxu0 }
  0xf9   :  { %v1220_v19 = vadd.f32 %v1219_v17, %v1218_v13  ;;  %v1221_v20 = vpop.f32.mrb[2].mxu1  ;;  %v1158_v21 = vpop.f32.mrb[3].mxu0 }
  0xfa   :  { %v618_v22 = vadd.f32 %v1156_v16, %v1661_v14  ;;  %v1159_v23 = vadd.f32 %v1158_v21, %v1157_v18  ;;  %v1222_v24 = vpop.f32.mrb[3].mxu1 }
  0xfb   :  { %v1223_v25 = vadd.f32 %v1222_v24, %v1221_v20 }
  0xfc   :  { %v621_v26 = vadd.f32 %v1159_v23, %v1661_v14  ;;  %v1665_v27 = vadd.f32 %v1220_v19, %v618_v22 }
  0xfe   :  { %v1160_v28 = vpop.f32.mrb[4].mxu0  ;;  %v1667_v29 = vadd.f32 %v1223_v25, %v621_v26 }
  0xff   :  { %v1224_v30 = vpop.f32.mrb[4].mxu1  ;;  %v1161_v31 = vpop.f32.mrb[5].mxu0 }
 0x100   :  { %v1162_v32 = vadd.f32 %v1161_v31, %v1160_v28  ;;  %v1225_v33 = vpop.f32.mrb[5].mxu1  ;;  %v1163_v34 = vpop.f32.mrb[6].mxu0 }
 0x101   :  { %v1226_v35 = vadd.f32 %v1225_v33, %v1224_v30  ;;  %v1227_v36 = vpop.f32.mrb[6].mxu1  ;;  %v1164_v37 = vpop.f32.mrb[7].mxu0 }
 0x102   :  { %v626_v38 = vadd.f32 %v1162_v32, %v1661_v14  ;;  %v1165_v39 = vadd.f32 %v1164_v37, %v1163_v34  ;;  %v1228_v40 = vpop.f32.mrb[7].mxu1 }
 0x103   :  { %v1229_v41 = vadd.f32 %v1228_v40, %v1227_v36 }
 0x104   :  { %v629_v42 = vadd.f32 %v1165_v39, %v1661_v14  ;;  %v1671_v43 = vadd.f32 %v1226_v35, %v626_v38 }
 0x106   :  { %v1166_v44 = vpop.f32.mrb[8].mxu0  ;;  %v1673_v45 = vadd.f32 %v1229_v41, %v629_v42 }
 0x107   :  { %v1230_v46 = vpop.f32.mrb[8].mxu1  ;;  %v1167_v47 = vpop.f32.mrb[9].mxu0 }
 0x108   :  { %v1168_v48 = vadd.f32 %v1167_v47, %v1166_v44  ;;  %v1231_v49 = vpop.f32.mrb[9].mxu1  ;;  %v1169_v50 = vpop.f32.mrb[10].mxu0 }
 0x109   :  { %v1232_v51 = vadd.f32 %v1231_v49, %v1230_v46  ;;  %v1233_v52 = vpop.f32.mrb[10].mxu1  ;;  %v1170_v53 = vpop.f32.mrb[11].mxu0 }
 0x10a   :  { %v634_v54 = vadd.f32 %v1168_v48, %v1661_v14  ;;  %v1171_v55 = vadd.f32 %v1170_v53, %v1169_v50  ;;  %v1234_v56 = vpop.f32.mrb[11].mxu1 }
 0x10b   :  { %v1235_v57 = vadd.f32 %v1234_v56, %v1233_v52 }
 0x10c   :  { %v637_v58 = vadd.f32 %v1171_v55, %v1661_v14  ;;  %v1677_v59 = vadd.f32 %v1232_v51, %v634_v54 }
 0x10e   :  { %v1172_v60 = vpop.f32.mrb[12].mxu0  ;;  %v1679_v61 = vadd.f32 %v1235_v57, %v637_v58 }
 0x10f   :  { %v1236_v62 = vpop.f32.mrb[12].mxu1  ;;  %v1173_v63 = vpop.f32.mrb[13].mxu0 }
 0x110   :  { %v1174_v0 = vadd.f32 %v1173_v63, %v1172_v60  ;;  %v1237_v1 = vpop.f32.mrb[13].mxu1  ;;  %v1175_v2 = vpop.f32.mrb[14].mxu0 }
 0x111   :  { %v1238_v3 = vadd.f32 %v1237_v1, %v1236_v62  ;;  %v1239_v4 = vpop.f32.mrb[14].mxu1  ;;  %v1176_v5 = vpop.f32.mrb[15].mxu0 }
 0x112   :  { %v642_v6 = vadd.f32 %v1174_v0, %v1661_v14  ;;  %v1177_v7 = vadd.f32 %v1176_v5, %v1175_v2  ;;  %v1240_v8 = vpop.f32.mrb[15].mxu1 }
 0x113   :  { %v1241_v9 = vadd.f32 %v1240_v8, %v1239_v4 }
 0x114   :  { %v645_v10 = vadd.f32 %v1177_v7, %v1661_v14  ;;  %v1683_v11 = vadd.f32 %v1238_v3, %v642_v6 }
 0x116   :  { %v1178_v12 = vpop.f32.mrb[16].mxu0  ;;  %v1685_v13 = vadd.f32 %v1241_v9, %v645_v10 }
 0x117   :  { %v1242_v15 = vpop.f32.mrb[16].mxu1  ;;  %v1179_v16 = vpop.f32.mrb[17].mxu0 }
 0x118   :  { %v1180_v17 = vadd.f32 %v1179_v16, %v1178_v12  ;;  %v1243_v18 = vpop.f32.mrb[17].mxu1  ;;  %v1181_v19 = vpop.f32.mrb[18].mxu0 }
 0x119   :  { %v1244_v20 = vadd.f32 %v1243_v18, %v1242_v15  ;;  %v1245_v21 = vpop.f32.mrb[18].mxu1  ;;  %v1182_v22 = vpop.f32.mrb[19].mxu0 }
 0x11a   :  { %v650_v23 = vadd.f32 %v1180_v17, %v1661_v14  ;;  %v1183_v24 = vadd.f32 %v1182_v22, %v1181_v19  ;;  %v1246_v25 = vpop.f32.mrb[19].mxu1 }
 0x11b   :  { %v1247_v26 = vadd.f32 %v1246_v25, %v1245_v21 }
 0x11c   :  { %v653_v28 = vadd.f32 %v1183_v24, %v1661_v14  ;;  %v747_v30 = vadd.f32 %v1244_v20, %v650_v23 }
 0x11e   :  { %v1184_v31 = vpop.f32.mrb[20].mxu0  ;;  %v1689_v32 = vadd.f32 %v1247_v26, %v653_v28 }
 0x11f   :  { %v1248_v33 = vpop.f32.mrb[20].mxu1  ;;  %v1185_v34 = vpop.f32.mrb[21].mxu0 }
 0x120   :  { %v1186_v35 = vadd.f32 %v1185_v34, %v1184_v31  ;;  %v1249_v36 = vpop.f32.mrb[21].mxu1  ;;  %v1187_v37 = vpop.f32.mrb[22].mxu0 }
 0x121   :  { %v1250_v38 = vadd.f32 %v1249_v36, %v1248_v33  ;;  %v1251_v39 = vpop.f32.mrb[22].mxu1  ;;  %v1188_v40 = vpop.f32.mrb[23].mxu0 }
 0x122   :  { %v658_v41 = vadd.f32 %v1186_v35, %v1661_v14  ;;  %v1189_v42 = vadd.f32 %v1188_v40, %v1187_v37  ;;  %v1252_v44 = vpop.f32.mrb[23].mxu1 }
 0x123   :  { %v1253_v46 = vadd.f32 %v1252_v44, %v1251_v39 }
 0x124   :  { %v661_v47 = vadd.f32 %v1189_v42, %v1661_v14  ;;  %v755_v48 = vadd.f32 %v1250_v38, %v658_v41 }
 0x126   :  { %v1190_v49 = vpop.f32.mrb[24].mxu0  ;;  %v758_v50 = vadd.f32 %v1253_v46, %v661_v47 }
 0x127   :  { %v1254_v51 = vpop.f32.mrb[24].mxu1  ;;  %v1191_v52 = vpop.f32.mrb[25].mxu0 }
 0x128   :  { %v1192_v53 = vadd.f32 %v1191_v52, %v1190_v49  ;;  %v1255_v54 = vpop.f32.mrb[25].mxu1  ;;  %v1193_v55 = vpop.f32.mrb[26].mxu0 }
 0x129   :  { %v1256_v56 = vadd.f32 %v1255_v54, %v1254_v51  ;;  %v1257_v57 = vpop.f32.mrb[26].mxu1  ;;  %v1194_v58 = vpop.f32.mrb[27].mxu0 }
 0x12a   :  { %v666_v60 = vadd.f32 %v1192_v53, %v1661_v14  ;;  %v1195_v62 = vadd.f32 %v1194_v58, %v1193_v55  ;;  %v1258_v63 = vpop.f32.mrb[27].mxu1 }
 0x12b   :  { %v1259_v0 = vadd.f32 %v1258_v63, %v1257_v57 }
 0x12c   :  { %v669_v1 = vadd.f32 %v1195_v62, %v1661_v14  ;;  %v763_v2 = vadd.f32 %v1256_v56, %v666_v60 }
 0x12e   :  { %v1196_v3 = vpop.f32.mrb[28].mxu0  ;;  %v1695_v4 = vadd.f32 %v1259_v0, %v669_v1 }
 0x12f   :  { %v1260_v5 = vpop.f32.mrb[28].mxu1  ;;  %v1197_v6 = vpop.f32.mrb[29].mxu0 }
 0x130   :  { %v1198_v7 = vadd.f32 %v1197_v6, %v1196_v3  ;;  %v1261_v8 = vpop.f32.mrb[29].mxu1  ;;  %v1199_v9 = vpop.f32.mrb[30].mxu0 }
 0x131   :  { %v1262_v10 = vadd.f32 %v1261_v8, %v1260_v5  ;;  %v1263_v12 = vpop.f32.mrb[30].mxu1  ;;  %v1200_v15 = vpop.f32.mrb[31].mxu0 }
 0x132   :  { %v674_v16 = vadd.f32 %v1198_v7, %v1661_v14  ;;  %v1201_v17 = vadd.f32 %v1200_v15, %v1199_v9  ;;  %v1264_v18 = vpop.f32.mrb[31].mxu1 }
 0x133   :  { %v1265_v19 = vadd.f32 %v1264_v18, %v1263_v12 }
 0x134   :  { %v677_v20 = vadd.f32 %v1201_v17, %v1661_v14  ;;  %v771_v21 = vadd.f32 %v1262_v10, %v674_v16 }
 0x136   :  { %v1288_v22 = vpop.f32.mrb[32].mxu0  ;;  %v774_v23 = vadd.f32 %v1265_v19, %v677_v20 }
 0x137   :  { %v820_v24 = vadd.f32 %v1288_v22, %v1671_v43  ;;  %v1296_v25 = vpop.f32.mrb[32].mxu1  ;;  %v811_v26 = vpop.f32.mrb[33].mxu0 }
 0x138   :  { %v852_v28 = vadd.f32 %v1296_v25, %v755_v48  ;;  %v812_v31 = vadd.f32 %v811_v26, %v1665_v27  ;;  %v843_v33 = vpop.f32.mrb[33].mxu1  ;;  %v1289_v34 = vpop.f32.mrb[34].mxu0 }
 0x139   :  { %v844_v35 = vadd.f32 %v843_v33, %v747_v30  ;;  %v823_v36 = vadd.f32 %v1289_v34, %v1673_v45  ;;  %v1297_v37 = vpop.f32.mrb[34].mxu1  ;;  %v814_v38 = vpop.f32.mrb[35].mxu0  ;;  %v876_v41 = vmax.f32 %v820_v24, 0.0 }
 0x13a   :  { %v855_v39 = vadd.f32 %v1297_v37, %v758_v50  ;;  %v815_v14 = vadd.f32 %v814_v38, %v1667_v29  ;;  %v846_v40 = vpop.f32.mrb[35].mxu1  ;;  %v884_v44 = vmax.f32 %v852_v28, 0.0  ;;  %v874_v46 = vmax.f32 %v812_v31, 0.0 }
 0x13b   :  { %v877_v42 = vmax.f32 %v823_v36, 0.0  ;;  %v847_v43 = vadd.f32 %v846_v40, %v1689_v32  ;;  %v882_v27 = vmax.f32 %v844_v35, 0.0 }
 0x13c   :  { %v885_v47 = vmax.f32 %v855_v39, 0.0  ;;  %v875_v48 = vmax.f32 %v815_v14, 0.0 }
 0x13d   :  { %v1099_v49 = vpack.c.bf16 %v877_v42, %v876_v41  ;;  %v883_v51 = vmax.f32 %v847_v43, 0.0 }
 0x13e   :  { %v1119_v30 = vpack.c.bf16 %v885_v47, %v884_v44  ;;  %v1094_v52 = vpack.c.bf16 %v875_v48, %v874_v46  ;;  %v1292_v45 = vpop.f32.mrb[36].mxu0 }
 0x13f   :  { %1131 = vst [vmem:[%s1736_s3 + $0x8] sm:$0xff] %v1099_v49   ;;  %v1114_v29 = vpack.c.bf16 %v883_v51, %v882_v27  ;;  %v836_v50 = vadd.f32 %v1292_v45, %v1683_v11  ;;  %v1300_v53 = vpop.f32.mrb[36].mxu1  ;;  %v827_v54 = vpop.f32.mrb[37].mxu0 }
 0x140   :  { %1135 = vst [vmem:[%s1736_s3 + $0x28] sm:$0xff] %v1119_v30   ;;  %1095 = vst [vmem:[%s1736_s3] sm:$0xff] %v1094_v52   ;;  %v868_v32 = vadd.f32 %v1300_v53, %v771_v21  ;;  %v828_v55 = vadd.f32 %v827_v54, %v1677_v59  ;;  %v859_v56 = vpop.f32.mrb[37].mxu1  ;;  %v1293_v57 = vpop.f32.mrb[38].mxu0 }
 0x141   :  { %1134 = vst [vmem:[%s1736_s3 + $0x20] sm:$0xff] %v1114_v29   ;;  %v860_v11 = vadd.f32 %v859_v56, %v763_v2  ;;  %v839_v58 = vadd.f32 %v1293_v57, %v1685_v13  ;;  %v1301_v60 = vpop.f32.mrb[38].mxu1  ;;  %v830_v62 = vpop.f32.mrb[39].mxu0  ;;  %v880_v3 = vmax.f32 %v836_v50, 0.0 }
 0x142   :  { %v871_v63 = vadd.f32 %v1301_v60, %v774_v23  ;;  %v831_v0 = vadd.f32 %v830_v62, %v1679_v61  ;;  %v862_v1 = vpop.f32.mrb[39].mxu1  ;;  %v888_v59 = vmax.f32 %v868_v32, 0.0  ;;  %v878_v7 = vmax.f32 %v828_v55, 0.0 }
 0x143   :  { %v881_v5 = vmax.f32 %v839_v58, 0.0  ;;  %v863_v6 = vadd.f32 %v862_v1, %v1695_v4  ;;  %v886_v10 = vmax.f32 %v860_v11, 0.0 }
 0x144   :  { %v889_v8 = vmax.f32 %v871_v63, 0.0  ;;  %v879_v9 = vmax.f32 %v831_v0, 0.0 }
 0x145   :  { %v1109_v12 = vpack.c.bf16 %v881_v5, %v880_v3  ;;  %v887_v15 = vmax.f32 %v863_v6, 0.0 }
 0x146   :  { %v1129_v2 = vpack.c.bf16 %v889_v8, %v888_v59  ;;  %v1104_v16 = vpack.c.bf16 %v879_v9, %v878_v7 }
 0x147   :  { %1133 = vst [vmem:[%s1736_s3 + $0x18] sm:$0xff] %v1109_v12   ;;  %v1124_v13 = vpack.c.bf16 %v887_v15, %v886_v10 }
 0x148   :  { %1137 = vst [vmem:[%s1736_s3 + $0x38] sm:$0xff] %v1129_v2   ;;  %1132 = vst [vmem:[%s1736_s3 + $0x10] sm:$0xff] %v1104_v16  }
 0x149   :  { %1136 = vst [vmem:[%s1736_s3 + $0x30] sm:$0xff] %v1124_v13  }

// kernel: betavae_forward.16
= control target key start
LH: loop header
LB: loop body
LE: loop exit
PB: predicated region body
PF: predicated region fallthrough
CT: control target
= control target key end

     0   :  { %v2584_v0 = vmov 0   ;;  %vm774_vm0 = vcmask 261120   ;;  %s3302_s1 = inlined_call_operand.vmem [shape: bf16[288,128], index: 1, kind: input, shape index: {}]   ;;  %s3303_s0 = inlined_call_operand.vmem [shape: bf16[512,288], index: 0, kind: input, shape index: {}]   ;;  %s3304_s2 = inlined_call_operand.vmem [shape: f32[1,128], index: 2, kind: input, shape index: {}]   ;;  %s3305_s3 = inlined_call_operand.vmem [shape: bf16[512,128], index: 3, kind: output, shape index: {}]  }
   0x1   :  { %871 = vmatprep.subr.bf16.mxu0 %v2584_v0  ;;  %2405 = vmatprep.subr.bf16.mxu1 %v2584_v0  ;;  %v2438_v1 = vld [vmem:[%s3302_s1] sm:$0xff]   ;;  %v2439_v2 = vld [vmem:[%s3302_s1 + $0x8] sm:$0xff]   ;;  %v2440_v3 = vld [vmem:[%s3302_s1 + $0x10] sm:$0xff]  }
   0x2   :  { %872 = vmatpush1.bf16.msra.mxu0 %v2438_v1  ;;  %2421 = vmatpush1.bf16.msra.mxu1 %v2438_v1  ;;  %v2441_v4 = vld [vmem:[%s3302_s1 + $0x18] sm:$0xff]   ;;  %v2442_v5 = vld [vmem:[%s3302_s1 + $0x20] sm:$0xff]   ;;  %v2443_v7 = vld [vmem:[%s3302_s1 + $0x28] sm:$0xff]  }
   0x3   :  { %873 = vmatprep.subr.bf16.mxu0 %v2584_v0  ;;  %2406 = vmatprep.subr.bf16.mxu1 %v2584_v0  ;;  %v2456_v6 = vld [vmem:[%s3303_s0 + $0x4] ss:$12 sps:$4 sm:$0xff]   ;;  %v2445_v10 = vld [vmem:[%s3302_s1 + $0x38] sm:$0xff]   ;;  %v2447_v12 = vld [vmem:[%s3302_s1 + $0x48] sm:$0xff]  }
   0x4   :  { %v2459_v8 = vld [vmem:[%s3303_s0 + $0x244] ss:$12 sps:$4 sm:$0xff]   ;;  %903 = vmatprep.mubr.bf16.mxu0 %v2456_v6  ;;  %v2449_v14 = vld [vmem:[%s3302_s1 + $0x58] sm:$0xff]   ;;  %v2451_v16 = vld [vmem:[%s3302_s1 + $0x68] sm:$0xff]  }
   0x5   :  { %1095 = vmatprep.mubr.bf16.mxu1 %v2459_v8  ;;  %v2444_v9 = vld [vmem:[%s3302_s1 + $0x30] sm:$0xff]   ;;  %v2446_v11 = vld [vmem:[%s3302_s1 + $0x40] sm:$0xff]   ;;  %v2453_v18 = vld [vmem:[%s3302_s1 + $0x78] sm:$0xff]  }
   0x6   :  { %874 = vmatpush1.bf16.msra.mxu0 %v2439_v2  ;;  %2422 = vmatpush1.bf16.msra.mxu1 %v2439_v2  ;;  %v2448_v13 = vld [vmem:[%s3302_s1 + $0x50] sm:$0xff]   ;;  %v2450_v15 = vld [vmem:[%s3302_s1 + $0x60] sm:$0xff]   ;;  %v2461_v22 = vld [vmem:[%s3303_s0 + $0x1c] ss:$12 sps:$4 sm:$0xff]  }
   0x7   :  { %875 = vmatprep.subr.bf16.mxu0 %v2584_v0  ;;  %2407 = vmatprep.subr.bf16.mxu1 %v2584_v0  ;;  %v2452_v17 = vld [vmem:[%s3302_s1 + $0x70] sm:$0xff]   ;;  %v2460_v19 = vld [vmem:[%s3302_s1 + $0x80] sm:$0xff]   ;;  %v2463_v23 = vld [vmem:[%s3303_s0 + $0x25c] ss:$12 sps:$4 sm:$0xff]  }
   0x8   :  { %v2454_v20 = vld [vmem:[%s3303_s0] ss:$12 sps:$4 sm:$0xff]   ;;  %v2465_v25 = vld [vmem:[%s3303_s0 + $0x18] ss:$12 sps:$4 sm:$0xff]   ;;  %v2471_v29 = vld [vmem:[%s3303_s0 + $0x30] ss:$12 sps:$4 sm:$0xff]  }
   0x9   :  { %v2457_v21 = vld [vmem:[%s3303_s0 + $0x240] ss:$12 sps:$4 sm:$0xff]   ;;  %v2466_v26 = vld [vmem:[%s3303_s0 + $0x258] ss:$12 sps:$4 sm:$0xff]   ;;  %v2472_v30 = vld [vmem:[%s3303_s0 + $0x270] ss:$12 sps:$4 sm:$0xff]  }
   0xa   :  { %876 = vmatpush1.bf16.msra.mxu0 %v2440_v3  ;;  %2423 = vmatpush1.bf16.msra.mxu1 %v2440_v3  ;;  %v2485_v24 = vld [vmem:[%s3302_s1 + $0x88] sm:$0xff]   ;;  %v2467_v27 = vld [vmem:[%s3303_s0 + $0x34] ss:$12 sps:$4 sm:$0xff]   ;;  %v2479_v35 = vld [vmem:[%s3303_s0 + $0x64] ss:$12 sps:$4 sm:$0xff]  }
   0xb   :  { %877 = vmatprep.subr.bf16.mxu0 %v2584_v0  ;;  %2408 = vmatprep.subr.bf16.mxu1 %v2584_v0  ;;  %v2469_v28 = vld [vmem:[%s3303_s0 + $0x274] ss:$12 sps:$4 sm:$0xff]   ;;  %v2473_v31 = vld [vmem:[%s3303_s0 + $0x4c] ss:$12 sps:$4 sm:$0xff]   ;;  %v2481_v36 = vld [vmem:[%s3303_s0 + $0x2a4] ss:$12 sps:$4 sm:$0xff]  }
   0xc   :  { %v2475_v32 = vld [vmem:[%s3303_s0 + $0x28c] ss:$12 sps:$4 sm:$0xff]   ;;  %v2477_v33 = vld [vmem:[%s3303_s0 + $0x48] ss:$12 sps:$4 sm:$0xff]   ;;  %v2496_v45 = vld [vmem:[%s3303_s0 + $0x90] ss:$12 sps:$4 sm:$0xff]  }
   0xd   :  { %v2478_v34 = vld [vmem:[%s3303_s0 + $0x288] ss:$12 sps:$4 sm:$0xff]   ;;  %v2483_v37 = vld [vmem:[%s3303_s0 + $0x60] ss:$12 sps:$4 sm:$0xff]   ;;  %v2490_v41 = vld [vmem:[%s3303_s0 + $0x78] ss:$12 sps:$4 sm:$0xff]  }
   0xe   :  { %878 = vmatpush1.bf16.msra.mxu0 %v2441_v4  ;;  %2424 = vmatpush1.bf16.msra.mxu1 %v2441_v4  ;;  %v2484_v38 = vld [vmem:[%s3303_s0 + $0x2a0] ss:$12 sps:$4 sm:$0xff]   ;;  %v2486_v39 = vld [vmem:[%s3303_s0 + $0x7c] ss:$12 sps:$4 sm:$0xff]   ;;  %v2491_v42 = vld [vmem:[%s3303_s0 + $0x2b8] ss:$12 sps:$4 sm:$0xff]  }
   0xf   :  { %879 = vmatprep.subr.bf16.mxu0 %v2584_v0  ;;  %2409 = vmatprep.subr.bf16.mxu1 %v2584_v0  ;;  %v2488_v40 = vld [vmem:[%s3303_s0 + $0x2bc] ss:$12 sps:$4 sm:$0xff]   ;;  %v2492_v43 = vld [vmem:[%s3303_s0 + $0x94] ss:$12 sps:$4 sm:$0xff]   ;;  %v2498_v47 = vld [vmem:[%s3303_s0 + $0xac] ss:$12 sps:$4 sm:$0xff]  }
  0x10   :  { %v2494_v44 = vld [vmem:[%s3303_s0 + $0x2d4] ss:$12 sps:$4 sm:$0xff]   ;;  %v2497_v46 = vld [vmem:[%s3303_s0 + $0x2d0] ss:$12 sps:$4 sm:$0xff]   ;;  %v2500_v48 = vld [vmem:[%s3303_s0 + $0x2ec] ss:$12 sps:$4 sm:$0xff]  }
  0x11   :  { %v2502_v49 = vld [vmem:[%s3303_s0 + $0xa8] ss:$12 sps:$4 sm:$0xff]   ;;  %v2504_v51 = vld [vmem:[%s3303_s0 + $0xc4] ss:$12 sps:$4 sm:$0xff]   ;;  %v2507_v53 = vld [vmem:[%s3303_s0 + $0xc0] ss:$12 sps:$4 sm:$0xff]  }
  0x12   :  { %880 = vmatpush1.bf16.msra.mxu0 %v2442_v5  ;;  %2425 = vmatpush1.bf16.msra.mxu1 %v2442_v5  ;;  %v2503_v50 = vld [vmem:[%s3303_s0 + $0x2e8] ss:$12 sps:$4 sm:$0xff]   ;;  %v2508_v54 = vld [vmem:[%s3303_s0 + $0x20] ss:$12 sps:$4 sm:$0xff]   ;;  %v2511_v56 = vld [vmem:[%s3303_s0 + $0x38] ss:$12 sps:$4 sm:$0xff]  }
  0x13   :  { %881 = vmatprep.subr.bf16.mxu0 %v2584_v0  ;;  %2410 = vmatprep.subr.bf16.mxu1 %v2584_v0  ;;  %v2506_v52 = vld [vmem:[%s3303_s0 + $0x8] ss:$12 sps:$4 sm:$0xff]   ;;  %v2512_v57 = vld [vmem:[%s3303_s0 + $0xd8] ss:$12 sps:$4 sm:$0xff]   ;;  %v2513_v58 = vld [vmem:[%s3303_s0 + $0x50] ss:$12 sps:$4 sm:$0xff]  }
  0x14   :  { %v2509_v55 = vld [vmem:[%s3303_s0 + $0xdc] ss:$12 sps:$4 sm:$0xff]   ;;  %v2514_v59 = vld [vmem:[%s3303_s0 + $0xf4] ss:$12 sps:$4 sm:$0xff]   ;;  %v2519_v63 = vld [vmem:[%s3303_s0 + $0x10c] ss:$12 sps:$4 sm:$0xff]  }
  0x15   :  { %v2516_v60 = vld [vmem:[%s3303_s0 + $0x68] ss:$12 sps:$4 sm:$0xff]   ;;  %v2517_v61 = vld [vmem:[%s3303_s0 + $0xf0] ss:$12 sps:$4 sm:$0xff]   ;;  %v2518_v62 = vld [vmem:[%s3303_s0 + $0x80] ss:$12 sps:$4 sm:$0xff]  }
  0x16   :  { %882 = vmatpush1.bf16.msra.mxu0 %v2443_v7  ;;  %2426 = vmatpush1.bf16.msra.mxu1 %v2443_v7  ;;  %v2522_v1 = vld [vmem:[%s3303_s0 + $0x108] ss:$12 sps:$4 sm:$0xff]   ;;  %v2523_v2 = vld [vmem:[%s3303_s0 + $0xb0] ss:$12 sps:$4 sm:$0xff]   ;;  %v2527_v5 = vld [vmem:[%s3303_s0 + $0x120] ss:$12 sps:$4 sm:$0xff]  }
  0x17   :  { %883 = vmatprep.subr.bf16.mxu0 %v2584_v0  ;;  %2411 = vmatprep.subr.bf16.mxu1 %v2584_v0  ;;  %v2524_v3 = vld [vmem:[%s3303_s0 + $0x124] ss:$12 sps:$4 sm:$0xff]   ;;  %v2526_v4 = vld [vmem:[%s3303_s0 + $0xc8] ss:$12 sps:$4 sm:$0xff]   ;;  %v2528_v6 = vld [vmem:[%s3303_s0 + $0xe0] ss:$12 sps:$4 sm:$0xff]  }
  0x18   :  { %v2529_v7 = vld [vmem:[%s3303_s0 + $0x13c] ss:$12 sps:$4 sm:$0xff]   ;;  %v2531_v8 = vld [vmem:[%s3303_s0 + $0xf8] ss:$12 sps:$4 sm:$0xff]  }
  0x1a   :  { %884 = vmatpush1.bf16.msra.mxu0 %v2444_v9  ;;  %2427 = vmatpush1.bf16.msra.mxu1 %v2444_v9  ;;  %v2532_v9 = vld [vmem:[%s3303_s0 + $0x138] ss:$12 sps:$4 sm:$0xff]  }
  0x1b   :  { %885 = vmatprep.subr.bf16.mxu0 %v2584_v0  ;;  %2412 = vmatprep.subr.bf16.mxu1 %v2584_v0 }
  0x1e   :  { %886 = vmatpush1.bf16.msra.mxu0 %v2445_v10  ;;  %2428 = vmatpush1.bf16.msra.mxu1 %v2445_v10  ;;  %v2533_v10 = vld [vmem:[%s3303_s0 + $0x110] ss:$12 sps:$4 sm:$0xff]  }
  0x1f   :  { %887 = vmatprep.subr.bf16.mxu0 %v2584_v0  ;;  %2413 = vmatprep.subr.bf16.mxu1 %v2584_v0 }
  0x22   :  { %888 = vmatpush1.bf16.msra.mxu0 %v2446_v11  ;;  %2429 = vmatpush1.bf16.msra.mxu1 %v2446_v11  ;;  %v2534_v11 = vld [vmem:[%s3303_s0 + $0x154] ss:$12 sps:$4 sm:$0xff]  }
  0x23   :  { %889 = vmatprep.subr.bf16.mxu0 %v2584_v0  ;;  %2414 = vmatprep.subr.bf16.mxu1 %v2584_v0 }
  0x26   :  { %890 = vmatpush1.bf16.msra.mxu0 %v2447_v12  ;;  %2430 = vmatpush1.bf16.msra.mxu1 %v2447_v12  ;;  %v2536_v12 = vld [vmem:[%s3303_s0 + $0x128] ss:$12 sps:$4 sm:$0xff]  }
  0x27   :  { %891 = vmatprep.subr.bf16.mxu0 %v2584_v0  ;;  %2415 = vmatprep.subr.bf16.mxu1 %v2584_v0 }
  0x2a   :  { %892 = vmatpush1.bf16.msra.mxu0 %v2448_v13  ;;  %2431 = vmatpush1.bf16.msra.mxu1 %v2448_v13  ;;  %v2537_v13 = vld [vmem:[%s3303_s0 + $0x150] ss:$12 sps:$4 sm:$0xff]  }
  0x2b   :  { %893 = vmatprep.subr.bf16.mxu0 %v2584_v0  ;;  %2416 = vmatprep.subr.bf16.mxu1 %v2584_v0 }
  0x2e   :  { %894 = vmatpush1.bf16.msra.mxu0 %v2449_v14  ;;  %2432 = vmatpush1.bf16.msra.mxu1 %v2449_v14  ;;  %v2538_v14 = vld [vmem:[%s3303_s0 + $0x140] ss:$12 sps:$4 sm:$0xff]  }
  0x2f   :  { %895 = vmatprep.subr.bf16.mxu0 %v2584_v0  ;;  %2417 = vmatprep.subr.bf16.mxu1 %v2584_v0 }
  0x32   :  { %896 = vmatpush1.bf16.msra.mxu0 %v2450_v15  ;;  %2433 = vmatpush1.bf16.msra.mxu1 %v2450_v15  ;;  %v2539_v15 = vld [vmem:[%s3303_s0 + $0x16c] ss:$12 sps:$4 sm:$0xff]  }
  0x33   :  { %897 = vmatprep.subr.bf16.mxu0 %v2584_v0  ;;  %2418 = vmatprep.subr.bf16.mxu1 %v2584_v0 }
  0x36   :  { %898 = vmatpush1.bf16.msra.mxu0 %v2451_v16  ;;  %2434 = vmatpush1.bf16.msra.mxu1 %v2451_v16  ;;  %v2541_v16 = vld [vmem:[%s3303_s0 + $0x158] ss:$12 sps:$4 sm:$0xff]  }
  0x37   :  { %899 = vmatprep.subr.bf16.mxu0 %v2584_v0  ;;  %2419 = vmatprep.subr.bf16.mxu1 %v2584_v0 }
  0x3a   :  { %900 = vmatpush1.bf16.msra.mxu0 %v2452_v17  ;;  %2435 = vmatpush1.bf16.msra.mxu1 %v2452_v17  ;;  %v2542_v17 = vld [vmem:[%s3303_s0 + $0x168] ss:$12 sps:$4 sm:$0xff]  }
  0x3b   :  { %901 = vmatprep.subr.bf16.mxu0 %v2584_v0  ;;  %2420 = vmatprep.subr.bf16.mxu1 %v2584_v0  ;;  %v2521_v0 = vld [vmem:[%s3303_s0 + $0x98] ss:$12 sps:$4 sm:$0xff]  }
  0x3e   :  { %902 = vmatpush1.bf16.msra.mxu0 %v2453_v18  ;;  %2436 = vmatpush1.bf16.msra.mxu1 %v2453_v18  ;;  %v2543_v18 = vld [vmem:[%s3303_s0 + $0x170] ss:$12 sps:$4 sm:$0xff]  }
  0x3f   :  { %2337 = vmatprep.subr.bf16.mxu1 %v2460_v19 }
  0x41   :  { %904 = vmatmul.mubr.bf16.vlgmr.msra.gmra.mrb[0].mxu0 %v2454_v20  ;;  %1096 = vmatmul.mubr.bf16.vlgmr.msra.gmra.mrb[0].mxu1 %v2457_v21  ;;  %v2546_v20 = vld [vmem:[%s3303_s0 + $0x188] ss:$12 sps:$4 sm:$0xff]   ;;  %v2547_v21 = vld [vmem:[%s3303_s0 + $0x180] ss:$12 sps:$4 sm:$0xff]  }
  0x42   :  { %2338 = vmatpush3.bf16.msra.mxu1 %v2460_v19  ;;  %911 = vmatprep.mubr.bf16.mxu0 %v2461_v22  ;;  %v2544_v19 = vld [vmem:[%s3303_s0 + $0x184] ss:$12 sps:$4 sm:$0xff]   ;;  %v2548_v22 = vld [vmem:[%s3303_s0 + $0x1a0] ss:$12 sps:$4 sm:$0xff]  }
  0x43   :  { %1103 = vmatprep.mubr.bf16.mxu1 %v2463_v23  ;;  %2339 = vmatprep.subr.bf16.mxu1 %v2485_v24  ;;  %v2549_v23 = vld [vmem:[%s3303_s0 + $0x19c] ss:$12 sps:$4 sm:$0xff]  }
  0x46   :  { %2340 = vmatpush3.bf16.msra.mxu1 %v2485_v24  ;;  %v2551_v24 = vld [vmem:[%s3303_s0 + $0x1b8] ss:$12 sps:$4 sm:$0xff]  }
  0x49   :  { %912 = vmatmul.mubr.bf16.gmra.mrb[4].mxu0 %v2465_v25  ;;  %1104 = vmatmul.mubr.bf16.gmra.mrb[4].mxu1 %v2466_v26  ;;  %v2552_v25 = vld [vmem:[%s3303_s0 + $0x198] ss:$12 sps:$4 sm:$0xff]   ;;  %v2553_v26 = vld [vmem:[%s3303_s0 + $0x1d0] ss:$12 sps:$4 sm:$0xff]  }
  0x4a   :  { %919 = vmatprep.mubr.bf16.mxu0 %v2467_v27  ;;  %1111 = vmatprep.mubr.bf16.mxu1 %v2469_v28  ;;  %v2554_v27 = vld [vmem:[%s3303_s0 + $0x1b4] ss:$12 sps:$4 sm:$0xff]  }
  0x4b   :  { %v2556_v28 = vld [vmem:[%s3303_s0 + $0x1e8] ss:$12 sps:$4 sm:$0xff]  }
  0x51   :  { %920 = vmatmul.mubr.bf16.gmra.mrb[8].mxu0 %v2471_v29  ;;  %1112 = vmatmul.mubr.bf16.gmra.mrb[8].mxu1 %v2472_v30  ;;  %v2557_v29 = vld [vmem:[%s3303_s0 + $0x1b0] ss:$12 sps:$4 sm:$0xff]   ;;  %v2558_v30 = vld [vmem:[%s3303_s0 + $0x200] ss:$12 sps:$4 sm:$0xff]  }
  0x52   :  { %927 = vmatprep.mubr.bf16.mxu0 %v2473_v31  ;;  %1119 = vmatprep.mubr.bf16.mxu1 %v2475_v32  ;;  %v2559_v31 = vld [vmem:[%s3303_s0 + $0x1cc] ss:$12 sps:$4 sm:$0xff]  }
  0x53   :  { %v2561_v32 = vld [vmem:[%s3303_s0 + $0x218] ss:$12 sps:$4 sm:$0xff]  }
  0x59   :  { %928 = vmatmul.mubr.bf16.gmra.mrb[12].mxu0 %v2477_v33  ;;  %1120 = vmatmul.mubr.bf16.gmra.mrb[12].mxu1 %v2478_v34  ;;  %v2562_v33 = vld [vmem:[%s3303_s0 + $0x1c8] ss:$12 sps:$4 sm:$0xff]   ;;  %v2563_v34 = vld [vmem:[%s3303_s0 + $0x230] ss:$12 sps:$4 sm:$0xff]  }
  0x5a   :  { %935 = vmatprep.mubr.bf16.mxu0 %v2479_v35  ;;  %1127 = vmatprep.mubr.bf16.mxu1 %v2481_v36  ;;  %v2564_v35 = vld [vmem:[%s3303_s0 + $0x1e4] ss:$12 sps:$4 sm:$0xff]   ;;  %v2566_v36 = vld [vmem:[%s3303_s0 + $0x248] ss:$12 sps:$4 sm:$0xff]  }
  0x61   :  { %936 = vmatmul.mubr.bf16.gmra.mrb[16].mxu0 %v2483_v37  ;;  %1128 = vmatmul.mubr.bf16.gmra.mrb[16].mxu1 %v2484_v38  ;;  %v2567_v37 = vld [vmem:[%s3303_s0 + $0x1e0] ss:$12 sps:$4 sm:$0xff]  }
  0x62   :  { %943 = vmatprep.mubr.bf16.mxu0 %v2486_v39  ;;  %1135 = vmatprep.mubr.bf16.mxu1 %v2488_v40  ;;  %v2568_v38 = vld [vmem:[%s3303_s0 + $0x260] ss:$12 sps:$4 sm:$0xff]   ;;  %v2569_v39 = vld [vmem:[%s3303_s0 + $0x1fc] ss:$12 sps:$4 sm:$0xff]   ;;  %v2571_v40 = vld [vmem:[%s3303_s0 + $0x278] ss:$12 sps:$4 sm:$0xff]  }
  0x69   :  { %944 = vmatmul.mubr.bf16.gmra.mrb[20].mxu0 %v2490_v41  ;;  %1136 = vmatmul.mubr.bf16.gmra.mrb[20].mxu1 %v2491_v42  ;;  %v2572_v41 = vld [vmem:[%s3303_s0 + $0x1f8] ss:$12 sps:$4 sm:$0xff]   ;;  %v2573_v42 = vld [vmem:[%s3303_s0 + $0x290] ss:$12 sps:$4 sm:$0xff]  }
  0x6a   :  { %951 = vmatprep.mubr.bf16.mxu0 %v2492_v43  ;;  %1143 = vmatprep.mubr.bf16.mxu1 %v2494_v44  ;;  %v2574_v43 = vld [vmem:[%s3303_s0 + $0x214] ss:$12 sps:$4 sm:$0xff]  }
  0x6b   :  { %v2576_v44 = vld [vmem:[%s3303_s0 + $0x2a8] ss:$12 sps:$4 sm:$0xff]  }
  0x71   :  { %952 = vmatmul.mubr.bf16.gmra.mrb[24].mxu0 %v2496_v45  ;;  %1144 = vmatmul.mubr.bf16.gmra.mrb[24].mxu1 %v2497_v46  ;;  %v2577_v45 = vld [vmem:[%s3303_s0 + $0x210] ss:$12 sps:$4 sm:$0xff]   ;;  %v2578_v46 = vld [vmem:[%s3303_s0 + $0x2c0] ss:$12 sps:$4 sm:$0xff]  }
  0x72   :  { %959 = vmatprep.mubr.bf16.mxu0 %v2498_v47  ;;  %1151 = vmatprep.mubr.bf16.mxu1 %v2500_v48  ;;  %v2579_v47 = vld [vmem:[%s3303_s0 + $0x22c] ss:$12 sps:$4 sm:$0xff]  }
  0x73   :  { %v2581_v48 = vld [vmem:[%s3303_s0 + $0x2d8] ss:$12 sps:$4 sm:$0xff]  }
  0x79   :  { %960 = vmatmul.mubr.bf16.gmra.mrb[28].mxu0 %v2502_v49  ;;  %1152 = vmatmul.mubr.bf16.gmra.mrb[28].mxu1 %v2503_v50  ;;  %v2582_v49 = vld [vmem:[%s3303_s0 + $0x228] ss:$12 sps:$4 sm:$0xff]   ;;  %v2583_v50 = vld [vmem:[%s3303_s0 + $0x2f0] ss:$12 sps:$4 sm:$0xff]  }
  0x7a   :  { %967 = vmatprep.mubr.bf16.mxu0 %v2504_v51  ;;  %2341 = vmatprep.mubr.msk.bf16.mxu1 %vm774_vm0, %v2506_v52 }
  0x81   :  { %968 = vmatmul.mubr.bf16.gmra.mrb[32].mxu0 %v2507_v53  ;;  %2342 = vmatmul.mubr.msk.bf16.vlgmr.msra.gmra.mrb[32].mxu1 %vm774_vm0, %v2508_v54 }
  0x82   :  { %975 = vmatprep.mubr.bf16.mxu0 %v2509_v55  ;;  %2345 = vmatprep.mubr.msk.bf16.mxu1 %vm774_vm0, %v2511_v56 }
  0x89   :  { %976 = vmatmul.mubr.bf16.gmra.mrb[36].mxu0 %v2512_v57  ;;  %2346 = vmatmul.mubr.msk.bf16.gmra.mrb[36].mxu1 %vm774_vm0, %v2513_v58 }
  0x8a   :  { %983 = vmatprep.mubr.bf16.mxu0 %v2514_v59  ;;  %2349 = vmatprep.mubr.msk.bf16.mxu1 %vm774_vm0, %v2516_v60 }
  0x91   :  { %984 = vmatmul.mubr.bf16.gmra.mrb[40].mxu0 %v2517_v61  ;;  %2350 = vmatmul.mubr.msk.bf16.gmra.mrb[40].mxu1 %vm774_vm0, %v2518_v62 }
  0x92   :  { %991 = vmatprep.mubr.bf16.mxu0 %v2519_v63  ;;  %2353 = vmatprep.mubr.msk.bf16.mxu1 %vm774_vm0, %v2521_v0 }
  0x99   :  { %992 = vmatmul.mubr.bf16.gmra.mrb[44].mxu0 %v2522_v1  ;;  %2354 = vmatmul.mubr.msk.bf16.gmra.mrb[44].mxu1 %vm774_vm0, %v2523_v2 }
  0x9a   :  { %999 = vmatprep.mubr.bf16.mxu0 %v2524_v3  ;;  %2357 = vmatprep.mubr.msk.bf16.mxu1 %vm774_vm0, %v2526_v4 }
  0xa1   :  { %1000 = vmatmul.mubr.bf16.gmra.mrb[48].mxu0 %v2527_v5  ;;  %2358 = vmatmul.mubr.msk.bf16.gmra.mrb[48].mxu1 %vm774_vm0, %v2528_v6 }
  0xa2   :  { %1007 = vmatprep.mubr.bf16.mxu0 %v2529_v7  ;;  %2361 = vmatprep.mubr.msk.bf16.mxu1 %vm774_vm0, %v2531_v8 }
  0xa9   :  { %1008 = vmatmul.mubr.bf16.gmra.mrb[52].mxu0 %v2532_v9  ;;  %2362 = vmatmul.mubr.msk.bf16.gmra.mrb[52].mxu1 %vm774_vm0, %v2533_v10 }
  0xaa   :  { %1015 = vmatprep.mubr.bf16.mxu0 %v2534_v11  ;;  %2365 = vmatprep.mubr.msk.bf16.mxu1 %vm774_vm0, %v2536_v12 }
  0xb1   :  { %1016 = vmatmul.mubr.bf16.gmra.mrb[56].mxu0 %v2537_v13  ;;  %2366 = vmatmul.mubr.msk.bf16.gmra.mrb[56].mxu1 %vm774_vm0, %v2538_v14 }
  0xb2   :  { %1023 = vmatprep.mubr.bf16.mxu0 %v2539_v15  ;;  %2369 = vmatprep.mubr.msk.bf16.mxu1 %vm774_vm0, %v2541_v16 }
  0xb9   :  { %1024 = vmatmul.mubr.bf16.gmra.mrb[60].mxu0 %v2542_v17  ;;  %2370 = vmatmul.mubr.msk.bf16.gmra.mrb[60].mxu1 %vm774_vm0, %v2543_v18 }
  0xba   :  { %1031 = vmatprep.mubr.bf16.mxu0 %v2544_v19  ;;  %2373 = vmatprep.mubr.msk.bf16.mxu1 %vm774_vm0, %v2546_v20 }
  0xc1   :  { %1032 = vmatmul.mubr.bf16.gmra.mrb[64].mxu0 %v2547_v21  ;;  %2374 = vmatmul.mubr.msk.bf16.gmra.mrb[64].mxu1 %vm774_vm0, %v2548_v22 }
  0xc2   :  { %1039 = vmatprep.mubr.bf16.mxu0 %v2549_v23  ;;  %2377 = vmatprep.mubr.msk.bf16.mxu1 %vm774_vm0, %v2551_v24 }
  0xc9   :  { %1040 = vmatmul.mubr.bf16.gmra.mrb[68].mxu0 %v2552_v25  ;;  %2378 = vmatmul.mubr.msk.bf16.gmra.mrb[68].mxu1 %vm774_vm0, %v2553_v26 }
  0xca   :  { %1047 = vmatprep.mubr.bf16.mxu0 %v2554_v27  ;;  %2381 = vmatprep.mubr.msk.bf16.mxu1 %vm774_vm0, %v2556_v28 }
  0xd1   :  { %1048 = vmatmul.mubr.bf16.gmra.mrb[72].mxu0 %v2557_v29  ;;  %2382 = vmatmul.mubr.msk.bf16.gmra.mrb[72].mxu1 %vm774_vm0, %v2558_v30 }
  0xd2   :  { %1055 = vmatprep.mubr.bf16.mxu0 %v2559_v31  ;;  %2385 = vmatprep.mubr.msk.bf16.mxu1 %vm774_vm0, %v2561_v32 }
  0xd9   :  { %1056 = vmatmul.mubr.bf16.gmra.mrb[76].mxu0 %v2562_v33  ;;  %2386 = vmatmul.mubr.msk.bf16.gmra.mrb[76].mxu1 %vm774_vm0, %v2563_v34 }
  0xda   :  { %1063 = vmatprep.mubr.bf16.mxu0 %v2564_v35  ;;  %2389 = vmatprep.mubr.msk.bf16.mxu1 %vm774_vm0, %v2566_v36 }
  0xe1   :  { %1064 = vmatmul.mubr.bf16.gmra.mrb[80].mxu0 %v2567_v37  ;;  %2390 = vmatmul.mubr.msk.bf16.gmra.mrb[80].mxu1 %vm774_vm0, %v2568_v38 }
  0xe2   :  { %1071 = vmatprep.mubr.bf16.mxu0 %v2569_v39  ;;  %2393 = vmatprep.mubr.msk.bf16.mxu1 %vm774_vm0, %v2571_v40 }
  0xe9   :  { %1072 = vmatmul.mubr.bf16.gmra.mrb[84].mxu0 %v2572_v41  ;;  %2394 = vmatmul.mubr.msk.bf16.gmra.mrb[84].mxu1 %vm774_vm0, %v2573_v42 }
  0xea   :  { %1079 = vmatprep.mubr.bf16.mxu0 %v2574_v43  ;;  %2397 = vmatprep.mubr.msk.bf16.mxu1 %vm774_vm0, %v2576_v44 }
  0xf1   :  { %1080 = vmatmul.mubr.bf16.gmra.mrb[88].mxu0 %v2577_v45  ;;  %2398 = vmatmul.mubr.msk.bf16.gmra.mrb[88].mxu1 %vm774_vm0, %v2578_v46 }
  0xf2   :  { %1087 = vmatprep.mubr.bf16.mxu0 %v2579_v47  ;;  %2401 = vmatprep.mubr.msk.bf16.mxu1 %vm774_vm0, %v2581_v48 }
  0xf9   :  { %1088 = vmatmul.mubr.bf16.gmra.mrb[92].mxu0 %v2582_v49  ;;  %2402 = vmatmul.mubr.msk.bf16.gmra.mrb[92].mxu1 %vm774_vm0, %v2583_v50 }
 0x114   :  { %v3011_v51 = vpop.f32.mrb[0].mxu0  ;;  %v3013_v52 = vpop.f32.mrb[0].mxu1 }
 0x115   :  { %v907_v53 = vpop.f32.mrb[1].mxu0  ;;  %v1099_v54 = vpop.f32.mrb[1].mxu1 }
 0x116   :  { %v3015_v55 = vpop.f32.mrb[2].mxu0  ;;  %v3017_v56 = vpop.f32.mrb[2].mxu1  ;;  %v3074_v53 = vld [vmem:[%s3304_s2] ss:$0 sm:$0xff] }
 0x117   :  { %v910_v57 = vpop.f32.mrb[3].mxu0  ;;  %v1102_v58 = vpop.f32.mrb[3].mxu1 }
 0x118   :  { %v906_v57 = vadd.f32 %v3074_v53, %v3011_v51 }
 0x11c   :  { %v913_v59 = vpop.f32.mrb[4].mxu0  ;;  %v3019_v60 = vpop.f32.mrb[4].mxu1 }
 0x11d   :  { %v915_v61 = vpop.f32.mrb[5].mxu0  ;;  %v1107_v62 = vpop.f32.mrb[5].mxu1  ;;  %v914_v54 = vadd.f32 %v3074_v53, %v913_v59 }
 0x11e   :  { %v916_v63 = vpop.f32.mrb[6].mxu0  ;;  %v3021_v0 = vpop.f32.mrb[6].mxu1 }
 0x11f   :  { %v918_v1 = vpop.f32.mrb[7].mxu0  ;;  %v1110_v2 = vpop.f32.mrb[7].mxu1  ;;  %v917_v62 = vadd.f32 %v3074_v53, %v916_v63 }
 0x124   :  { %v3023_v3 = vpop.f32.mrb[8].mxu0  ;;  %v3025_v4 = vpop.f32.mrb[8].mxu1 }
 0x125   :  { %v923_v5 = vpop.f32.mrb[9].mxu0  ;;  %v1115_v6 = vpop.f32.mrb[9].mxu1 }
 0x126   :  { %v3027_v7 = vpop.f32.mrb[10].mxu0  ;;  %v3029_v8 = vpop.f32.mrb[10].mxu1  ;;  %v909_v6 = vadd.f32 %v3074_v53, %v3015_v55 }
 0x127   :  { %v926_v9 = vpop.f32.mrb[11].mxu0  ;;  %v1118_v10 = vpop.f32.mrb[11].mxu1 }
 0x12c   :  { %v3031_v11 = vpop.f32.mrb[12].mxu0  ;;  %v3033_v12 = vpop.f32.mrb[12].mxu1 }
 0x12d   :  { %v931_v13 = vpop.f32.mrb[13].mxu0  ;;  %v1123_v14 = vpop.f32.mrb[13].mxu1  ;;  %v930_v63 = vadd.f32 %v3074_v53, %v3031_v11  ;;  %v925_v11 = vadd.f32 %v3074_v53, %v3027_v7 }
 0x12e   :  { %v3035_v15 = vpop.f32.mrb[14].mxu0  ;;  %v3037_v16 = vpop.f32.mrb[14].mxu1 }
 0x12f   :  { %v934_v17 = vpop.f32.mrb[15].mxu0  ;;  %v1126_v18 = vpop.f32.mrb[15].mxu1 }
 0x134   :  { %v3039_v19 = vpop.f32.mrb[16].mxu0  ;;  %v3041_v20 = vpop.f32.mrb[16].mxu1 }
 0x135   :  { %v939_v21 = vpop.f32.mrb[17].mxu0  ;;  %v1131_v22 = vpop.f32.mrb[17].mxu1 }
 0x136   :  { %v3043_v23 = vpop.f32.mrb[18].mxu0  ;;  %v3045_v24 = vpop.f32.mrb[18].mxu1 }
 0x137   :  { %v942_v25 = vpop.f32.mrb[19].mxu0  ;;  %v1134_v26 = vpop.f32.mrb[19].mxu1 }
 0x13c   :  { %v3047_v27 = vpop.f32.mrb[20].mxu0  ;;  %v3049_v28 = vpop.f32.mrb[20].mxu1 }
 0x13d   :  { %v947_v29 = vpop.f32.mrb[21].mxu0  ;;  %v1139_v30 = vpop.f32.mrb[21].mxu1 }
 0x13e   :  { %v3051_v31 = vpop.f32.mrb[22].mxu0  ;;  %v3053_v32 = vpop.f32.mrb[22].mxu1  ;;  %v922_v29 = vadd.f32 %v3074_v53, %v3023_v3 }
 0x13f   :  { %v950_v33 = vpop.f32.mrb[23].mxu0  ;;  %v1142_v34 = vpop.f32.mrb[23].mxu1 }
 0x140   :  { %v933_v34 = vadd.f32 %v3074_v53, %v3035_v15 }
 0x144   :  { %v3055_v35 = vpop.f32.mrb[24].mxu0  ;;  %v3057_v36 = vpop.f32.mrb[24].mxu1 }
 0x145   :  { %v955_v37 = vpop.f32.mrb[25].mxu0  ;;  %v1147_v38 = vpop.f32.mrb[25].mxu1 }
 0x146   :  { %v3059_v39 = vpop.f32.mrb[26].mxu0  ;;  %v3061_v40 = vpop.f32.mrb[26].mxu1 }
 0x147   :  { %v958_v41 = vpop.f32.mrb[27].mxu0  ;;  %v1150_v42 = vpop.f32.mrb[27].mxu1 }
 0x14c   :  { %v3063_v43 = vpop.f32.mrb[28].mxu0  ;;  %v3065_v44 = vpop.f32.mrb[28].mxu1 }
 0x14d   :  { %v963_v45 = vpop.f32.mrb[29].mxu0  ;;  %v1155_v46 = vpop.f32.mrb[29].mxu1 }
 0x14e   :  { %v3067_v47 = vpop.f32.mrb[30].mxu0  ;;  %v3069_v48 = vpop.f32.mrb[30].mxu1 }
 0x14f   :  { %v966_v49 = vpop.f32.mrb[31].mxu0  ;;  %v1158_v50 = vpop.f32.mrb[31].mxu1 }
 0x154   :  { %v3079_v58 = vpop.f32.mrb[32].mxu0  ;;  %v2343_v61 = vpop.f32.mrb[32].mxu1 }
 0x155   :  { %v1203_v1 = vadd.f32 %v2343_v61, %v914_v54  ;;  %v971_v2 = vpop.f32.mrb[33].mxu0  ;;  %v1194_v5 = vpop.f32.mrb[33].mxu1 }
 0x156   :  { %v1195_v9 = vadd.f32 %v1194_v5, %v906_v57  ;;  %v3084_v10 = vpop.f32.mrb[34].mxu0  ;;  %v2344_v13 = vpop.f32.mrb[34].mxu1  ;;  %v938_v2 = vadd.f32 %v3074_v53, %v3039_v19 }
 0x157   :  { %v1206_v14 = vadd.f32 %v2344_v13, %v917_v62  ;;  %v974_v59 = vpop.f32.mrb[35].mxu0  ;;  %v1197_v17 = vpop.f32.mrb[35].mxu1  ;;  %v1451_v51 = vmax.f32 %v1203_v1, 0.0  ;;  %v946_v1 = vadd.f32 %v3074_v53, %v3047_v27  ;;  %v949_v13 = vadd.f32 %v3074_v53, %v3051_v31 }
 0x158   :  { %v1198_v18 = vadd.f32 %v1197_v17, %v909_v6  ;;  %v1449_v22 = vmax.f32 %v1195_v9, 0.0  ;;  %v941_v27 = vadd.f32 %v3074_v53, %v3043_v23 }
 0x159   :  { %v1452_v21 = vmax.f32 %v1206_v14, 0.0 }
 0x15a   :  { %v1450_v25 = vmax.f32 %v1198_v18, 0.0 }
 0x15b   :  { %v2120_v26 = vpack.c.bf16 %v1452_v21, %v1451_v51 }
 0x15c   :  { %v2115_v55 = vpack.c.bf16 %v1450_v25, %v1449_v22  ;;  %v3090_v30 = vpop.f32.mrb[36].mxu0  ;;  %v2347_v33 = vpop.f32.mrb[36].mxu1 }
 0x15d   :  { %2272 = vst [vmem:[%s3305_s3 + $0x8] sm:$0xff] %v2120_v26   ;;  %v1219_v37 = vadd.f32 %v2347_v33, %v930_v63  ;;  %v979_v38 = vpop.f32.mrb[37].mxu0  ;;  %v1210_v41 = vpop.f32.mrb[37].mxu1  ;;  %v962_v33 = vadd.f32 %v3074_v53, %v3063_v43  ;;  %v957_v43 = vadd.f32 %v3074_v53, %v3059_v39  ;;  %v970_v39 = vadd.f32 %v3074_v53, %v3079_v58 }
 0x15e   :  { %2116 = vst [vmem:[%s3305_s3] sm:$0xff] %v2115_v55   ;;  %v1211_v3 = vadd.f32 %v1210_v41, %v922_v29  ;;  %v3102_v42 = vpop.f32.mrb[38].mxu0  ;;  %v2348_v45 = vpop.f32.mrb[38].mxu1 }
 0x15f   :  { %v1222_v46 = vadd.f32 %v2348_v45, %v933_v34  ;;  %v982_v15 = vpop.f32.mrb[39].mxu0  ;;  %v1213_v49 = vpop.f32.mrb[39].mxu1  ;;  %v1455_v54 = vmax.f32 %v1219_v37, 0.0  ;;  %v954_v34 = vadd.f32 %v3074_v53, %v3055_v35 }
 0x160   :  { %v1214_v50 = vadd.f32 %v1213_v49, %v925_v11  ;;  %v1453_v61 = vmax.f32 %v1211_v3, 0.0  ;;  %v965_v11 = vadd.f32 %v3074_v53, %v3067_v47 }
 0x161   :  { %v1456_v57 = vmax.f32 %v1222_v46, 0.0 }
 0x162   :  { %v1454_v62 = vmax.f32 %v1214_v50, 0.0 }
 0x163   :  { %v2130_v7 = vpack.c.bf16 %v1456_v57, %v1455_v54 }
 0x164   :  { %v2125_v5 = vpack.c.bf16 %v1454_v62, %v1453_v61  ;;  %v3108_v6 = vpop.f32.mrb[40].mxu0  ;;  %v2351_v9 = vpop.f32.mrb[40].mxu1 }
 0x165   :  { %2274 = vst [vmem:[%s3305_s3 + $0x18] sm:$0xff] %v2130_v7   ;;  %v1235_v14 = vadd.f32 %v2351_v9, %v946_v1  ;;  %v987_v59 = vpop.f32.mrb[41].mxu0  ;;  %v1226_v17 = vpop.f32.mrb[41].mxu1 }
 0x166   :  { %2273 = vst [vmem:[%s3305_s3 + $0x10] sm:$0xff] %v2125_v5   ;;  %v1227_v19 = vadd.f32 %v1226_v17, %v938_v2  ;;  %v3120_v18 = vpop.f32.mrb[42].mxu0  ;;  %v2352_v51 = vpop.f32.mrb[42].mxu1  ;;  %v978_v2 = vadd.f32 %v3074_v53, %v3090_v30  ;;  %v981_v59 = vadd.f32 %v3074_v53, %v3102_v42  ;;  %v973_v30 = vadd.f32 %v3074_v53, %v3084_v10 }
 0x167   :  { %v1238_v21 = vadd.f32 %v2352_v51, %v949_v13  ;;  %v990_v31 = vpop.f32.mrb[43].mxu0  ;;  %v1229_v22 = vpop.f32.mrb[43].mxu1  ;;  %v1459_v63 = vmax.f32 %v1235_v14, 0.0  ;;  %v986_v10 = vadd.f32 %v3074_v53, %v3108_v6 }
 0x168   :  { %v1230_v25 = vadd.f32 %v1229_v22, %v941_v27  ;;  %v1457_v29 = vmax.f32 %v1227_v19, 0.0 }
 0x169   :  { %v1460_v26 = vmax.f32 %v1238_v21, 0.0 }
 0x16a   :  { %v1458_v55 = vmax.f32 %v1230_v25, 0.0 }
 0x16b   :  { %v2140_v23 = vpack.c.bf16 %v1460_v26, %v1459_v63 }
 0x16c   :  { %v2135_v37 = vpack.c.bf16 %v1458_v55, %v1457_v29  ;;  %v993_v38 = vpop.f32.mrb[44].mxu0  ;;  %v2355_v41 = vpop.f32.mrb[44].mxu1 }
 0x16d   :  { %2276 = vst [vmem:[%s3305_s3 + $0x28] sm:$0xff] %v2140_v23   ;;  %v1251_v3 = vadd.f32 %v2355_v41, %v962_v33  ;;  %v995_v45 = vpop.f32.mrb[45].mxu0  ;;  %v1242_v46 = vpop.f32.mrb[45].mxu1  ;;  %v994_v33 = vadd.f32 %v3074_v53, %v993_v38 }
 0x16e   :  { %2275 = vst [vmem:[%s3305_s3 + $0x20] sm:$0xff] %v2135_v37   ;;  %v1243_v35 = vadd.f32 %v1242_v46, %v954_v34  ;;  %v996_v15 = vpop.f32.mrb[46].mxu0  ;;  %v2356_v49 = vpop.f32.mrb[46].mxu1 }
 0x16f   :  { %v1254_v50 = vadd.f32 %v2356_v49, %v965_v11  ;;  %v998_v54 = vpop.f32.mrb[47].mxu0  ;;  %v1245_v47 = vpop.f32.mrb[47].mxu1  ;;  %v1463_v61 = vmax.f32 %v1251_v3, 0.0  ;;  %v997_v11 = vadd.f32 %v3074_v53, %v996_v15 }
 0x170   :  { %v1246_v57 = vadd.f32 %v1245_v47, %v957_v43  ;;  %v1461_v1 = vmax.f32 %v1243_v35, 0.0  ;;  %v989_v43 = vadd.f32 %v3074_v53, %v3120_v18 }
 0x171   :  { %v1464_v62 = vmax.f32 %v1254_v50, 0.0 }
 0x172   :  { %v1462_v7 = vmax.f32 %v1246_v57, 0.0 }
 0x173   :  { %v2150_v5 = vpack.c.bf16 %v1464_v62, %v1463_v61 }
 0x174   :  { %v2145_v9 = vpack.c.bf16 %v1462_v7, %v1461_v1  ;;  %v1001_v13 = vpop.f32.mrb[48].mxu0  ;;  %v2359_v14 = vpop.f32.mrb[48].mxu1 }
 0x175   :  { %2278 = vst [vmem:[%s3305_s3 + $0x38] sm:$0xff] %v2150_v5   ;;  %v1267_v17 = vadd.f32 %v2359_v14, %v978_v2  ;;  %v1003_v27 = vpop.f32.mrb[49].mxu0  ;;  %v1258_v19 = vpop.f32.mrb[49].mxu1  ;;  %v1002_v18 = vadd.f32 %v3074_v53, %v1001_v13 }
 0x176   :  { %2277 = vst [vmem:[%s3305_s3 + $0x30] sm:$0xff] %v2145_v9   ;;  %v1259_v58 = vadd.f32 %v1258_v19, %v970_v39  ;;  %v1004_v51 = vpop.f32.mrb[50].mxu0  ;;  %v2360_v21 = vpop.f32.mrb[50].mxu1 }
 0x177   :  { %v1270_v31 = vadd.f32 %v2360_v21, %v981_v59  ;;  %v1006_v22 = vpop.f32.mrb[51].mxu0  ;;  %v1261_v42 = vpop.f32.mrb[51].mxu1  ;;  %v1467_v63 = vmax.f32 %v1267_v17, 0.0  ;;  %v1005_v27 = vadd.f32 %v3074_v53, %v1004_v51 }
 0x178   :  { %v1262_v25 = vadd.f32 %v1261_v42, %v973_v30  ;;  %v1465_v29 = vmax.f32 %v1259_v58, 0.0 }
 0x179   :  { %v1468_v26 = vmax.f32 %v1270_v31, 0.0 }
 0x17a   :  { %v1466_v55 = vmax.f32 %v1262_v25, 0.0 }
 0x17b   :  { %v2160_v23 = vpack.c.bf16 %v1468_v26, %v1467_v63 }
 0x17c   :  { %v2155_v34 = vpack.c.bf16 %v1466_v55, %v1465_v29  ;;  %v1009_v37 = vpop.f32.mrb[52].mxu0  ;;  %v2363_v41 = vpop.f32.mrb[52].mxu1 }
 0x17d   :  { %2280 = vst [vmem:[%s3305_s3 + $0x48] sm:$0xff] %v2160_v23   ;;  %v1283_v3 = vadd.f32 %v2363_v41, %v994_v33  ;;  %v1011_v45 = vpop.f32.mrb[53].mxu0  ;;  %v1274_v46 = vpop.f32.mrb[53].mxu1  ;;  %v1010_v1 = vadd.f32 %v3074_v53, %v1009_v37 }
 0x17e   :  { %2279 = vst [vmem:[%s3305_s3 + $0x40] sm:$0xff] %v2155_v34   ;;  %v1275_v6 = vadd.f32 %v1274_v46, %v986_v10  ;;  %v1012_v38 = vpop.f32.mrb[54].mxu0  ;;  %v2364_v35 = vpop.f32.mrb[54].mxu1 }
 0x17f   :  { %v1286_v49 = vadd.f32 %v2364_v35, %v997_v11  ;;  %v1014_v50 = vpop.f32.mrb[55].mxu0  ;;  %v1277_v15 = vpop.f32.mrb[55].mxu1  ;;  %v1471_v47 = vmax.f32 %v1283_v3, 0.0  ;;  %v1013_v9 = vadd.f32 %v3074_v53, %v1012_v38 }
 0x180   :  { %v1278_v54 = vadd.f32 %v1277_v15, %v989_v43  ;;  %v1469_v61 = vmax.f32 %v1275_v6, 0.0 }
 0x181   :  { %v1472_v57 = vmax.f32 %v1286_v49, 0.0 }
 0x182   :  { %v1470_v62 = vmax.f32 %v1278_v54, 0.0 }
 0x183   :  { %v2170_v7 = vpack.c.bf16 %v1472_v57, %v1471_v47 }
 0x184   :  { %v2165_v2 = vpack.c.bf16 %v1470_v62, %v1469_v61  ;;  %v1017_v5 = vpop.f32.mrb[56].mxu0  ;;  %v2367_v39 = vpop.f32.mrb[56].mxu1 }
 0x185   :  { %2282 = vst [vmem:[%s3305_s3 + $0x58] sm:$0xff] %v2170_v7   ;;  %v1299_v14 = vadd.f32 %v2367_v39, %v1010_v1  ;;  %v1019_v59 = vpop.f32.mrb[57].mxu0  ;;  %v1290_v17 = vpop.f32.mrb[57].mxu1  ;;  %v1018_v55 = vadd.f32 %v3074_v53, %v1017_v5 }
 0x186   :  { %2281 = vst [vmem:[%s3305_s3 + $0x50] sm:$0xff] %v2165_v2   ;;  %v1291_v19 = vadd.f32 %v1290_v17, %v1002_v18  ;;  %v1020_v13 = vpop.f32.mrb[58].mxu0  ;;  %v2368_v30 = vpop.f32.mrb[58].mxu1 }
 0x187   :  { %v1302_v58 = vadd.f32 %v2368_v30, %v1013_v9  ;;  %v1022_v21 = vpop.f32.mrb[59].mxu0  ;;  %v1293_v31 = vpop.f32.mrb[59].mxu1  ;;  %v1475_v42 = vmax.f32 %v1299_v14, 0.0  ;;  %v1021_v41 = vadd.f32 %v3074_v53, %v1020_v13 }
 0x188   :  { %v1294_v22 = vadd.f32 %v1293_v31, %v1005_v27  ;;  %v1473_v63 = vmax.f32 %v1291_v19, 0.0 }
 0x189   :  { %v1476_v25 = vmax.f32 %v1302_v58, 0.0 }
 0x18a   :  { %v1474_v26 = vmax.f32 %v1294_v22, 0.0 }
 0x18b   :  { %v2180_v29 = vpack.c.bf16 %v1476_v25, %v1475_v42 }
 0x18c   :  { %v2175_v33 = vpack.c.bf16 %v1474_v26, %v1473_v63  ;;  %v1025_v51 = vpop.f32.mrb[60].mxu0  ;;  %v2371_v23 = vpop.f32.mrb[60].mxu1 }
 0x18d   :  { %2284 = vst [vmem:[%s3305_s3 + $0x68] sm:$0xff] %v2180_v29   ;;  %v1026_v10 = vadd.f32 %v3074_v53, %v1025_v51  ;;  %v1027_v34 = vpop.f32.mrb[61].mxu0  ;;  %v1306_v37 = vpop.f32.mrb[61].mxu1 }
 0x18e   :  { %2283 = vst [vmem:[%s3305_s3 + $0x60] sm:$0xff] %v2175_v33   ;;  %v1307_v11 = vadd.f32 %v1306_v37, %v1018_v55  ;;  %v1028_v3 = vpop.f32.mrb[62].mxu0  ;;  %v2372_v45 = vpop.f32.mrb[62].mxu1 }
 0x18f   :  { %v1315_v46 = vadd.f32 %v2371_v23, %v1026_v10  ;;  %v1029_v43 = vadd.f32 %v3074_v53, %v1028_v3  ;;  %v1030_v6 = vpop.f32.mrb[63].mxu0  ;;  %v1309_v38 = vpop.f32.mrb[63].mxu1 }
 0x190   :  { %v1310_v35 = vadd.f32 %v1309_v38, %v1021_v41  ;;  %v1477_v50 = vmax.f32 %v1307_v11, 0.0 }
 0x191   :  { %v1318_v49 = vadd.f32 %v2372_v45, %v1029_v43  ;;  %v1479_v54 = vmax.f32 %v1315_v46, 0.0 }
 0x192   :  { %v1478_v15 = vmax.f32 %v1310_v35, 0.0 }
 0x193   :  { %v1480_v47 = vmax.f32 %v1318_v49, 0.0 }
 0x194   :  { %v2185_v57 = vpack.c.bf16 %v1478_v15, %v1477_v50  ;;  %v1033_v61 = vpop.f32.mrb[64].mxu0  ;;  %v2375_v62 = vpop.f32.mrb[64].mxu1 }
 0x195   :  { %v2190_v1 = vpack.c.bf16 %v1480_v47, %v1479_v54  ;;  %v1034_v7 = vadd.f32 %v3074_v53, %v1033_v61  ;;  %v1035_v18 = vpop.f32.mrb[65].mxu0  ;;  %v1322_v2 = vpop.f32.mrb[65].mxu1 }
 0x196   :  { %2285 = vst [vmem:[%s3305_s3 + $0x70] sm:$0xff] %v2185_v57   ;;  %v1036_v5 = vpop.f32.mrb[66].mxu0  ;;  %v2376_v39 = vpop.f32.mrb[66].mxu1 }
 0x197   :  { %2286 = vst [vmem:[%s3305_s3 + $0x78] sm:$0xff] %v2190_v1   ;;  %v1323_v9 = vadd.f32 %v1322_v2, %v1034_v7  ;;  %v1037_v14 = vadd.f32 %v3074_v53, %v1036_v5  ;;  %v1038_v59 = vpop.f32.mrb[67].mxu0  ;;  %v1325_v17 = vpop.f32.mrb[67].mxu1 }
 0x199   :  { %v1326_v27 = vadd.f32 %v1325_v17, %v1037_v14  ;;  %v1481_v19 = vmax.f32 %v1323_v9, 0.0  ;;  %v1106_v17 = vadd.f32 %v3074_v53, %v3019_v60 }
 0x19b   :  { %v1482_v13 = vmax.f32 %v1326_v27, 0.0 }
 0x19c   :  { %v1041_v30 = vpop.f32.mrb[68].mxu0  ;;  %v2379_v58 = vpop.f32.mrb[68].mxu1 }
 0x19d   :  { %v2195_v21 = vpack.c.bf16 %v1482_v13, %v1481_v19  ;;  %v1042_v31 = vadd.f32 %v3074_v53, %v1041_v30  ;;  %v1043_v22 = vpop.f32.mrb[69].mxu0  ;;  %v1338_v42 = vpop.f32.mrb[69].mxu1  ;;  %v1098_v13 = vadd.f32 %v3074_v53, %v3013_v52 }
 0x19e   :  { %v1044_v25 = vpop.f32.mrb[70].mxu0  ;;  %v2380_v63 = vpop.f32.mrb[70].mxu1 }
 0x19f   :  { %2287 = vst [vmem:[%s3305_s3 + $0x80] sm:$0xff] %v2195_v21   ;;  %v1331_v26 = vadd.f32 %v2375_v62, %v1042_v31  ;;  %v1045_v29 = vadd.f32 %v3074_v53, %v1044_v25  ;;  %v1046_v55 = vpop.f32.mrb[71].mxu0  ;;  %v1341_v33 = vpop.f32.mrb[71].mxu1  ;;  %v1109_v31 = vadd.f32 %v3074_v53, %v3021_v0 }
 0x1a1   :  { %v1334_v51 = vadd.f32 %v2376_v39, %v1045_v29  ;;  %v1483_v23 = vmax.f32 %v1331_v26, 0.0 }
 0x1a3   :  { %v1484_v10 = vmax.f32 %v1334_v51, 0.0 }
 0x1a4   :  { %v1049_v34 = vpop.f32.mrb[72].mxu0  ;;  %v3195_v37 = vpop.f32.mrb[72].mxu1 }
 0x1a5   :  { %v2200_v41 = vpack.c.bf16 %v1484_v10, %v1483_v23  ;;  %v1050_v11 = vadd.f32 %v3074_v53, %v1049_v34  ;;  %v1051_v3 = vpop.f32.mrb[73].mxu0  ;;  %v1354_v45 = vpop.f32.mrb[73].mxu1 }
 0x1a6   :  { %v1052_v46 = vpop.f32.mrb[74].mxu0  ;;  %v3198_v43 = vpop.f32.mrb[74].mxu1 }
 0x1a7   :  { %2288 = vst [vmem:[%s3305_s3 + $0x88] sm:$0xff] %v2200_v41   ;;  %v1339_v6 = vadd.f32 %v1338_v42, %v1050_v11  ;;  %v1053_v38 = vadd.f32 %v3074_v53, %v1052_v46  ;;  %v1054_v35 = vpop.f32.mrb[75].mxu0  ;;  %v1357_v49 = vpop.f32.mrb[75].mxu1 }
 0x1a9   :  { %v1342_v50 = vadd.f32 %v1341_v33, %v1053_v38  ;;  %v1485_v15 = vmax.f32 %v1339_v6, 0.0 }
 0x1ab   :  { %v1486_v54 = vmax.f32 %v1342_v50, 0.0 }
 0x1ac   :  { %v1057_v47 = vpop.f32.mrb[76].mxu0  ;;  %v3204_v57 = vpop.f32.mrb[76].mxu1 }
 0x1ad   :  { %v2205_v61 = vpack.c.bf16 %v1486_v54, %v1485_v15  ;;  %v1058_v62 = vadd.f32 %v3074_v53, %v1057_v47  ;;  %v1059_v1 = vpop.f32.mrb[77].mxu0  ;;  %v3207_v7 = vpop.f32.mrb[77].mxu1  ;;  %v1125_v47 = vadd.f32 %v3074_v53, %v3037_v16 }
 0x1ae   :  { %v1060_v18 = vpop.f32.mrb[78].mxu0  ;;  %v3209_v2 = vpop.f32.mrb[78].mxu1 }
 0x1af   :  { %2289 = vst [vmem:[%s3305_s3 + $0x90] sm:$0xff] %v2205_v61   ;;  %v1347_v5 = vadd.f32 %v2379_v58, %v1058_v62  ;;  %v1061_v39 = vadd.f32 %v3074_v53, %v1060_v18  ;;  %v1062_v9 = vpop.f32.mrb[79].mxu0  ;;  %v3215_v14 = vpop.f32.mrb[79].mxu1  ;;  %v1117_v18 = vadd.f32 %v3074_v53, %v3029_v8 }
 0x1b1   :  { %v1350_v59 = vadd.f32 %v2380_v63, %v1061_v39  ;;  %v1487_v27 = vmax.f32 %v1347_v5, 0.0  ;;  %v1101_v63 = vadd.f32 %v3074_v53, %v3017_v56  ;;  %v1122_v56 = vadd.f32 %v3074_v53, %v3033_v12 }
 0x1b3   :  { %v1488_v19 = vmax.f32 %v1350_v59, 0.0 }
 0x1b4   :  { %v1065_v30 = vpop.f32.mrb[80].mxu0  ;;  %v2391_v21 = vpop.f32.mrb[80].mxu1 }
 0x1b5   :  { %v2210_v58 = vpack.c.bf16 %v1488_v19, %v1487_v27  ;;  %v1066_v22 = vadd.f32 %v3074_v53, %v1065_v30  ;;  %v1395_v42 = vadd.f32 %v2391_v21, %v1106_v17  ;;  %v1067_v25 = vpop.f32.mrb[81].mxu0  ;;  %v1386_v26 = vpop.f32.mrb[81].mxu1 }
 0x1b6   :  { %v1387_v60 = vadd.f32 %v1386_v26, %v1098_v13  ;;  %v1068_v29 = vpop.f32.mrb[82].mxu0  ;;  %v2392_v55 = vpop.f32.mrb[82].mxu1 }
 0x1b7   :  { %2290 = vst [vmem:[%s3305_s3 + $0x98] sm:$0xff] %v2210_v58   ;;  %v1355_v52 = vadd.f32 %v1354_v45, %v1066_v22  ;;  %v1069_v33 = vadd.f32 %v3074_v53, %v1068_v29  ;;  %v1398_v0 = vadd.f32 %v2392_v55, %v1109_v31  ;;  %v1070_v51 = vpop.f32.mrb[83].mxu0  ;;  %v1389_v23 = vpop.f32.mrb[83].mxu1  ;;  %v1499_v34 = vmax.f32 %v1395_v42, 0.0 }
 0x1b8   :  { %v1390_v10 = vadd.f32 %v1389_v23, %v1101_v63  ;;  %v1497_v3 = vmax.f32 %v1387_v60, 0.0  ;;  %v1114_v45 = vadd.f32 %v3074_v53, %v3025_v4  ;;  %v1138_v58 = vadd.f32 %v3074_v53, %v3049_v28 }
 0x1b9   :  { %v1358_v41 = vadd.f32 %v1357_v49, %v1069_v33  ;;  %v1500_v11 = vmax.f32 %v1398_v0, 0.0  ;;  %v1489_v6 = vmax.f32 %v1355_v52, 0.0  ;;  %v1141_v29 = vadd.f32 %v3074_v53, %v3053_v32 }
 0x1ba   :  { %v1498_v46 = vmax.f32 %v1390_v10, 0.0  ;;  %v1133_v0 = vadd.f32 %v3074_v53, %v3045_v24 }
 0x1bb   :  { %v1490_v38 = vmax.f32 %v1358_v41, 0.0  ;;  %v2240_v35 = vpack.c.bf16 %v1500_v11, %v1499_v34 }
 0x1bc   :  { %v2235_v50 = vpack.c.bf16 %v1498_v46, %v1497_v3  ;;  %v1073_v15 = vpop.f32.mrb[84].mxu0  ;;  %v2395_v54 = vpop.f32.mrb[84].mxu1 }
 0x1bd   :  { %v2215_v61 = vpack.c.bf16 %v1490_v38, %v1489_v6  ;;  %2296 = vst [vmem:[%s3305_s3 + $0xc8] sm:$0xff] %v2240_v35   ;;  %v1074_v49 = vadd.f32 %v3074_v53, %v1073_v15  ;;  %v1411_v12 = vadd.f32 %v2395_v54, %v1122_v56  ;;  %v1075_v62 = vpop.f32.mrb[85].mxu0  ;;  %v1402_v1 = vpop.f32.mrb[85].mxu1  ;;  %v1154_v35 = vadd.f32 %v3074_v53, %v3065_v44 }
 0x1be   :  { %2295 = vst [vmem:[%s3305_s3 + $0xc0] sm:$0xff] %v2235_v50   ;;  %v1403_v4 = vadd.f32 %v1402_v1, %v1114_v45  ;;  %v1076_v5 = vpop.f32.mrb[86].mxu0  ;;  %v2396_v16 = vpop.f32.mrb[86].mxu1 }
 0x1bf   :  { %2291 = vst [vmem:[%s3305_s3 + $0xa0] sm:$0xff] %v2215_v61   ;;  %v1363_v39 = vadd.f32 %v3195_v37, %v1074_v49  ;;  %v1077_v9 = vadd.f32 %v3074_v53, %v1076_v5  ;;  %v1414_v59 = vadd.f32 %v2396_v16, %v1125_v47  ;;  %v1078_v17 = vpop.f32.mrb[87].mxu0  ;;  %v1405_v27 = vpop.f32.mrb[87].mxu1  ;;  %v1503_v8 = vmax.f32 %v1411_v12, 0.0 }
 0x1c0   :  { %v1406_v19 = vadd.f32 %v1405_v27, %v1117_v18  ;;  %v1501_v21 = vmax.f32 %v1403_v4, 0.0  ;;  %v1130_v37 = vadd.f32 %v3074_v53, %v3041_v20  ;;  %v1157_v49 = vadd.f32 %v3074_v53, %v3069_v48 }
 0x1c1   :  { %v1366_v13 = vadd.f32 %v3198_v43, %v1077_v9  ;;  %v1504_v30 = vmax.f32 %v1414_v59, 0.0  ;;  %v1491_v22 = vmax.f32 %v1363_v39, 0.0  ;;  %v1149_v18 = vadd.f32 %v3074_v53, %v3061_v40 }
 0x1c2   :  { %v1502_v31 = vmax.f32 %v1406_v19, 0.0 }
 0x1c3   :  { %v1492_v42 = vmax.f32 %v1366_v13, 0.0  ;;  %v2250_v25 = vpack.c.bf16 %v1504_v30, %v1503_v8 }
 0x1c4   :  { %v2245_v26 = vpack.c.bf16 %v1502_v31, %v1501_v21  ;;  %v1081_v63 = vpop.f32.mrb[88].mxu0  ;;  %v2399_v60 = vpop.f32.mrb[88].mxu1 }
 0x1c5   :  { %v2220_v55 = vpack.c.bf16 %v1492_v42, %v1491_v22  ;;  %2298 = vst [vmem:[%s3305_s3 + $0xd8] sm:$0xff] %v2250_v25   ;;  %v1082_v43 = vadd.f32 %v3074_v53, %v1081_v63  ;;  %v1427_v28 = vadd.f32 %v2399_v60, %v1138_v58  ;;  %v1083_v52 = vpop.f32.mrb[89].mxu0  ;;  %v1418_v33 = vpop.f32.mrb[89].mxu1 }
 0x1c6   :  { %2297 = vst [vmem:[%s3305_s3 + $0xd0] sm:$0xff] %v2245_v26   ;;  %v1419_v20 = vadd.f32 %v1418_v33, %v1130_v37  ;;  %v1084_v51 = vpop.f32.mrb[90].mxu0  ;;  %v2400_v32 = vpop.f32.mrb[90].mxu1 }
 0x1c7   :  { %2292 = vst [vmem:[%s3305_s3 + $0xa8] sm:$0xff] %v2220_v55   ;;  %v1371_v23 = vadd.f32 %v3207_v7, %v1082_v43  ;;  %v1085_v10 = vadd.f32 %v3074_v53, %v1084_v51  ;;  %v1430_v34 = vadd.f32 %v2400_v32, %v1141_v29  ;;  %v1086_v41 = vpop.f32.mrb[91].mxu0  ;;  %v1421_v11 = vpop.f32.mrb[91].mxu1  ;;  %v1507_v24 = vmax.f32 %v1427_v28, 0.0 }
 0x1c8   :  { %v1422_v3 = vadd.f32 %v1421_v11, %v1133_v0  ;;  %v1505_v6 = vmax.f32 %v1419_v20, 0.0  ;;  %v1146_v7 = vadd.f32 %v3074_v53, %v3057_v36 }
 0x1c9   :  { %v1374_v46 = vadd.f32 %v3215_v14, %v1085_v10  ;;  %v1508_v56 = vmax.f32 %v1430_v34, 0.0  ;;  %v1493_v45 = vmax.f32 %v1371_v23, 0.0 }
 0x1ca   :  { %v1506_v38 = vmax.f32 %v1422_v3, 0.0 }
 0x1cb   :  { %v1494_v50 = vmax.f32 %v1374_v46, 0.0  ;;  %v2260_v15 = vpack.c.bf16 %v1508_v56, %v1507_v24 }
 0x1cc   :  { %v2255_v54 = vpack.c.bf16 %v1506_v38, %v1505_v6  ;;  %v1089_v47 = vpop.f32.mrb[92].mxu0  ;;  %v2403_v61 = vpop.f32.mrb[92].mxu1 }
 0x1cd   :  { %v2225_v12 = vpack.c.bf16 %v1494_v50, %v1493_v45  ;;  %2300 = vst [vmem:[%s3305_s3 + $0xe8] sm:$0xff] %v2260_v15   ;;  %v1090_v14 = vadd.f32 %v3074_v53, %v1089_v47  ;;  %v1443_v44 = vadd.f32 %v2403_v61, %v1154_v35  ;;  %v1091_v62 = vpop.f32.mrb[93].mxu0  ;;  %v1434_v1 = vpop.f32.mrb[93].mxu1 }
 0x1ce   :  { %2299 = vst [vmem:[%s3305_s3 + $0xe0] sm:$0xff] %v2255_v54   ;;  %v1435_v36 = vadd.f32 %v1434_v1, %v1146_v7  ;;  %v1092_v4 = vpop.f32.mrb[94].mxu0  ;;  %v2404_v48 = vpop.f32.mrb[94].mxu1 }
 0x1cf   :  { %2293 = vst [vmem:[%s3305_s3 + $0xb0] sm:$0xff] %v2225_v12   ;;  %v1379_v5 = vadd.f32 %v3204_v57, %v1090_v14  ;;  %v1093_v16 = vadd.f32 %v3074_v53, %v1092_v4  ;;  %v1446_v39 = vadd.f32 %v2404_v48, %v1157_v49  ;;  %v1094_v9 = vpop.f32.mrb[95].mxu0  ;;  %v1437_v59 = vpop.f32.mrb[95].mxu1  ;;  %v1511_v40 = vmax.f32 %v1443_v44, 0.0 }
 0x1d0   :  { %v1438_v17 = vadd.f32 %v1437_v59, %v1149_v18  ;;  %v1509_v8 = vmax.f32 %v1435_v36, 0.0 }
 0x1d1   :  { %v1382_v27 = vadd.f32 %v3209_v2, %v1093_v16  ;;  %v1512_v19 = vmax.f32 %v1446_v39, 0.0  ;;  %v1495_v30 = vmax.f32 %v1379_v5, 0.0 }
 0x1d2   :  { %v1510_v13 = vmax.f32 %v1438_v17, 0.0 }
 0x1d3   :  { %v1496_v21 = vmax.f32 %v1382_v27, 0.0  ;;  %v2270_v31 = vpack.c.bf16 %v1512_v19, %v1511_v40 }
 0x1d4   :  { %v2265_v58 = vpack.c.bf16 %v1510_v13, %v1509_v8 }
 0x1d5   :  { %v2230_v22 = vpack.c.bf16 %v1496_v21, %v1495_v30  ;;  %2302 = vst [vmem:[%s3305_s3 + $0xf8] sm:$0xff] %v2270_v31  }
 0x1d6   :  { %2301 = vst [vmem:[%s3305_s3 + $0xf0] sm:$0xff] %v2265_v58  }
 0x1d7   :  { %2294 = vst [vmem:[%s3305_s3 + $0xb8] sm:$0xff] %v2230_v22  }

// kernel: betavae_forward.17
= control target key start
LH: loop header
LB: loop body
LE: loop exit
PB: predicated region body
PF: predicated region fallthrough
CT: control target
= control target key end

     0   :  { %s5252_s12 = smov 0   ;;  %s6444_s0 = inlined_call_operand.vmem [shape: bf16[2048,288], index: 0, kind: input, shape index: {}]   ;;  %s6445_s1 = inlined_call_operand.vmem [shape: bf16[288,12], index: 1, kind: input, shape index: {}]   ;;  %s6446_s2 = inlined_call_operand.vmem [shape: f32[1,12], index: 2, kind: input, shape index: {}]   ;;  %s6447_s3 = inlined_call_operand.vmem [shape: f32[2048,12], index: 3, kind: output, shape index: {}]  }
   0x1 LB: > { %s3781_s13 = sadd.s32 4294967295, %s5229_s12   ;;  %p3785_p0 = scmp.ge.s32.totalorder %s5229_s12, 1  ;;  %s5229_s12 = sphi %s5252_s12, %s13_s12  }
   0x2   : > { %p139_p1 = scmp.lt.s32.totalorder %s5229_s12, 3 }
   0x4   : > { %p140_p2 = pnand %p3785_p0, %p139_p1 }
   0x6   : > { %143 = sbr.rel (%p140_p2) target bundleno = 731 (0x2db), region = 32 }
   0xd   : > { %v4435_v0 = vld [vmem:[%s6445_s1] sm:$0xff]   ;;  %v5231_v1 = vmov 0   ;;  %s3786_s16 = sshll.u32 %s3781_s13, 7  ;;  %v4436_v2 = vld [vmem:[%s6445_s1 + $0x8] sm:$0xff]   ;;  %v4437_v3 = vld [vmem:[%s6445_s1 + $0x10] sm:$0xff]   ;;  %vm1545_vm0 = vcmask 261120  }
   0xe   : > { %1738 = vmatprep.subr.bf16.mxu0 %v5231_v1  ;;  %4393 = vmatprep.subr.bf16.mxu1 %v5231_v1  ;;  %p165_p3 = scmp.lt.s32.totalorder %s3786_s16, 255  ;;  %v4438_v4 = vld [vmem:[%s6445_s1 + $0x18] sm:$0xff]   ;;  %v4439_v5 = vld [vmem:[%s6445_s1 + $0x20] sm:$0xff]   ;;  %v4440_v7 = vld [vmem:[%s6445_s1 + $0x28] sm:$0xff]   ;;  %vm3596_vm1 = vcmask 97280  }
   0xf   : > { %1739 = vmatpush1.bf16.msra.mxu0 %v4435_v0  ;;  %4409 = vmatpush1.bf16.msra.mxu1 %v4435_v0  ;;  %v4441_v9 = vld [vmem:[%s6445_s1 + $0x30] sm:$0xff]   ;;  %v4442_v10 = vld [vmem:[%s6445_s1 + $0x38] sm:$0xff]   ;;  %v4443_v11 = vld [vmem:[%s6445_s1 + $0x40] sm:$0xff]  }
  0x10   : > { %1740 = vmatprep.subr.bf16.mxu0 %v5231_v1  ;;  %4394 = vmatprep.subr.bf16.mxu1 %v5231_v1  ;;  %s6489_s16 = smov (!%p165_p3, %s3786_s16), 255  ;;  %v4444_v12 = vld [vmem:[%s6445_s1 + $0x48] sm:$0xff]   ;;  %v4445_v13 = vld [vmem:[%s6445_s1 + $0x50] sm:$0xff]   ;;  %v4446_v14 = vld [vmem:[%s6445_s1 + $0x58] sm:$0xff]  }
  0x11   : > { %s4425_s23 = smul.u32 12, %s6489_s16  ;;  %v4447_v15 = vld [vmem:[%s6445_s1 + $0x60] sm:$0xff]   ;;  %v4448_v16 = vld [vmem:[%s6445_s1 + $0x68] sm:$0xff]   ;;  %v4449_v17 = vld [vmem:[%s6445_s1 + $0x70] sm:$0xff]   ;;  %s3789_s6 = sshll.u32 %s6489_s16, 3 }
  0x12   : > { %v4450_v18 = vld [vmem:[%s6445_s1 + $0x78] sm:$0xff]   ;;  %v4457_v19 = vld [vmem:[%s6445_s1 + $0x80] sm:$0xff]   ;;  %v4506_v24 = vld [vmem:[%s6445_s1 + $0x88] sm:$0xff]   ;;  %s5787_s8 = scalar_lea.vmem %s6447_s3, %s3789_s6 }
  0x13   : > { %1741 = vmatpush1.bf16.msra.mxu0 %v4436_v2  ;;  %4410 = vmatpush1.bf16.msra.mxu1 %v4436_v2  ;;  %s5289_s28 = scalar_lea.vmem %s6444_s0, %s4425_s23 }
  0x14   : > { %1742 = vmatprep.subr.bf16.mxu0 %v5231_v1  ;;  %4395 = vmatprep.subr.bf16.mxu1 %v5231_v1  ;;  %v4453_v6 = vld [vmem:[%s5289_s28 + $0x4] ss:$12 sps:$4 sm:$0xff]   ;;  %v4451_v20 = vld [vmem:[%s5289_s28] ss:$12 sps:$4 sm:$0xff]   ;;  %v4458_v22 = vld [vmem:[%s5289_s28 + $0x1c] ss:$12 sps:$4 sm:$0xff]  }
  0x15   : > { %v4456_v8 = vld [vmem:[%s5289_s28 + $0x484] ss:$12 sps:$4 sm:$0xff]   ;;  %1770 = vmatprep.mubr.bf16.mxu0 %v4453_v6  ;;  %v4454_v21 = vld [vmem:[%s5289_s28 + $0x480] ss:$12 sps:$4 sm:$0xff]   ;;  %v4460_v23 = vld [vmem:[%s5289_s28 + $0x49c] ss:$12 sps:$4 sm:$0xff]  }
  0x16   : > { %2154 = vmatprep.mubr.bf16.mxu1 %v4456_v8  ;;  %v4462_v25 = vld [vmem:[%s5289_s28 + $0x18] ss:$12 sps:$4 sm:$0xff]   ;;  %v4464_v27 = vld [vmem:[%s5289_s28 + $0x34] ss:$12 sps:$4 sm:$0xff]   ;;  %v4468_v29 = vld [vmem:[%s5289_s28 + $0x30] ss:$12 sps:$4 sm:$0xff]  }
  0x17   : > { %1743 = vmatpush1.bf16.msra.mxu0 %v4437_v3  ;;  %4411 = vmatpush1.bf16.msra.mxu1 %v4437_v3  ;;  %v4463_v26 = vld [vmem:[%s5289_s28 + $0x498] ss:$12 sps:$4 sm:$0xff]   ;;  %v4466_v28 = vld [vmem:[%s5289_s28 + $0x4b4] ss:$12 sps:$4 sm:$0xff]   ;;  %v4469_v30 = vld [vmem:[%s5289_s28 + $0x4b0] ss:$12 sps:$4 sm:$0xff]  }
  0x18   : > { %1744 = vmatprep.subr.bf16.mxu0 %v5231_v1  ;;  %4396 = vmatprep.subr.bf16.mxu1 %v5231_v1  ;;  %v4470_v31 = vld [vmem:[%s5289_s28 + $0x4c] ss:$12 sps:$4 sm:$0xff]   ;;  %v4474_v33 = vld [vmem:[%s5289_s28 + $0x48] ss:$12 sps:$4 sm:$0xff]   ;;  %v4476_v35 = vld [vmem:[%s5289_s28 + $0x64] ss:$12 sps:$4 sm:$0xff]  }
  0x19   : > { %v4472_v32 = vld [vmem:[%s5289_s28 + $0x4cc] ss:$12 sps:$4 sm:$0xff]   ;;  %v4475_v34 = vld [vmem:[%s5289_s28 + $0x4c8] ss:$12 sps:$4 sm:$0xff]   ;;  %v4478_v36 = vld [vmem:[%s5289_s28 + $0x4e4] ss:$12 sps:$4 sm:$0xff]  }
  0x1a   : > { %v4480_v37 = vld [vmem:[%s5289_s28 + $0x60] ss:$12 sps:$4 sm:$0xff]   ;;  %v4482_v39 = vld [vmem:[%s5289_s28 + $0x7c] ss:$12 sps:$4 sm:$0xff]   ;;  %v4486_v41 = vld [vmem:[%s5289_s28 + $0x78] ss:$12 sps:$4 sm:$0xff]  }
  0x1b   : > { %1745 = vmatpush1.bf16.msra.mxu0 %v4438_v4  ;;  %4412 = vmatpush1.bf16.msra.mxu1 %v4438_v4  ;;  %v4481_v38 = vld [vmem:[%s5289_s28 + $0x4e0] ss:$12 sps:$4 sm:$0xff]   ;;  %v4484_v40 = vld [vmem:[%s5289_s28 + $0x4fc] ss:$12 sps:$4 sm:$0xff]   ;;  %v4487_v42 = vld [vmem:[%s5289_s28 + $0x4f8] ss:$12 sps:$4 sm:$0xff]  }
  0x1c   : > { %1746 = vmatprep.subr.bf16.mxu0 %v5231_v1  ;;  %4397 = vmatprep.subr.bf16.mxu1 %v5231_v1  ;;  %v4488_v43 = vld [vmem:[%s5289_s28 + $0x94] ss:$12 sps:$4 sm:$0xff]   ;;  %v4492_v45 = vld [vmem:[%s5289_s28 + $0x90] ss:$12 sps:$4 sm:$0xff]   ;;  %v4494_v47 = vld [vmem:[%s5289_s28 + $0xac] ss:$12 sps:$4 sm:$0xff]  }
  0x1d   : > { %v4490_v44 = vld [vmem:[%s5289_s28 + $0x514] ss:$12 sps:$4 sm:$0xff]   ;;  %v4493_v46 = vld [vmem:[%s5289_s28 + $0x510] ss:$12 sps:$4 sm:$0xff]   ;;  %v4496_v48 = vld [vmem:[%s5289_s28 + $0x52c] ss:$12 sps:$4 sm:$0xff]  }
  0x1e   : > { %v4498_v49 = vld [vmem:[%s5289_s28 + $0xa8] ss:$12 sps:$4 sm:$0xff]   ;;  %v4500_v51 = vld [vmem:[%s5289_s28 + $0xc4] ss:$12 sps:$4 sm:$0xff]   ;;  %v4504_v53 = vld [vmem:[%s5289_s28 + $0xc0] ss:$12 sps:$4 sm:$0xff]  }
  0x1f   : > { %1747 = vmatpush1.bf16.msra.mxu0 %v4439_v5  ;;  %4413 = vmatpush1.bf16.msra.mxu1 %v4439_v5  ;;  %v4499_v50 = vld [vmem:[%s5289_s28 + $0x528] ss:$12 sps:$4 sm:$0xff]   ;;  %v4502_v52 = vld [vmem:[%s5289_s28 + $0x544] ss:$12 sps:$4 sm:$0xff]   ;;  %v4505_v54 = vld [vmem:[%s5289_s28 + $0x540] ss:$12 sps:$4 sm:$0xff]  }
  0x20   : > { %1748 = vmatprep.subr.bf16.mxu0 %v5231_v1  ;;  %4398 = vmatprep.subr.bf16.mxu1 %v5231_v1  ;;  %v4507_v55 = vld [vmem:[%s5289_s28 + $0xdc] ss:$12 sps:$4 sm:$0xff]   ;;  %v4511_v57 = vld [vmem:[%s5289_s28 + $0xd8] ss:$12 sps:$4 sm:$0xff]   ;;  %v4513_v59 = vld [vmem:[%s5289_s28 + $0xf4] ss:$12 sps:$4 sm:$0xff]  }
  0x21   : > { %v4509_v56 = vld [vmem:[%s5289_s28 + $0x55c] ss:$12 sps:$4 sm:$0xff]   ;;  %v4512_v58 = vld [vmem:[%s5289_s28 + $0x558] ss:$12 sps:$4 sm:$0xff]   ;;  %v4515_v60 = vld [vmem:[%s5289_s28 + $0x574] ss:$12 sps:$4 sm:$0xff]  }
  0x22   : > { %v4517_v61 = vld [vmem:[%s5289_s28 + $0xf0] ss:$12 sps:$4 sm:$0xff]   ;;  %v4519_v63 = vld [vmem:[%s5289_s28 + $0x10c] ss:$12 sps:$4 sm:$0xff]   ;;  %v4524_v2 = vld [vmem:[%s5289_s28 + $0x588] ss:$12 sps:$4 sm:$0xff]  }
  0x23   : > { %1749 = vmatpush1.bf16.msra.mxu0 %v4440_v7  ;;  %4414 = vmatpush1.bf16.msra.mxu1 %v4440_v7  ;;  %v4518_v62 = vld [vmem:[%s5289_s28 + $0x570] ss:$12 sps:$4 sm:$0xff]   ;;  %v4521_v0 = vld [vmem:[%s5289_s28 + $0x58c] ss:$12 sps:$4 sm:$0xff]  }
  0x24   : > { %1750 = vmatprep.subr.bf16.mxu0 %v5231_v1  ;;  %4399 = vmatprep.subr.bf16.mxu1 %v5231_v1  ;;  %v4525_v3 = vld [vmem:[%s5289_s28 + $0x124] ss:$12 sps:$4 sm:$0xff]   ;;  %v4529_v5 = vld [vmem:[%s5289_s28 + $0x120] ss:$12 sps:$4 sm:$0xff]   ;;  %v4531_v7 = vld [vmem:[%s5289_s28 + $0x13c] ss:$12 sps:$4 sm:$0xff]  }
  0x25   : > { %v4527_v4 = vld [vmem:[%s5289_s28 + $0x5a4] ss:$12 sps:$4 sm:$0xff]   ;;  %v4530_v6 = vld [vmem:[%s5289_s28 + $0x5a0] ss:$12 sps:$4 sm:$0xff]   ;;  %v4533_v8 = vld [vmem:[%s5289_s28 + $0x5bc] ss:$12 sps:$4 sm:$0xff]  }
  0x27   : > { %1751 = vmatpush1.bf16.msra.mxu0 %v4441_v9  ;;  %4415 = vmatpush1.bf16.msra.mxu1 %v4441_v9  ;;  %v4535_v9 = vld [vmem:[%s5289_s28 + $0x138] ss:$12 sps:$4 sm:$0xff]  }
  0x28   : > { %1752 = vmatprep.subr.bf16.mxu0 %v5231_v1  ;;  %4400 = vmatprep.subr.bf16.mxu1 %v5231_v1 }
  0x2b   : > { %1753 = vmatpush1.bf16.msra.mxu0 %v4442_v10  ;;  %4416 = vmatpush1.bf16.msra.mxu1 %v4442_v10  ;;  %v4536_v10 = vld [vmem:[%s5289_s28 + $0x5b8] ss:$12 sps:$4 sm:$0xff]  }
  0x2c   : > { %1754 = vmatprep.subr.bf16.mxu0 %v5231_v1  ;;  %4401 = vmatprep.subr.bf16.mxu1 %v5231_v1 }
  0x2f   : > { %1755 = vmatpush1.bf16.msra.mxu0 %v4443_v11  ;;  %4417 = vmatpush1.bf16.msra.mxu1 %v4443_v11  ;;  %v4537_v11 = vld [vmem:[%s5289_s28 + $0x154] ss:$12 sps:$4 sm:$0xff]  }
  0x30   : > { %1756 = vmatprep.subr.bf16.mxu0 %v5231_v1  ;;  %4402 = vmatprep.subr.bf16.mxu1 %v5231_v1 }
  0x33   : > { %1757 = vmatpush1.bf16.msra.mxu0 %v4444_v12  ;;  %4418 = vmatpush1.bf16.msra.mxu1 %v4444_v12  ;;  %v4539_v12 = vld [vmem:[%s5289_s28 + $0x5d4] ss:$12 sps:$4 sm:$0xff]  }
  0x34   : > { %1758 = vmatprep.subr.bf16.mxu0 %v5231_v1  ;;  %4403 = vmatprep.subr.bf16.mxu1 %v5231_v1 }
  0x37   : > { %1759 = vmatpush1.bf16.msra.mxu0 %v4445_v13  ;;  %4419 = vmatpush1.bf16.msra.mxu1 %v4445_v13  ;;  %v4541_v13 = vld [vmem:[%s5289_s28 + $0x150] ss:$12 sps:$4 sm:$0xff]  }
  0x38   : > { %1760 = vmatprep.subr.bf16.mxu0 %v5231_v1  ;;  %4404 = vmatprep.subr.bf16.mxu1 %v5231_v1 }
  0x3b   : > { %1761 = vmatpush1.bf16.msra.mxu0 %v4446_v14  ;;  %4420 = vmatpush1.bf16.msra.mxu1 %v4446_v14  ;;  %v4542_v14 = vld [vmem:[%s5289_s28 + $0x5d0] ss:$12 sps:$4 sm:$0xff]  }
  0x3c   : > { %1762 = vmatprep.subr.bf16.mxu0 %v5231_v1  ;;  %4405 = vmatprep.subr.bf16.mxu1 %v5231_v1 }
  0x3f   : > { %1763 = vmatpush1.bf16.msra.mxu0 %v4447_v15  ;;  %4421 = vmatpush1.bf16.msra.mxu1 %v4447_v15  ;;  %v4543_v15 = vld [vmem:[%s5289_s28 + $0x16c] ss:$12 sps:$4 sm:$0xff]  }
  0x40   : > { %1764 = vmatprep.subr.bf16.mxu0 %v5231_v1  ;;  %4406 = vmatprep.subr.bf16.mxu1 %v5231_v1 }
  0x43   : > { %1765 = vmatpush1.bf16.msra.mxu0 %v4448_v16  ;;  %4422 = vmatpush1.bf16.msra.mxu1 %v4448_v16  ;;  %v4545_v16 = vld [vmem:[%s5289_s28 + $0x5ec] ss:$12 sps:$4 sm:$0xff]  }
  0x44   : > { %1766 = vmatprep.subr.bf16.mxu0 %v5231_v1  ;;  %4407 = vmatprep.subr.bf16.mxu1 %v5231_v1 }
  0x47   : > { %1767 = vmatpush1.bf16.msra.mxu0 %v4449_v17  ;;  %4423 = vmatpush1.bf16.msra.mxu1 %v4449_v17  ;;  %v4547_v17 = vld [vmem:[%s5289_s28 + $0x168] ss:$12 sps:$4 sm:$0xff]  }
  0x48   : > { %1768 = vmatprep.subr.bf16.mxu0 %v5231_v1  ;;  %4408 = vmatprep.subr.bf16.mxu1 %v5231_v1  ;;  %v4523_v1 = vld [vmem:[%s5289_s28 + $0x108] ss:$12 sps:$4 sm:$0xff]  }
  0x4b   : > { %1769 = vmatpush1.bf16.msra.mxu0 %v4450_v18  ;;  %4424 = vmatpush1.bf16.msra.mxu1 %v4450_v18  ;;  %v4548_v18 = vld [vmem:[%s5289_s28 + $0x5e8] ss:$12 sps:$4 sm:$0xff]  }
  0x4c   : > { %4261 = vmatprep.subr.bf16.mxu1 %v4457_v19 }
  0x4e   : > { %1771 = vmatmul.mubr.bf16.vlgmr.msra.gmra.mrb[0].mxu0 %v4451_v20  ;;  %2155 = vmatmul.mubr.bf16.vlgmr.msra.gmra.mrb[0].mxu1 %v4454_v21  ;;  %v4551_v20 = vld [vmem:[%s5289_s28 + $0x8] ss:$12 sps:$4 sm:$0xff]   ;;  %v4552_v21 = vld [vmem:[%s5289_s28 + $0x180] ss:$12 sps:$4 sm:$0xff]  }
  0x4f   : > { %4262 = vmatpush3.bf16.msra.mxu1 %v4457_v19  ;;  %1778 = vmatprep.mubr.bf16.mxu0 %v4458_v22  ;;  %v4549_v19 = vld [vmem:[%s5289_s28 + $0x184] ss:$12 sps:$4 sm:$0xff]   ;;  %v4553_v22 = vld [vmem:[%s5289_s28 + $0x20] ss:$12 sps:$4 sm:$0xff]  }
  0x50   : > { %2162 = vmatprep.mubr.bf16.mxu1 %v4460_v23  ;;  %4263 = vmatprep.subr.bf16.mxu1 %v4506_v24  ;;  %v4554_v23 = vld [vmem:[%s5289_s28 + $0x19c] ss:$12 sps:$4 sm:$0xff]  }
  0x53   : > { %4264 = vmatpush3.bf16.msra.mxu1 %v4506_v24  ;;  %v4556_v24 = vld [vmem:[%s5289_s28 + $0x38] ss:$12 sps:$4 sm:$0xff]  }
  0x56   : > { %1779 = vmatmul.mubr.bf16.gmra.mrb[4].mxu0 %v4462_v25  ;;  %2163 = vmatmul.mubr.bf16.gmra.mrb[4].mxu1 %v4463_v26  ;;  %v4557_v25 = vld [vmem:[%s5289_s28 + $0x198] ss:$12 sps:$4 sm:$0xff]   ;;  %v4558_v26 = vld [vmem:[%s5289_s28 + $0x50] ss:$12 sps:$4 sm:$0xff]  }
  0x57   : > { %1786 = vmatprep.mubr.bf16.mxu0 %v4464_v27  ;;  %2170 = vmatprep.mubr.bf16.mxu1 %v4466_v28  ;;  %v4559_v27 = vld [vmem:[%s5289_s28 + $0x1b4] ss:$12 sps:$4 sm:$0xff]  }
  0x58   : > { %v4561_v28 = vld [vmem:[%s5289_s28 + $0x68] ss:$12 sps:$4 sm:$0xff]  }
  0x5e   : > { %1787 = vmatmul.mubr.bf16.gmra.mrb[8].mxu0 %v4468_v29  ;;  %2171 = vmatmul.mubr.bf16.gmra.mrb[8].mxu1 %v4469_v30  ;;  %v4562_v29 = vld [vmem:[%s5289_s28 + $0x1b0] ss:$12 sps:$4 sm:$0xff]   ;;  %v4563_v30 = vld [vmem:[%s5289_s28 + $0x80] ss:$12 sps:$4 sm:$0xff]  }
  0x5f   : > { %1794 = vmatprep.mubr.bf16.mxu0 %v4470_v31  ;;  %2178 = vmatprep.mubr.bf16.mxu1 %v4472_v32  ;;  %v4564_v31 = vld [vmem:[%s5289_s28 + $0x1cc] ss:$12 sps:$4 sm:$0xff]  }
  0x60   : > { %v4566_v32 = vld [vmem:[%s5289_s28 + $0x98] ss:$12 sps:$4 sm:$0xff]  }
  0x66   : > { %1795 = vmatmul.mubr.bf16.gmra.mrb[12].mxu0 %v4474_v33  ;;  %2179 = vmatmul.mubr.bf16.gmra.mrb[12].mxu1 %v4475_v34  ;;  %v4567_v33 = vld [vmem:[%s5289_s28 + $0x1c8] ss:$12 sps:$4 sm:$0xff]   ;;  %v4568_v34 = vld [vmem:[%s5289_s28 + $0xb0] ss:$12 sps:$4 sm:$0xff]  }
  0x67   : > { %1802 = vmatprep.mubr.bf16.mxu0 %v4476_v35  ;;  %2186 = vmatprep.mubr.bf16.mxu1 %v4478_v36  ;;  %v4569_v35 = vld [vmem:[%s5289_s28 + $0x1e4] ss:$12 sps:$4 sm:$0xff]   ;;  %v4571_v36 = vld [vmem:[%s5289_s28 + $0xc8] ss:$12 sps:$4 sm:$0xff]  }
  0x6e   : > { %1803 = vmatmul.mubr.bf16.gmra.mrb[16].mxu0 %v4480_v37  ;;  %2187 = vmatmul.mubr.bf16.gmra.mrb[16].mxu1 %v4481_v38  ;;  %v4572_v37 = vld [vmem:[%s5289_s28 + $0x1e0] ss:$12 sps:$4 sm:$0xff]  }
  0x6f   : > { %1810 = vmatprep.mubr.bf16.mxu0 %v4482_v39  ;;  %2194 = vmatprep.mubr.bf16.mxu1 %v4484_v40  ;;  %v4573_v38 = vld [vmem:[%s5289_s28 + $0xe0] ss:$12 sps:$4 sm:$0xff]   ;;  %v4574_v39 = vld [vmem:[%s5289_s28 + $0x1fc] ss:$12 sps:$4 sm:$0xff]   ;;  %v4576_v40 = vld [vmem:[%s5289_s28 + $0xf8] ss:$12 sps:$4 sm:$0xff]  }
  0x76   : > { %1811 = vmatmul.mubr.bf16.gmra.mrb[20].mxu0 %v4486_v41  ;;  %2195 = vmatmul.mubr.bf16.gmra.mrb[20].mxu1 %v4487_v42  ;;  %v4577_v41 = vld [vmem:[%s5289_s28 + $0x1f8] ss:$12 sps:$4 sm:$0xff]   ;;  %v4578_v42 = vld [vmem:[%s5289_s28 + $0x110] ss:$12 sps:$4 sm:$0xff]  }
  0x77   : > { %1818 = vmatprep.mubr.bf16.mxu0 %v4488_v43  ;;  %2202 = vmatprep.mubr.bf16.mxu1 %v4490_v44  ;;  %v4579_v43 = vld [vmem:[%s5289_s28 + $0x214] ss:$12 sps:$4 sm:$0xff]  }
  0x78   : > { %v4581_v44 = vld [vmem:[%s5289_s28 + $0x128] ss:$12 sps:$4 sm:$0xff]  }
  0x7e   : > { %1819 = vmatmul.mubr.bf16.gmra.mrb[24].mxu0 %v4492_v45  ;;  %2203 = vmatmul.mubr.bf16.gmra.mrb[24].mxu1 %v4493_v46  ;;  %v4582_v45 = vld [vmem:[%s5289_s28 + $0x210] ss:$12 sps:$4 sm:$0xff]   ;;  %v4583_v46 = vld [vmem:[%s5289_s28 + $0x140] ss:$12 sps:$4 sm:$0xff]  }
  0x7f   : > { %1826 = vmatprep.mubr.bf16.mxu0 %v4494_v47  ;;  %2210 = vmatprep.mubr.bf16.mxu1 %v4496_v48  ;;  %v4584_v47 = vld [vmem:[%s5289_s28 + $0x22c] ss:$12 sps:$4 sm:$0xff]  }
  0x80   : > { %v4586_v48 = vld [vmem:[%s5289_s28 + $0x158] ss:$12 sps:$4 sm:$0xff]  }
  0x86   : > { %1827 = vmatmul.mubr.bf16.gmra.mrb[28].mxu0 %v4498_v49  ;;  %2211 = vmatmul.mubr.bf16.gmra.mrb[28].mxu1 %v4499_v50  ;;  %v4587_v49 = vld [vmem:[%s5289_s28 + $0x228] ss:$12 sps:$4 sm:$0xff]   ;;  %v4588_v50 = vld [vmem:[%s5289_s28 + $0x170] ss:$12 sps:$4 sm:$0xff]  }
  0x87   : > { %1834 = vmatprep.mubr.bf16.mxu0 %v4500_v51  ;;  %2218 = vmatprep.mubr.bf16.mxu1 %v4502_v52  ;;  %v4589_v51 = vld [vmem:[%s5289_s28 + $0x244] ss:$12 sps:$4 sm:$0xff]   ;;  %v4591_v52 = vld [vmem:[%s5289_s28 + $0x188] ss:$12 sps:$4 sm:$0xff]  }
  0x8e   : > { %1835 = vmatmul.mubr.bf16.gmra.mrb[32].mxu0 %v4504_v53  ;;  %2219 = vmatmul.mubr.bf16.gmra.mrb[32].mxu1 %v4505_v54  ;;  %v4592_v53 = vld [vmem:[%s5289_s28 + $0x240] ss:$12 sps:$4 sm:$0xff]  }
  0x8f   : > { %1842 = vmatprep.mubr.bf16.mxu0 %v4507_v55  ;;  %2226 = vmatprep.mubr.bf16.mxu1 %v4509_v56  ;;  %v4593_v54 = vld [vmem:[%s5289_s28 + $0x1a0] ss:$12 sps:$4 sm:$0xff]   ;;  %v4594_v55 = vld [vmem:[%s5289_s28 + $0x25c] ss:$12 sps:$4 sm:$0xff]   ;;  %v4596_v56 = vld [vmem:[%s5289_s28 + $0x1b8] ss:$12 sps:$4 sm:$0xff]  }
  0x96   : > { %1843 = vmatmul.mubr.bf16.gmra.mrb[36].mxu0 %v4511_v57  ;;  %2227 = vmatmul.mubr.bf16.gmra.mrb[36].mxu1 %v4512_v58  ;;  %v4597_v57 = vld [vmem:[%s5289_s28 + $0x258] ss:$12 sps:$4 sm:$0xff]   ;;  %v4598_v58 = vld [vmem:[%s5289_s28 + $0x1d0] ss:$12 sps:$4 sm:$0xff]  }
  0x97   : > { %1850 = vmatprep.mubr.bf16.mxu0 %v4513_v59  ;;  %2234 = vmatprep.mubr.bf16.mxu1 %v4515_v60  ;;  %v4599_v59 = vld [vmem:[%s5289_s28 + $0x274] ss:$12 sps:$4 sm:$0xff]  }
  0x98   : > { %v4601_v60 = vld [vmem:[%s5289_s28 + $0x1e8] ss:$12 sps:$4 sm:$0xff]  }
  0x9e   : > { %1851 = vmatmul.mubr.bf16.gmra.mrb[40].mxu0 %v4517_v61  ;;  %2235 = vmatmul.mubr.bf16.gmra.mrb[40].mxu1 %v4518_v62  ;;  %v4602_v61 = vld [vmem:[%s5289_s28 + $0x270] ss:$12 sps:$4 sm:$0xff]   ;;  %v4603_v62 = vld [vmem:[%s5289_s28 + $0x200] ss:$12 sps:$4 sm:$0xff]  }
  0x9f   : > { %1858 = vmatprep.mubr.bf16.mxu0 %v4519_v63  ;;  %2242 = vmatprep.mubr.bf16.mxu1 %v4521_v0  ;;  %v4604_v63 = vld [vmem:[%s5289_s28 + $0x28c] ss:$12 sps:$4 sm:$0xff]  }
  0xa0   : > { %v4606_v0 = vld [vmem:[%s5289_s28 + $0x218] ss:$12 sps:$4 sm:$0xff]  }
  0xa6   : > { %1859 = vmatmul.mubr.bf16.gmra.mrb[44].mxu0 %v4523_v1  ;;  %2243 = vmatmul.mubr.bf16.gmra.mrb[44].mxu1 %v4524_v2 }
  0xa7   : > { %1866 = vmatprep.mubr.bf16.mxu0 %v4525_v3  ;;  %2250 = vmatprep.mubr.bf16.mxu1 %v4527_v4 }
  0xae   : > { %1867 = vmatmul.mubr.bf16.gmra.mrb[48].mxu0 %v4529_v5  ;;  %2251 = vmatmul.mubr.bf16.gmra.mrb[48].mxu1 %v4530_v6  ;;  %v4607_v5 = vld [vmem:[%s5289_s28 + $0x288] ss:$12 sps:$4 sm:$0xff]   ;;  %v4608_v6 = vld [vmem:[%s5289_s28 + $0x230] ss:$12 sps:$4 sm:$0xff]  }
  0xaf   : > { %1874 = vmatprep.mubr.bf16.mxu0 %v4531_v7  ;;  %2258 = vmatprep.mubr.bf16.mxu1 %v4533_v8 }
  0xb6   : > { %1875 = vmatmul.mubr.bf16.gmra.mrb[52].mxu0 %v4535_v9  ;;  %2259 = vmatmul.mubr.bf16.gmra.mrb[52].mxu1 %v4536_v10  ;;  %v4609_v9 = vld [vmem:[%s5289_s28 + $0x2a4] ss:$12 sps:$4 sm:$0xff]   ;;  %v4611_v10 = vld [vmem:[%s5289_s28 + $0x248] ss:$12 sps:$4 sm:$0xff]  }
  0xb7   : > { %1882 = vmatprep.mubr.bf16.mxu0 %v4537_v11  ;;  %2266 = vmatprep.mubr.bf16.mxu1 %v4539_v12 }
  0xbe   : > { %1883 = vmatmul.mubr.bf16.gmra.mrb[56].mxu0 %v4541_v13  ;;  %2267 = vmatmul.mubr.bf16.gmra.mrb[56].mxu1 %v4542_v14 }
  0xbf   : > { %1890 = vmatprep.mubr.bf16.mxu0 %v4543_v15  ;;  %2274 = vmatprep.mubr.bf16.mxu1 %v4545_v16 }
  0xc6   : > { %1891 = vmatmul.mubr.bf16.gmra.mrb[60].mxu0 %v4547_v17  ;;  %2275 = vmatmul.mubr.bf16.gmra.mrb[60].mxu1 %v4548_v18  ;;  %v4612_v17 = vld [vmem:[%s5289_s28 + $0x2a0] ss:$12 sps:$4 sm:$0xff]  }
  0xc7   : > { %1898 = vmatprep.mubr.bf16.mxu0 %v4549_v19  ;;  %4265 = vmatprep.mubr.msk.bf16.mxu1 %vm1545_vm0, %v4551_v20  ;;  %v4613_v18 = vld [vmem:[%s5289_s28 + $0x260] ss:$12 sps:$4 sm:$0xff]  }
  0xce   : > { %1899 = vmatmul.mubr.bf16.gmra.mrb[64].mxu0 %v4552_v21  ;;  %4266 = vmatmul.mubr.msk.bf16.vlgmr.msra.gmra.mrb[64].mxu1 %vm1545_vm0, %v4553_v22  ;;  %v4614_v21 = vld [vmem:[%s5289_s28 + $0x2bc] ss:$12 sps:$4 sm:$0xff]   ;;  %v4616_v22 = vld [vmem:[%s5289_s28 + $0x278] ss:$12 sps:$4 sm:$0xff]  }
  0xcf   : > { %1906 = vmatprep.mubr.bf16.mxu0 %v4554_v23  ;;  %4269 = vmatprep.mubr.msk.bf16.mxu1 %vm1545_vm0, %v4556_v24 }
  0xd6   : > { %1907 = vmatmul.mubr.bf16.gmra.mrb[68].mxu0 %v4557_v25  ;;  %4270 = vmatmul.mubr.msk.bf16.gmra.mrb[68].mxu1 %vm1545_vm0, %v4558_v26 }
  0xd7   : > { %1914 = vmatprep.mubr.bf16.mxu0 %v4559_v27  ;;  %4273 = vmatprep.mubr.msk.bf16.mxu1 %vm1545_vm0, %v4561_v28 }
  0xde   : > { %1915 = vmatmul.mubr.bf16.gmra.mrb[72].mxu0 %v4562_v29  ;;  %4274 = vmatmul.mubr.msk.bf16.gmra.mrb[72].mxu1 %vm1545_vm0, %v4563_v30  ;;  %v4617_v29 = vld [vmem:[%s5289_s28 + $0x2b8] ss:$12 sps:$4 sm:$0xff]   ;;  %v4618_v30 = vld [vmem:[%s5289_s28 + $0x290] ss:$12 sps:$4 sm:$0xff]  }
  0xdf   : > { %1922 = vmatprep.mubr.bf16.mxu0 %v4564_v31  ;;  %4277 = vmatprep.mubr.msk.bf16.mxu1 %vm1545_vm0, %v4566_v32 }
  0xe6   : > { %1923 = vmatmul.mubr.bf16.gmra.mrb[76].mxu0 %v4567_v33  ;;  %4278 = vmatmul.mubr.msk.bf16.gmra.mrb[76].mxu1 %vm1545_vm0, %v4568_v34  ;;  %v4619_v33 = vld [vmem:[%s5289_s28 + $0x2d4] ss:$12 sps:$4 sm:$0xff]  }
  0xe7   : > { %1930 = vmatprep.mubr.bf16.mxu0 %v4569_v35  ;;  %4281 = vmatprep.mubr.msk.bf16.mxu1 %vm1545_vm0, %v4571_v36  ;;  %v4621_v34 = vld [vmem:[%s5289_s28 + $0x2a8] ss:$12 sps:$4 sm:$0xff]  }
  0xee   : > { %1931 = vmatmul.mubr.bf16.gmra.mrb[80].mxu0 %v4572_v37  ;;  %4282 = vmatmul.mubr.msk.bf16.gmra.mrb[80].mxu1 %vm1545_vm0, %v4573_v38 }
  0xef   : > { %1938 = vmatprep.mubr.bf16.mxu0 %v4574_v39  ;;  %4285 = vmatprep.mubr.msk.bf16.mxu1 %vm1545_vm0, %v4576_v40 }
  0xf6   : > { %1939 = vmatmul.mubr.bf16.gmra.mrb[84].mxu0 %v4577_v41  ;;  %4286 = vmatmul.mubr.msk.bf16.gmra.mrb[84].mxu1 %vm1545_vm0, %v4578_v42  ;;  %v4622_v41 = vld [vmem:[%s5289_s28 + $0x2d0] ss:$12 sps:$4 sm:$0xff]   ;;  %v4623_v42 = vld [vmem:[%s5289_s28 + $0x2c0] ss:$12 sps:$4 sm:$0xff]  }
  0xf7   : > { %1946 = vmatprep.mubr.bf16.mxu0 %v4579_v43  ;;  %4289 = vmatprep.mubr.msk.bf16.mxu1 %vm1545_vm0, %v4581_v44 }
  0xfe   : > { %1947 = vmatmul.mubr.bf16.gmra.mrb[88].mxu0 %v4582_v45  ;;  %4290 = vmatmul.mubr.msk.bf16.gmra.mrb[88].mxu1 %vm1545_vm0, %v4583_v46  ;;  %v4624_v45 = vld [vmem:[%s5289_s28 + $0x2ec] ss:$12 sps:$4 sm:$0xff]  }
  0xff   : > { %1954 = vmatprep.mubr.bf16.mxu0 %v4584_v47  ;;  %4293 = vmatprep.mubr.msk.bf16.mxu1 %vm1545_vm0, %v4586_v48  ;;  %v4626_v46 = vld [vmem:[%s5289_s28 + $0x2d8] ss:$12 sps:$4 sm:$0xff]  }
 0x106   : > { %1955 = vmatmul.mubr.bf16.gmra.mrb[92].mxu0 %v4587_v49  ;;  %4294 = vmatmul.mubr.msk.bf16.gmra.mrb[92].mxu1 %vm1545_vm0, %v4588_v50 }
 0x107   : > { %1962 = vmatprep.mubr.bf16.mxu0 %v4589_v51  ;;  %4297 = vmatprep.mubr.msk.bf16.mxu1 %vm1545_vm0, %v4591_v52 }
 0x10e   : > { %1963 = vmatmul.mubr.bf16.gmra.mrb[96].mxu0 %v4592_v53  ;;  %4298 = vmatmul.mubr.msk.bf16.gmra.mrb[96].mxu1 %vm1545_vm0, %v4593_v54  ;;  %v4627_v53 = vld [vmem:[%s5289_s28 + $0x2e8] ss:$12 sps:$4 sm:$0xff]   ;;  %v4628_v54 = vld [vmem:[%s5289_s28 + $0x2f0] ss:$12 sps:$4 sm:$0xff]  }
 0x10f   : > { %1970 = vmatprep.mubr.bf16.mxu0 %v4594_v55  ;;  %4301 = vmatprep.mubr.msk.bf16.mxu1 %vm1545_vm0, %v4596_v56 }
 0x116   : > { %1971 = vmatmul.mubr.bf16.gmra.mrb[100].mxu0 %v4597_v57  ;;  %4302 = vmatmul.mubr.msk.bf16.gmra.mrb[100].mxu1 %vm1545_vm0, %v4598_v58  ;;  %v4629_v57 = vld [vmem:[%s5289_s28 + $0x304] ss:$12 sps:$4 sm:$0xff]   ;;  %v4631_v58 = vld [vmem:[%s5289_s28 + $0x308] ss:$12 sps:$4 sm:$0xff]  }
 0x117   : > { %1978 = vmatprep.mubr.bf16.mxu0 %v4599_v59  ;;  %4305 = vmatprep.mubr.msk.bf16.mxu1 %vm1545_vm0, %v4601_v60 }
 0x11e   : > { %1979 = vmatmul.mubr.bf16.gmra.mrb[104].mxu0 %v4602_v61  ;;  %4306 = vmatmul.mubr.msk.bf16.gmra.mrb[104].mxu1 %vm1545_vm0, %v4603_v62 }
 0x11f   : > { %1986 = vmatprep.mubr.bf16.mxu0 %v4604_v63  ;;  %4309 = vmatprep.mubr.msk.bf16.mxu1 %vm1545_vm0, %v4606_v0 }
 0x121   : > { %v5487_v1 = vpop.f32.mrb[0].mxu0  ;;  %v5489_v2 = vpop.f32.mrb[0].mxu1 }
 0x122   : > { %v1774_v3 = vpop.f32.mrb[1].mxu0  ;;  %v2158_v4 = vpop.f32.mrb[1].mxu1 }
 0x123   : > { %v5493_v7 = vpop.f32.mrb[2].mxu0  ;;  %v5495_v8 = vpop.f32.mrb[2].mxu1  ;;  %v4632_v3 = vld [vmem:[%s5289_s28 + $0x300] ss:$12 sps:$4 sm:$0xff]  }
 0x124   : > { %v1777_v11 = vpop.f32.mrb[3].mxu0  ;;  %v2161_v12 = vpop.f32.mrb[3].mxu1  ;;  %v4633_v4 = vld [vmem:[%s5289_s28 + $0x320] ss:$12 sps:$4 sm:$0xff]  }
 0x126   : > { %1987 = vmatmul.mubr.bf16.gmra.mrb[108].mxu0 %v4607_v5  ;;  %4310 = vmatmul.mubr.msk.bf16.gmra.mrb[108].mxu1 %vm1545_vm0, %v4608_v6 }
 0x127   : > { %1994 = vmatprep.mubr.bf16.mxu0 %v4609_v9  ;;  %4313 = vmatprep.mubr.msk.bf16.mxu1 %vm1545_vm0, %v4611_v10  ;;  %v4634_v9 = vld [vmem:[%s5289_s28 + $0x31c] ss:$12 sps:$4 sm:$0xff]   ;;  %v4636_v10 = vld [vmem:[%s5289_s28 + $0x338] ss:$12 sps:$4 sm:$0xff]  }
 0x129   : > { %v5501_v13 = vpop.f32.mrb[4].mxu0  ;;  %v5503_v14 = vpop.f32.mrb[4].mxu1 }
 0x12a   : > { %v1782_v15 = vpop.f32.mrb[5].mxu0  ;;  %v2166_v16 = vpop.f32.mrb[5].mxu1 }
 0x12b   : > { %v5507_v19 = vpop.f32.mrb[6].mxu0  ;;  %v5509_v20 = vpop.f32.mrb[6].mxu1 }
 0x12c   : > { %v1785_v23 = vpop.f32.mrb[7].mxu0  ;;  %v2169_v24 = vpop.f32.mrb[7].mxu1 }
 0x12e   : > { %1995 = vmatmul.mubr.bf16.gmra.mrb[112].mxu0 %v4612_v17  ;;  %4314 = vmatmul.mubr.msk.bf16.gmra.mrb[112].mxu1 %vm1545_vm0, %v4613_v18 }
 0x12f   : > { %2002 = vmatprep.mubr.bf16.mxu0 %v4614_v21  ;;  %4317 = vmatprep.mubr.msk.bf16.mxu1 %vm1545_vm0, %v4616_v22  ;;  %v4637_v21 = vld [vmem:[%s5289_s28 + $0x318] ss:$12 sps:$4 sm:$0xff]   ;;  %v4638_v22 = vld [vmem:[%s5289_s28 + $0x350] ss:$12 sps:$4 sm:$0xff]  }
 0x131   : > { %v5515_v25 = vpop.f32.mrb[8].mxu0  ;;  %v5517_v26 = vpop.f32.mrb[8].mxu1 }
 0x132   : > { %v1790_v27 = vpop.f32.mrb[9].mxu0  ;;  %v2174_v28 = vpop.f32.mrb[9].mxu1 }
 0x133   : > { %v5521_v31 = vpop.f32.mrb[10].mxu0  ;;  %v5523_v32 = vpop.f32.mrb[10].mxu1  ;;  %v4639_v27 = vld [vmem:[%s5289_s28 + $0x334] ss:$12 sps:$4 sm:$0xff]  }
 0x134   : > { %v1793_v35 = vpop.f32.mrb[11].mxu0  ;;  %v2177_v36 = vpop.f32.mrb[11].mxu1  ;;  %v4641_v28 = vld [vmem:[%s5289_s28 + $0x368] ss:$12 sps:$4 sm:$0xff]  }
 0x136   : > { %2003 = vmatmul.mubr.bf16.gmra.mrb[116].mxu0 %v4617_v29  ;;  %4318 = vmatmul.mubr.msk.bf16.gmra.mrb[116].mxu1 %vm1545_vm0, %v4618_v30 }
 0x137   : > { %2010 = vmatprep.mubr.bf16.mxu0 %v4619_v33  ;;  %4321 = vmatprep.mubr.msk.bf16.mxu1 %vm1545_vm0, %v4621_v34 }
 0x139   : > { %v5529_v37 = vpop.f32.mrb[12].mxu0  ;;  %v5531_v38 = vpop.f32.mrb[12].mxu1 }
 0x13a   : > { %v1798_v39 = vpop.f32.mrb[13].mxu0  ;;  %v2182_v40 = vpop.f32.mrb[13].mxu1 }
 0x13b   : > { %v5535_v43 = vpop.f32.mrb[14].mxu0  ;;  %v5537_v44 = vpop.f32.mrb[14].mxu1  ;;  %v4642_v39 = vld [vmem:[%s5289_s28 + $0x330] ss:$12 sps:$4 sm:$0xff]   ;;  %v4643_v40 = vld [vmem:[%s5289_s28 + $0x380] ss:$12 sps:$4 sm:$0xff]  }
 0x13c   : > { %v1801_v47 = vpop.f32.mrb[15].mxu0  ;;  %v2185_v48 = vpop.f32.mrb[15].mxu1 }
 0x13e   : > { %2011 = vmatmul.mubr.bf16.gmra.mrb[120].mxu0 %v4622_v41  ;;  %4322 = vmatmul.mubr.msk.bf16.gmra.mrb[120].mxu1 %vm1545_vm0, %v4623_v42 }
 0x13f   : > { %2018 = vmatprep.mubr.bf16.mxu0 %v4624_v45  ;;  %4325 = vmatprep.mubr.msk.bf16.mxu1 %vm1545_vm0, %v4626_v46  ;;  %v4644_v45 = vld [vmem:[%s5289_s28 + $0x34c] ss:$12 sps:$4 sm:$0xff]  }
 0x140   : > { %v4646_v46 = vld [vmem:[%s5289_s28 + $0x398] ss:$12 sps:$4 sm:$0xff]  }
 0x141   : > { %v5543_v49 = vpop.f32.mrb[16].mxu0  ;;  %v5545_v50 = vpop.f32.mrb[16].mxu1 }
 0x142   : > { %v1806_v51 = vpop.f32.mrb[17].mxu0  ;;  %v2190_v52 = vpop.f32.mrb[17].mxu1 }
 0x143   : > { %v5549_v55 = vpop.f32.mrb[18].mxu0  ;;  %v5551_v56 = vpop.f32.mrb[18].mxu1 }
 0x144   : > { %v1809_v59 = vpop.f32.mrb[19].mxu0  ;;  %v2193_v60 = vpop.f32.mrb[19].mxu1 }
 0x146   : > { %2019 = vmatmul.mubr.bf16.gmra.mrb[124].mxu0 %v4627_v53  ;;  %4326 = vmatmul.mubr.msk.bf16.gmra.mrb[124].mxu1 %vm1545_vm0, %v4628_v54 }
 0x147   : > { %2026 = vmatprep.mubr.bf16.mxu0 %v4629_v57  ;;  %4329 = vmatprep.mubr.msk.bf16.mxu1 %vm1545_vm0, %v4631_v58  ;;  %v4647_v57 = vld [vmem:[%s5289_s28 + $0x348] ss:$12 sps:$4 sm:$0xff]   ;;  %v4648_v58 = vld [vmem:[%s5289_s28 + $0x3b0] ss:$12 sps:$4 sm:$0xff]  }
 0x149   : > { %v5557_v61 = vpop.f32.mrb[20].mxu0  ;;  %v5559_v62 = vpop.f32.mrb[20].mxu1 }
 0x14a   : > { %v1814_v63 = vpop.f32.mrb[21].mxu0  ;;  %v2198_v0 = vpop.f32.mrb[21].mxu1 }
 0x14b   : > { %v5563_v5 = vpop.f32.mrb[22].mxu0  ;;  %v5565_v6 = vpop.f32.mrb[22].mxu1  ;;  %v4649_v63 = vld [vmem:[%s5289_s28 + $0x364] ss:$12 sps:$4 sm:$0xff]   ;;  %v4651_v0 = vld [vmem:[%s5289_s28 + $0x3c8] ss:$12 sps:$4 sm:$0xff]  }
 0x14c   : > { %v1817_v11 = vpop.f32.mrb[23].mxu0  ;;  %v2201_v12 = vpop.f32.mrb[23].mxu1 }
 0x14e   : > { %2027 = vmatmul.mubr.bf16.gmra.mrb[128].mxu0 %v4632_v3  ;;  %4330 = vmatmul.mubr.msk.bf16.gmra.mrb[128].mxu1 %vm1545_vm0, %v4633_v4 }
 0x14f   : > { %2034 = vmatprep.mubr.bf16.mxu0 %v4634_v9  ;;  %4333 = vmatprep.mubr.msk.bf16.mxu1 %vm1545_vm0, %v4636_v10 }
 0x151   : > { %v5571_v15 = vpop.f32.mrb[24].mxu0  ;;  %v5573_v16 = vpop.f32.mrb[24].mxu1 }
 0x152   : > { %6448 = vst [vmem:[#allocation2_spill] sm:$0xff] %v5573_v16  ;;  %v1822_v17 = vpop.f32.mrb[25].mxu0  ;;  %v2206_v18 = vpop.f32.mrb[25].mxu1 }
 0x153   : > { %v5577_v23 = vpop.f32.mrb[26].mxu0  ;;  %v5579_v24 = vpop.f32.mrb[26].mxu1  ;;  %v4652_v17 = vld [vmem:[%s5289_s28 + $0x360] ss:$12 sps:$4 sm:$0xff]  }
 0x154   : > { %6449 = vst [vmem:[#allocation3_spill] sm:$0xff] %v5579_v24  ;;  %v1825_v29 = vpop.f32.mrb[27].mxu0  ;;  %v2209_v30 = vpop.f32.mrb[27].mxu1  ;;  %v4653_v18 = vld [vmem:[%s5289_s28 + $0x3e0] ss:$12 sps:$4 sm:$0xff]  }
 0x156   : > { %2035 = vmatmul.mubr.bf16.gmra.mrb[132].mxu0 %v4637_v21  ;;  %4334 = vmatmul.mubr.msk.bf16.gmra.mrb[132].mxu1 %vm1545_vm0, %v4638_v22 }
 0x157   : > { %2042 = vmatprep.mubr.bf16.mxu0 %v4639_v27  ;;  %4337 = vmatprep.mubr.msk.bf16.mxu1 %vm1545_vm0, %v4641_v28  ;;  %v4654_v27 = vld [vmem:[%s5289_s28 + $0x37c] ss:$12 sps:$4 sm:$0xff]   ;;  %v4656_v28 = vld [vmem:[%s5289_s28 + $0x3f8] ss:$12 sps:$4 sm:$0xff]  }
 0x159   : > { %v5585_v33 = vpop.f32.mrb[28].mxu0  ;;  %v5587_v34 = vpop.f32.mrb[28].mxu1 }
 0x15a   : > { %6450 = vst [vmem:[#allocation4_spill] sm:$0xff] %v5587_v34  ;;  %v1830_v35 = vpop.f32.mrb[29].mxu0  ;;  %v2214_v36 = vpop.f32.mrb[29].mxu1 }
 0x15b   : > { %v5591_v41 = vpop.f32.mrb[30].mxu0  ;;  %v5593_v42 = vpop.f32.mrb[30].mxu1 }
 0x15c   : > { %6451 = vst [vmem:[#allocation5_spill] sm:$0xff] %v5593_v42  ;;  %v1833_v47 = vpop.f32.mrb[31].mxu0  ;;  %v2217_v48 = vpop.f32.mrb[31].mxu1 }
 0x15e   : > { %2043 = vmatmul.mubr.bf16.gmra.mrb[136].mxu0 %v4642_v39  ;;  %4338 = vmatmul.mubr.msk.bf16.gmra.mrb[136].mxu1 %vm1545_vm0, %v4643_v40 }
 0x15f   : > { %2050 = vmatprep.mubr.bf16.mxu0 %v4644_v45  ;;  %4341 = vmatprep.mubr.msk.bf16.mxu1 %vm1545_vm0, %v4646_v46  ;;  %v4657_v45 = vld [vmem:[%s5289_s28 + $0x378] ss:$12 sps:$4 sm:$0xff]   ;;  %v4658_v46 = vld [vmem:[%s5289_s28 + $0x410] ss:$12 sps:$4 sm:$0xff]  }
 0x161   : > { %v5599_v51 = vpop.f32.mrb[32].mxu0  ;;  %v5601_v52 = vpop.f32.mrb[32].mxu1 }
 0x162   : > { %6452 = vst [vmem:[#allocation6_spill] sm:$0xff] %v5601_v52  ;;  %v1838_v53 = vpop.f32.mrb[33].mxu0  ;;  %v2222_v54 = vpop.f32.mrb[33].mxu1  ;;  %v4689_v52 = vld [vmem:[%s5289_s28 + $0x424] ss:$12 sps:$4 sm:$0xff]  }
 0x163   : > { %v5605_v59 = vpop.f32.mrb[34].mxu0  ;;  %v5607_v60 = vpop.f32.mrb[34].mxu1  ;;  %v4659_v53 = vld [vmem:[%s5289_s28 + $0x394] ss:$12 sps:$4 sm:$0xff]  }
 0x164   : > { %6453 = vst [vmem:[#allocation7_spill] sm:$0xff] %v5607_v60  ;;  %v1841_v3 = vpop.f32.mrb[35].mxu0  ;;  %v2225_v4 = vpop.f32.mrb[35].mxu1  ;;  %v4661_v54 = vld [vmem:[%s5289_s28 + $0x428] ss:$12 sps:$4 sm:$0xff]  }
 0x166   : > { %2051 = vmatmul.mubr.bf16.gmra.mrb[140].mxu0 %v4647_v57  ;;  %4342 = vmatmul.mubr.msk.bf16.gmra.mrb[140].mxu1 %vm1545_vm0, %v4648_v58 }
 0x167   : > { %2058 = vmatprep.mubr.bf16.mxu0 %v4649_v63  ;;  %4345 = vmatprep.mubr.msk.bf16.mxu1 %vm1545_vm0, %v4651_v0 }
 0x169   : > { %v5613_v9 = vpop.f32.mrb[36].mxu0  ;;  %v5615_v10 = vpop.f32.mrb[36].mxu1 }
 0x16a   : > { %6454 = vst [vmem:[#allocation8_spill] sm:$0xff] %v5615_v10  ;;  %v1846_v11 = vpop.f32.mrb[37].mxu0  ;;  %v2230_v12 = vpop.f32.mrb[37].mxu1 }
 0x16b   : > { %v5619_v21 = vpop.f32.mrb[38].mxu0  ;;  %v5621_v22 = vpop.f32.mrb[38].mxu1  ;;  %v4662_v11 = vld [vmem:[%s5289_s28 + $0x390] ss:$12 sps:$4 sm:$0xff]   ;;  %v4663_v12 = vld [vmem:[%s5289_s28 + $0x440] ss:$12 sps:$4 sm:$0xff]  }
 0x16c   : > { %6455 = vst [vmem:[#allocation9_spill] sm:$0xff] %v5621_v22  ;;  %v1849_v29 = vpop.f32.mrb[39].mxu0  ;;  %v2233_v30 = vpop.f32.mrb[39].mxu1 }
 0x16e   : > { %2059 = vmatmul.mubr.bf16.gmra.mrb[144].mxu0 %v4652_v17  ;;  %4346 = vmatmul.mubr.msk.bf16.gmra.mrb[144].mxu1 %vm1545_vm0, %v4653_v18 }
 0x16f   : > { %2066 = vmatprep.mubr.bf16.mxu0 %v4654_v27  ;;  %4349 = vmatprep.mubr.msk.bf16.mxu1 %vm1545_vm0, %v4656_v28  ;;  %v4664_v27 = vld [vmem:[%s5289_s28 + $0x3ac] ss:$12 sps:$4 sm:$0xff]  }
 0x170   : > { %v4666_v28 = vld [vmem:[%s5289_s28 + $0x458] ss:$12 sps:$4 sm:$0xff]  }
 0x171   : > { %v5627_v35 = vpop.f32.mrb[40].mxu0  ;;  %v5629_v36 = vpop.f32.mrb[40].mxu1 }
 0x172   : > { %6456 = vst [vmem:[#allocation10_spill] sm:$0xff] %v5629_v36  ;;  %v1854_v39 = vpop.f32.mrb[41].mxu0  ;;  %v2238_v40 = vpop.f32.mrb[41].mxu1 }
 0x173   : > { %v5633_v47 = vpop.f32.mrb[42].mxu0  ;;  %v5635_v48 = vpop.f32.mrb[42].mxu1 }
 0x174   : > { %6457 = vst [vmem:[#allocation11_spill] sm:$0xff] %v5635_v48  ;;  %v1857_v57 = vpop.f32.mrb[43].mxu0  ;;  %v2241_v58 = vpop.f32.mrb[43].mxu1 }
 0x176   : > { %2067 = vmatmul.mubr.bf16.gmra.mrb[148].mxu0 %v4657_v45  ;;  %4350 = vmatmul.mubr.msk.bf16.gmra.mrb[148].mxu1 %vm1545_vm0, %v4658_v46 }
 0x177   : > { %2074 = vmatprep.mubr.bf16.mxu0 %v4659_v53  ;;  %4353 = vmatprep.mubr.msk.bf16.mxu1 %vm1545_vm0, %v4661_v54  ;;  %v4667_v53 = vld [vmem:[%s5289_s28 + $0x3a8] ss:$12 sps:$4 sm:$0xff]   ;;  %v4668_v54 = vld [vmem:[%s5289_s28 + $0x470] ss:$12 sps:$4 sm:$0xff]  }
 0x179   : > { %v5641_v63 = vpop.f32.mrb[44].mxu0  ;;  %v5643_v0 = vpop.f32.mrb[44].mxu1 }
 0x17a   : > { %6458 = vst [vmem:[#allocation12_spill] sm:$0xff] %v5643_v0  ;;  %v1862_v3 = vpop.f32.mrb[45].mxu0  ;;  %v2246_v4 = vpop.f32.mrb[45].mxu1 }
 0x17b   : > { %v5647_v17 = vpop.f32.mrb[46].mxu0  ;;  %v5649_v18 = vpop.f32.mrb[46].mxu1  ;;  %v4669_v3 = vld [vmem:[%s5289_s28 + $0x3c4] ss:$12 sps:$4 sm:$0xff]   ;;  %v4671_v4 = vld [vmem:[%s5289_s28 + $0x488] ss:$12 sps:$4 sm:$0xff]  }
 0x17c   : > { %6459 = vst [vmem:[#allocation13_spill] sm:$0xff] %v5649_v18  ;;  %v1865_v29 = vpop.f32.mrb[47].mxu0  ;;  %v2249_v30 = vpop.f32.mrb[47].mxu1  ;;  %v4682_v18 = vld [vmem:[%s5289_s28 + $0x3f0] ss:$12 sps:$4 sm:$0xff]  }
 0x17e   : > { %2075 = vmatmul.mubr.bf16.gmra.mrb[152].mxu0 %v4662_v11  ;;  %4354 = vmatmul.mubr.msk.bf16.gmra.mrb[152].mxu1 %vm1545_vm0, %v4663_v12 }
 0x17f   : > { %2082 = vmatprep.mubr.bf16.mxu0 %v4664_v27  ;;  %4357 = vmatprep.mubr.msk.bf16.mxu1 %vm1545_vm0, %v4666_v28 }
 0x181   : > { %v5655_v39 = vpop.f32.mrb[48].mxu0  ;;  %v5657_v40 = vpop.f32.mrb[48].mxu1 }
 0x182   : > { %6460 = vst [vmem:[#allocation14_spill] sm:$0xff] %v5657_v40  ;;  %v1870_v45 = vpop.f32.mrb[49].mxu0  ;;  %v2254_v46 = vpop.f32.mrb[49].mxu1 }
 0x183   : > { %v5661_v57 = vpop.f32.mrb[50].mxu0  ;;  %v5663_v58 = vpop.f32.mrb[50].mxu1  ;;  %v4672_v45 = vld [vmem:[%s5289_s28 + $0x3c0] ss:$12 sps:$4 sm:$0xff]  }
 0x184   : > { %6461 = vst [vmem:[#allocation15_spill] sm:$0xff] %v5663_v58  ;;  %v1873_v11 = vpop.f32.mrb[51].mxu0  ;;  %v2257_v12 = vpop.f32.mrb[51].mxu1  ;;  %v4673_v46 = vld [vmem:[%s5289_s28 + $0x4a0] ss:$12 sps:$4 sm:$0xff]  }
 0x186   : > { %2083 = vmatmul.mubr.bf16.gmra.mrb[156].mxu0 %v4667_v53  ;;  %4358 = vmatmul.mubr.msk.bf16.gmra.mrb[156].mxu1 %vm1545_vm0, %v4668_v54  ;;  %v4674_v53 = vld [vmem:[%s5289_s28 + $0x3dc] ss:$12 sps:$4 sm:$0xff]   ;;  %v4676_v54 = vld [vmem:[%s5289_s28 + $0x4b8] ss:$12 sps:$4 sm:$0xff]  }
 0x187   : > { %2090 = vmatprep.mubr.bf16.mxu0 %v4669_v3  ;;  %4361 = vmatprep.mubr.msk.bf16.mxu1 %vm1545_vm0, %v4671_v4 }
 0x189   : > { %v5669_v27 = vpop.f32.mrb[52].mxu0  ;;  %v5671_v28 = vpop.f32.mrb[52].mxu1 }
 0x18a   : > { %6462 = vst [vmem:[#allocation16_spill] sm:$0xff] %v5671_v28  ;;  %v1878_v29 = vpop.f32.mrb[53].mxu0  ;;  %v2262_v30 = vpop.f32.mrb[53].mxu1  ;;  %v4677_v28 = vld [vmem:[%s5289_s28 + $0x3d8] ss:$12 sps:$4 sm:$0xff]  }
 0x18b   : > { %v5675_v58 = vpop.f32.mrb[54].mxu0  ;;  %v5677_v11 = vpop.f32.mrb[54].mxu1 }
 0x18c   : > { %6463 = vst [vmem:[#allocation17_spill] sm:$0xff] %v5677_v11  ;;  %v1881_v3 = vpop.f32.mrb[55].mxu0  ;;  %v2265_v4 = vpop.f32.mrb[55].mxu1  ;;  %v4678_v11 = vld [vmem:[%s5289_s28 + $0x4d0] ss:$12 sps:$4 sm:$0xff]  }
 0x18e   : > { %2091 = vmatmul.mubr.bf16.gmra.mrb[160].mxu0 %v4672_v45  ;;  %4362 = vmatmul.mubr.msk.bf16.gmra.mrb[160].mxu1 %vm1545_vm0, %v4673_v46  ;;  %v4679_v45 = vld [vmem:[%s5289_s28 + $0x3f4] ss:$12 sps:$4 sm:$0xff]  }
 0x18f   : > { %2098 = vmatprep.mubr.bf16.mxu0 %v4674_v53  ;;  %4365 = vmatprep.mubr.msk.bf16.mxu1 %vm1545_vm0, %v4676_v54  ;;  %v4681_v46 = vld [vmem:[%s5289_s28 + $0x4e8] ss:$12 sps:$4 sm:$0xff]  }
 0x191   : > { %v5683_v12 = vpop.f32.mrb[56].mxu0  ;;  %v5685_v29 = vpop.f32.mrb[56].mxu1 }
 0x192   : > { %6464 = vst [vmem:[#allocation18_spill] sm:$0xff] %v5685_v29  ;;  %v1886_v30 = vpop.f32.mrb[57].mxu0  ;;  %v2270_v40 = vpop.f32.mrb[57].mxu1 }
 0x193   : > { %v5689_v48 = vpop.f32.mrb[58].mxu0  ;;  %v5691_v3 = vpop.f32.mrb[58].mxu1 }
 0x194   : > { %6465 = vst [vmem:[#allocation19_spill] sm:$0xff] %v5691_v3  ;;  %v1889_v53 = vpop.f32.mrb[59].mxu0  ;;  %v2273_v54 = vpop.f32.mrb[59].mxu1  ;;  %v4683_v3 = vld [vmem:[%s5289_s28 + $0x500] ss:$12 sps:$4 sm:$0xff]  }
 0x195   : > { %v4684_v53 = vld [vmem:[%s5289_s28 + $0x40c] ss:$12 sps:$4 sm:$0xff]  }
 0x196   : > { %2099 = vmatmul.mubr.bf16.gmra.mrb[164].mxu0 %v4677_v28  ;;  %4366 = vmatmul.mubr.msk.bf16.gmra.mrb[164].mxu1 %vm1545_vm0, %v4678_v11  ;;  %v4686_v54 = vld [vmem:[%s5289_s28 + $0x518] ss:$12 sps:$4 sm:$0xff]  }
 0x197   : > { %2106 = vmatprep.mubr.bf16.mxu0 %v4679_v45  ;;  %4369 = vmatprep.mubr.msk.bf16.mxu1 %vm1545_vm0, %v4681_v46  ;;  %v5712_v45 = vld [vmem:[%s6446_s2] ss:$0 sm:$0xff] }
 0x198   : > { %v1773_v46 = vadd.f32 %v5712_v45, %v5487_v1  ;;  %v4691_v1 = vld [vmem:[%s5289_s28 + $0x548] ss:$12 sps:$4 sm:$0xff]  }
 0x199   : > { %v5697_v40 = vpop.f32.mrb[60].mxu0  ;;  %v5699_v4 = vpop.f32.mrb[60].mxu1 }
 0x19a   : > { %6466 = vst [vmem:[#allocation20_spill] sm:$0xff] %v5699_v4  ;;  %v1894_v30 = vpop.f32.mrb[61].mxu0  ;;  %v2278_v29 = vpop.f32.mrb[61].mxu1  ;;  %v4688_v4 = vld [vmem:[%s5289_s28 + $0x530] ss:$12 sps:$4 sm:$0xff]  }
 0x19b   : > { %v5703_v36 = vpop.f32.mrb[62].mxu0  ;;  %v5705_v0 = vpop.f32.mrb[62].mxu1  ;;  %v1781_v29 = vadd.f32 %v5712_v45, %v5501_v13 }
 0x19c   : > { %6467 = vst [vmem:[#allocation21_spill] sm:$0xff] %v5705_v0  ;;  %v1897_v28 = vpop.f32.mrb[63].mxu0  ;;  %v2281_v11 = vpop.f32.mrb[63].mxu1 }
 0x19d   : > { %v1784_v11 = vadd.f32 %v5712_v45, %v5507_v19 }
 0x19e   : > { %2107 = vmatmul.mubr.bf16.gmra.mrb[168].mxu0 %v4682_v18  ;;  %4370 = vmatmul.mubr.msk.bf16.gmra.mrb[168].mxu1 %vm1545_vm0, %v4683_v3 }
 0x19f   : > { %2114 = vmatprep.mubr.bf16.mxu0 %v4684_v53  ;;  %4373 = vmatprep.mubr.msk.bf16.mxu1 %vm1545_vm0, %v4686_v54  ;;  %v4687_v53 = vld [vmem:[%s5289_s28 + $0x408] ss:$12 sps:$4 sm:$0xff]   ;;  %v1776_v54 = vadd.f32 %v5712_v45, %v5493_v7 }
 0x1a1   : > { %v5720_v30 = vpop.f32.mrb[64].mxu0  ;;  %v4267_v28 = vpop.f32.mrb[64].mxu1 }
 0x1a2   : > { %v2326_v18 = vadd.f32 %v4267_v28, %v1781_v29  ;;  %v1902_v0 = vpop.f32.mrb[65].mxu0  ;;  %v2317_v3 = vpop.f32.mrb[65].mxu1  ;;  %v1797_v29 = vadd.f32 %v5712_v45, %v5529_v37  ;;  %v1792_v37 = vadd.f32 %v5712_v45, %v5521_v31 }
 0x1a3   : > { %v2318_v22 = vadd.f32 %v2317_v3, %v1773_v46  ;;  %v5728_v60 = vpop.f32.mrb[66].mxu0  ;;  %v4268_v13 = vpop.f32.mrb[66].mxu1  ;;  %v4693_v46 = vld [vmem:[%s5289_s28 + $0x560] ss:$12 sps:$4 sm:$0xff]   ;;  %v4696_v3 = vld [vmem:[%s5289_s28 + $0x578] ss:$12 sps:$4 sm:$0xff]  }
 0x1a4   : > { %v4067_v10 = vmul.f32 -1.442695, %v2326_v18  ;;  %v2329_v24 = vadd.f32 %v4268_v13, %v1784_v11  ;;  %v1905_v42 = vpop.f32.mrb[67].mxu0  ;;  %v2320_v16 = vpop.f32.mrb[67].mxu1 }
 0x1a5   : > { %v4065_v34 = vmul.f32 -1.442695, %v2318_v22  ;;  %v2321_v19 = vadd.f32 %v2320_v16, %v1776_v54  ;;  %v1789_v16 = vadd.f32 %v5712_v45, %v5515_v25  ;;  %v4694_v25 = vld [vmem:[%s5289_s28 + $0x43c] ss:$12 sps:$4 sm:$0xff]  }
 0x1a6   : > { %4709 = vpow2.f32 %v4067_v10  ;;  %v4068_v0 = vmul.f32 -1.442695, %v2329_v24  ;;  %2115 = vmatmul.mubr.bf16.gmra.mrb[172].mxu0 %v4687_v53  ;;  %4374 = vmatmul.mubr.msk.bf16.gmra.mrb[172].mxu1 %vm1545_vm0, %v4688_v4  ;;  %v4692_v4 = vld [vmem:[%s5289_s28 + $0x420] ss:$12 sps:$4 sm:$0xff]  }
 0x1a7   : > { %4711 = vpow2.f32 %v4065_v34  ;;  %v4066_v7 = vmul.f32 -1.442695, %v2321_v19  ;;  %2122 = vmatprep.mubr.bf16.mxu0 %v4689_v52  ;;  %4377 = vmatprep.mubr.msk.bf16.mxu1 %vm1545_vm0, %v4691_v1  ;;  %v1800_v34 = vadd.f32 %v5712_v45, %v5535_v43 }
 0x1a8   : > { %4713 = vpow2.f32 %v4068_v0 }
 0x1a9   : > { %4715 = vpow2.f32 %v4066_v7  ;;  %v5738_v24 = vpop.f32.mrb[68].mxu0  ;;  %v4271_v42 = vpop.f32.mrb[68].mxu1 }
 0x1aa   : > { %v2342_v10 = vadd.f32 %v4271_v42, %v1797_v29  ;;  %v1910_v52 = vpop.f32.mrb[69].mxu0  ;;  %v2333_v22 = vpop.f32.mrb[69].mxu1  ;;  %v1813_v29 = vadd.f32 %v5712_v45, %v5557_v61 }
 0x1ab   : > { %v2334_v28 = vadd.f32 %v2333_v22, %v1789_v16  ;;  %v5746_v11 = vpop.f32.mrb[70].mxu0  ;;  %v4272_v18 = vpop.f32.mrb[70].mxu1  ;;  %v4697_v16 = vld [vmem:[%s5289_s28 + $0x438] ss:$12 sps:$4 sm:$0xff]  }
 0x1ac   : > { %v4071_v53 = vmul.f32 -1.442695, %v2342_v10  ;;  %v2345_v54 = vadd.f32 %v4272_v18, %v1800_v34  ;;  %v1913_v13 = vpop.f32.mrb[71].mxu0  ;;  %v2336_v1 = vpop.f32.mrb[71].mxu1  ;;  %v1805_v34 = vadd.f32 %v5712_v45, %v5543_v49  ;;  %v1816_v49 = vadd.f32 %v5712_v45, %v5563_v5 }
 0x1ad   : > { %v4069_v43 = vmul.f32 -1.442695, %v2334_v28  ;;  %v2337_v19 = vadd.f32 %v2336_v1, %v1792_v37  ;;  %v1808_v37 = vadd.f32 %v5712_v45, %v5549_v55 }
 0x1ae   : > { %4717 = vpow2.f32 %v4071_v53  ;;  %v4072_v0 = vmul.f32 -1.442695, %v2345_v54  ;;  %2123 = vmatmul.mubr.bf16.gmra.mrb[176].mxu0 %v4692_v4  ;;  %4378 = vmatmul.mubr.msk.bf16.gmra.mrb[176].mxu1 %vm1545_vm0, %v4693_v46  ;;  %v4698_v4 = vld [vmem:[%s5289_s28 + $0x590] ss:$12 sps:$4 sm:$0xff]  }
 0x1af   : > { %4719 = vpow2.f32 %v4069_v43  ;;  %v4070_v31 = vmul.f32 -1.442695, %v2337_v19  ;;  %2130 = vmatprep.mubr.bf16.mxu0 %v4694_v25  ;;  %4381 = vmatprep.mubr.msk.bf16.mxu1 %vm1545_vm0, %v4696_v3  ;;  %v4699_v3 = vld [vmem:[%s5289_s28 + $0x454] ss:$12 sps:$4 sm:$0xff]  }
 0x1b0   : > { %v4710_v7 = vpop.eup %4709  ;;  %4721 = vpow2.f32 %v4072_v0  ;;  %v4701_v19 = vld [vmem:[%s5289_s28 + $0x5a8] ss:$12 sps:$4 sm:$0xff]  }
 0x1b1   : > { %v4712_v42 = vpop.eup %4711  ;;  %v3214_v10 = vadd.f32 1.0, %v4710_v7  ;;  %4723 = vpow2.f32 %v4070_v31  ;;  %v5757_v52 = vpop.f32.mrb[72].mxu0 }
 0x1b2   : > { %v4275_v22 = vpop.f32.mrb[72].mxu1  ;;  %v4714_v46 = vpop.eup %4713  ;;  %v3212_v28 = vadd.f32 1.0, %v4712_v42 }
 0x1b3   : > { %v2358_v61 = vadd.f32 %v4275_v22, %v1813_v29  ;;  %v1918_v18 = vpop.f32.mrb[73].mxu0  ;;  %v2349_v25 = vpop.f32.mrb[73].mxu1  ;;  %4725 = vrcp.f32 %v3214_v10  ;;  %v3215_v54 = vadd.f32 1.0, %v4714_v46  ;;  %v1829_v46 = vadd.f32 %v5712_v45, %v5585_v33 }
 0x1b4   : > { %v4716_v53 = vpop.eup %4715  ;;  %v2350_v13 = vadd.f32 %v2349_v25, %v1805_v34  ;;  %v5765_v1 = vpop.f32.mrb[74].mxu0  ;;  %4727 = vrcp.f32 %v3212_v28  ;;  %v4702_v28 = vld [vmem:[%s5289_s28 + $0x450] ss:$12 sps:$4 sm:$0xff]   ;;  %v4703_v25 = vld [vmem:[%s5289_s28 + $0x5c0] ss:$12 sps:$4 sm:$0xff]   ;;  %v1824_v33 = vadd.f32 %v5712_v45, %v5577_v23 }
 0x1b5   : > { %v4276_v43 = vpop.f32.mrb[74].mxu1  ;;  %v3213_v0 = vadd.f32 1.0, %v4716_v53  ;;  %v4075_v31 = vmul.f32 -1.442695, %v2358_v61  ;;  %v1921_v55 = vpop.f32.mrb[75].mxu0  ;;  %4729 = vrcp.f32 %v3215_v54 }
 0x1b6   : > { %v2352_v7 = vpop.f32.mrb[75].mxu1  ;;  %v4073_v29 = vmul.f32 -1.442695, %v2350_v13  ;;  %v2361_v42 = vadd.f32 %v4276_v43, %v1816_v49  ;;  %2131 = vmatmul.mubr.bf16.gmra.mrb[180].mxu0 %v4697_v16  ;;  %4382 = vmatmul.mubr.msk.bf16.gmra.mrb[180].mxu1 %vm1545_vm0, %v4698_v4  ;;  %v1821_v16 = vadd.f32 %v5712_v45, %v5571_v15  ;;  %v4704_v43 = vld [vmem:[%s5289_s28 + $0x46c] ss:$12 sps:$4 sm:$0xff]   ;;  %v1832_v15 = vadd.f32 %v5712_v45, %v5591_v41 }
 0x1b7   : > { %v2353_v22 = vadd.f32 %v2352_v7, %v1808_v37  ;;  %4731 = vrcp.f32 %v3213_v0  ;;  %2138 = vmatprep.mubr.bf16.mxu0 %v4699_v3  ;;  %4385 = vmatprep.mubr.msk.bf16.mxu1 %vm1545_vm0, %v4701_v19  ;;  %v4706_v7 = vld [vmem:[%s5289_s28 + $0x5d8] ss:$12 sps:$4 sm:$0xff]  }
 0x1b8   : > { %4733 = vpow2.f32 %v4075_v31  ;;  %v4076_v5 = vmul.f32 -1.442695, %v2361_v42  ;;  %v4718_v10 = vpop.eup %4717 }
 0x1b9   : > { %v4074_v34 = vmul.f32 -1.442695, %v2353_v22  ;;  %4735 = vpow2.f32 %v4073_v29  ;;  %v4720_v37 = vpop.eup %4719  ;;  %v3218_v4 = vadd.f32 1.0, %v4718_v10  ;;  %v5776_v61 = vpop.f32.mrb[76].mxu0 }
 0x1ba   : > { %4737 = vpow2.f32 %v4076_v5  ;;  %v4279_v18 = vpop.f32.mrb[76].mxu1  ;;  %v4722_v3 = vpop.eup %4721  ;;  %v3216_v53 = vadd.f32 1.0, %v4720_v37 }
 0x1bb   : > { %4739 = vpow2.f32 %v4074_v34  ;;  %v2374_v49 = vadd.f32 %v4279_v18, %v1829_v46  ;;  %v1926_v54 = vpop.f32.mrb[77].mxu0  ;;  %v2365_v13 = vpop.f32.mrb[77].mxu1  ;;  %v3219_v0 = vadd.f32 1.0, %v4722_v3 }
 0x1bc   : > { %v4724_v19 = vpop.eup %4723  ;;  %4741 = vrcp.f32 %v3218_v4  ;;  %v2366_v31 = vadd.f32 %v2365_v13, %v1821_v16  ;;  %v5789_v23 = vpop.f32.mrb[78].mxu0  ;;  %v4707_v54 = vld [vmem:[%s5289_s28 + $0x468] ss:$12 sps:$4 sm:$0xff]  }
 0x1bd   : > { %v4280_v55 = vpop.f32.mrb[78].mxu1  ;;  %4743 = vrcp.f32 %v3216_v53  ;;  %v3217_v29 = vadd.f32 1.0, %v4724_v19  ;;  %v4079_v42 = vmul.f32 -1.442695, %v2374_v49  ;;  %v1929_v22 = vpop.f32.mrb[79].mxu0 }
 0x1be   : > { %v2368_v5 = vpop.f32.mrb[79].mxu1  ;;  %v4726_v41 = vpop.eup %4725  ;;  %4745 = vrcp.f32 %v3219_v0  ;;  %v4077_v34 = vmul.f32 -1.442695, %v2366_v31  ;;  %v2377_v10 = vadd.f32 %v4280_v55, %v1832_v15  ;;  %2139 = vmatmul.mubr.bf16.gmra.mrb[184].mxu0 %v4702_v28  ;;  %4386 = vmatmul.mubr.msk.bf16.gmra.mrb[184].mxu1 %vm1545_vm0, %v4703_v25  ;;  %v1837_v25 = vadd.f32 %v5712_v45, %v5599_v51  ;;  %v4708_v0 = vld [vmem:[%s5289_s28 + $0x5f0] ss:$12 sps:$4 sm:$0xff]  }
 0x1bf   : > { %v2369_v46 = vadd.f32 %v2368_v5, %v1824_v33  ;;  %v4728_v37 = vpop.eup %4727  ;;  %3599 = vst.msk [vmem:[%s5787_s8 + $0x10] sm:$0xff] %vm3596_vm1, %v4726_v41  ;;  %4747 = vrcp.f32 %v3217_v29  ;;  %2146 = vmatprep.mubr.bf16.mxu0 %v4704_v43  ;;  %4389 = vmatprep.mubr.msk.bf16.mxu1 %vm1545_vm0, %v4706_v7  ;;  %v1845_v33 = vadd.f32 %v5712_v45, %v5613_v9 }
 0x1c0   : > { %v4730_v16 = vpop.eup %4729  ;;  %3597 = vst.msk [vmem:[%s5787_s8] sm:$0xff] %vm3596_vm1, %v4728_v37  ;;  %4749 = vpow2.f32 %v4079_v42  ;;  %v4080_v4 = vmul.f32 -1.442695, %v2377_v10  ;;  %v1848_v55 = vadd.f32 %v5712_v45, %v5619_v21  ;;  %v1840_v5 = vadd.f32 %v5712_v45, %v5605_v59 }
 0x1c1   : > { %v4078_v18 = vmul.f32 -1.442695, %v2369_v46  ;;  %v4732_v3 = vpop.eup %4731  ;;  %3600 = vst.msk [vmem:[%s5787_s8 + $0x18] sm:$0xff] %vm3596_vm1, %v4730_v16  ;;  %4751 = vpow2.f32 %v4077_v34  ;;  %v5806_v53 = vpop.f32.mrb[80].mxu0 }
 0x1c2   : > { %v4734_v28 = vpop.eup %4733  ;;  %3598 = vst.msk [vmem:[%s5787_s8 + $0x8] sm:$0xff] %vm3596_vm1, %v4732_v3  ;;  %4753 = vpow2.f32 %v4080_v4  ;;  %v4283_v49 = vpop.f32.mrb[80].mxu1 }
 0x1c3   : > { %v4736_v13 = vpop.eup %4735  ;;  %v3222_v43 = vadd.f32 1.0, %v4734_v28  ;;  %4755 = vpow2.f32 %v4078_v18  ;;  %v2390_v19 = vadd.f32 %v4283_v49, %v1845_v33  ;;  %v1934_v9 = vpop.f32.mrb[81].mxu0 }
 0x1c4   : > { %v2381_v15 = vpop.f32.mrb[81].mxu1  ;;  %v4738_v31 = vpop.eup %4737  ;;  %v3220_v7 = vadd.f32 1.0, %v4736_v13 }
 0x1c5   : > { %v2382_v51 = vadd.f32 %v2381_v15, %v1837_v25  ;;  %v5812_v29 = vpop.f32.mrb[82].mxu0  ;;  %v4284_v42 = vpop.f32.mrb[82].mxu1  ;;  %4757 = vrcp.f32 %v3222_v43  ;;  %v3223_v41 = vadd.f32 1.0, %v4738_v31  ;;  %v4083_v34 = vmul.f32 -1.442695, %v2390_v19 }
 0x1c6   : > { %v4740_v22 = vpop.eup %4739  ;;  %v1937_v10 = vpop.f32.mrb[83].mxu0  ;;  %4759 = vrcp.f32 %v3220_v7  ;;  %v2393_v4 = vadd.f32 %v4284_v42, %v1848_v55  ;;  %2147 = vmatmul.mubr.bf16.gmra.mrb[188].mxu0 %v4707_v54  ;;  %4390 = vmatmul.mubr.msk.bf16.gmra.mrb[188].mxu1 %vm1545_vm0, %v4708_v0  ;;  %v1861_v25 = vadd.f32 %v5712_v45, %v5641_v63  ;;  %v1853_v43 = vadd.f32 %v5712_v45, %v5627_v35 }
 0x1c7   : > { %v2384_v46 = vpop.f32.mrb[83].mxu1  ;;  %v4742_v37 = vpop.eup %4741  ;;  %v3221_v21 = vadd.f32 1.0, %v4740_v22  ;;  %v4081_v16 = vmul.f32 -1.442695, %v2382_v51  ;;  %4761 = vrcp.f32 %v3223_v41  ;;  %v1864_v7 = vadd.f32 %v5712_v45, %v5647_v17 }
 0x1c8   : > { %v4744_v18 = vpop.eup %4743  ;;  %3603 = vst.msk [vmem:[%s5787_s8 + $0x30] sm:$0xff] %vm3596_vm1, %v4742_v37  ;;  %v2385_v3 = vadd.f32 %v2384_v46, %v1840_v5  ;;  %v4084_v33 = vmul.f32 -1.442695, %v2393_v4  ;;  %v1856_v41 = vadd.f32 %v5712_v45, %v5633_v47 }
 0x1c9   : > { %v4746_v59 = vpop.eup %4745  ;;  %3601 = vst.msk [vmem:[%s5787_s8 + $0x20] sm:$0xff] %vm3596_vm1, %v4744_v18  ;;  %4763 = vrcp.f32 %v3221_v21  ;;  %v5829_v54 = vpop.f32.mrb[84].mxu0 }
 0x1ca   : > { %v4748_v28 = vpop.eup %4747  ;;  %3604 = vst.msk [vmem:[%s5787_s8 + $0x38] sm:$0xff] %vm3596_vm1, %v4746_v59  ;;  %4765 = vpow2.f32 %v4083_v34  ;;  %v4082_v49 = vmul.f32 -1.442695, %v2385_v3  ;;  %v4287_v19 = vpop.f32.mrb[84].mxu1 }
 0x1cb   : > { %v4750_v13 = vpop.eup %4749  ;;  %3602 = vst.msk [vmem:[%s5787_s8 + $0x28] sm:$0xff] %vm3596_vm1, %v4748_v28  ;;  %4767 = vpow2.f32 %v4081_v16  ;;  %v2406_v0 = vadd.f32 %v4287_v19, %v1861_v25  ;;  %v1942_v31 = vpop.f32.mrb[85].mxu0 }
 0x1cc   : > { %v4752_v9 = vpop.eup %4751  ;;  %v3226_v15 = vadd.f32 1.0, %v4750_v13  ;;  %4769 = vpow2.f32 %v4084_v33  ;;  %v2397_v63 = vpop.f32.mrb[85].mxu1  ;;  %v1877_v33 = vadd.f32 %v5712_v45, %v5669_v27 }
 0x1cd   : > { %v4754_v55 = vpop.eup %4753  ;;  %v3224_v51 = vadd.f32 1.0, %v4752_v9  ;;  %4771 = vpow2.f32 %v4082_v49  ;;  %v2398_v42 = vadd.f32 %v2397_v63, %v1853_v43  ;;  %v5833_v35 = vpop.f32.mrb[86].mxu0  ;;  %v4087_v10 = vmul.f32 -1.442695, %v2406_v0 }
 0x1ce   : > { %v4288_v22 = vpop.f32.mrb[86].mxu1  ;;  %v4756_v5 = vpop.eup %4755  ;;  %4773 = vrcp.f32 %v3226_v15  ;;  %v3227_v34 = vadd.f32 1.0, %v4754_v55  ;;  %v1869_v49 = vadd.f32 %v5712_v45, %v5655_v39  ;;  %v1880_v9 = vadd.f32 %v5712_v45, %v5675_v58 }
 0x1cf   : > { %v1945_v46 = vpop.f32.mrb[87].mxu0  ;;  %v2400_v37 = vpop.f32.mrb[87].mxu1  ;;  %4775 = vrcp.f32 %v3224_v51  ;;  %v3225_v21 = vadd.f32 1.0, %v4756_v5  ;;  %v4085_v17 = vmul.f32 -1.442695, %v2398_v42  ;;  %v2409_v16 = vadd.f32 %v4288_v22, %v1864_v7 }
 0x1d0   : > { %v4758_v4 = vpop.eup %4757  ;;  %4777 = vrcp.f32 %v3227_v34  ;;  %v2401_v18 = vadd.f32 %v2400_v37, %v1856_v41  ;;  %v1872_v39 = vadd.f32 %v5712_v45, %v5661_v57 }
 0x1d1   : > { %v4760_v3 = vpop.eup %4759  ;;  %3607 = vst.msk [vmem:[%s5787_s8 + $0x50] sm:$0xff] %vm3596_vm1, %v4758_v4  ;;  %4779 = vrcp.f32 %v3225_v21  ;;  %v4088_v47 = vmul.f32 -1.442695, %v2409_v16  ;;  %v5847_v13 = vpop.f32.mrb[88].mxu0 }
 0x1d2   : > { %v4762_v59 = vpop.eup %4761  ;;  %3605 = vst.msk [vmem:[%s5787_s8 + $0x40] sm:$0xff] %vm3596_vm1, %v4760_v3  ;;  %4781 = vpow2.f32 %v4087_v10  ;;  %v4086_v28 = vmul.f32 -1.442695, %v2401_v18  ;;  %v4291_v43 = vpop.f32.mrb[88].mxu1  ;;  %v1893_v3 = vadd.f32 %v5712_v45, %v5697_v40 }
 0x1d3   : > { %v4764_v25 = vpop.eup %4763  ;;  %3608 = vst.msk [vmem:[%s5787_s8 + $0x58] sm:$0xff] %vm3596_vm1, %v4762_v59  ;;  %4783 = vpow2.f32 %v4085_v17  ;;  %v2422_v27 = vadd.f32 %v4291_v43, %v1877_v33  ;;  %v1950_v15 = vpop.f32.mrb[89].mxu0  ;;  %v1885_v33 = vadd.f32 %v5712_v45, %v5683_v12 }
 0x1d4   : > { %v4766_v19 = vpop.eup %4765  ;;  %3606 = vst.msk [vmem:[%s5787_s8 + $0x48] sm:$0xff] %vm3596_vm1, %v4764_v25  ;;  %4785 = vpow2.f32 %v4088_v47  ;;  %v2413_v0 = vpop.f32.mrb[89].mxu1 }
 0x1d5   : > { %v4768_v31 = vpop.eup %4767  ;;  %v3230_v63 = vadd.f32 1.0, %v4766_v19  ;;  %4787 = vpow2.f32 %v4086_v28  ;;  %v2414_v55 = vadd.f32 %v2413_v0, %v1869_v49  ;;  %v5855_v7 = vpop.f32.mrb[90].mxu0  ;;  %v4091_v46 = vmul.f32 -1.442695, %v2422_v27 }
 0x1d6   : > { %v4292_v51 = vpop.f32.mrb[90].mxu1  ;;  %v4770_v42 = vpop.eup %4769  ;;  %v3228_v22 = vadd.f32 1.0, %v4768_v31  ;;  %v1896_v27 = vadd.f32 %v5712_v45, %v5703_v36 }
 0x1d7   : > { %v2425_v58 = vadd.f32 %v4292_v51, %v1880_v9  ;;  %v1953_v5 = vpop.f32.mrb[91].mxu0  ;;  %v2416_v41 = vpop.f32.mrb[91].mxu1  ;;  %4789 = vrcp.f32 %v3230_v63  ;;  %v3231_v10 = vadd.f32 1.0, %v4770_v42  ;;  %v4089_v17 = vmul.f32 -1.442695, %v2414_v55 }
 0x1d8   : > { %v4772_v34 = vpop.eup %4771  ;;  %v2417_v37 = vadd.f32 %v2416_v41, %v1872_v39  ;;  %4791 = vrcp.f32 %v3228_v22  ;;  %v1888_v63 = vadd.f32 %v5712_v45, %v5689_v48 }
 0x1d9   : > { %v4774_v57 = vpop.eup %4773  ;;  %v3229_v21 = vadd.f32 1.0, %v4772_v34  ;;  %4793 = vrcp.f32 %v3231_v10  ;;  %v4092_v4 = vmul.f32 -1.442695, %v2425_v58  ;;  %v5867_v28 = vpop.f32.mrb[92].mxu0 }
 0x1da   : > { %v4776_v16 = vpop.eup %4775  ;;  %3611 = vst.msk [vmem:[%s5787_s8 + $0x70] sm:$0xff] %vm3596_vm1, %v4774_v57  ;;  %v4090_v47 = vmul.f32 -1.442695, %v2417_v37  ;;  %v4295_v25 = vpop.f32.mrb[92].mxu1  ;;  %v1909_v57 = vadd.f32 %v5712_v45, %v5738_v24 }
 0x1db   : > { %v4778_v18 = vpop.eup %4777  ;;  %3609 = vst.msk [vmem:[%s5787_s8 + $0x60] sm:$0xff] %vm3596_vm1, %v4776_v16  ;;  %4795 = vrcp.f32 %v3229_v21  ;;  %v2438_v43 = vadd.f32 %v4295_v25, %v1893_v3  ;;  %v1958_v40 = vpop.f32.mrb[93].mxu0  ;;  %v1901_v16 = vadd.f32 %v5712_v45, %v5720_v30  ;;  %v1904_v25 = vadd.f32 %v5712_v45, %v5728_v60 }
 0x1dc   : > { %v4780_v59 = vpop.eup %4779  ;;  %3612 = vst.msk [vmem:[%s5787_s8 + $0x78] sm:$0xff] %vm3596_vm1, %v4778_v18  ;;  %4797 = vpow2.f32 %v4091_v46  ;;  %v2429_v19 = vpop.f32.mrb[93].mxu1  ;;  %v1912_v30 = vadd.f32 %v5712_v45, %v5746_v11 }
 0x1dd   : > { %v4782_v49 = vpop.eup %4781  ;;  %3610 = vst.msk [vmem:[%s5787_s8 + $0x68] sm:$0xff] %vm3596_vm1, %v4780_v59  ;;  %4799 = vpow2.f32 %v4089_v17  ;;  %v2430_v12 = vadd.f32 %v2429_v19, %v1885_v33  ;;  %v5873_v0 = vpop.f32.mrb[94].mxu0  ;;  %v4095_v5 = vmul.f32 -1.442695, %v2438_v43 }
 0x1de   : > { %v4784_v9 = vpop.eup %4783  ;;  %v3234_v15 = vadd.f32 1.0, %v4782_v49  ;;  %4801 = vpow2.f32 %v4092_v4  ;;  %v4296_v31 = vpop.f32.mrb[94].mxu1 }
 0x1df   : > { %v4786_v39 = vpop.eup %4785  ;;  %v3232_v55 = vadd.f32 1.0, %v4784_v9  ;;  %4803 = vpow2.f32 %v4090_v47  ;;  %v1961_v51 = vpop.f32.mrb[95].mxu0  ;;  %v2441_v36 = vadd.f32 %v4296_v31, %v1896_v27  ;;  %v4093_v34 = vmul.f32 -1.442695, %v2430_v12 }
 0x1e0   : > { %v2432_v42 = vpop.f32.mrb[95].mxu1  ;;  %v4788_v22 = vpop.eup %4787  ;;  %4805 = vrcp.f32 %v3234_v15  ;;  %v3235_v58 = vadd.f32 1.0, %v4786_v39 }
 0x1e1   : > { %4807 = vrcp.f32 %v3232_v55  ;;  %v3233_v41 = vadd.f32 1.0, %v4788_v22  ;;  %v2433_v10 = vadd.f32 %v2432_v42, %v1888_v63  ;;  %v4790_v46 = vpop.eup %4789  ;;  %v4096_v37 = vmul.f32 -1.442695, %v2441_v36  ;;  %v5885_v4 = vpop.f32.mrb[96].mxu0 }
 0x1e2   : > { %4809 = vrcp.f32 %v3235_v58  ;;  %v4792_v48 = vpop.eup %4791  ;;  %3615 = vst.msk [vmem:[%s5787_s8 + $0x90] sm:$0xff] %vm3596_vm1, %v4790_v46  ;;  %v4299_v18 = vpop.f32.mrb[96].mxu1 }
 0x1e3   : > { %4811 = vrcp.f32 %v3233_v41  ;;  %v4094_v21 = vmul.f32 -1.442695, %v2433_v10  ;;  %v4794_v17 = vpop.eup %4793  ;;  %3613 = vst.msk [vmem:[%s5787_s8 + $0x80] sm:$0xff] %vm3596_vm1, %v4792_v48  ;;  %v2454_v24 = vadd.f32 %v4299_v18, %v1909_v57  ;;  %v1966_v47 = vpop.f32.mrb[97].mxu0 }
 0x1e4   : > { %4813 = vpow2.f32 %v4095_v5  ;;  %3616 = vst.msk [vmem:[%s5787_s8 + $0x98] sm:$0xff] %vm3596_vm1, %v4794_v17  ;;  %v2445_v59 = vpop.f32.mrb[97].mxu1  ;;  %v5895_v43 = vpop.f32.mrb[98].mxu0  ;;  %v1925_v5 = vadd.f32 %v5712_v45, %v5776_v61  ;;  %v1920_v47 = vadd.f32 %v5712_v45, %v5765_v1  ;;  %v1941_v1 = vadd.f32 %v5712_v45, %v5829_v54 }
 0x1e5   : > { %v4796_v3 = vpop.eup %4795  ;;  %4815 = vpow2.f32 %v4093_v34  ;;  %v2446_v49 = vadd.f32 %v2445_v59, %v1901_v16  ;;  %v4300_v40 = vpop.f32.mrb[98].mxu1  ;;  %v4099_v55 = vmul.f32 -1.442695, %v2454_v24  ;;  %v1917_v34 = vadd.f32 %v5712_v45, %v5757_v52 }
 0x1e6   : > { %v4798_v33 = vpop.eup %4797  ;;  %3614 = vst.msk [vmem:[%s5787_s8 + $0x88] sm:$0xff] %vm3596_vm1, %v4796_v3  ;;  %4817 = vpow2.f32 %v4096_v37  ;;  %v1969_v27 = vpop.f32.mrb[99].mxu0  ;;  %v2457_v39 = vadd.f32 %v4300_v40, %v1912_v30  ;;  %v1928_v16 = vadd.f32 %v5712_v45, %v5789_v23 }
 0x1e7   : > { %v4800_v19 = vpop.eup %4799  ;;  %v3238_v9 = vadd.f32 1.0, %v4798_v33  ;;  %4819 = vpow2.f32 %v4094_v21  ;;  %v2448_v15 = vpop.f32.mrb[99].mxu1  ;;  %v4097_v22 = vmul.f32 -1.442695, %v2446_v49 }
 0x1e8   : > { %v4802_v12 = vpop.eup %4801  ;;  %v3236_v31 = vadd.f32 1.0, %v4800_v19  ;;  %v2449_v60 = vadd.f32 %v2448_v15, %v1904_v25  ;;  %v4100_v36 = vmul.f32 -1.442695, %v2457_v39 }
 0x1e9   : > { %v4804_v63 = vpop.eup %4803  ;;  %4821 = vrcp.f32 %v3238_v9  ;;  %v3239_v11 = vadd.f32 1.0, %v4802_v12  ;;  %v5905_v46 = vpop.f32.mrb[100].mxu0 }
 0x1ea   : > { %v4806_v51 = vpop.eup %4805  ;;  %4823 = vrcp.f32 %v3236_v31  ;;  %v3237_v42 = vadd.f32 1.0, %v4804_v63  ;;  %v4098_v10 = vmul.f32 -1.442695, %v2449_v60  ;;  %v4303_v37 = vpop.f32.mrb[100].mxu1  ;;  %v1933_v63 = vadd.f32 %v5712_v45, %v5806_v53 }
 0x1eb   : > { %v4808_v58 = vpop.eup %4807  ;;  %3619 = vst.msk [vmem:[%s5787_s8 + $0xb0] sm:$0xff] %vm3596_vm1, %v4806_v51  ;;  %4825 = vrcp.f32 %v3239_v11  ;;  %v2470_v61 = vadd.f32 %v4303_v37, %v1925_v5  ;;  %v1974_v57 = vpop.f32.mrb[101].mxu0  ;;  %v1936_v53 = vadd.f32 %v5712_v45, %v5812_v29 }
 0x1ec   : > { %v4810_v41 = vpop.eup %4809  ;;  %3617 = vst.msk [vmem:[%s5787_s8 + $0xa0] sm:$0xff] %vm3596_vm1, %v4808_v58  ;;  %4827 = vrcp.f32 %v3237_v42  ;;  %v2461_v21 = vpop.f32.mrb[101].mxu1 }
 0x1ed   : > { %v4812_v48 = vpop.eup %4811  ;;  %3620 = vst.msk [vmem:[%s5787_s8 + $0xb8] sm:$0xff] %vm3596_vm1, %v4810_v41  ;;  %4829 = vpow2.f32 %v4099_v55  ;;  %v2462_v52 = vadd.f32 %v2461_v21, %v1917_v34  ;;  %v5913_v18 = vpop.f32.mrb[102].mxu0  ;;  %v4103_v9 = vmul.f32 -1.442695, %v2470_v61 }
 0x1ee   : > { %v4814_v17 = vpop.eup %4813  ;;  %3618 = vst.msk [vmem:[%s5787_s8 + $0xa8] sm:$0xff] %vm3596_vm1, %v4812_v48  ;;  %4831 = vpow2.f32 %v4097_v22  ;;  %v4304_v3 = vpop.f32.mrb[102].mxu1  ;;  %v1944_v22 = vadd.f32 %v5712_v45, %v5833_v35 }
 0x1ef   : > { %v4816_v24 = vpop.eup %4815  ;;  %v3242_v59 = vadd.f32 1.0, %v4814_v17  ;;  %4833 = vpow2.f32 %v4100_v36  ;;  %v1977_v33 = vpop.f32.mrb[103].mxu0  ;;  %v2473_v23 = vadd.f32 %v4304_v3, %v1928_v16  ;;  %v4101_v12 = vmul.f32 -1.442695, %v2462_v52 }
 0x1f0   : > { %v2464_v25 = vpop.f32.mrb[103].mxu1  ;;  %v4818_v30 = vpop.eup %4817  ;;  %v3240_v49 = vadd.f32 1.0, %v4816_v24  ;;  %4835 = vpow2.f32 %v4098_v10  ;;  %v1957_v33 = vadd.f32 %v5712_v45, %v5867_v28  ;;  %v1960_v28 = vadd.f32 %v5712_v45, %v5873_v0 }
 0x1f1   : > { %v4820_v40 = vpop.eup %4819  ;;  %4837 = vrcp.f32 %v3242_v59  ;;  %v3243_v19 = vadd.f32 1.0, %v4818_v30  ;;  %v2465_v27 = vadd.f32 %v2464_v25, %v1920_v47  ;;  %v4104_v39 = vmul.f32 -1.442695, %v2473_v23  ;;  %v5923_v55 = vpop.f32.mrb[104].mxu0 }
 0x1f2   : > { %4839 = vrcp.f32 %v3240_v49  ;;  %v3241_v15 = vadd.f32 1.0, %v4820_v40  ;;  %v4307_v51 = vpop.f32.mrb[104].mxu1  ;;  %v1982_v58 = vpop.f32.mrb[105].mxu0  ;;  %v1949_v23 = vadd.f32 %v5712_v45, %v5847_v13  ;;  %v1952_v13 = vadd.f32 %v5712_v45, %v5855_v7 }
 0x1f3   : > { %v4822_v31 = vpop.eup %4821  ;;  %4841 = vrcp.f32 %v3243_v19  ;;  %v4102_v11 = vmul.f32 -1.442695, %v2465_v27  ;;  %v2486_v54 = vadd.f32 %v4307_v51, %v1941_v1  ;;  %v2477_v5 = vpop.f32.mrb[105].mxu1 }
 0x1f4   : > { %v4824_v60 = vpop.eup %4823  ;;  %3623 = vst.msk [vmem:[%s5787_s8 + $0xd0] sm:$0xff] %vm3596_vm1, %v4822_v31  ;;  %4843 = vrcp.f32 %v3241_v15  ;;  %v2478_v41 = vadd.f32 %v2477_v5, %v1933_v63  ;;  %v5933_v34 = vpop.f32.mrb[106].mxu0 }
 0x1f5   : > { %v4826_v42 = vpop.eup %4825  ;;  %3621 = vst.msk [vmem:[%s5787_s8 + $0xc0] sm:$0xff] %vm3596_vm1, %v4824_v60  ;;  %4845 = vpow2.f32 %v4103_v9  ;;  %v4308_v10 = vpop.f32.mrb[106].mxu1  ;;  %v4107_v35 = vmul.f32 -1.442695, %v2486_v54 }
 0x1f6   : > { %v4828_v36 = vpop.eup %4827  ;;  %3624 = vst.msk [vmem:[%s5787_s8 + $0xd8] sm:$0xff] %vm3596_vm1, %v4826_v42  ;;  %4847 = vpow2.f32 %v4101_v12  ;;  %v2489_v48 = vadd.f32 %v4308_v10, %v1944_v22  ;;  %v1985_v61 = vpop.f32.mrb[107].mxu0  ;;  %v4105_v47 = vmul.f32 -1.442695, %v2478_v41 }
 0x1f7   : > { %v4830_v37 = vpop.eup %4829  ;;  %3622 = vst.msk [vmem:[%s5787_s8 + $0xc8] sm:$0xff] %vm3596_vm1, %v4828_v36  ;;  %4849 = vpow2.f32 %v4104_v39  ;;  %v2480_v57 = vpop.f32.mrb[107].mxu1 }
 0x1f8   : > { %v4832_v21 = vpop.eup %4831  ;;  %v3246_v17 = vadd.f32 1.0, %v4830_v37  ;;  %4851 = vpow2.f32 %v4102_v11  ;;  %v2481_v29 = vadd.f32 %v2480_v57, %v1936_v53  ;;  %v4108_v30 = vmul.f32 -1.442695, %v2489_v48  ;;  %v5962_v57 = vld [vmem:[%s6446_s2] ss:$0 sm:$0xff] }
 0x1f9   : > { %v4834_v16 = vpop.eup %4833  ;;  %v3244_v52 = vadd.f32 1.0, %v4832_v21  ;;  %4853 = vpow2.f32 %v4107_v35  ;;  %v5943_v19 = vpop.f32.mrb[108].mxu0  ;;  %v1973_v37 = vadd.f32 %v5712_v45, %v5905_v46  ;;  %v1965_v21 = vadd.f32 %v5962_v57, %v5885_v4 }
 0x1fa   : > { %v4836_v3 = vpop.eup %4835  ;;  %4855 = vrcp.f32 %v3246_v17  ;;  %v3247_v24 = vadd.f32 1.0, %v4834_v16  ;;  %v4106_v40 = vmul.f32 -1.442695, %v2481_v29  ;;  %v4311_v9 = vpop.f32.mrb[108].mxu1  ;;  %v1976_v46 = vadd.f32 %v5962_v57, %v5913_v18 }
 0x1fb   : > { %v4838_v59 = vpop.eup %4837  ;;  %4857 = vrcp.f32 %v3244_v52  ;;  %v3245_v25 = vadd.f32 1.0, %v4836_v3  ;;  %v2502_v15 = vadd.f32 %v4311_v9, %v1957_v33  ;;  %v1990_v12 = vpop.f32.mrb[109].mxu0  ;;  %v1968_v33 = vadd.f32 %v5962_v57, %v5895_v43 }
 0x1fc   : > { %v4840_v49 = vpop.eup %4839  ;;  %3627 = vst.msk [vmem:[%s5787_s8 + $0xf0] sm:$0xff] %vm3596_vm1, %v4838_v59  ;;  %4859 = vrcp.f32 %v3247_v24  ;;  %v2493_v31 = vpop.f32.mrb[109].mxu1 }
 0x1fd   : > { %v4842_v27 = vpop.eup %4841  ;;  %3625 = vst.msk [vmem:[%s5787_s8 + $0xe0] sm:$0xff] %vm3596_vm1, %v4840_v49  ;;  %4861 = vrcp.f32 %v3245_v25  ;;  %v2494_v39 = vadd.f32 %v2493_v31, %v1949_v23  ;;  %v5953_v60 = vpop.f32.mrb[110].mxu0  ;;  %v4111_v0 = vmul.f32 -1.442695, %v2502_v15 }
 0x1fe   : > { %v4844_v1 = vpop.eup %4843  ;;  %3628 = vst.msk [vmem:[%s5787_s8 + $0xf8] sm:$0xff] %vm3596_vm1, %v4842_v27  ;;  %4863 = vpow2.f32 %v4105_v47  ;;  %v4312_v63 = vpop.f32.mrb[110].mxu1 }
 0x1ff   : > { %v4846_v11 = vpop.eup %4845  ;;  %3626 = vst.msk [vmem:[%s5787_s8 + $0xe8] sm:$0xff] %vm3596_vm1, %v4844_v1  ;;  %4865 = vpow2.f32 %v4108_v30  ;;  %v2505_v51 = vadd.f32 %v4312_v63, %v1960_v28  ;;  %v1993_v42 = vpop.f32.mrb[111].mxu0  ;;  %v4109_v48 = vmul.f32 -1.442695, %v2494_v39  ;;  %v1989_v63 = vadd.f32 %v5962_v57, %v5943_v19 }
 0x200   : > { %v2496_v22 = vpop.f32.mrb[111].mxu1  ;;  %v4848_v54 = vpop.eup %4847  ;;  %v3250_v58 = vadd.f32 1.0, %v4846_v11  ;;  %4867 = vpow2.f32 %v4106_v40 }
 0x201   : > { %v2497_v5 = vadd.f32 %v2496_v22, %v1952_v13  ;;  %v4850_v7 = vpop.eup %4849  ;;  %v3248_v36 = vadd.f32 1.0, %v4848_v54  ;;  %4869 = vpow2.f32 %v4111_v0  ;;  %v4112_v29 = vmul.f32 -1.442695, %v2505_v51  ;;  %v5966_v16 = vpop.f32.mrb[112].mxu0 }
 0x202   : > { %v4852_v53 = vpop.eup %4851  ;;  %4871 = vrcp.f32 %v3250_v58  ;;  %v3251_v41 = vadd.f32 1.0, %v4850_v7  ;;  %v4315_v52 = vpop.f32.mrb[112].mxu1  ;;  %v1981_v51 = vadd.f32 %v5962_v57, %v5923_v55  ;;  %v1992_v7 = vadd.f32 %v5962_v57, %v5953_v60 }
 0x203   : > { %v4854_v10 = vpop.eup %4853  ;;  %4873 = vrcp.f32 %v3248_v36  ;;  %v3249_v35 = vadd.f32 1.0, %v4852_v53  ;;  %v4110_v3 = vmul.f32 -1.442695, %v2497_v5  ;;  %v2518_v24 = vadd.f32 %v4315_v52, %v1973_v37  ;;  %v1998_v47 = vpop.f32.mrb[113].mxu0 }
 0x204   : > { %v4856_v61 = vpop.eup %4855  ;;  %4875 = vrcp.f32 %v3251_v41  ;;  %v3254_v17 = vadd.f32 1.0, %v4854_v10  ;;  %v2509_v59 = vpop.f32.mrb[113].mxu1  ;;  %v1984_v55 = vadd.f32 %v5962_v57, %v5933_v34 }
 0x205   : > { %v4858_v45 = vpop.eup %4857  ;;  %3631 = vst.msk [vmem:[%s5787_s8 + $0x110] sm:$0xff] %vm3596_vm1, %v4856_v61  ;;  %4877 = vrcp.f32 %v3249_v35  ;;  %v2510_v25 = vadd.f32 %v2509_v59, %v1965_v21  ;;  %v5976_v30 = vpop.f32.mrb[114].mxu0  ;;  %v4115_v18 = vmul.f32 -1.442695, %v2518_v24 }
 0x206   : > { %v4860_v4 = vpop.eup %4859  ;;  %3629 = vst.msk [vmem:[%s5787_s8 + $0x100] sm:$0xff] %vm3596_vm1, %v4858_v45  ;;  %4879 = vrcp.f32 %v3254_v17  ;;  %v4316_v49 = vpop.f32.mrb[114].mxu1 }
 0x207   : > { %v4862_v23 = vpop.eup %4861  ;;  %3632 = vst.msk [vmem:[%s5787_s8 + $0x118] sm:$0xff] %vm3596_vm1, %v4860_v4  ;;  %4881 = vpow2.f32 %v4109_v48  ;;  %v2521_v40 = vadd.f32 %v4316_v49, %v1976_v46  ;;  %v2001_v9 = vpop.f32.mrb[115].mxu0  ;;  %v4113_v11 = vmul.f32 -1.442695, %v2510_v25  ;;  %v1997_v4 = vadd.f32 %v5962_v57, %v5966_v16 }
 0x208   : > { %v2512_v27 = vpop.f32.mrb[115].mxu1  ;;  %v4864_v28 = vpop.eup %4863  ;;  %3630 = vst.msk [vmem:[%s5787_s8 + $0x108] sm:$0xff] %vm3596_vm1, %v4862_v23  ;;  %4883 = vpow2.f32 %v4112_v29 }
 0x209   : > { %v2513_v15 = vadd.f32 %v2512_v27, %v1968_v33  ;;  %v4866_v12 = vpop.eup %4865  ;;  %v3252_v43 = vadd.f32 1.0, %v4864_v28  ;;  %4885 = vpow2.f32 %v4110_v3  ;;  %v4116_v22 = vmul.f32 -1.442695, %v2521_v40  ;;  %v2004_v54 = vpop.f32.mrb[116].mxu0 }
 0x20a   : > { %v4868_v31 = vpop.eup %4867  ;;  %v3255_v1 = vadd.f32 1.0, %v4866_v12  ;;  %4887 = vpow2.f32 %v4115_v18  ;;  %v4319_v58 = vpop.f32.mrb[116].mxu1  ;;  %v2005_v33 = vadd.f32 %v5962_v57, %v2004_v54 }
 0x20b   : > { %v4870_v13 = vpop.eup %4869  ;;  %4889 = vrcp.f32 %v3252_v43  ;;  %v3253_v39 = vadd.f32 1.0, %v4868_v31  ;;  %v4114_v19 = vmul.f32 -1.442695, %v2513_v15  ;;  %v2534_v36 = vadd.f32 %v4319_v58, %v1989_v63  ;;  %v2006_v53 = vpop.f32.mrb[117].mxu0 }
 0x20c   : > { %v4872_v0 = vpop.eup %4871  ;;  %4891 = vrcp.f32 %v3255_v1  ;;  %v3258_v42 = vadd.f32 1.0, %v4870_v13  ;;  %v2525_v41 = vpop.f32.mrb[117].mxu1  ;;  %v2000_v1 = vadd.f32 %v5962_v57, %v5976_v30 }
 0x20d   : > { %v4874_v5 = vpop.eup %4873  ;;  %3635 = vst.msk [vmem:[%s5787_s8 + $0x130] sm:$0xff] %vm3596_vm1, %v4872_v0  ;;  %4893 = vrcp.f32 %v3253_v39  ;;  %v2526_v37 = vadd.f32 %v2525_v41, %v1981_v51  ;;  %v2007_v35 = vpop.f32.mrb[118].mxu0  ;;  %v4119_v60 = vmul.f32 -1.442695, %v2534_v36 }
 0x20e   : > { %v4876_v10 = vpop.eup %4875  ;;  %3633 = vst.msk [vmem:[%s5787_s8 + $0x120] sm:$0xff] %vm3596_vm1, %v4874_v5  ;;  %4895 = vrcp.f32 %v3258_v42  ;;  %v4320_v48 = vpop.f32.mrb[118].mxu1  ;;  %v2008_v23 = vadd.f32 %v5962_v57, %v2007_v35 }
 0x20f   : > { %v4878_v61 = vpop.eup %4877  ;;  %3636 = vst.msk [vmem:[%s5787_s8 + $0x138] sm:$0xff] %vm3596_vm1, %v4876_v10  ;;  %4897 = vpow2.f32 %v4113_v11  ;;  %v2537_v21 = vadd.f32 %v4320_v48, %v1992_v7  ;;  %v2009_v17 = vpop.f32.mrb[119].mxu0  ;;  %v4117_v45 = vmul.f32 -1.442695, %v2526_v37 }
 0x210   : > { %v2528_v29 = vpop.f32.mrb[119].mxu1  ;;  %v4880_v52 = vpop.eup %4879  ;;  %3634 = vst.msk [vmem:[%s5787_s8 + $0x128] sm:$0xff] %vm3596_vm1, %v4878_v61  ;;  %4899 = vpow2.f32 %v4116_v22 }
 0x211   : > { %v2529_v46 = vadd.f32 %v2528_v29, %v1984_v55  ;;  %v4882_v34 = vpop.eup %4881  ;;  %3639 = vst.msk [vmem:[%s5787_s8 + $0x150] sm:$0xff] %vm3596_vm1, %v4880_v52  ;;  %4901 = vpow2.f32 %v4114_v19  ;;  %v4120_v18 = vmul.f32 -1.442695, %v2537_v21  ;;  %v2012_v40 = vpop.f32.mrb[120].mxu0 }
 0x212   : > { %v4884_v3 = vpop.eup %4883  ;;  %v3256_v24 = vadd.f32 1.0, %v4882_v34  ;;  %4903 = vpow2.f32 %v4119_v60  ;;  %v4323_v9 = vpop.f32.mrb[120].mxu1  ;;  %v2013_v55 = vadd.f32 %v5962_v57, %v2012_v40 }
 0x213   : > { %v4886_v47 = vpop.eup %4885  ;;  %v3259_v59 = vadd.f32 1.0, %v4884_v3  ;;  %4905 = vpow2.f32 %v4117_v45  ;;  %v4118_v15 = vmul.f32 -1.442695, %v2529_v46  ;;  %v2550_v12 = vadd.f32 %v4323_v9, %v2005_v33  ;;  %v2014_v43 = vpop.f32.mrb[121].mxu0 }
 0x214   : > { %v4888_v25 = vpop.eup %4887  ;;  %4907 = vrcp.f32 %v3256_v24  ;;  %v3257_v49 = vadd.f32 1.0, %v4886_v47  ;;  %v2541_v16 = vpop.f32.mrb[121].mxu1 }
 0x215   : > { %v4890_v27 = vpop.eup %4889  ;;  %4909 = vrcp.f32 %v3259_v59  ;;  %v3262_v28 = vadd.f32 1.0, %v4888_v25  ;;  %v2542_v13 = vadd.f32 %v2541_v16, %v1997_v4  ;;  %v2015_v39 = vpop.f32.mrb[122].mxu0  ;;  %v4123_v0 = vmul.f32 -1.442695, %v2550_v12 }
 0x216   : > { %v4892_v31 = vpop.eup %4891  ;;  %3637 = vst.msk [vmem:[%s5787_s8 + $0x140] sm:$0xff] %vm3596_vm1, %v4890_v27  ;;  %4911 = vrcp.f32 %v3257_v49  ;;  %v4324_v63 = vpop.f32.mrb[122].mxu1  ;;  %v2016_v37 = vadd.f32 %v5962_v57, %v2015_v39 }
 0x217   : > { %v4894_v11 = vpop.eup %4893  ;;  %3640 = vst.msk [vmem:[%s5787_s8 + $0x158] sm:$0xff] %vm3596_vm1, %v4892_v31  ;;  %4913 = vrcp.f32 %v3262_v28  ;;  %v2553_v51 = vadd.f32 %v4324_v63, %v2008_v23  ;;  %v2017_v42 = vpop.f32.mrb[123].mxu0  ;;  %v4121_v58 = vmul.f32 -1.442695, %v2542_v13 }
 0x218   : > { %v2544_v22 = vpop.f32.mrb[123].mxu1  ;;  %v4896_v54 = vpop.eup %4895  ;;  %3638 = vst.msk [vmem:[%s5787_s8 + $0x148] sm:$0xff] %vm3596_vm1, %v4894_v11  ;;  %4915 = vpow2.f32 %v4120_v18 }
 0x219   : > { %v2545_v5 = vadd.f32 %v2544_v22, %v2000_v1  ;;  %v4898_v7 = vpop.eup %4897  ;;  %3643 = vst.msk [vmem:[%s5787_s8 + $0x170] sm:$0xff] %vm3596_vm1, %v4896_v54  ;;  %4917 = vpow2.f32 %v4118_v15  ;;  %v2020_v35 = vpop.f32.mrb[124].mxu0  ;;  %v4124_v21 = vmul.f32 -1.442695, %v2553_v51 }
 0x21a   : > { %v4900_v30 = vpop.eup %4899  ;;  %v3260_v19 = vadd.f32 1.0, %v4898_v7  ;;  %4919 = vpow2.f32 %v4123_v0  ;;  %v4327_v48 = vpop.f32.mrb[124].mxu1  ;;  %v2021_v17 = vadd.f32 %v5962_v57, %v2020_v35 }
 0x21b   : > { %v4902_v36 = vpop.eup %4901  ;;  %v3263_v53 = vadd.f32 1.0, %v4900_v30  ;;  %4921 = vpow2.f32 %v4121_v58  ;;  %v2022_v29 = vpop.f32.mrb[125].mxu0  ;;  %v4122_v34 = vmul.f32 -1.442695, %v2545_v5 }
 0x21c   : > { %v4904_v41 = vpop.eup %4903  ;;  %4923 = vrcp.f32 %v3260_v19  ;;  %v3261_v10 = vadd.f32 1.0, %v4902_v36  ;;  %v2557_v52 = vpop.f32.mrb[125].mxu1  ;;  %v2566_v4 = vadd.f32 %v4327_v48, %v2021_v17 }
 0x21d   : > { %v4906_v61 = vpop.eup %4905  ;;  %4925 = vrcp.f32 %v3263_v53  ;;  %v3266_v60 = vadd.f32 1.0, %v4904_v41  ;;  %v2558_v3 = vadd.f32 %v2557_v52, %v2013_v55  ;;  %v2023_v24 = vpop.f32.mrb[126].mxu0 }
 0x21e   : > { %v4908_v45 = vpop.eup %4907  ;;  %4927 = vrcp.f32 %v3261_v10  ;;  %v3264_v46 = vadd.f32 1.0, %v4906_v61  ;;  %v4328_v47 = vpop.f32.mrb[126].mxu1  ;;  %v2024_v33 = vadd.f32 %v5962_v57, %v2023_v24  ;;  %v4127_v27 = vmul.f32 -1.442695, %v2566_v4 }
 0x21f   : > { %v4910_v59 = vpop.eup %4909  ;;  %3641 = vst.msk [vmem:[%s5787_s8 + $0x160] sm:$0xff] %vm3596_vm1, %v4908_v45  ;;  %4929 = vrcp.f32 %v3266_v60  ;;  %v2025_v25 = vpop.f32.mrb[127].mxu0  ;;  %v4125_v18 = vmul.f32 -1.442695, %v2558_v3 }
 0x220   : > { %v2560_v49 = vpop.f32.mrb[127].mxu1  ;;  %v4912_v23 = vpop.eup %4911  ;;  %3644 = vst.msk [vmem:[%s5787_s8 + $0x178] sm:$0xff] %vm3596_vm1, %v4910_v59  ;;  %4931 = vrcp.f32 %v3264_v46  ;;  %v2569_v28 = vadd.f32 %v4328_v47, %v2024_v33 }
 0x221   : > { %v2561_v40 = vadd.f32 %v2560_v49, %v2016_v37  ;;  %v4914_v9 = vpop.eup %4913  ;;  %3642 = vst.msk [vmem:[%s5787_s8 + $0x168] sm:$0xff] %vm3596_vm1, %v4912_v23  ;;  %4933 = vpow2.f32 %v4124_v21  ;;  %v2028_v1 = vpop.f32.mrb[128].mxu0 }
 0x222   : > { %v4916_v15 = vpop.eup %4915  ;;  %3647 = vst.msk [vmem:[%s5787_s8 + $0x190] sm:$0xff] %vm3596_vm1, %v4914_v9  ;;  %4935 = vpow2.f32 %v4122_v34  ;;  %v4331_v13 = vpop.f32.mrb[128].mxu1  ;;  %v4128_v11 = vmul.f32 -1.442695, %v2569_v28  ;;  %v2029_v0 = vadd.f32 %v5962_v57, %v2028_v1 }
 0x223   : > { %v4918_v12 = vpop.eup %4917  ;;  %v3267_v43 = vadd.f32 1.0, %v4916_v15  ;;  %4937 = vpow2.f32 %v4127_v27  ;;  %v2030_v51 = vpop.f32.mrb[129].mxu0  ;;  %v4126_v58 = vmul.f32 -1.442695, %v2561_v40 }
 0x224   : > { %v4920_v16 = vpop.eup %4919  ;;  %v3265_v31 = vadd.f32 1.0, %v4918_v12  ;;  %4939 = vpow2.f32 %v4125_v18  ;;  %v2573_v42 = vpop.f32.mrb[129].mxu1 }
 0x225   : > { %v4922_v39 = vpop.eup %4921  ;;  %4941 = vrcp.f32 %v3267_v43  ;;  %v3270_v63 = vadd.f32 1.0, %v4920_v16  ;;  %v2031_v5 = vpop.f32.mrb[130].mxu0  ;;  %v2574_v19 = vadd.f32 %v2573_v42, %v2029_v0 }
 0x226   : > { %v4924_v22 = vpop.eup %4923  ;;  %4943 = vrcp.f32 %v3265_v31  ;;  %v3268_v54 = vadd.f32 1.0, %v4922_v39  ;;  %v4332_v7 = vpop.f32.mrb[130].mxu1  ;;  %v2032_v36 = vadd.f32 %v5962_v57, %v2031_v5 }
 0x227   : > { %v4926_v30 = vpop.eup %4925  ;;  %3645 = vst.msk [vmem:[%s5787_s8 + $0x180] sm:$0xff] %vm3596_vm1, %v4924_v22  ;;  %4945 = vrcp.f32 %v3270_v63  ;;  %v2033_v53 = vpop.f32.mrb[131].mxu0  ;;  %v4129_v37 = vmul.f32 -1.442695, %v2574_v19 }
 0x228   : > { %v2576_v41 = vpop.f32.mrb[131].mxu1  ;;  %v4928_v10 = vpop.eup %4927  ;;  %3648 = vst.msk [vmem:[%s5787_s8 + $0x198] sm:$0xff] %vm3596_vm1, %v4926_v30  ;;  %4947 = vrcp.f32 %v3268_v54 }
 0x229   : > { %v4930_v55 = vpop.eup %4929  ;;  %3646 = vst.msk [vmem:[%s5787_s8 + $0x188] sm:$0xff] %vm3596_vm1, %v4928_v10  ;;  %4949 = vpow2.f32 %v4128_v11  ;;  %v2577_v35 = vadd.f32 %v2576_v41, %v2032_v36  ;;  %v2036_v29 = vpop.f32.mrb[132].mxu0 }
 0x22a   : > { %v4932_v48 = vpop.eup %4931  ;;  %3651 = vst.msk [vmem:[%s5787_s8 + $0x1b0] sm:$0xff] %vm3596_vm1, %v4930_v55  ;;  %4951 = vpow2.f32 %v4126_v58  ;;  %v6038_v52 = vpop.f32.mrb[132].mxu1  ;;  %v2037_v34 = vadd.f32 %v5962_v57, %v2036_v29 }
 0x22b   : > { %v4934_v61 = vpop.eup %4933  ;;  %3649 = vst.msk [vmem:[%s5787_s8 + $0x1a0] sm:$0xff] %vm3596_vm1, %v4932_v48  ;;  %4953 = vpow2.f32 %v4129_v37  ;;  %v4130_v60 = vmul.f32 -1.442695, %v2577_v35  ;;  %v2038_v3 = vpop.f32.mrb[133].mxu0 }
 0x22c   : > { %v4936_v21 = vpop.eup %4935  ;;  %v3271_v17 = vadd.f32 1.0, %v4934_v61  ;;  %v2589_v24 = vpop.f32.mrb[133].mxu1  ;;  %v2582_v23 = vadd.f32 %v4331_v13, %v2037_v34 }
 0x22d   : > { %v4938_v45 = vpop.eup %4937  ;;  %v3269_v46 = vadd.f32 1.0, %v4936_v21  ;;  %4955 = vpow2.f32 %v4130_v60  ;;  %v2039_v4 = vpop.f32.mrb[134].mxu0 }
 0x22e   : > { %v4940_v47 = vpop.eup %4939  ;;  %4957 = vrcp.f32 %v3271_v17  ;;  %v3274_v59 = vadd.f32 1.0, %v4938_v45  ;;  %v6041_v33 = vpop.f32.mrb[134].mxu1  ;;  %v2040_v18 = vadd.f32 %v5962_v57, %v2039_v4  ;;  %v4131_v15 = vmul.f32 -1.442695, %v2582_v23 }
 0x22f   : > { %v4942_v25 = vpop.eup %4941  ;;  %4959 = vrcp.f32 %v3269_v46  ;;  %v3272_v49 = vadd.f32 1.0, %v4940_v47  ;;  %v2041_v40 = vpop.f32.mrb[135].mxu0 }
 0x230   : > { %v2592_v9 = vpop.f32.mrb[135].mxu1  ;;  %v4944_v27 = vpop.eup %4943  ;;  %3652 = vst.msk [vmem:[%s5787_s8 + $0x1b8] sm:$0xff] %vm3596_vm1, %v4942_v25  ;;  %4961 = vrcp.f32 %v3274_v59  ;;  %v2585_v12 = vadd.f32 %v4332_v7, %v2040_v18 }
 0x231   : > { %v4946_v28 = vpop.eup %4945  ;;  %3650 = vst.msk [vmem:[%s5787_s8 + $0x1a8] sm:$0xff] %vm3596_vm1, %v4944_v27  ;;  %4963 = vrcp.f32 %v3272_v49  ;;  %v2044_v39 = vpop.f32.mrb[136].mxu0 }
 0x232   : > { %v4948_v43 = vpop.eup %4947  ;;  %3655 = vst.msk [vmem:[%s5787_s8 + $0x1d0] sm:$0xff] %vm3596_vm1, %v4946_v28  ;;  %4965 = vpow2.f32 %v4131_v15  ;;  %v4132_v31 = vmul.f32 -1.442695, %v2585_v12  ;;  %v6052_v63 = vpop.f32.mrb[136].mxu1  ;;  %v2045_v51 = vadd.f32 %v5962_v57, %v2044_v39 }
 0x233   : > { %v4950_v16 = vpop.eup %4949  ;;  %3653 = vst.msk [vmem:[%s5787_s8 + $0x1c0] sm:$0xff] %vm3596_vm1, %v4948_v43  ;;  %v2046_v42 = vpop.f32.mrb[137].mxu0 }
 0x234   : > { %v4952_v1 = vpop.eup %4951  ;;  %v3275_v13 = vadd.f32 1.0, %v4950_v16  ;;  %4967 = vpow2.f32 %v4132_v31  ;;  %v6055_v22 = vpop.f32.mrb[137].mxu1  ;;  %v2590_v30 = vadd.f32 %v2589_v24, %v2045_v51 }
 0x235   : > { %v4954_v11 = vpop.eup %4953  ;;  %v3273_v0 = vadd.f32 1.0, %v4952_v1  ;;  %v2047_v58 = vpop.f32.mrb[138].mxu0 }
 0x236   : > { %4969 = vrcp.f32 %v3275_v13  ;;  %v3276_v54 = vadd.f32 1.0, %v4954_v11  ;;  %v6057_v5 = vpop.f32.mrb[138].mxu1  ;;  %v2048_v19 = vadd.f32 %v5962_v57, %v2047_v58  ;;  %v2049_v36 = vpop.f32.mrb[139].mxu0  ;;  %v4133_v37 = vmul.f32 -1.442695, %v2590_v30 }
 0x237   : > { %v4956_v7 = vpop.eup %4955  ;;  %4971 = vrcp.f32 %v3273_v0  ;;  %v6060_v53 = vpop.f32.mrb[139].mxu1 }
 0x238   : > { %v4958_v41 = vpop.eup %4957  ;;  %4973 = vrcp.f32 %v3276_v54  ;;  %v3277_v10 = vadd.f32 1.0, %v4956_v7  ;;  %v2593_v35 = vadd.f32 %v2592_v9, %v2048_v19 }
 0x239   : > { %v4960_v55 = vpop.eup %4959  ;;  %3656 = vst.msk [vmem:[%s5787_s8 + $0x1d8] sm:$0xff] %vm3596_vm1, %v4958_v41  ;;  %v2052_v21 = vpop.f32.mrb[140].mxu0 }
 0x23a   : > { %v4962_v48 = vpop.eup %4961  ;;  %3654 = vst.msk [vmem:[%s5787_s8 + $0x1c8] sm:$0xff] %vm3596_vm1, %v4960_v55  ;;  %4975 = vrcp.f32 %v3277_v10  ;;  %v4134_v60 = vmul.f32 -1.442695, %v2593_v35  ;;  %v6070_v17 = vpop.f32.mrb[140].mxu1  ;;  %v2053_v45 = vadd.f32 %v5962_v57, %v2052_v21 }
 0x23b   : > { %v4964_v61 = vpop.eup %4963  ;;  %3659 = vst.msk [vmem:[%s5787_s8 + $0x1f0] sm:$0xff] %vm3596_vm1, %v4962_v48  ;;  %4977 = vpow2.f32 %v4133_v37  ;;  %v2054_v46 = vpop.f32.mrb[141].mxu0 }
 0x23c   : > { %3657 = vst.msk [vmem:[%s5787_s8 + $0x1e0] sm:$0xff] %vm3596_vm1, %v4964_v61  ;;  %v4966_v29 = vpop.eup %4965  ;;  %4979 = vpow2.f32 %v4134_v60  ;;  %v6073_v34 = vpop.f32.mrb[141].mxu1  ;;  %v2598_v4 = vadd.f32 %v6038_v52, %v2053_v45 }
 0x23d   : > { %v3278_v3 = vadd.f32 1.0, %v4966_v29  ;;  %v2055_v24 = vpop.f32.mrb[142].mxu0  ;;  %v6075_v47 = vpop.f32.mrb[142].mxu1 }
 0x23e   : > { %v4968_v59 = vpop.eup %4967  ;;  %v2056_v25 = vadd.f32 %v5962_v57, %v2055_v24  ;;  %v2057_v49 = vpop.f32.mrb[143].mxu0  ;;  %v4135_v27 = vmul.f32 -1.442695, %v2598_v4 }
 0x23f   : > { %v6079_v23 = vpop.f32.mrb[143].mxu1  ;;  %4981 = vrcp.f32 %v3278_v3  ;;  %v3279_v40 = vadd.f32 1.0, %v4968_v59 }
 0x240   : > { %v4970_v18 = vpop.eup %4969  ;;  %v2601_v28 = vadd.f32 %v6041_v33, %v2056_v25 }
 0x241   : > { %v4972_v9 = vpop.eup %4971  ;;  %3660 = vst.msk [vmem:[%s5787_s8 + $0x1f8] sm:$0xff] %vm3596_vm1, %v4970_v18  ;;  %4983 = vrcp.f32 %v3279_v40  ;;  %v2060_v43 = vpop.f32.mrb[144].mxu0 }
 0x242   : > { %v4974_v15 = vpop.eup %4973  ;;  %3658 = vst.msk [vmem:[%s5787_s8 + $0x1e8] sm:$0xff] %vm3596_vm1, %v4972_v9  ;;  %4985 = vpow2.f32 %v4135_v27  ;;  %v4136_v52 = vmul.f32 -1.442695, %v2601_v28  ;;  %v6088_v16 = vpop.f32.mrb[144].mxu1  ;;  %v2061_v1 = vadd.f32 %v5962_v57, %v2060_v43 }
 0x243   : > { %3661 = vst.msk [vmem:[%s5787_s8 + $0x200] sm:$0xff] %vm3596_vm1, %v4974_v15  ;;  %v2062_v13 = vpop.f32.mrb[145].mxu0  ;;  %v6093_v33 = vpop.f32.mrb[145].mxu1 }
 0x244   : > { %v4976_v12 = vpop.eup %4975  ;;  %4987 = vpow2.f32 %v4136_v52  ;;  %v2063_v11 = vpop.f32.mrb[146].mxu0  ;;  %v2606_v42 = vadd.f32 %v6055_v22, %v2061_v1 }
 0x245   : > { %v4978_v31 = vpop.eup %4977  ;;  %3662 = vst.msk [vmem:[%s5787_s8 + $0x208] sm:$0xff] %vm3596_vm1, %v4976_v12  ;;  %v6095_v0 = vpop.f32.mrb[146].mxu1  ;;  %v2064_v54 = vadd.f32 %v5962_v57, %v2063_v11 }
 0x246   : > { %v3280_v39 = vadd.f32 1.0, %v4978_v31  ;;  %v4980_v51 = vpop.eup %4979  ;;  %v2065_v58 = vpop.f32.mrb[147].mxu0  ;;  %v4137_v19 = vmul.f32 -1.442695, %v2606_v42 }
 0x247   : > { %v6099_v7 = vpop.f32.mrb[147].mxu1  ;;  %v3281_v30 = vadd.f32 1.0, %v4980_v51  ;;  %v2609_v36 = vadd.f32 %v6060_v53, %v2064_v54 }
 0x248   : > { %4989 = vrcp.f32 %v3280_v39 }
 0x249   : > { %v4982_v41 = vpop.eup %4981  ;;  %4991 = vrcp.f32 %v3281_v30  ;;  %v4138_v10 = vmul.f32 -1.442695, %v2609_v36  ;;  %v2068_v37 = vpop.f32.mrb[148].mxu0 }
 0x24a   : > { %3663 = vst.msk [vmem:[%s5787_s8 + $0x210] sm:$0xff] %vm3596_vm1, %v4982_v41  ;;  %4993 = vpow2.f32 %v4137_v19  ;;  %v6104_v22 = vpop.f32.mrb[148].mxu1  ;;  %v2069_v48 = vadd.f32 %v5962_v57, %v2068_v37  ;;  %v2070_v61 = vpop.f32.mrb[149].mxu0 }
 0x24b   : > { %v4984_v55 = vpop.eup %4983  ;;  %4995 = vpow2.f32 %v4138_v10  ;;  %v6109_v60 = vpop.f32.mrb[149].mxu1 }
 0x24c   : > { %v4986_v35 = vpop.eup %4985  ;;  %3664 = vst.msk [vmem:[%s5787_s8 + $0x218] sm:$0xff] %vm3596_vm1, %v4984_v55  ;;  %v2071_v21 = vpop.f32.mrb[150].mxu0  ;;  %v2614_v46 = vadd.f32 %v6052_v63, %v2069_v48 }
 0x24d   : > { %v3282_v53 = vadd.f32 1.0, %v4986_v35  ;;  %v6111_v29 = vpop.f32.mrb[150].mxu1  ;;  %v2072_v3 = vadd.f32 %v5962_v57, %v2071_v21  ;;  %v2073_v24 = vpop.f32.mrb[151].mxu0 }
 0x24e   : > { %v4988_v45 = vpop.eup %4987  ;;  %v6115_v59 = vpop.f32.mrb[151].mxu1  ;;  %v4139_v25 = vmul.f32 -1.442695, %v2614_v46 }
 0x24f   : > { %4997 = vrcp.f32 %v3282_v53  ;;  %v3283_v4 = vadd.f32 1.0, %v4988_v45  ;;  %v2617_v49 = vadd.f32 %v6057_v5, %v2072_v3 }
 0x251   : > { %4999 = vrcp.f32 %v3283_v4  ;;  %v4140_v40 = vmul.f32 -1.442695, %v2617_v49  ;;  %v2076_v27 = vpop.f32.mrb[152].mxu0  ;;  %v6120_v63 = vpop.f32.mrb[152].mxu1 }
 0x252   : > { %v4990_v18 = vpop.eup %4989  ;;  %5001 = vpow2.f32 %v4139_v25  ;;  %v2077_v15 = vadd.f32 %v5962_v57, %v2076_v27  ;;  %v2078_v52 = vpop.f32.mrb[153].mxu0 }
 0x253   : > { %3665 = vst.msk [vmem:[%s5787_s8 + $0x220] sm:$0xff] %vm3596_vm1, %v4990_v18  ;;  %v4992_v9 = vpop.eup %4991  ;;  %5003 = vpow2.f32 %v4140_v40  ;;  %v6125_v12 = vpop.f32.mrb[153].mxu1  ;;  %v2165_v18 = vadd.f32 %v5962_v57, %v5503_v14  ;;  %v2168_v52 = vadd.f32 %v5962_v57, %v5509_v20 }
 0x254   : > { %v4994_v28 = vpop.eup %4993  ;;  %3666 = vst.msk [vmem:[%s5787_s8 + $0x228] sm:$0xff] %vm3596_vm1, %v4992_v9  ;;  %v2079_v43 = vpop.f32.mrb[154].mxu0  ;;  %v2622_v13 = vadd.f32 %v6073_v34, %v2077_v15  ;;  %v2157_v9 = vadd.f32 %v5962_v57, %v5489_v2 }
 0x255   : > { %v3284_v5 = vadd.f32 1.0, %v4994_v28  ;;  %v6127_v31 = vpop.f32.mrb[154].mxu1  ;;  %v4996_v1 = vpop.eup %4995  ;;  %v2080_v39 = vadd.f32 %v5962_v57, %v2079_v43 }
 0x256   : > { %v2081_v11 = vpop.f32.mrb[155].mxu0  ;;  %v6131_v51 = vpop.f32.mrb[155].mxu1  ;;  %v3285_v42 = vadd.f32 1.0, %v4996_v1  ;;  %v4141_v54 = vmul.f32 -1.442695, %v2622_v13  ;;  %v2160_v1 = vadd.f32 %v5962_v57, %v5495_v8 }
 0x257   : > { %5005 = vrcp.f32 %v3284_v5  ;;  %v2625_v58 = vadd.f32 %v6079_v23, %v2080_v39 }
 0x258   : > { %5007 = vrcp.f32 %v3285_v42 }
 0x259   : > { %v4998_v30 = vpop.eup %4997  ;;  %5009 = vpow2.f32 %v4141_v54  ;;  %v4142_v19 = vmul.f32 -1.442695, %v2625_v58  ;;  %v2084_v41 = vpop.f32.mrb[156].mxu0 }
 0x25a   : > { %3667 = vst.msk [vmem:[%s5787_s8 + $0x230] sm:$0xff] %vm3596_vm1, %v4998_v30  ;;  %v6136_v34 = vpop.f32.mrb[156].mxu1  ;;  %v2085_v55 = vadd.f32 %v5962_v57, %v2084_v41  ;;  %v2086_v37 = vpop.f32.mrb[157].mxu0 }
 0x25b   : > { %v5000_v36 = vpop.eup %4999  ;;  %5011 = vpow2.f32 %v4142_v19  ;;  %v6141_v35 = vpop.f32.mrb[157].mxu1 }
 0x25c   : > { %v5002_v10 = vpop.eup %5001  ;;  %3668 = vst.msk [vmem:[%s5787_s8 + $0x238] sm:$0xff] %vm3596_vm1, %v5000_v36  ;;  %v2087_v48 = vpop.f32.mrb[158].mxu0  ;;  %v2630_v21 = vadd.f32 %v6070_v17, %v2085_v55 }
 0x25d   : > { %v3286_v23 = vadd.f32 1.0, %v5002_v10  ;;  %v6143_v61 = vpop.f32.mrb[158].mxu1  ;;  %v5004_v53 = vpop.eup %5003  ;;  %v2088_v45 = vadd.f32 %v5962_v57, %v2087_v48 }
 0x25e   : > { %v2089_v46 = vpop.f32.mrb[159].mxu0  ;;  %v6147_v3 = vpop.f32.mrb[159].mxu1  ;;  %v3287_v24 = vadd.f32 1.0, %v5004_v53  ;;  %v4143_v4 = vmul.f32 -1.442695, %v2630_v21 }
 0x25f   : > { %5013 = vrcp.f32 %v3286_v23  ;;  %v2633_v25 = vadd.f32 %v6075_v47, %v2088_v45  ;;  %v2173_v46 = vadd.f32 %v5962_v57, %v5517_v26 }
 0x260   : > { %5015 = vrcp.f32 %v3287_v24 }
 0x261   : > { %v5006_v49 = vpop.eup %5005  ;;  %5017 = vpow2.f32 %v4143_v4  ;;  %v4144_v17 = vmul.f32 -1.442695, %v2633_v25  ;;  %v2092_v27 = vpop.f32.mrb[160].mxu0  ;;  %v2176_v25 = vadd.f32 %v5962_v57, %v5523_v32 }
 0x262   : > { %3669 = vst.msk [vmem:[%s5787_s8 + $0x240] sm:$0xff] %vm3596_vm1, %v5006_v49  ;;  %v5008_v40 = vpop.eup %5007  ;;  %v4363_v28 = vpop.f32.mrb[160].mxu1  ;;  %v2093_v47 = vadd.f32 %v5962_v57, %v2092_v27 }
 0x263   : > { %v5010_v15 = vpop.eup %5009  ;;  %3670 = vst.msk [vmem:[%s5787_s8 + $0x248] sm:$0xff] %vm3596_vm1, %v5008_v40  ;;  %5019 = vpow2.f32 %v4144_v17  ;;  %v2710_v14 = vadd.f32 %v4363_v28, %v2165_v18  ;;  %v2094_v5 = vpop.f32.mrb[161].mxu0  ;;  %v2184_v40 = vadd.f32 %v5962_v57, %v5537_v44 }
 0x264   : > { %v2701_v43 = vpop.f32.mrb[161].mxu1  ;;  %v3288_v13 = vadd.f32 1.0, %v5010_v15  ;;  %v2095_v2 = vpop.f32.mrb[162].mxu0  ;;  %v2638_v54 = vadd.f32 %v6093_v33, %v2093_v47  ;;  %v2181_v33 = vadd.f32 %v5962_v57, %v5531_v38 }
 0x265   : > { %v2702_v39 = vadd.f32 %v2701_v43, %v2157_v9  ;;  %v4364_v11 = vpop.f32.mrb[162].mxu1  ;;  %v5012_v42 = vpop.eup %5011  ;;  %v4163_v58 = vmul.f32 -1.442695, %v2710_v14  ;;  %v2096_v20 = vadd.f32 %v5962_v57, %v2095_v2 }
 0x266   : > { %v2713_v30 = vadd.f32 %v4364_v11, %v2168_v52  ;;  %v2097_v19 = vpop.f32.mrb[163].mxu0  ;;  %v2704_v36 = vpop.f32.mrb[163].mxu1  ;;  %5021 = vrcp.f32 %v3288_v13  ;;  %v3289_v41 = vadd.f32 1.0, %v5012_v42  ;;  %v4145_v37 = vmul.f32 -1.442695, %v2638_v54 }
 0x267   : > { %v4161_v10 = vmul.f32 -1.442695, %v2702_v39  ;;  %v2705_v55 = vadd.f32 %v2704_v36, %v2160_v1  ;;  %5023 = vpow2.f32 %v4163_v58  ;;  %v2641_v8 = vadd.f32 %v6099_v7, %v2096_v20 }
 0x268   : > { %5025 = vrcp.f32 %v3289_v41  ;;  %v4164_v48 = vmul.f32 -1.442695, %v2713_v30  ;;  %v2189_v30 = vadd.f32 %v5962_v57, %v5545_v50 }
 0x269   : > { %v5014_v23 = vpop.eup %5013  ;;  %5027 = vpow2.f32 %v4145_v37  ;;  %v4146_v53 = vmul.f32 -1.442695, %v2641_v8  ;;  %v4162_v21 = vmul.f32 -1.442695, %v2705_v55  ;;  %v2100_v24 = vpop.f32.mrb[164].mxu0 }
 0x26a   : > { %3671 = vst.msk [vmem:[%s5787_s8 + $0x250] sm:$0xff] %vm3596_vm1, %v5014_v23  ;;  %v5016_v45 = vpop.eup %5015  ;;  %5029 = vpow2.f32 %v4161_v10  ;;  %v4367_v4 = vpop.f32.mrb[164].mxu1  ;;  %v2101_v38 = vadd.f32 %v5962_v57, %v2100_v24 }
 0x26b   : > { %v5018_v7 = vpop.eup %5017  ;;  %3672 = vst.msk [vmem:[%s5787_s8 + $0x258] sm:$0xff] %vm3596_vm1, %v5016_v45  ;;  %5031 = vpow2.f32 %v4146_v53  ;;  %v2726_v49 = vadd.f32 %v4367_v4, %v2181_v33  ;;  %v2102_v18 = vpop.f32.mrb[165].mxu0 }
 0x26c   : > { %v2717_v17 = vpop.f32.mrb[165].mxu1  ;;  %v3290_v9 = vadd.f32 1.0, %v5018_v7  ;;  %5033 = vpow2.f32 %v4164_v48  ;;  %v2103_v27 = vpop.f32.mrb[166].mxu0  ;;  %v2646_v32 = vadd.f32 %v6088_v16, %v2101_v38  ;;  %v2197_v16 = vadd.f32 %v5962_v57, %v5559_v62 }
 0x26d   : > { %v2718_v26 = vadd.f32 %v2717_v17, %v2173_v46  ;;  %v4368_v28 = vpop.f32.mrb[166].mxu1  ;;  %v5020_v15 = vpop.eup %5019  ;;  %5035 = vpow2.f32 %v4162_v21  ;;  %v4167_v52 = vmul.f32 -1.442695, %v2726_v49  ;;  %v2104_v47 = vadd.f32 %v5962_v57, %v2103_v27  ;;  %v6196_v21 = vld [vmem:[%s6446_s2] ss:$0 sm:$0xff] }
 0x26e   : > { %v2105_v14 = vpop.f32.mrb[167].mxu0  ;;  %v2720_v5 = vpop.f32.mrb[167].mxu1  ;;  %5037 = vrcp.f32 %v3290_v9  ;;  %v3291_v43 = vadd.f32 1.0, %v5020_v15  ;;  %v2729_v13 = vadd.f32 %v4368_v28, %v2184_v40  ;;  %v4147_v44 = vmul.f32 -1.442695, %v2646_v32  ;;  %v6468_v32 = vld [vmem:[#allocation4_spill] sm:$0xff] }
 0x26f   : > { %v4165_v1 = vmul.f32 -1.442695, %v2718_v26  ;;  %5039 = vpow2.f32 %v4167_v52  ;;  %v2649_v39 = vadd.f32 %v6095_v0, %v2104_v47  ;;  %v2721_v2 = vadd.f32 %v2720_v5, %v2176_v25 }
 0x270   : > { %v5022_v11 = vpop.eup %5021  ;;  %5041 = vrcp.f32 %v3291_v43  ;;  %v4168_v58 = vmul.f32 -1.442695, %v2729_v13  ;;  %v2200_v45 = vadd.f32 %v6196_v21, %v5565_v6  ;;  %v2192_v25 = vadd.f32 %v6196_v21, %v5551_v56  ;;  %v6469_v43 = vld [vmem:[#allocation2_spill] sm:$0xff]  ;;  %v6470_v13 = vld [vmem:[#allocation5_spill] sm:$0xff] }
 0x271   : > { %v5024_v42 = vpop.eup %5023  ;;  %3673 = vst.msk [vmem:[%s5787_s8 + $0x260] sm:$0xff] %vm3596_vm1, %v5022_v11  ;;  %5043 = vpow2.f32 %v4147_v44  ;;  %v4148_v54 = vmul.f32 -1.442695, %v2649_v39  ;;  %v2108_v0 = vpop.f32.mrb[168].mxu0  ;;  %v4166_v40 = vmul.f32 -1.442695, %v2721_v2  ;;  %v2213_v52 = vadd.f32 %v6196_v21, %v6468_v32 }
 0x272   : > { %v5026_v20 = vpop.eup %5025  ;;  %v3310_v19 = vadd.f32 1.0, %v5024_v42  ;;  %5045 = vpow2.f32 %v4165_v1  ;;  %v4371_v36 = vpop.f32.mrb[168].mxu1  ;;  %v2109_v10 = vadd.f32 %v5962_v57, %v2108_v0  ;;  %v2205_v1 = vadd.f32 %v6196_v21, %v6469_v43 }
 0x273   : > { %v5028_v41 = vpop.eup %5027  ;;  %3674 = vst.msk [vmem:[%s5787_s8 + $0x268] sm:$0xff] %vm3596_vm1, %v5026_v20  ;;  %5047 = vpow2.f32 %v4148_v54  ;;  %v2742_v62 = vadd.f32 %v4371_v36, %v2197_v16  ;;  %v2110_v55 = vpop.f32.mrb[169].mxu0 }
 0x274   : > { %v2733_v37 = vpop.f32.mrb[169].mxu1  ;;  %v5030_v8 = vpop.eup %5029  ;;  %v3292_v23 = vadd.f32 1.0, %v5028_v41  ;;  %5049 = vrcp.f32 %v3310_v19  ;;  %v2654_v46 = vadd.f32 %v6109_v60, %v2109_v10 }
 0x275   : > { %v6191_v48 = vadd.f32 %v2733_v37, %v2189_v30  ;;  %v2111_v33 = vpop.f32.mrb[170].mxu0  ;;  %v4372_v50 = vpop.f32.mrb[170].mxu1  ;;  %v3308_v57 = vadd.f32 1.0, %v5030_v8  ;;  %5051 = vpow2.f32 %v4168_v58  ;;  %v4171_v16 = vmul.f32 -1.442695, %v2742_v62  ;;  %v6471_v37 = vld [vmem:[#allocation3_spill] sm:$0xff] }
 0x276   : > { %v5032_v53 = vpop.eup %5031  ;;  %v2113_v24 = vpop.f32.mrb[171].mxu0  ;;  %5053 = vrcp.f32 %v3292_v23  ;;  %v2112_v49 = vadd.f32 %v6196_v21, %v2111_v33  ;;  %v2745_v6 = vadd.f32 %v4372_v50, %v2200_v45  ;;  %v4149_v56 = vmul.f32 -1.442695, %v2654_v46 }
 0x277   : > { %v2736_v4 = vpop.f32.mrb[171].mxu1  ;;  %v5034_v7 = vpop.eup %5033  ;;  %v3293_v38 = vadd.f32 1.0, %v5032_v53  ;;  %5055 = vrcp.f32 %v3308_v57  ;;  %v2208_v8 = vadd.f32 %v6196_v21, %v6471_v37 }
 0x278   : > { %v5036_v18 = vpop.eup %5035  ;;  %v3311_v17 = vadd.f32 1.0, %v5034_v7  ;;  %v2657_v26 = vadd.f32 %v6115_v59, %v2112_v49  ;;  %v2737_v27 = vadd.f32 %v2736_v4, %v2192_v25  ;;  %v2216_v59 = vadd.f32 %v6196_v21, %v6470_v13  ;;  %v6472_v25 = vld [vmem:[#allocation8_spill] sm:$0xff] }
 0x279   : > { %v5038_v9 = vpop.eup %5037  ;;  %5057 = vrcp.f32 %v3293_v38  ;;  %v3309_v60 = vadd.f32 1.0, %v5036_v18  ;;  %v2116_v14 = vpop.f32.mrb[172].mxu0  ;;  %v2229_v38 = vadd.f32 %v6196_v21, %v6472_v25  ;;  %v4172_v49 = vmul.f32 -1.442695, %v2745_v6 }
 0x27a   : > { %v5040_v28 = vpop.eup %5039  ;;  %3675 = vst.msk [vmem:[%s5787_s8 + $0x270] sm:$0xff] %vm3596_vm1, %v5038_v9  ;;  %5059 = vrcp.f32 %v3311_v17  ;;  %v2117_v44 = vadd.f32 %v6196_v21, %v2116_v14  ;;  %v4375_v39 = vpop.f32.mrb[172].mxu1  ;;  %v4150_v53 = vmul.f32 -1.442695, %v2657_v26  ;;  %v6475_v14 = vld [vmem:[#allocation9_spill] sm:$0xff] }
 0x27b   : > { %v5042_v15 = vpop.eup %5041  ;;  %5061 = vrcp.f32 %v3309_v60  ;;  %v3314_v47 = vadd.f32 1.0, %v5040_v28  ;;  %v2118_v2 = vpop.f32.mrb[173].mxu0  ;;  %v2758_v54 = vadd.f32 %v4375_v39, %v2213_v52  ;;  %v6474_v52 = vld [vmem:[#allocation7_spill] sm:$0xff] }
 0x27c   : > { %v5044_v5 = vpop.eup %5043  ;;  %3676 = vst.msk [vmem:[%s5787_s8 + $0x278] sm:$0xff] %vm3596_vm1, %v5042_v15  ;;  %5063 = vpow2.f32 %v4166_v40  ;;  %v2749_v58 = vpop.f32.mrb[173].mxu1  ;;  %v2662_v0 = vadd.f32 %v6104_v22, %v2117_v44  ;;  %v4169_v22 = vmul.f32 -1.442695, %v6191_v48  ;;  %v6473_v48 = vld [vmem:[#allocation6_spill] sm:$0xff] }
 0x27d   : > { %v5046_v11 = vpop.eup %5045  ;;  %v3294_v42 = vadd.f32 1.0, %v5044_v5  ;;  %5065 = vrcp.f32 %v3314_v47  ;;  %v2119_v20 = vpop.f32.mrb[174].mxu0  ;;  %v2750_v36 = vadd.f32 %v2749_v58, %v2205_v1  ;;  %v2221_v17 = vadd.f32 %v6196_v21, %v6473_v48 }
 0x27e   : > { %v5048_v30 = vpop.eup %5047  ;;  %v3312_v19 = vadd.f32 1.0, %v5046_v11  ;;  %5067 = vpow2.f32 %v4149_v56  ;;  %v4376_v41 = vpop.f32.mrb[174].mxu1  ;;  %v2120_v62 = vadd.f32 %v6196_v21, %v2119_v20  ;;  %v4170_v40 = vmul.f32 -1.442695, %v2737_v27 }
 0x27f   : > { %v2121_v10 = vpop.f32.mrb[175].mxu0  ;;  %v5050_v55 = vpop.eup %5049  ;;  %5069 = vrcp.f32 %v3294_v42  ;;  %v3295_v23 = vadd.f32 1.0, %v5048_v30  ;;  %v2761_v45 = vadd.f32 %v4376_v41, %v2216_v59  ;;  %v4151_v26 = vmul.f32 -1.442695, %v2662_v0 }
 0x280   : > { %v2752_v33 = vpop.f32.mrb[175].mxu1  ;;  %v5052_v50 = vpop.eup %5051  ;;  %3695 = vst.msk [vmem:[%s5787_s8 + $0x310] sm:$0xff] %vm3596_vm1, %v5050_v55  ;;  %5071 = vrcp.f32 %v3312_v19  ;;  %v2665_v24 = vadd.f32 %v6111_v29, %v2120_v62  ;;  %v2224_v47 = vadd.f32 %v6196_v21, %v6474_v52  ;;  %v2232_v27 = vadd.f32 %v6196_v21, %v6475_v14  ;;  %v6476_v55 = vld [vmem:[#allocation12_spill] sm:$0xff] }
 0x281   : > { %v5054_v57 = vpop.eup %5053  ;;  %5073 = vrcp.f32 %v3295_v23  ;;  %v3315_v46 = vadd.f32 1.0, %v5052_v50  ;;  %v6224_v4 = vadd.f32 %v2752_v33, %v2208_v8  ;;  %v2124_v29 = vpop.f32.mrb[176].mxu0  ;;  %v4175_v59 = vmul.f32 -1.442695, %v2758_v54 }
 0x282   : > { %v5056_v7 = vpop.eup %5055  ;;  %3677 = vst.msk [vmem:[%s5787_s8 + $0x280] sm:$0xff] %vm3596_vm1, %v5054_v57  ;;  %5075 = vpow2.f32 %v4171_v16  ;;  %v4379_v9 = vpop.f32.mrb[176].mxu1  ;;  %v2125_v28 = vadd.f32 %v6196_v21, %v2124_v29  ;;  %v4173_v30 = vmul.f32 -1.442695, %v2750_v36  ;;  %v4152_v41 = vmul.f32 -1.442695, %v2665_v24 }
 0x283   : > { %v5058_v18 = vpop.eup %5057  ;;  %3693 = vst.msk [vmem:[%s5787_s8 + $0x300] sm:$0xff] %vm3596_vm1, %v5056_v7  ;;  %5077 = vrcp.f32 %v3315_v46  ;;  %v6237_v6 = vadd.f32 %v4379_v9, %v2229_v38  ;;  %v2126_v56 = vpop.f32.mrb[177].mxu0  ;;  %v2245_v37 = vadd.f32 %v6196_v21, %v6476_v55  ;;  %v4176_v8 = vmul.f32 -1.442695, %v2761_v45  ;;  %v6477_v36 = vld [vmem:[#allocation10_spill] sm:$0xff]  ;;  %v6478_v7 = vld [vmem:[#allocation13_spill] sm:$0xff] }
 0x284   : > { %v5060_v60 = vpop.eup %5059  ;;  %3678 = vst.msk [vmem:[%s5787_s8 + $0x288] sm:$0xff] %vm3596_vm1, %v5058_v18  ;;  %5079 = vpow2.f32 %v4169_v22  ;;  %v2765_v15 = vpop.f32.mrb[177].mxu1  ;;  %v6250_v44 = vadd.f32 %v6125_v12, %v2125_v28  ;;  %v4174_v22 = vmul.f32 -1.442695, %v6224_v4  ;;  %v2248_v25 = vadd.f32 %v6196_v21, %v6478_v7 }
 0x285   : > { %v5062_v32 = vpop.eup %5061  ;;  %3696 = vst.msk [vmem:[%s5787_s8 + $0x318] sm:$0xff] %vm3596_vm1, %v5060_v60  ;;  %5081 = vpow2.f32 %v4150_v53  ;;  %v6245_v5 = vadd.f32 %v2765_v15, %v2221_v17  ;;  %v2127_v43 = vpop.f32.mrb[178].mxu0 }
 0x286   : > { %v4380_v1 = vpop.f32.mrb[178].mxu1  ;;  %v5064_v13 = vpop.eup %5063  ;;  %3694 = vst.msk [vmem:[%s5787_s8 + $0x308] sm:$0xff] %vm3596_vm1, %v5062_v32  ;;  %5083 = vpow2.f32 %v4172_v49  ;;  %v2128_v39 = vadd.f32 %v6196_v21, %v2127_v43 }
 0x287   : > { %v2129_v2 = vpop.f32.mrb[179].mxu0  ;;  %v2768_v11 = vpop.f32.mrb[179].mxu1  ;;  %v3313_v16 = vadd.f32 1.0, %v5064_v13  ;;  %5085 = vpow2.f32 %v4170_v40  ;;  %v6253_v58 = vadd.f32 %v4380_v1, %v2232_v27  ;;  %v6480_v1 = vld [vmem:[#allocation16_spill] sm:$0xff] }
 0x288   : > { %v5066_v42 = vpop.eup %5065  ;;  %5087 = vpow2.f32 %v4151_v26  ;;  %v6258_v54 = vadd.f32 %v6131_v51, %v2128_v39  ;;  %v6260_v12 = vadd.f32 %v2768_v11, %v2224_v47  ;;  %v2237_v51 = vadd.f32 %v6196_v21, %v6477_v36  ;;  %v6479_v26 = vld [vmem:[#allocation11_spill] sm:$0xff]  ;;  %v6481_v11 = vld [vmem:[#allocation14_spill] sm:$0xff] }
 0x289   : > { %v5068_v20 = vpop.eup %5067  ;;  %3699 = vst.msk [vmem:[%s5787_s8 + $0x330] sm:$0xff] %vm3596_vm1, %v5066_v42  ;;  %5089 = vrcp.f32 %v3313_v16  ;;  %v2132_v62 = vpop.f32.mrb[180].mxu0  ;;  %v2240_v28 = vadd.f32 %v6196_v21, %v6479_v26  ;;  %v2261_v13 = vadd.f32 %v6196_v21, %v6480_v1  ;;  %v4153_v39 = vmul.f32 -1.442695, %v6250_v44 }
 0x28a   : > { %v5070_v19 = vpop.eup %5069  ;;  %v3296_v0 = vadd.f32 1.0, %v5068_v20  ;;  %5091 = vpow2.f32 %v4175_v59  ;;  %v4383_v33 = vpop.f32.mrb[180].mxu1  ;;  %v2133_v53 = vadd.f32 %v6196_v21, %v2132_v62  ;;  %v2253_v42 = vadd.f32 %v6196_v21, %v6481_v11 }
 0x28b   : > { %v5072_v10 = vpop.eup %5071  ;;  %3679 = vst.msk [vmem:[%s5787_s8 + $0x290] sm:$0xff] %vm3596_vm1, %v5070_v19  ;;  %v6274_v57 = vadd.f32 %v4383_v33, %v2245_v37  ;;  %v2134_v45 = vpop.f32.mrb[181].mxu0  ;;  %v4179_v19 = vmul.f32 -1.442695, %v6237_v6  ;;  %v6482_v37 = vld [vmem:[#allocation17_spill] sm:$0xff] }
 0x28c   : > { %v5074_v23 = vpop.eup %5073  ;;  %3697 = vst.msk [vmem:[%s5787_s8 + $0x320] sm:$0xff] %vm3596_vm1, %v5072_v10  ;;  %5093 = vrcp.f32 %v3296_v0  ;;  %v2781_v46 = vpop.f32.mrb[181].mxu1  ;;  %v6283_v4 = vadd.f32 %v6120_v63, %v2133_v53 }
 0x28d   : > { %v5076_v50 = vpop.eup %5075  ;;  %3680 = vst.msk [vmem:[%s5787_s8 + $0x298] sm:$0xff] %vm3596_vm1, %v5074_v23  ;;  %5095 = vpow2.f32 %v4173_v30  ;;  %v6278_v49 = vadd.f32 %v2781_v46, %v2237_v51  ;;  %v2135_v18 = vpop.f32.mrb[182].mxu0  ;;  %v6483_v46 = vld [vmem:[#allocation15_spill] sm:$0xff] }
 0x28e   : > { %v5078_v24 = vpop.eup %5077  ;;  %v3318_v38 = vadd.f32 1.0, %v5076_v50  ;;  %5097 = vpow2.f32 %v4152_v41  ;;  %v4384_v48 = vpop.f32.mrb[182].mxu1  ;;  %v2136_v40 = vadd.f32 %v6196_v21, %v2135_v18 }
 0x28f   : > { %v5080_v17 = vpop.eup %5079  ;;  %3700 = vst.msk [vmem:[%s5787_s8 + $0x338] sm:$0xff] %vm3596_vm1, %v5078_v24  ;;  %5099 = vpow2.f32 %v4176_v8  ;;  %v2137_v29 = vpop.f32.mrb[183].mxu0  ;;  %v6288_v15 = vadd.f32 %v4384_v48, %v2248_v25  ;;  %v2264_v8 = vadd.f32 %v6196_v21, %v6482_v37  ;;  %v2256_v24 = vadd.f32 %v6196_v21, %v6483_v46 }
 0x290   : > { %v2784_v9 = vpop.f32.mrb[183].mxu1  ;;  %v5082_v60 = vpop.eup %5081  ;;  %5101 = vrcp.f32 %v3318_v38  ;;  %v3316_v56 = vadd.f32 1.0, %v5080_v17  ;;  %v6291_v47 = vadd.f32 %v6127_v31, %v2136_v40  ;;  %v4177_v48 = vmul.f32 -1.442695, %v6245_v5 }
 0x291   : > { %v5084_v32 = vpop.eup %5083  ;;  %v3297_v52 = vadd.f32 1.0, %v5082_v60  ;;  %5103 = vpow2.f32 %v4174_v22  ;;  %v6293_v27 = vadd.f32 %v2784_v9, %v2240_v28  ;;  %v2140_v16 = vpop.f32.mrb[184].mxu0  ;;  %v6484_v60 = vld [vmem:[#allocation18_spill] sm:$0xff]  ;;  %v6485_v28 = vld [vmem:[#allocation20_spill] sm:$0xff]  ;;  %v4154_v5 = vmul.f32 -1.442695, %v6258_v54 }
 0x292   : > { %v5086_v63 = vpop.eup %5085  ;;  %5105 = vrcp.f32 %v3316_v56  ;;  %v3319_v14 = vadd.f32 1.0, %v5084_v32  ;;  %v4387_v20 = vpop.f32.mrb[184].mxu1  ;;  %v2141_v0 = vadd.f32 %v6196_v21, %v2140_v16  ;;  %v2269_v26 = vadd.f32 %v6196_v21, %v6484_v60  ;;  %v6486_v32 = vld [vmem:[#allocation19_spill] sm:$0xff] }
 0x293   : > { %v5088_v43 = vpop.eup %5087  ;;  %5107 = vrcp.f32 %v3297_v52  ;;  %v3317_v59 = vadd.f32 1.0, %v5086_v63  ;;  %v6304_v41 = vadd.f32 %v4387_v20, %v2261_v13  ;;  %v2142_v44 = vpop.f32.mrb[185].mxu0  ;;  %v2277_v56 = vadd.f32 %v6196_v21, %v6485_v28 }
 0x294   : > { %v5090_v2 = vpop.eup %5089  ;;  %5109 = vrcp.f32 %v3319_v14  ;;  %v3298_v31 = vadd.f32 1.0, %v5088_v43  ;;  %v2797_v10 = vpop.f32.mrb[185].mxu1  ;;  %v6313_v6 = vadd.f32 %v6141_v35, %v2141_v0  ;;  %v2272_v52 = vadd.f32 %v6196_v21, %v6486_v32 }
 0x295   : > { %v5092_v30 = vpop.eup %5091  ;;  %3698 = vst.msk [vmem:[%s5787_s8 + $0x328] sm:$0xff] %vm3596_vm1, %v5090_v2  ;;  %5111 = vrcp.f32 %v3317_v59  ;;  %v6308_v36 = vadd.f32 %v2797_v10, %v2253_v42  ;;  %v2143_v51 = vpop.f32.mrb[186].mxu0  ;;  %v4180_v14 = vmul.f32 -1.442695, %v6253_v58  ;;  %v4178_v59 = vmul.f32 -1.442695, %v6260_v12 }
 0x296   : > { %v5094_v55 = vpop.eup %5093  ;;  %5113 = vrcp.f32 %v3298_v31  ;;  %v3322_v23 = vadd.f32 1.0, %v5092_v30  ;;  %v4388_v62 = vpop.f32.mrb[186].mxu1  ;;  %v2144_v50 = vadd.f32 %v6196_v21, %v2143_v51  ;;  %v6487_v31 = vld [vmem:[#allocation21_spill] sm:$0xff]  ;;  %v4155_v58 = vmul.f32 -1.442695, %v6283_v4 }
 0x297   : > { %v5096_v33 = vpop.eup %5095  ;;  %3681 = vst.msk [vmem:[%s5787_s8 + $0x2a0] sm:$0xff] %vm3596_vm1, %v5094_v55  ;;  %5115 = vpow2.f32 %v4153_v39  ;;  %v2145_v22 = vpop.f32.mrb[187].mxu0  ;;  %v6318_v25 = vadd.f32 %v4388_v62, %v2264_v8  ;;  %v2280_v16 = vadd.f32 %v6196_v21, %v6487_v31  ;;  %v4183_v0 = vmul.f32 -1.442695, %v6274_v57 }
 0x298   : > { %v2800_v53 = vpop.f32.mrb[187].mxu1  ;;  %v5098_v45 = vpop.eup %5097  ;;  %5117 = vrcp.f32 %v3322_v23  ;;  %v3320_v7 = vadd.f32 1.0, %v5096_v33  ;;  %v6322_v35 = vadd.f32 %v6147_v3, %v2144_v50  ;;  %v4156_v50 = vmul.f32 -1.442695, %v6291_v47 }
 0x299   : > { %v5100_v38 = vpop.eup %5099  ;;  %v3299_v18 = vadd.f32 1.0, %v5098_v45  ;;  %5119 = vpow2.f32 %v4179_v19  ;;  %v6324_v29 = vadd.f32 %v2800_v53, %v2256_v24  ;;  %v2148_v43 = vpop.f32.mrb[188].mxu0  ;;  %v4184_v45 = vmul.f32 -1.442695, %v6288_v15 }
 0x29a   : > { %v5102_v17 = vpop.eup %5101  ;;  %5121 = vrcp.f32 %v3320_v7  ;;  %v3323_v40 = vadd.f32 1.0, %v5100_v38  ;;  %v4391_v1 = vpop.f32.mrb[188].mxu1  ;;  %v2149_v54 = vadd.f32 %v6196_v21, %v2148_v43  ;;  %v4157_v47 = vmul.f32 -1.442695, %v6313_v6 }
 0x29b   : > { %v5104_v9 = vpop.eup %5103  ;;  %3703 = vst.msk [vmem:[%s5787_s8 + $0x350] sm:$0xff] %vm3596_vm1, %v5102_v17  ;;  %5123 = vrcp.f32 %v3299_v18  ;;  %v6340_v39 = vadd.f32 %v4391_v1, %v2277_v56  ;;  %v2150_v2 = vpop.f32.mrb[189].mxu0  ;;  %v4186_v31 = vmul.f32 -1.442695, %v6324_v29 }
 0x29c   : > { %v5106_v3 = vpop.eup %5105  ;;  %5125 = vrcp.f32 %v3323_v40  ;;  %v3321_v63 = vadd.f32 1.0, %v5104_v9  ;;  %v2813_v11 = vpop.f32.mrb[189].mxu1  ;;  %v6353_v44 = vadd.f32 %v6136_v34, %v2149_v54  ;;  %v4181_v34 = vmul.f32 -1.442695, %v6278_v49 }
 0x29d   : > { %v5108_v13 = vpop.eup %5107  ;;  %3701 = vst.msk [vmem:[%s5787_s8 + $0x340] sm:$0xff] %vm3596_vm1, %v5106_v3  ;;  %5127 = vpow2.f32 %v4177_v48  ;;  %v6347_v20 = vadd.f32 %v2813_v11, %v2269_v26  ;;  %v2151_v30 = vpop.f32.mrb[190].mxu0  ;;  %v4187_v26 = vmul.f32 -1.442695, %v6304_v41  ;;  %v4185_v3 = vmul.f32 -1.442695, %v6308_v36 }
 0x29e   : > { %v5110_v42 = vpop.eup %5109  ;;  %3682 = vst.msk [vmem:[%s5787_s8 + $0x2a8] sm:$0xff] %vm3596_vm1, %v5108_v13  ;;  %5129 = vrcp.f32 %v3321_v63  ;;  %v4392_v12 = vpop.f32.mrb[190].mxu1  ;;  %v2152_v10 = vadd.f32 %v6196_v21, %v2151_v30  ;;  %v4158_v13 = vmul.f32 -1.442695, %v6322_v35  ;;  %v4188_v2 = vmul.f32 -1.442695, %v6318_v25 }
 0x29f   : > { %v5112_v19 = vpop.eup %5111  ;;  %3704 = vst.msk [vmem:[%s5787_s8 + $0x358] sm:$0xff] %vm3596_vm1, %v5110_v42  ;;  %5131 = vpow2.f32 %v4154_v5  ;;  %v2153_v55 = vpop.f32.mrb[191].mxu0  ;;  %v6358_v8 = vadd.f32 %v4392_v12, %v2280_v16  ;;  %v4159_v35 = vmul.f32 -1.442695, %v6353_v44  ;;  %v4191_v30 = vmul.f32 -1.442695, %v6340_v39 }
 0x2a0   : > { %v2816_v37 = vpop.f32.mrb[191].mxu1  ;;  %v5114_v4 = vpop.eup %5113  ;;  %3702 = vst.msk [vmem:[%s5787_s8 + $0x348] sm:$0xff] %vm3596_vm1, %v5112_v19  ;;  %5133 = vpow2.f32 %v4180_v14  ;;  %v6366_v21 = vadd.f32 %v6143_v61, %v2152_v10  ;;  %v4182_v61 = vmul.f32 -1.442695, %v6293_v27  ;;  %v4189_v29 = vmul.f32 -1.442695, %v6347_v20 }
 0x2a1   : > { %v6360_v23 = vadd.f32 %v2816_v37, %v2272_v52  ;;  %v5116_v51 = vpop.eup %5115  ;;  %3683 = vst.msk [vmem:[%s5787_s8 + $0x2b0] sm:$0xff] %vm3596_vm1, %v5114_v4  ;;  %5135 = vpow2.f32 %v4178_v59  ;;  %v4192_v20 = vmul.f32 -1.442695, %v6358_v8 }
 0x2a2   : > { %v5118_v57 = vpop.eup %5117  ;;  %v3300_v62 = vadd.f32 1.0, %v5116_v51  ;;  %5137 = vpow2.f32 %v4155_v58 }
 0x2a3   : > { %v5120_v33 = vpop.eup %5119  ;;  %3707 = vst.msk [vmem:[%s5787_s8 + $0x370] sm:$0xff] %vm3596_vm1, %v5118_v57  ;;  %5139 = vpow2.f32 %v4183_v0  ;;  %v4160_v0 = vmul.f32 -1.442695, %v6366_v21  ;;  %v4190_v4 = vmul.f32 -1.442695, %v6360_v23 }
 0x2a4   : > { %v5122_v22 = vpop.eup %5121  ;;  %5141 = vrcp.f32 %v3300_v62  ;;  %v3326_v53 = vadd.f32 1.0, %v5120_v33 }
 0x2a5   : > { %v5124_v49 = vpop.eup %5123  ;;  %3705 = vst.msk [vmem:[%s5787_s8 + $0x360] sm:$0xff] %vm3596_vm1, %v5122_v22  ;;  %5143 = vpow2.f32 %v4181_v34 }
 0x2a6   : > { %v5126_v46 = vpop.eup %5125  ;;  %3684 = vst.msk [vmem:[%s5787_s8 + $0x2b8] sm:$0xff] %vm3596_vm1, %v5124_v49  ;;  %5145 = vrcp.f32 %v3326_v53 }
 0x2a7   : > { %v5128_v24 = vpop.eup %5127  ;;  %3708 = vst.msk [vmem:[%s5787_s8 + $0x378] sm:$0xff] %vm3596_vm1, %v5126_v46  ;;  %5147 = vpow2.f32 %v4156_v50 }
 0x2a8   : > { %v5130_v7 = vpop.eup %5129  ;;  %v3324_v38 = vadd.f32 1.0, %v5128_v24  ;;  %5149 = vpow2.f32 %v4184_v45 }
 0x2a9   : > { %v5132_v15 = vpop.eup %5131  ;;  %3706 = vst.msk [vmem:[%s5787_s8 + $0x368] sm:$0xff] %vm3596_vm1, %v5130_v7  ;;  %5151 = vpow2.f32 %v4182_v61 }
 0x2aa   : > { %v5134_v18 = vpop.eup %5133  ;;  %5153 = vrcp.f32 %v3324_v38  ;;  %v3301_v27 = vadd.f32 1.0, %v5132_v15 }
 0x2ab   : > { %v5136_v48 = vpop.eup %5135  ;;  %v3327_v17 = vadd.f32 1.0, %v5134_v18  ;;  %5155 = vpow2.f32 %v4157_v47 }
 0x2ac   : > { %v5138_v40 = vpop.eup %5137  ;;  %5157 = vrcp.f32 %v3301_v27  ;;  %v3325_v9 = vadd.f32 1.0, %v5136_v48 }
 0x2ad   : > { %v5140_v60 = vpop.eup %5139  ;;  %5159 = vrcp.f32 %v3327_v17  ;;  %v3302_v6 = vadd.f32 1.0, %v5138_v40 }
 0x2ae   : > { %v5142_v28 = vpop.eup %5141  ;;  %5161 = vrcp.f32 %v3325_v9  ;;  %v3330_v56 = vadd.f32 1.0, %v5140_v60 }
 0x2af   : > { %v5144_v5 = vpop.eup %5143  ;;  %3685 = vst.msk [vmem:[%s5787_s8 + $0x2c0] sm:$0xff] %vm3596_vm1, %v5142_v28  ;;  %5163 = vrcp.f32 %v3302_v6 }
 0x2b0   : > { %v5146_v32 = vpop.eup %5145  ;;  %5165 = vrcp.f32 %v3330_v56  ;;  %v3328_v52 = vadd.f32 1.0, %v5144_v5 }
 0x2b1   : > { %v5148_v63 = vpop.eup %5147  ;;  %3711 = vst.msk [vmem:[%s5787_s8 + $0x390] sm:$0xff] %vm3596_vm1, %v5146_v32  ;;  %5167 = vpow2.f32 %v4187_v26 }
 0x2b2   : > { %v5150_v14 = vpop.eup %5149  ;;  %5169 = vrcp.f32 %v3328_v52  ;;  %v3303_v41 = vadd.f32 1.0, %v5148_v63 }
 0x2b3   : > { %v5152_v43 = vpop.eup %5151  ;;  %v3331_v1 = vadd.f32 1.0, %v5150_v14  ;;  %5171 = vpow2.f32 %v4185_v3 }
 0x2b4   : > { %v5154_v59 = vpop.eup %5153  ;;  %5173 = vrcp.f32 %v3303_v41  ;;  %v3329_v36 = vadd.f32 1.0, %v5152_v43 }
 0x2b5   : > { %v5156_v54 = vpop.eup %5155  ;;  %3709 = vst.msk [vmem:[%s5787_s8 + $0x380] sm:$0xff] %vm3596_vm1, %v5154_v59  ;;  %5175 = vrcp.f32 %v3331_v1 }
 0x2b6   : > { %v5158_v11 = vpop.eup %5157  ;;  %5177 = vrcp.f32 %v3329_v36  ;;  %v3304_v42 = vadd.f32 1.0, %v5156_v54 }
 0x2b7   : > { %v5160_v16 = vpop.eup %5159  ;;  %3686 = vst.msk [vmem:[%s5787_s8 + $0x2c8] sm:$0xff] %vm3596_vm1, %v5158_v11  ;;  %5179 = vpow2.f32 %v4158_v13 }
 0x2b8   : > { %v5162_v58 = vpop.eup %5161  ;;  %3712 = vst.msk [vmem:[%s5787_s8 + $0x398] sm:$0xff] %vm3596_vm1, %v5160_v16  ;;  %5181 = vrcp.f32 %v3304_v42 }
 0x2b9   : > { %v5164_v25 = vpop.eup %5163  ;;  %3710 = vst.msk [vmem:[%s5787_s8 + $0x388] sm:$0xff] %vm3596_vm1, %v5162_v58  ;;  %5183 = vpow2.f32 %v4188_v2 }
 0x2ba   : > { %v5166_v12 = vpop.eup %5165  ;;  %3687 = vst.msk [vmem:[%s5787_s8 + $0x2d0] sm:$0xff] %vm3596_vm1, %v5164_v25  ;;  %5185 = vpow2.f32 %v4186_v31 }
 0x2bb   : > { %v5168_v19 = vpop.eup %5167  ;;  %3715 = vst.msk [vmem:[%s5787_s8 + $0x3b0] sm:$0xff] %vm3596_vm1, %v5166_v12  ;;  %5187 = vpow2.f32 %v4159_v35 }
 0x2bc   : > { %v5170_v39 = vpop.eup %5169  ;;  %v3334_v44 = vadd.f32 1.0, %v5168_v19  ;;  %5189 = vpow2.f32 %v4191_v30 }
 0x2bd   : > { %v5172_v10 = vpop.eup %5171  ;;  %3713 = vst.msk [vmem:[%s5787_s8 + $0x3a0] sm:$0xff] %vm3596_vm1, %v5170_v39  ;;  %5191 = vpow2.f32 %v4189_v29 }
 0x2be   : > { %v5174_v55 = vpop.eup %5173  ;;  %5193 = vrcp.f32 %v3334_v44  ;;  %v3332_v37 = vadd.f32 1.0, %v5172_v10 }
 0x2bf   : > { %v5176_v51 = vpop.eup %5175  ;;  %3688 = vst.msk [vmem:[%s5787_s8 + $0x2d8] sm:$0xff] %vm3596_vm1, %v5174_v55  ;;  %5195 = vpow2.f32 %v4160_v0 }
 0x2c0   : > { %v5178_v34 = vpop.eup %5177  ;;  %3716 = vst.msk [vmem:[%s5787_s8 + $0x3b8] sm:$0xff] %vm3596_vm1, %v5176_v51  ;;  %5197 = vrcp.f32 %v3332_v37 }
 0x2c1   : > { %v5180_v21 = vpop.eup %5179  ;;  %3714 = vst.msk [vmem:[%s5787_s8 + $0x3a8] sm:$0xff] %vm3596_vm1, %v5178_v34  ;;  %5199 = vpow2.f32 %v4192_v20 }
 0x2c2   : > { %v5182_v57 = vpop.eup %5181  ;;  %v3305_v8 = vadd.f32 1.0, %v5180_v21  ;;  %5201 = vpow2.f32 %v4190_v4 }
 0x2c3   : > { %v5184_v62 = vpop.eup %5183  ;;  %3689 = vst.msk [vmem:[%s5787_s8 + $0x2e0] sm:$0xff] %vm3596_vm1, %v5182_v57 }
 0x2c4   : > { %v5186_v23 = vpop.eup %5185  ;;  %5203 = vrcp.f32 %v3305_v8  ;;  %v3335_v33 = vadd.f32 1.0, %v5184_v62 }
 0x2c5   : > { %v5188_v50 = vpop.eup %5187  ;;  %v3333_v22 = vadd.f32 1.0, %v5186_v23 }
 0x2c6   : > { %v5190_v53 = vpop.eup %5189  ;;  %5205 = vrcp.f32 %v3335_v33  ;;  %v3306_v45 = vadd.f32 1.0, %v5188_v50 }
 0x2c7   : > { %v5192_v49 = vpop.eup %5191  ;;  %5207 = vrcp.f32 %v3333_v22  ;;  %v3338_v61 = vadd.f32 1.0, %v5190_v53 }
 0x2c8   : > { %v5194_v46 = vpop.eup %5193  ;;  %5209 = vrcp.f32 %v3306_v45  ;;  %v3336_v24 = vadd.f32 1.0, %v5192_v49 }
 0x2c9   : > { %v5196_v47 = vpop.eup %5195  ;;  %3719 = vst.msk [vmem:[%s5787_s8 + $0x3d0] sm:$0xff] %vm3596_vm1, %v5194_v46  ;;  %5211 = vrcp.f32 %v3338_v61 }
 0x2ca   : > { %v5198_v7 = vpop.eup %5197  ;;  %5213 = vrcp.f32 %v3336_v24  ;;  %v3307_v38 = vadd.f32 1.0, %v5196_v47 }
 0x2cb   : > { %v5200_v15 = vpop.eup %5199  ;;  %3717 = vst.msk [vmem:[%s5787_s8 + $0x3c0] sm:$0xff] %vm3596_vm1, %v5198_v7 }
 0x2cc   : > { %v5202_v18 = vpop.eup %5201  ;;  %5215 = vrcp.f32 %v3307_v38  ;;  %v3339_v27 = vadd.f32 1.0, %v5200_v15 }
 0x2cd   : > { %v3337_v48 = vadd.f32 1.0, %v5202_v18 }
 0x2ce   : > { %v5204_v17 = vpop.eup %5203  ;;  %5217 = vrcp.f32 %v3339_v27 }
 0x2cf   : > { %3690 = vst.msk [vmem:[%s5787_s8 + $0x2e8] sm:$0xff] %vm3596_vm1, %v5204_v17  ;;  %5219 = vrcp.f32 %v3337_v48 }
 0x2d0   : > { %v5206_v40 = vpop.eup %5205 }
 0x2d1   : > { %v5208_v9 = vpop.eup %5207  ;;  %3720 = vst.msk [vmem:[%s5787_s8 + $0x3d8] sm:$0xff] %vm3596_vm1, %v5206_v40 }
 0x2d2   : > { %v5210_v60 = vpop.eup %5209  ;;  %3718 = vst.msk [vmem:[%s5787_s8 + $0x3c8] sm:$0xff] %vm3596_vm1, %v5208_v9 }
 0x2d3   : > { %v5212_v6 = vpop.eup %5211  ;;  %3691 = vst.msk [vmem:[%s5787_s8 + $0x2f0] sm:$0xff] %vm3596_vm1, %v5210_v60 }
 0x2d4   : > { %v5214_v26 = vpop.eup %5213  ;;  %3723 = vst.msk [vmem:[%s5787_s8 + $0x3f0] sm:$0xff] %vm3596_vm1, %v5212_v6 }
 0x2d5   : > { %3721 = vst.msk [vmem:[%s5787_s8 + $0x3e0] sm:$0xff] %vm3596_vm1, %v5214_v26 }
 0x2d6   : > { %v5216_v28 = vpop.eup %5215 }
 0x2d7   : > { %3692 = vst.msk [vmem:[%s5787_s8 + $0x2f8] sm:$0xff] %vm3596_vm1, %v5216_v28 }
 0x2d8   : > { %v5218_v56 = vpop.eup %5217 }
 0x2d9   : > { %v5220_v5 = vpop.eup %5219  ;;  %3724 = vst.msk [vmem:[%s5787_s8 + $0x3f8] sm:$0xff] %vm3596_vm1, %v5218_v56 }
 0x2da   : > { %3722 = vst.msk [vmem:[%s5787_s8 + $0x3e8] sm:$0xff] %vm3596_vm1, %v5220_v5 }
 0x2db PF: > { %s13_s12 = sadd.s32 1, %s5229_s12  }
 0x2dc   : > { %p10_p4 = scmp.ge.s32.totalorder %s13_s12, 4  }
 0x2de   :  { %12 = sbr.rel (!%p10_p4) target bundleno = 1 (0x1), region = 62 }

</bundles_post_ra>
